<compile_context>
chip_gen: v5e
topology: v5e:2x2
jax: 0.10.0
libtpu: 0.0.40
codegen_flags: <defaults>
</compile_context>

<pallas_src>
import functools
import math

import jax
import jax.numpy as jnp
from jax.experimental import pallas as pl
from jax.experimental.pallas import tpu as pltpu  # noqa: F401  (TPU backend)


# ----------------------------------------------------------------------------
# Pallas kernels
# ----------------------------------------------------------------------------

def _gemm_kernel(a_ref, b_ref, o_ref):
    o_ref[...] = jnp.dot(a_ref[...], b_ref[...],
                         preferred_element_type=jnp.float32)


def pallas_gemm(a, b):
    """(M, K) @ (K, N) -> f32 (M, N).  bf16 MXU inputs, f32 accumulation.

    Operands in this model are tiny (<= ~288 x 512), so a single full VMEM
    block is used (no tiling needed at these shapes).
    """
    M, K = a.shape
    K2, N = b.shape
    assert K == K2
    return pl.pallas_call(
        _gemm_kernel,
        out_shape=jax.ShapeDtypeStruct((M, N), jnp.float32),
        grid=(1,),
        in_specs=[pl.BlockSpec((M, K), lambda i: (0, 0)),
                  pl.BlockSpec((K, N), lambda i: (0, 0))],
        out_specs=pl.BlockSpec((M, N), lambda i: (0, 0)),
    )(a.astype(jnp.bfloat16), b.astype(jnp.bfloat16))


def _gemm_fused_kernel(a_ref, b_ref, sb_ref, o_ref, *, mode, act, eps):
    # GEMM + epilogue, all while the result is resident in VMEM.
    y = jnp.dot(a_ref[...], b_ref[...], preferred_element_type=jnp.float32)
    if mode == "bn":
        # Per-channel (row) batch statistics over N*H*W (the lane axis).
        mean = jnp.mean(y, axis=1, keepdims=True)
        yc = y - mean
        var = jnp.mean(yc * yc, axis=1, keepdims=True)   # biased (train mode)
        y = yc * jax.lax.rsqrt(var + eps)
        y = y * sb_ref[:, 0:1] + sb_ref[:, 1:2]          # gamma, beta
    elif mode == "bias":
        y = y + sb_ref[:, 0:1]
    if act == "relu":
        y = jnp.maximum(y, 0.0)
    elif act == "sigmoid":
        y = 1.0 / (1.0 + jnp.exp(-y))
    o_ref[...] = y


def pallas_gemm_fused(a, b, sb, mode, act="none", eps=1e-5):
    """Fused (Cout,K)@(K,L) GEMM + {BatchNorm|bias} + activation epilogue."""
    M, K = a.shape
    K2, N = b.shape
    assert K == K2
    kern = functools.partial(_gemm_fused_kernel, mode=mode, act=act, eps=eps)
    return pl.pallas_call(
        kern,
        out_shape=jax.ShapeDtypeStruct((M, N), jnp.float32),
        grid=(1,),
        in_specs=[pl.BlockSpec((M, K), lambda i: (0, 0)),
                  pl.BlockSpec((K, N), lambda i: (0, 0)),
                  pl.BlockSpec((M, 2), lambda i: (0, 0))],
        out_specs=pl.BlockSpec((M, N), lambda i: (0, 0)),
    )(a.astype(jnp.bfloat16), b.astype(jnp.bfloat16), sb.astype(jnp.float32))


def _attn_kernel(q_ref, k_ref, v_ref, o_ref, *, scale):
    # All batch*head tiles processed in one invocation (BH is small).
    q = q_ref[...]                                   # (BH, Sq, D) bf16
    k = k_ref[...]                                   # (BH, Sk, D) bf16
    v = v_ref[...]                                   # (BH, Sk, D) bf16
    s = jnp.einsum("bqd,bkd->bqk", q, k,
                   preferred_element_type=jnp.float32) * scale
    s = s - jnp.max(s, axis=-1, keepdims=True)
    p = jnp.exp(s)
    p = p * pl.reciprocal(jnp.sum(p, axis=-1, keepdims=True), approx=True)
    o_ref[...] = jnp.einsum("bqk,bkd->bqd", p.astype(v.dtype), v,
                            preferred_element_type=jnp.float32)


def pallas_attention(q, k, v, scale):
    """softmax(q k^T * scale) v for all (batch*head) tiles in one call."""
    BH, Sq, D = q.shape
    Sk = k.shape[1]
    kern = functools.partial(_attn_kernel, scale=scale)
    return pl.pallas_call(
        kern,
        out_shape=jax.ShapeDtypeStruct((BH, Sq, D), jnp.float32),
        grid=(1,),
        in_specs=[pl.BlockSpec((BH, Sq, D), lambda i: (0, 0, 0)),
                  pl.BlockSpec((BH, Sk, D), lambda i: (0, 0, 0)),
                  pl.BlockSpec((BH, Sk, D), lambda i: (0, 0, 0))],
        out_specs=pl.BlockSpec((BH, Sq, D), lambda i: (0, 0, 0)),
    )(q.astype(jnp.bfloat16), k.astype(jnp.bfloat16), v.astype(jnp.bfloat16))


# ----------------------------------------------------------------------------
# NN building blocks (CNHW glue around the Pallas kernels)
# ----------------------------------------------------------------------------

def _scale_shift(a, b):
    return jnp.stack([a, b], axis=1)                  # (C, 2)


def conv1x1_bn_act(x, w, gamma, beta, act):
    # x: (Cin, N, H, W), w: (Cout, Cin, 1, 1) — one fused pallas_call
    Cin, N, H, W = x.shape
    Cout = w.shape[0]
    y = pallas_gemm_fused(w.reshape(Cout, Cin), x.reshape(Cin, N * H * W),
                          _scale_shift(gamma, beta), mode="bn", act=act)
    return y.reshape(Cout, N, H, W)


def conv1x1_bias(x, w, bias):
    Cin, N, H, W = x.shape
    Cout = w.shape[0]
    y = pallas_gemm_fused(w.reshape(Cout, Cin), x.reshape(Cin, N * H * W),
                          _scale_shift(bias, jnp.zeros_like(bias)),
                          mode="bias", act="none")
    return y.reshape(Cout, N, H, W)


def conv3x3_bn_relu(x, w, gamma, beta):
    # x: (Cin, N, H, W), w: (Cout, Cin, 3, 3), padding=1, stride=1, no bias
    Cin, N, H, W = x.shape
    Cout = w.shape[0]
    xp = jnp.pad(x, ((0, 0), (0, 0), (1, 1), (1, 1)))
    cols = jnp.stack([xp[:, :, di:di + H, dj:dj + W]
                      for di in range(3) for dj in range(3)], axis=1)
    cols = cols.reshape(Cin * 9, N * H * W)           # lane-dense im2col
    y = pallas_gemm_fused(w.reshape(Cout, Cin * 9), cols,
                          _scale_shift(gamma, beta), mode="bn", act="relu")
    return y.reshape(Cout, N, H, W)


def conv_transpose_2x2(x, w):
    # x: (Cin, N, H, W), w: (Cin, Cout, 2, 2) (PyTorch layout), stride=2, no bias
    Cin, N, H, W = x.shape
    Cout = w.shape[1]
    wt = w.transpose(1, 2, 3, 0).reshape(Cout * 4, Cin)
    y = pallas_gemm(wt, x.reshape(Cin, N * H * W))    # (Cout*4, L)
    y = y.reshape(Cout, 2, 2, N, H, W).transpose(0, 3, 4, 1, 5, 2)
    return y.reshape(Cout, N, 2 * H, 2 * W)


def maxpool2(x):
    C, N, H, W = x.shape
    return x.reshape(C, N, H // 2, 2, W // 2, 2).max(axis=(3, 5))


def positional_encoding(x):
    # PositionalEncoding.forward (sin/cos concatenated along channel axis)
    C, N, H, W = x.shape
    depth = C // 2
    positions = jnp.arange(H * W, dtype=jnp.float32)
    depths = jnp.arange(depth, dtype=jnp.float32) / depth
    angle_rates = 1.0 / (10000.0 ** depths)
    angle_rads = positions[:, None] * angle_rates[None, :]      # (HW, C/2)
    pe = jnp.concatenate([jnp.sin(angle_rads), jnp.cos(angle_rads)], axis=-1).T
    return (x.reshape(C, N, H * W) + pe[:, None, :]).reshape(C, N, H, W)


def multihead_attention(q_in, k_in, v_in, w_in, w_out, num_heads):
    """nn.MultiheadAttention(batch_first=True, bias=False) on channel-major
    (E, B, S) sequences.  Projections are fused when inputs coincide."""
    E, B, Sq = q_in.shape
    Sk = k_in.shape[2]
    qf = q_in.reshape(E, B * Sq)
    vf = v_in.reshape(E, B * Sk)
    if (q_in is k_in) and (k_in is v_in):             # self-attention: 1 GEMM
        qkv = pallas_gemm(w_in, qf)                   # (3E, B*Sq)
        q, k, v = qkv[:E], qkv[E:2 * E], qkv[2 * E:]
    elif q_in is k_in:                                # cross-attention: 2 GEMMs
        qk = pallas_gemm(w_in[:2 * E], qf)            # (2E, B*Sq)
        q, k = qk[:E], qk[E:]
        v = pallas_gemm(w_in[2 * E:], vf)             # (E, B*Sk)
    else:
        kf = k_in.reshape(E, B * Sk)
        q = pallas_gemm(w_in[:E], qf)
        k = pallas_gemm(w_in[E:2 * E], kf)
        v = pallas_gemm(w_in[2 * E:], vf)

    dh = E // num_heads

    def to_heads(t, S):
        # (E, B*S) -> (B*heads, S, dh); E splits head-major as in PyTorch MHA
        return (t.reshape(num_heads, dh, B, S)
                 .transpose(2, 0, 3, 1)
                 .reshape(B * num_heads, S, dh))

    o = pallas_attention(to_heads(q, Sq), to_heads(k, Sk), to_heads(v, Sk),
                         scale=1.0 / math.sqrt(dh))
    o = (o.reshape(B, num_heads, Sq, dh)
          .transpose(1, 3, 0, 2)
          .reshape(E, B * Sq))
    out = pallas_gemm(w_out, o)                       # (E, B*Sq)
    return out.reshape(E, B, Sq)


def conv_block(x, p):
    x = conv3x3_bn_relu(x, p["w1"], p["g1"], p["b1"])
    x = conv3x3_bn_relu(x, p["w2"], p["g2"], p["b2"])
    return x


def encoder_layer(x, p):
    skip = conv_block(x, p)
    return skip, maxpool2(skip)


def decoder_layer(skip_x, x, p):
    x = conv_transpose_2x2(x, p["up_w"])
    x = jnp.concatenate([skip_x, x], axis=0)          # channel axis in CNHW
    return conv_block(x, p["conv"])


def mhsa_forward(x, p, num_heads):
    C, N, H, W = x.shape
    xs = x.reshape(C, N, H * W)
    o = multihead_attention(xs, xs, xs, p["in_w"], p["out_w"], num_heads)
    return o.reshape(C, N, H, W)


def mhca_forward(s, y, p, num_heads):
    s_enc = s
    # conv_S: MaxPool2d(2) -> 1x1 conv -> BN -> ReLU   (1 fused pallas_call)
    s1 = conv1x1_bn_act(maxpool2(s), p["convS_w"], p["convS_g"], p["convS_b"],
                        act="relu")
    # conv_Y: 1x1 conv -> BN -> ReLU                   (1 fused pallas_call)
    y1 = conv1x1_bn_act(y, p["convY_w"], p["convY_g"], p["convY_b"], act="relu")
    C, N, H, W = y1.shape
    s_seq = s1.reshape(C, N, -1)
    y_seq = y1.reshape(C, N, H * W)
    att = multihead_attention(y_seq, y_seq, s_seq, p["mha_in"], p["mha_out"],
                              num_heads)
    y2 = att.reshape(C, N, H, W)
    # upsample: 1x1 conv -> BN -> Sigmoid -> ConvTranspose2d(2,2)
    u = conv1x1_bn_act(y2, p["up_conv_w"], p["up_g"], p["up_b"], act="sigmoid")
    u = conv_transpose_2x2(u, p["up_ct_w"])
    # Gating multiply stays in plain jnp; XLA fuses it (no extra pallas_call).
    return u * s_enc


def transformer_unet_forward(x_nchw, params, channels, num_heads):
    x = x_nchw.transpose(1, 0, 2, 3)                  # NCHW -> CNHW canonical
    skips = []
    for i in range(len(channels) - 2):
        skip, x = encoder_layer(x, params["enc"][i])
        skips.append(skip)
    x = conv_block(x, params["bottleneck"])
    x = positional_encoding(x)
    x = mhsa_forward(x, params["mhsa"], num_heads)
    for i, skip in enumerate(reversed(skips)):
        x = positional_encoding(x)
        skip = positional_encoding(skip)
        skip = mhca_forward(skip, x, params["mhca"][i], num_heads)
        x = decoder_layer(skip, x, params["dec"][i])
    out = conv1x1_bias(x, params["out_w"], params["out_b"])   # (1, N, H, W)
    return out.transpose(1, 0, 2, 3)                  # back to NCHW


# ----------------------------------------------------------------------------
# Deterministic parameter construction
# ----------------------------------------------------------------------------

def init_params(key, channels):
    keys = iter(jax.random.split(key, 256))

    def rand(shape, scale=0.1):
        return jax.random.normal(next(keys), shape, jnp.float32) * scale

    def bn(c):
        return jnp.ones((c,), jnp.float32), jnp.zeros((c,), jnp.float32)

    def convblock(cin, cout):
        g1, b1 = bn(cout)
        g2, b2 = bn(cout)
        return dict(w1=rand((cout, cin, 3, 3)), g1=g1, b1=b1,
                    w2=rand((cout, cout, 3, 3)), g2=g2, b2=b2)

    params = {}
    params["enc"] = [convblock(channels[i], channels[i + 1])
                     for i in range(len(channels) - 2)]
    params["bottleneck"] = convblock(channels[-2], channels[-1])

    E = channels[-1]
    params["mhsa"] = dict(in_w=rand((3 * E, E)), out_w=rand((E, E)))

    params["mhca"] = []
    params["dec"] = []
    for i in reversed(range(1, len(channels) - 1)):
        cS, cY = channels[i], channels[i + 1]
        gS, bS = bn(cS)
        gY, bY = bn(cS)
        gU, bU = bn(cS)
        params["mhca"].append(dict(
            convS_w=rand((cS, cS, 1, 1)), convS_g=gS, convS_b=bS,
            convY_w=rand((cS, cY, 1, 1)), convY_g=gY, convY_b=bY,
            mha_in=rand((3 * cS, cS)), mha_out=rand((cS, cS)),
            up_conv_w=rand((cS, cS, 1, 1)), up_g=gU, up_b=bU,
            up_ct_w=rand((cS, cS, 2, 2))))
        params["dec"].append(dict(
            up_w=rand((cY, cS, 2, 2)),
            conv=convblock(2 * cS, cS)))

    params["out_w"] = rand((1, channels[1], 1, 1))
    params["out_b"] = jnp.full((1,), 0.1, jnp.float32)  # init_weights: conv bias = 0.1
    return params


# ----------------------------------------------------------------------------
# Main
# ----------------------------------------------------------------------------

if __name__ == "__main__":
    channels = (4, 8, 16, 32)
    num_heads = 2

    key = jax.random.PRNGKey(0)
    k_x, k_p = jax.random.split(key)
    x = jax.random.normal(k_x, (2, channels[0], 16, 16), jnp.float32)  # NCHW
    params = init_params(k_p, channels)

    fwd = jax.jit(functools.partial(transformer_unet_forward,
                                    channels=channels, num_heads=num_heads))
    out = fwd(x, params)
    out = jax.block_until_ready(out)

    assert out.shape == (2, 1, 16, 16), out.shape
    assert bool(jnp.all(jnp.isfinite(out)))
    print("KERNEL_OK")
</pallas_src>

<mosaic_0001>
module attributes {stable_mosaic.version = 11 : i64} {
  func.func @_gemm_fused_kernel(%arg0: i32, %arg1: memref<8x36xbf16, #tpu.memory_space<vmem>>, %arg2: memref<36x512xbf16, #tpu.memory_space<vmem>>, %arg3: memref<8x2xf32, #tpu.memory_space<vmem>>, %arg4: memref<8x512xf32, #tpu.memory_space<vmem>>) attributes {dimension_semantics = [#tpu.dimension_semantics<arbitrary>], iteration_bounds = array<i64: 1>, scalar_prefetch = 0 : i64, scratch_operands = 0 : i64, tpu.core_type = #tpu.core_type<tc>, window_params = [{pipeline_mode = #tpu.pipeline_mode<synchronous>, transform_indices = @transform_0, window_bounds = array<i64: 8, 36>}, {pipeline_mode = #tpu.pipeline_mode<synchronous>, transform_indices = @transform_1, window_bounds = array<i64: 36, 512>}, {pipeline_mode = #tpu.pipeline_mode<synchronous>, transform_indices = @transform_2, window_bounds = array<i64: 8, 2>}, {pipeline_mode = #tpu.pipeline_mode<synchronous>, transform_indices = @transform_3, window_bounds = array<i64: 8, 512>}]} {
    %c0 = arith.constant 0 : index
    %c0_0 = arith.constant 0 : index
    %0 = vector.load %arg1[%c0, %c0_0] : memref<8x36xbf16, #tpu.memory_space<vmem>>, vector<8x36xbf16>
    %c0_1 = arith.constant 0 : index
    %c0_2 = arith.constant 0 : index
    %1 = vector.load %arg2[%c0_1, %c0_2] : memref<36x512xbf16, #tpu.memory_space<vmem>>, vector<36x512xbf16>
    %cst = arith.constant dense<0.000000e+00> : vector<8x512xf32>
    %2 = tpu.matmul %0, %1, %cst {dimension_numbers = #tpu.dot_dimension_numbers<[1], [0], [0], [1], [0, 0, 1, 1], [], []>} : vector<8x36xbf16>, vector<36x512xbf16>, vector<8x512xf32> -> vector<8x512xf32>
    %cst_3 = arith.constant dense<0.000000e+00> : vector<8xf32>
    %3 = vector.multi_reduction <add>, %2, %cst_3 [1] : vector<8x512xf32> to vector<8xf32>
    %4 = vector.shape_cast %3 : vector<8xf32> to vector<8x1xf32>
    %cst_4 = arith.constant 5.120000e+02 : f32
    %5 = vector.broadcast %cst_4 : f32 to vector<8x1xf32>
    %6 = arith.divf %4, %5 : vector<8x1xf32>
    %7 = vector.broadcast %6 : vector<8x1xf32> to vector<8x512xf32>
    %8 = arith.subf %2, %7 : vector<8x512xf32>
    %9 = arith.mulf %8, %8 : vector<8x512xf32>
    %cst_5 = arith.constant dense<0.000000e+00> : vector<8xf32>
    %10 = vector.multi_reduction <add>, %9, %cst_5 [1] : vector<8x512xf32> to vector<8xf32>
    %11 = vector.shape_cast %10 : vector<8xf32> to vector<8x1xf32>
    %cst_6 = arith.constant 5.120000e+02 : f32
    %12 = vector.broadcast %cst_6 : f32 to vector<8x1xf32>
    %13 = arith.divf %11, %12 : vector<8x1xf32>
    %cst_7 = arith.constant 9.99999974E-6 : f32
    %14 = vector.broadcast %cst_7 : f32 to vector<8x1xf32>
    %15 = arith.addf %13, %14 : vector<8x1xf32>
    %16 = math.rsqrt %15 : vector<8x1xf32>
    %17 = vector.broadcast %16 : vector<8x1xf32> to vector<8x512xf32>
    %18 = arith.mulf %8, %17 : vector<8x512xf32>
    %c0_8 = arith.constant 0 : index
    %c0_9 = arith.constant 0 : index
    %19 = vector.load %arg3[%c0_8, %c0_9] : memref<8x2xf32, #tpu.memory_space<vmem>>, vector<8x1xf32>
    %20 = vector.broadcast %19 : vector<8x1xf32> to vector<8x512xf32>
    %21 = arith.mulf %18, %20 : vector<8x512xf32>
    %c0_10 = arith.constant 0 : index
    %c1 = arith.constant 1 : index
    %22 = vector.load %arg3[%c0_10, %c1] : memref<8x2xf32, #tpu.memory_space<vmem>>, vector<8x1xf32>
    %23 = vector.broadcast %22 : vector<8x1xf32> to vector<8x512xf32>
    %24 = arith.addf %21, %23 : vector<8x512xf32>
    %cst_11 = arith.constant 0.000000e+00 : f32
    %25 = vector.broadcast %cst_11 : f32 to vector<8x512xf32>
    %26 = arith.maximumf %24, %25 : vector<8x512xf32>
    %c0_12 = arith.constant 0 : index
    %c0_13 = arith.constant 0 : index
    %27 = vector.load %arg4[%c0_12, %c0_13] : memref<8x512xf32, #tpu.memory_space<vmem>>, vector<8x512xf32>
    tpu.vector_store %arg4[%c0_12, %c0_13], %26 {strides = array<i32>} : memref<8x512xf32, #tpu.memory_space<vmem>>, vector<8x512xf32>,
    return
  }
  func.func @transform_0(%arg0: i32) -> (i32, i32) {
    %c0_i32 = arith.constant 0 : i32
    %c0_i32_0 = arith.constant 0 : i32
    %c0_i32_1 = arith.constant 0 : i32
    return %c0_i32, %c0_i32_0 : i32, i32
  }
  func.func @transform_1(%arg0: i32) -> (i32, i32) {
    %c0_i32 = arith.constant 0 : i32
    %c0_i32_0 = arith.constant 0 : i32
    %c0_i32_1 = arith.constant 0 : i32
    return %c0_i32, %c0_i32_0 : i32, i32
  }
  func.func @transform_2(%arg0: i32) -> (i32, i32) {
    %c0_i32 = arith.constant 0 : i32
    %c0_i32_0 = arith.constant 0 : i32
    %c0_i32_1 = arith.constant 0 : i32
    return %c0_i32, %c0_i32_0 : i32, i32
  }
  func.func @transform_3(%arg0: i32) -> (i32, i32) {
    %c0_i32 = arith.constant 0 : i32
    %c0_i32_0 = arith.constant 0 : i32
    %c0_i32_1 = arith.constant 0 : i32
    return %c0_i32, %c0_i32_0 : i32, i32
  }
}

module attributes {stable_mosaic.version = 11 : i64} {
  func.func @_gemm_fused_kernel(%arg0: i32, %arg1: memref<8x72xbf16, #tpu.memory_space<vmem>>, %arg2: memref<72x512xbf16, #tpu.memory_space<vmem>>, %arg3: memref<8x2xf32, #tpu.memory_space<vmem>>, %arg4: memref<8x512xf32, #tpu.memory_space<vmem>>) attributes {dimension_semantics = [#tpu.dimension_semantics<arbitrary>], iteration_bounds = array<i64: 1>, scalar_prefetch = 0 : i64, scratch_operands = 0 : i64, tpu.core_type = #tpu.core_type<tc>, window_params = [{pipeline_mode = #tpu.pipeline_mode<synchronous>, transform_indices = @transform_0, window_bounds = array<i64: 8, 72>}, {pipeline_mode = #tpu.pipeline_mode<synchronous>, transform_indices = @transform_1, window_bounds = array<i64: 72, 512>}, {pipeline_mode = #tpu.pipeline_mode<synchronous>, transform_indices = @transform_2, window_bounds = array<i64: 8, 2>}, {pipeline_mode = #tpu.pipeline_mode<synchronous>, transform_indices = @transform_3, window_bounds = array<i64: 8, 512>}]} {
    %c0 = arith.constant 0 : index
    %c0_0 = arith.constant 0 : index
    %0 = vector.load %arg1[%c0, %c0_0] : memref<8x72xbf16, #tpu.memory_space<vmem>>, vector<8x72xbf16>
    %c0_1 = arith.constant 0 : index
    %c0_2 = arith.constant 0 : index
    %1 = vector.load %arg2[%c0_1, %c0_2] : memref<72x512xbf16, #tpu.memory_space<vmem>>, vector<72x512xbf16>
    %cst = arith.constant dense<0.000000e+00> : vector<8x512xf32>
    %2 = tpu.matmul %0, %1, %cst {dimension_numbers = #tpu.dot_dimension_numbers<[1], [0], [0], [1], [0, 0, 1, 1], [], []>} : vector<8x72xbf16>, vector<72x512xbf16>, vector<8x512xf32> -> vector<8x512xf32>
    %cst_3 = arith.constant dense<0.000000e+00> : vector<8xf32>
    %3 = vector.multi_reduction <add>, %2, %cst_3 [1] : vector<8x512xf32> to vector<8xf32>
    %4 = vector.shape_cast %3 : vector<8xf32> to vector<8x1xf32>
    %cst_4 = arith.constant 5.120000e+02 : f32
    %5 = vector.broadcast %cst_4 : f32 to vector<8x1xf32>
    %6 = arith.divf %4, %5 : vector<8x1xf32>
    %7 = vector.broadcast %6 : vector<8x1xf32> to vector<8x512xf32>
    %8 = arith.subf %2, %7 : vector<8x512xf32>
    %9 = arith.mulf %8, %8 : vector<8x512xf32>
    %cst_5 = arith.constant dense<0.000000e+00> : vector<8xf32>
    %10 = vector.multi_reduction <add>, %9, %cst_5 [1] : vector<8x512xf32> to vector<8xf32>
    %11 = vector.shape_cast %10 : vector<8xf32> to vector<8x1xf32>
    %cst_6 = arith.constant 5.120000e+02 : f32
    %12 = vector.broadcast %cst_6 : f32 to vector<8x1xf32>
    %13 = arith.divf %11, %12 : vector<8x1xf32>
    %cst_7 = arith.constant 9.99999974E-6 : f32
    %14 = vector.broadcast %cst_7 : f32 to vector<8x1xf32>
    %15 = arith.addf %13, %14 : vector<8x1xf32>
    %16 = math.rsqrt %15 : vector<8x1xf32>
    %17 = vector.broadcast %16 : vector<8x1xf32> to vector<8x512xf32>
    %18 = arith.mulf %8, %17 : vector<8x512xf32>
    %c0_8 = arith.constant 0 : index
    %c0_9 = arith.constant 0 : index
    %19 = vector.load %arg3[%c0_8, %c0_9] : memref<8x2xf32, #tpu.memory_space<vmem>>, vector<8x1xf32>
    %20 = vector.broadcast %19 : vector<8x1xf32> to vector<8x512xf32>
    %21 = arith.mulf %18, %20 : vector<8x512xf32>
    %c0_10 = arith.constant 0 : index
    %c1 = arith.constant 1 : index
    %22 = vector.load %arg3[%c0_10, %c1] : memref<8x2xf32, #tpu.memory_space<vmem>>, vector<8x1xf32>
    %23 = vector.broadcast %22 : vector<8x1xf32> to vector<8x512xf32>
    %24 = arith.addf %21, %23 : vector<8x512xf32>
    %cst_11 = arith.constant 0.000000e+00 : f32
    %25 = vector.broadcast %cst_11 : f32 to vector<8x512xf32>
    %26 = arith.maximumf %24, %25 : vector<8x512xf32>
    %c0_12 = arith.constant 0 : index
    %c0_13 = arith.constant 0 : index
    %27 = vector.load %arg4[%c0_12, %c0_13] : memref<8x512xf32, #tpu.memory_space<vmem>>, vector<8x512xf32>
    tpu.vector_store %arg4[%c0_12, %c0_13], %26 {strides = array<i32>} : memref<8x512xf32, #tpu.memory_space<vmem>>, vector<8x512xf32>,
    return
  }
  func.func @transform_0(%arg0: i32) -> (i32, i32) {
    %c0_i32 = arith.constant 0 : i32
    %c0_i32_0 = arith.constant 0 : i32
    %c0_i32_1 = arith.constant 0 : i32
    return %c0_i32, %c0_i32_0 : i32, i32
  }
  func.func @transform_1(%arg0: i32) -> (i32, i32) {
    %c0_i32 = arith.constant 0 : i32
    %c0_i32_0 = arith.constant 0 : i32
    %c0_i32_1 = arith.constant 0 : i32
    return %c0_i32, %c0_i32_0 : i32, i32
  }
  func.func @transform_2(%arg0: i32) -> (i32, i32) {
    %c0_i32 = arith.constant 0 : i32
    %c0_i32_0 = arith.constant 0 : i32
    %c0_i32_1 = arith.constant 0 : i32
    return %c0_i32, %c0_i32_0 : i32, i32
  }
  func.func @transform_3(%arg0: i32) -> (i32, i32) {
    %c0_i32 = arith.constant 0 : i32
    %c0_i32_0 = arith.constant 0 : i32
    %c0_i32_1 = arith.constant 0 : i32
    return %c0_i32, %c0_i32_0 : i32, i32
  }
}

module attributes {stable_mosaic.version = 11 : i64} {
  func.func @_gemm_fused_kernel(%arg0: i32, %arg1: memref<16x72xbf16, #tpu.memory_space<vmem>>, %arg2: memref<72x128xbf16, #tpu.memory_space<vmem>>, %arg3: memref<16x2xf32, #tpu.memory_space<vmem>>, %arg4: memref<16x128xf32, #tpu.memory_space<vmem>>) attributes {dimension_semantics = [#tpu.dimension_semantics<arbitrary>], iteration_bounds = array<i64: 1>, scalar_prefetch = 0 : i64, scratch_operands = 0 : i64, tpu.core_type = #tpu.core_type<tc>, window_params = [{pipeline_mode = #tpu.pipeline_mode<synchronous>, transform_indices = @transform_0, window_bounds = array<i64: 16, 72>}, {pipeline_mode = #tpu.pipeline_mode<synchronous>, transform_indices = @transform_1, window_bounds = array<i64: 72, 128>}, {pipeline_mode = #tpu.pipeline_mode<synchronous>, transform_indices = @transform_2, window_bounds = array<i64: 16, 2>}, {pipeline_mode = #tpu.pipeline_mode<synchronous>, transform_indices = @transform_3, window_bounds = array<i64: 16, 128>}]} {
    %c0 = arith.constant 0 : index
    %c0_0 = arith.constant 0 : index
    %0 = vector.load %arg1[%c0, %c0_0] : memref<16x72xbf16, #tpu.memory_space<vmem>>, vector<16x72xbf16>
    %c0_1 = arith.constant 0 : index
    %c0_2 = arith.constant 0 : index
    %1 = vector.load %arg2[%c0_1, %c0_2] : memref<72x128xbf16, #tpu.memory_space<vmem>>, vector<72x128xbf16>
    %cst = arith.constant dense<0.000000e+00> : vector<16x128xf32>
    %2 = tpu.matmul %0, %1, %cst {dimension_numbers = #tpu.dot_dimension_numbers<[1], [0], [0], [1], [0, 0, 1, 1], [], []>} : vector<16x72xbf16>, vector<72x128xbf16>, vector<16x128xf32> -> vector<16x128xf32>
    %cst_3 = arith.constant dense<0.000000e+00> : vector<16xf32>
    %3 = vector.multi_reduction <add>, %2, %cst_3 [1] : vector<16x128xf32> to vector<16xf32>
    %4 = vector.shape_cast %3 : vector<16xf32> to vector<16x1xf32>
    %cst_4 = arith.constant 1.280000e+02 : f32
    %5 = vector.broadcast %cst_4 : f32 to vector<16x1xf32>
    %6 = arith.divf %4, %5 : vector<16x1xf32>
    %7 = vector.broadcast %6 : vector<16x1xf32> to vector<16x128xf32>
    %8 = arith.subf %2, %7 : vector<16x128xf32>
    %9 = arith.mulf %8, %8 : vector<16x128xf32>
    %cst_5 = arith.constant dense<0.000000e+00> : vector<16xf32>
    %10 = vector.multi_reduction <add>, %9, %cst_5 [1] : vector<16x128xf32> to vector<16xf32>
    %11 = vector.shape_cast %10 : vector<16xf32> to vector<16x1xf32>
    %cst_6 = arith.constant 1.280000e+02 : f32
    %12 = vector.broadcast %cst_6 : f32 to vector<16x1xf32>
    %13 = arith.divf %11, %12 : vector<16x1xf32>
    %cst_7 = arith.constant 9.99999974E-6 : f32
    %14 = vector.broadcast %cst_7 : f32 to vector<16x1xf32>
    %15 = arith.addf %13, %14 : vector<16x1xf32>
    %16 = math.rsqrt %15 : vector<16x1xf32>
    %17 = vector.broadcast %16 : vector<16x1xf32> to vector<16x128xf32>
    %18 = arith.mulf %8, %17 : vector<16x128xf32>
    %c0_8 = arith.constant 0 : index
    %c0_9 = arith.constant 0 : index
    %19 = vector.load %arg3[%c0_8, %c0_9] : memref<16x2xf32, #tpu.memory_space<vmem>>, vector<16x1xf32>
    %20 = vector.broadcast %19 : vector<16x1xf32> to vector<16x128xf32>
    %21 = arith.mulf %18, %20 : vector<16x128xf32>
    %c0_10 = arith.constant 0 : index
    %c1 = arith.constant 1 : index
    %22 = vector.load %arg3[%c0_10, %c1] : memref<16x2xf32, #tpu.memory_space<vmem>>, vector<16x1xf32>
    %23 = vector.broadcast %22 : vector<16x1xf32> to vector<16x128xf32>
    %24 = arith.addf %21, %23 : vector<16x128xf32>
    %cst_11 = arith.constant 0.000000e+00 : f32
    %25 = vector.broadcast %cst_11 : f32 to vector<16x128xf32>
    %26 = arith.maximumf %24, %25 : vector<16x128xf32>
    %c0_12 = arith.constant 0 : index
    %c0_13 = arith.constant 0 : index
    %27 = vector.load %arg4[%c0_12, %c0_13] : memref<16x128xf32, #tpu.memory_space<vmem>>, vector<16x128xf32>
    tpu.vector_store %arg4[%c0_12, %c0_13], %26 {strides = array<i32>} : memref<16x128xf32, #tpu.memory_space<vmem>>, vector<16x128xf32>,
    return
  }
  func.func @transform_0(%arg0: i32) -> (i32, i32) {
    %c0_i32 = arith.constant 0 : i32
    %c0_i32_0 = arith.constant 0 : i32
    %c0_i32_1 = arith.constant 0 : i32
    return %c0_i32, %c0_i32_0 : i32, i32
  }
  func.func @transform_1(%arg0: i32) -> (i32, i32) {
    %c0_i32 = arith.constant 0 : i32
    %c0_i32_0 = arith.constant 0 : i32
    %c0_i32_1 = arith.constant 0 : i32
    return %c0_i32, %c0_i32_0 : i32, i32
  }
  func.func @transform_2(%arg0: i32) -> (i32, i32) {
    %c0_i32 = arith.constant 0 : i32
    %c0_i32_0 = arith.constant 0 : i32
    %c0_i32_1 = arith.constant 0 : i32
    return %c0_i32, %c0_i32_0 : i32, i32
  }
  func.func @transform_3(%arg0: i32) -> (i32, i32) {
    %c0_i32 = arith.constant 0 : i32
    %c0_i32_0 = arith.constant 0 : i32
    %c0_i32_1 = arith.constant 0 : i32
    return %c0_i32, %c0_i32_0 : i32, i32
  }
}

module attributes {stable_mosaic.version = 11 : i64} {
  func.func @_gemm_fused_kernel(%arg0: i32, %arg1: memref<16x144xbf16, #tpu.memory_space<vmem>>, %arg2: memref<144x128xbf16, #tpu.memory_space<vmem>>, %arg3: memref<16x2xf32, #tpu.memory_space<vmem>>, %arg4: memref<16x128xf32, #tpu.memory_space<vmem>>) attributes {dimension_semantics = [#tpu.dimension_semantics<arbitrary>], iteration_bounds = array<i64: 1>, scalar_prefetch = 0 : i64, scratch_operands = 0 : i64, tpu.core_type = #tpu.core_type<tc>, window_params = [{pipeline_mode = #tpu.pipeline_mode<synchronous>, transform_indices = @transform_0, window_bounds = array<i64: 16, 144>}, {pipeline_mode = #tpu.pipeline_mode<synchronous>, transform_indices = @transform_1, window_bounds = array<i64: 144, 128>}, {pipeline_mode = #tpu.pipeline_mode<synchronous>, transform_indices = @transform_2, window_bounds = array<i64: 16, 2>}, {pipeline_mode = #tpu.pipeline_mode<synchronous>, transform_indices = @transform_3, window_bounds = array<i64: 16, 128>}]} {
    %c0 = arith.constant 0 : index
    %c0_0 = arith.constant 0 : index
    %0 = vector.load %arg1[%c0, %c0_0] : memref<16x144xbf16, #tpu.memory_space<vmem>>, vector<16x144xbf16>
    %c0_1 = arith.constant 0 : index
    %c0_2 = arith.constant 0 : index
    %1 = vector.load %arg2[%c0_1, %c0_2] : memref<144x128xbf16, #tpu.memory_space<vmem>>, vector<144x128xbf16>
    %cst = arith.constant dense<0.000000e+00> : vector<16x128xf32>
    %2 = tpu.matmul %0, %1, %cst {dimension_numbers = #tpu.dot_dimension_numbers<[1], [0], [0], [1], [0, 0, 1, 1], [], []>} : vector<16x144xbf16>, vector<144x128xbf16>, vector<16x128xf32> -> vector<16x128xf32>
    %cst_3 = arith.constant dense<0.000000e+00> : vector<16xf32>
    %3 = vector.multi_reduction <add>, %2, %cst_3 [1] : vector<16x128xf32> to vector<16xf32>
    %4 = vector.shape_cast %3 : vector<16xf32> to vector<16x1xf32>
    %cst_4 = arith.constant 1.280000e+02 : f32
    %5 = vector.broadcast %cst_4 : f32 to vector<16x1xf32>
    %6 = arith.divf %4, %5 : vector<16x1xf32>
    %7 = vector.broadcast %6 : vector<16x1xf32> to vector<16x128xf32>
    %8 = arith.subf %2, %7 : vector<16x128xf32>
    %9 = arith.mulf %8, %8 : vector<16x128xf32>
    %cst_5 = arith.constant dense<0.000000e+00> : vector<16xf32>
    %10 = vector.multi_reduction <add>, %9, %cst_5 [1] : vector<16x128xf32> to vector<16xf32>
    %11 = vector.shape_cast %10 : vector<16xf32> to vector<16x1xf32>
    %cst_6 = arith.constant 1.280000e+02 : f32
    %12 = vector.broadcast %cst_6 : f32 to vector<16x1xf32>
    %13 = arith.divf %11, %12 : vector<16x1xf32>
    %cst_7 = arith.constant 9.99999974E-6 : f32
    %14 = vector.broadcast %cst_7 : f32 to vector<16x1xf32>
    %15 = arith.addf %13, %14 : vector<16x1xf32>
    %16 = math.rsqrt %15 : vector<16x1xf32>
    %17 = vector.broadcast %16 : vector<16x1xf32> to vector<16x128xf32>
    %18 = arith.mulf %8, %17 : vector<16x128xf32>
    %c0_8 = arith.constant 0 : index
    %c0_9 = arith.constant 0 : index
    %19 = vector.load %arg3[%c0_8, %c0_9] : memref<16x2xf32, #tpu.memory_space<vmem>>, vector<16x1xf32>
    %20 = vector.broadcast %19 : vector<16x1xf32> to vector<16x128xf32>
    %21 = arith.mulf %18, %20 : vector<16x128xf32>
    %c0_10 = arith.constant 0 : index
    %c1 = arith.constant 1 : index
    %22 = vector.load %arg3[%c0_10, %c1] : memref<16x2xf32, #tpu.memory_space<vmem>>, vector<16x1xf32>
    %23 = vector.broadcast %22 : vector<16x1xf32> to vector<16x128xf32>
    %24 = arith.addf %21, %23 : vector<16x128xf32>
    %cst_11 = arith.constant 0.000000e+00 : f32
    %25 = vector.broadcast %cst_11 : f32 to vector<16x128xf32>
    %26 = arith.maximumf %24, %25 : vector<16x128xf32>
    %c0_12 = arith.constant 0 : index
    %c0_13 = arith.constant 0 : index
    %27 = vector.load %arg4[%c0_12, %c0_13] : memref<16x128xf32, #tpu.memory_space<vmem>>, vector<16x128xf32>
    tpu.vector_store %arg4[%c0_12, %c0_13], %26 {strides = array<i32>} : memref<16x128xf32, #tpu.memory_space<vmem>>, vector<16x128xf32>,
    return
  }
  func.func @transform_0(%arg0: i32) -> (i32, i32) {
    %c0_i32 = arith.constant 0 : i32
    %c0_i32_0 = arith.constant 0 : i32
    %c0_i32_1 = arith.constant 0 : i32
    return %c0_i32, %c0_i32_0 : i32, i32
  }
  func.func @transform_1(%arg0: i32) -> (i32, i32) {
    %c0_i32 = arith.constant 0 : i32
    %c0_i32_0 = arith.constant 0 : i32
    %c0_i32_1 = arith.constant 0 : i32
    return %c0_i32, %c0_i32_0 : i32, i32
  }
  func.func @transform_2(%arg0: i32) -> (i32, i32) {
    %c0_i32 = arith.constant 0 : i32
    %c0_i32_0 = arith.constant 0 : i32
    %c0_i32_1 = arith.constant 0 : i32
    return %c0_i32, %c0_i32_0 : i32, i32
  }
  func.func @transform_3(%arg0: i32) -> (i32, i32) {
    %c0_i32 = arith.constant 0 : i32
    %c0_i32_0 = arith.constant 0 : i32
    %c0_i32_1 = arith.constant 0 : i32
    return %c0_i32, %c0_i32_0 : i32, i32
  }
}

module attributes {stable_mosaic.version = 11 : i64} {
  func.func @_gemm_fused_kernel(%arg0: i32, %arg1: memref<32x144xbf16, #tpu.memory_space<vmem>>, %arg2: memref<144x32xbf16, #tpu.memory_space<vmem>>, %arg3: memref<32x2xf32, #tpu.memory_space<vmem>>, %arg4: memref<32x32xf32, #tpu.memory_space<vmem>>) attributes {dimension_semantics = [#tpu.dimension_semantics<arbitrary>], iteration_bounds = array<i64: 1>, scalar_prefetch = 0 : i64, scratch_operands = 0 : i64, tpu.core_type = #tpu.core_type<tc>, window_params = [{pipeline_mode = #tpu.pipeline_mode<synchronous>, transform_indices = @transform_0, window_bounds = array<i64: 32, 144>}, {pipeline_mode = #tpu.pipeline_mode<synchronous>, transform_indices = @transform_1, window_bounds = array<i64: 144, 32>}, {pipeline_mode = #tpu.pipeline_mode<synchronous>, transform_indices = @transform_2, window_bounds = array<i64: 32, 2>}, {pipeline_mode = #tpu.pipeline_mode<synchronous>, transform_indices = @transform_3, window_bounds = array<i64: 32, 32>}]} {
    %c0 = arith.constant 0 : index
    %c0_0 = arith.constant 0 : index
    %0 = vector.load %arg1[%c0, %c0_0] : memref<32x144xbf16, #tpu.memory_space<vmem>>, vector<32x144xbf16>
    %c0_1 = arith.constant 0 : index
    %c0_2 = arith.constant 0 : index
    %1 = vector.load %arg2[%c0_1, %c0_2] : memref<144x32xbf16, #tpu.memory_space<vmem>>, vector<144x32xbf16>
    %cst = arith.constant dense<0.000000e+00> : vector<32x32xf32>
    %2 = tpu.matmul %0, %1, %cst {dimension_numbers = #tpu.dot_dimension_numbers<[1], [0], [0], [1], [0, 0, 1, 1], [], []>} : vector<32x144xbf16>, vector<144x32xbf16>, vector<32x32xf32> -> vector<32x32xf32>
    %cst_3 = arith.constant dense<0.000000e+00> : vector<32xf32>
    %3 = vector.multi_reduction <add>, %2, %cst_3 [1] : vector<32x32xf32> to vector<32xf32>
    %4 = vector.shape_cast %3 : vector<32xf32> to vector<32x1xf32>
    %cst_4 = arith.constant 3.200000e+01 : f32
    %5 = vector.broadcast %cst_4 : f32 to vector<32x1xf32>
    %6 = arith.divf %4, %5 : vector<32x1xf32>
    %7 = vector.broadcast %6 : vector<32x1xf32> to vector<32x32xf32>
    %8 = arith.subf %2, %7 : vector<32x32xf32>
    %9 = arith.mulf %8, %8 : vector<32x32xf32>
    %cst_5 = arith.constant dense<0.000000e+00> : vector<32xf32>
    %10 = vector.multi_reduction <add>, %9, %cst_5 [1] : vector<32x32xf32> to vector<32xf32>
    %11 = vector.shape_cast %10 : vector<32xf32> to vector<32x1xf32>
    %cst_6 = arith.constant 3.200000e+01 : f32
    %12 = vector.broadcast %cst_6 : f32 to vector<32x1xf32>
    %13 = arith.divf %11, %12 : vector<32x1xf32>
    %cst_7 = arith.constant 9.99999974E-6 : f32
    %14 = vector.broadcast %cst_7 : f32 to vector<32x1xf32>
    %15 = arith.addf %13, %14 : vector<32x1xf32>
    %16 = math.rsqrt %15 : vector<32x1xf32>
    %17 = vector.broadcast %16 : vector<32x1xf32> to vector<32x32xf32>
    %18 = arith.mulf %8, %17 : vector<32x32xf32>
    %c0_8 = arith.constant 0 : index
    %c0_9 = arith.constant 0 : index
    %19 = vector.load %arg3[%c0_8, %c0_9] : memref<32x2xf32, #tpu.memory_space<vmem>>, vector<32x1xf32>
    %20 = vector.broadcast %19 : vector<32x1xf32> to vector<32x32xf32>
    %21 = arith.mulf %18, %20 : vector<32x32xf32>
    %c0_10 = arith.constant 0 : index
    %c1 = arith.constant 1 : index
    %22 = vector.load %arg3[%c0_10, %c1] : memref<32x2xf32, #tpu.memory_space<vmem>>, vector<32x1xf32>
    %23 = vector.broadcast %22 : vector<32x1xf32> to vector<32x32xf32>
    %24 = arith.addf %21, %23 : vector<32x32xf32>
    %cst_11 = arith.constant 0.000000e+00 : f32
    %25 = vector.broadcast %cst_11 : f32 to vector<32x32xf32>
    %26 = arith.maximumf %24, %25 : vector<32x32xf32>
    %c0_12 = arith.constant 0 : index
    %c0_13 = arith.constant 0 : index
    %27 = vector.load %arg4[%c0_12, %c0_13] : memref<32x32xf32, #tpu.memory_space<vmem>>, vector<32x32xf32>
    tpu.vector_store %arg4[%c0_12, %c0_13], %26 {strides = array<i32>} : memref<32x32xf32, #tpu.memory_space<vmem>>, vector<32x32xf32>,
    return
  }
  func.func @transform_0(%arg0: i32) -> (i32, i32) {
    %c0_i32 = arith.constant 0 : i32
    %c0_i32_0 = arith.constant 0 : i32
    %c0_i32_1 = arith.constant 0 : i32
    return %c0_i32, %c0_i32_0 : i32, i32
  }
  func.func @transform_1(%arg0: i32) -> (i32, i32) {
    %c0_i32 = arith.constant 0 : i32
    %c0_i32_0 = arith.constant 0 : i32
    %c0_i32_1 = arith.constant 0 : i32
    return %c0_i32, %c0_i32_0 : i32, i32
  }
  func.func @transform_2(%arg0: i32) -> (i32, i32) {
    %c0_i32 = arith.constant 0 : i32
    %c0_i32_0 = arith.constant 0 : i32
    %c0_i32_1 = arith.constant 0 : i32
    return %c0_i32, %c0_i32_0 : i32, i32
  }
  func.func @transform_3(%arg0: i32) -> (i32, i32) {
    %c0_i32 = arith.constant 0 : i32
    %c0_i32_0 = arith.constant 0 : i32
    %c0_i32_1 = arith.constant 0 : i32
    return %c0_i32, %c0_i32_0 : i32, i32
  }
}

module attributes {stable_mosaic.version = 11 : i64} {
  func.func @_gemm_fused_kernel(%arg0: i32, %arg1: memref<32x288xbf16, #tpu.memory_space<vmem>>, %arg2: memref<288x32xbf16, #tpu.memory_space<vmem>>, %arg3: memref<32x2xf32, #tpu.memory_space<vmem>>, %arg4: memref<32x32xf32, #tpu.memory_space<vmem>>) attributes {dimension_semantics = [#tpu.dimension_semantics<arbitrary>], iteration_bounds = array<i64: 1>, scalar_prefetch = 0 : i64, scratch_operands = 0 : i64, tpu.core_type = #tpu.core_type<tc>, window_params = [{pipeline_mode = #tpu.pipeline_mode<synchronous>, transform_indices = @transform_0, window_bounds = array<i64: 32, 288>}, {pipeline_mode = #tpu.pipeline_mode<synchronous>, transform_indices = @transform_1, window_bounds = array<i64: 288, 32>}, {pipeline_mode = #tpu.pipeline_mode<synchronous>, transform_indices = @transform_2, window_bounds = array<i64: 32, 2>}, {pipeline_mode = #tpu.pipeline_mode<synchronous>, transform_indices = @transform_3, window_bounds = array<i64: 32, 32>}]} {
    %c0 = arith.constant 0 : index
    %c0_0 = arith.constant 0 : index
    %0 = vector.load %arg1[%c0, %c0_0] : memref<32x288xbf16, #tpu.memory_space<vmem>>, vector<32x288xbf16>
    %c0_1 = arith.constant 0 : index
    %c0_2 = arith.constant 0 : index
    %1 = vector.load %arg2[%c0_1, %c0_2] : memref<288x32xbf16, #tpu.memory_space<vmem>>, vector<288x32xbf16>
    %cst = arith.constant dense<0.000000e+00> : vector<32x32xf32>
    %2 = tpu.matmul %0, %1, %cst {dimension_numbers = #tpu.dot_dimension_numbers<[1], [0], [0], [1], [0, 0, 1, 1], [], []>} : vector<32x288xbf16>, vector<288x32xbf16>, vector<32x32xf32> -> vector<32x32xf32>
    %cst_3 = arith.constant dense<0.000000e+00> : vector<32xf32>
    %3 = vector.multi_reduction <add>, %2, %cst_3 [1] : vector<32x32xf32> to vector<32xf32>
    %4 = vector.shape_cast %3 : vector<32xf32> to vector<32x1xf32>
    %cst_4 = arith.constant 3.200000e+01 : f32
    %5 = vector.broadcast %cst_4 : f32 to vector<32x1xf32>
    %6 = arith.divf %4, %5 : vector<32x1xf32>
    %7 = vector.broadcast %6 : vector<32x1xf32> to vector<32x32xf32>
    %8 = arith.subf %2, %7 : vector<32x32xf32>
    %9 = arith.mulf %8, %8 : vector<32x32xf32>
    %cst_5 = arith.constant dense<0.000000e+00> : vector<32xf32>
    %10 = vector.multi_reduction <add>, %9, %cst_5 [1] : vector<32x32xf32> to vector<32xf32>
    %11 = vector.shape_cast %10 : vector<32xf32> to vector<32x1xf32>
    %cst_6 = arith.constant 3.200000e+01 : f32
    %12 = vector.broadcast %cst_6 : f32 to vector<32x1xf32>
    %13 = arith.divf %11, %12 : vector<32x1xf32>
    %cst_7 = arith.constant 9.99999974E-6 : f32
    %14 = vector.broadcast %cst_7 : f32 to vector<32x1xf32>
    %15 = arith.addf %13, %14 : vector<32x1xf32>
    %16 = math.rsqrt %15 : vector<32x1xf32>
    %17 = vector.broadcast %16 : vector<32x1xf32> to vector<32x32xf32>
    %18 = arith.mulf %8, %17 : vector<32x32xf32>
    %c0_8 = arith.constant 0 : index
    %c0_9 = arith.constant 0 : index
    %19 = vector.load %arg3[%c0_8, %c0_9] : memref<32x2xf32, #tpu.memory_space<vmem>>, vector<32x1xf32>
    %20 = vector.broadcast %19 : vector<32x1xf32> to vector<32x32xf32>
    %21 = arith.mulf %18, %20 : vector<32x32xf32>
    %c0_10 = arith.constant 0 : index
    %c1 = arith.constant 1 : index
    %22 = vector.load %arg3[%c0_10, %c1] : memref<32x2xf32, #tpu.memory_space<vmem>>, vector<32x1xf32>
    %23 = vector.broadcast %22 : vector<32x1xf32> to vector<32x32xf32>
    %24 = arith.addf %21, %23 : vector<32x32xf32>
    %cst_11 = arith.constant 0.000000e+00 : f32
    %25 = vector.broadcast %cst_11 : f32 to vector<32x32xf32>
    %26 = arith.maximumf %24, %25 : vector<32x32xf32>
    %c0_12 = arith.constant 0 : index
    %c0_13 = arith.constant 0 : index
    %27 = vector.load %arg4[%c0_12, %c0_13] : memref<32x32xf32, #tpu.memory_space<vmem>>, vector<32x32xf32>
    tpu.vector_store %arg4[%c0_12, %c0_13], %26 {strides = array<i32>} : memref<32x32xf32, #tpu.memory_space<vmem>>, vector<32x32xf32>,
    return
  }
  func.func @transform_0(%arg0: i32) -> (i32, i32) {
    %c0_i32 = arith.constant 0 : i32
    %c0_i32_0 = arith.constant 0 : i32
    %c0_i32_1 = arith.constant 0 : i32
    return %c0_i32, %c0_i32_0 : i32, i32
  }
  func.func @transform_1(%arg0: i32) -> (i32, i32) {
    %c0_i32 = arith.constant 0 : i32
    %c0_i32_0 = arith.constant 0 : i32
    %c0_i32_1 = arith.constant 0 : i32
    return %c0_i32, %c0_i32_0 : i32, i32
  }
  func.func @transform_2(%arg0: i32) -> (i32, i32) {
    %c0_i32 = arith.constant 0 : i32
    %c0_i32_0 = arith.constant 0 : i32
    %c0_i32_1 = arith.constant 0 : i32
    return %c0_i32, %c0_i32_0 : i32, i32
  }
  func.func @transform_3(%arg0: i32) -> (i32, i32) {
    %c0_i32 = arith.constant 0 : i32
    %c0_i32_0 = arith.constant 0 : i32
    %c0_i32_1 = arith.constant 0 : i32
    return %c0_i32, %c0_i32_0 : i32, i32
  }
}

module attributes {stable_mosaic.version = 11 : i64} {
  func.func @_gemm_kernel(%arg0: i32, %arg1: memref<96x32xbf16, #tpu.memory_space<vmem>>, %arg2: memref<32x32xbf16, #tpu.memory_space<vmem>>, %arg3: memref<96x32xf32, #tpu.memory_space<vmem>>) attributes {dimension_semantics = [#tpu.dimension_semantics<arbitrary>], iteration_bounds = array<i64: 1>, scalar_prefetch = 0 : i64, scratch_operands = 0 : i64, tpu.core_type = #tpu.core_type<tc>, window_params = [{pipeline_mode = #tpu.pipeline_mode<synchronous>, transform_indices = @transform_0, window_bounds = array<i64: 96, 32>}, {pipeline_mode = #tpu.pipeline_mode<synchronous>, transform_indices = @transform_1, window_bounds = array<i64: 32, 32>}, {pipeline_mode = #tpu.pipeline_mode<synchronous>, transform_indices = @transform_2, window_bounds = array<i64: 96, 32>}]} {
    %c0 = arith.constant 0 : index
    %c0_0 = arith.constant 0 : index
    %0 = vector.load %arg1[%c0, %c0_0] : memref<96x32xbf16, #tpu.memory_space<vmem>>, vector<96x32xbf16>
    %c0_1 = arith.constant 0 : index
    %c0_2 = arith.constant 0 : index
    %1 = vector.load %arg2[%c0_1, %c0_2] : memref<32x32xbf16, #tpu.memory_space<vmem>>, vector<32x32xbf16>
    %cst = arith.constant dense<0.000000e+00> : vector<96x32xf32>
    %2 = tpu.matmul %0, %1, %cst {dimension_numbers = #tpu.dot_dimension_numbers<[1], [0], [0], [1], [0, 0, 1, 1], [], []>} : vector<96x32xbf16>, vector<32x32xbf16>, vector<96x32xf32> -> vector<96x32xf32>
    %c0_3 = arith.constant 0 : index
    %c0_4 = arith.constant 0 : index
    %3 = vector.load %arg3[%c0_3, %c0_4] : memref<96x32xf32, #tpu.memory_space<vmem>>, vector<96x32xf32>
    tpu.vector_store %arg3[%c0_3, %c0_4], %2 {strides = array<i32>} : memref<96x32xf32, #tpu.memory_space<vmem>>, vector<96x32xf32>,
    return
  }
  func.func @transform_0(%arg0: i32) -> (i32, i32) {
    %c0_i32 = arith.constant 0 : i32
    %c0_i32_0 = arith.constant 0 : i32
    %c0_i32_1 = arith.constant 0 : i32
    return %c0_i32, %c0_i32_0 : i32, i32
  }
  func.func @transform_1(%arg0: i32) -> (i32, i32) {
    %c0_i32 = arith.constant 0 : i32
    %c0_i32_0 = arith.constant 0 : i32
    %c0_i32_1 = arith.constant 0 : i32
    return %c0_i32, %c0_i32_0 : i32, i32
  }
  func.func @transform_2(%arg0: i32) -> (i32, i32) {
    %c0_i32 = arith.constant 0 : i32
    %c0_i32_0 = arith.constant 0 : i32
    %c0_i32_1 = arith.constant 0 : i32
    return %c0_i32, %c0_i32_0 : i32, i32
  }
}

module attributes {stable_mosaic.version = 11 : i64} {
  func.func @_attn_kernel(%arg0: i32, %arg1: memref<4x16x16xbf16, #tpu.memory_space<vmem>>, %arg2: memref<4x16x16xbf16, #tpu.memory_space<vmem>>, %arg3: memref<4x16x16xbf16, #tpu.memory_space<vmem>>, %arg4: memref<4x16x16xf32, #tpu.memory_space<vmem>>) attributes {dimension_semantics = [#tpu.dimension_semantics<arbitrary>], iteration_bounds = array<i64: 1>, scalar_prefetch = 0 : i64, scratch_operands = 0 : i64, tpu.core_type = #tpu.core_type<tc>, window_params = [{pipeline_mode = #tpu.pipeline_mode<synchronous>, transform_indices = @transform_0, window_bounds = array<i64: 4, 16, 16>}, {pipeline_mode = #tpu.pipeline_mode<synchronous>, transform_indices = @transform_1, window_bounds = array<i64: 4, 16, 16>}, {pipeline_mode = #tpu.pipeline_mode<synchronous>, transform_indices = @transform_2, window_bounds = array<i64: 4, 16, 16>}, {pipeline_mode = #tpu.pipeline_mode<synchronous>, transform_indices = @transform_3, window_bounds = array<i64: 4, 16, 16>}]} {
    %c0 = arith.constant 0 : index
    %c0_0 = arith.constant 0 : index
    %c0_1 = arith.constant 0 : index
    %0 = vector.load %arg1[%c0, %c0_0, %c0_1] : memref<4x16x16xbf16, #tpu.memory_space<vmem>>, vector<4x16x16xbf16>
    %c0_2 = arith.constant 0 : index
    %c0_3 = arith.constant 0 : index
    %c0_4 = arith.constant 0 : index
    %1 = vector.load %arg2[%c0_2, %c0_3, %c0_4] : memref<4x16x16xbf16, #tpu.memory_space<vmem>>, vector<4x16x16xbf16>
    %c0_5 = arith.constant 0 : index
    %c0_6 = arith.constant 0 : index
    %c0_7 = arith.constant 0 : index
    %2 = vector.load %arg3[%c0_5, %c0_6, %c0_7] : memref<4x16x16xbf16, #tpu.memory_space<vmem>>, vector<4x16x16xbf16>
    "tpu.trace_start"() <{level = 10 : i32, message = "bqd,bkd->bqk"}> : () -> ()
    %cst = arith.constant dense<0.000000e+00> : vector<4x16x16xf32>
    %3 = tpu.matmul %0, %1, %cst {dimension_numbers = #tpu.dot_dimension_numbers<[2], [2], [1], [1], [0, 0, 0, 1, 1, 1], [0], [0]>} : vector<4x16x16xbf16>, vector<4x16x16xbf16>, vector<4x16x16xf32> -> vector<4x16x16xf32>
    "tpu.trace_stop"() : () -> ()
    %cst_8 = arith.constant 2.500000e-01 : f32
    %4 = vector.broadcast %cst_8 : f32 to vector<4x16x16xf32>
    %5 = arith.mulf %3, %4 : vector<4x16x16xf32>
    %cst_9 = arith.constant dense<0xFF800000> : vector<4x16xf32>
    %6 = vector.multi_reduction <maximumf>, %5, %cst_9 [2] : vector<4x16x16xf32> to vector<4x16xf32>
    %7 = vector.shape_cast %6 : vector<4x16xf32> to vector<4x16x1xf32>
    %8 = vector.broadcast %7 : vector<4x16x1xf32> to vector<4x16x16xf32>
    %9 = arith.subf %5, %8 : vector<4x16x16xf32>
    %10 = math.exp %9 : vector<4x16x16xf32>
    %cst_10 = arith.constant dense<0.000000e+00> : vector<4x16xf32>
    %11 = vector.multi_reduction <add>, %10, %cst_10 [2] : vector<4x16x16xf32> to vector<4x16xf32>
    %12 = vector.shape_cast %11 : vector<4x16xf32> to vector<4x16x1xf32>
    %13 = tpu.reciprocal %12 {approx = true} : vector<4x16x1xf32> -> vector<4x16x1xf32>
    %14 = vector.broadcast %13 : vector<4x16x1xf32> to vector<4x16x16xf32>
    %15 = arith.mulf %10, %14 : vector<4x16x16xf32>
    %16 = arith.truncf %15 : vector<4x16x16xf32> to vector<4x16x16xbf16>
    "tpu.trace_start"() <{level = 10 : i32, message = "bqk,bkd->bqd"}> : () -> ()
    %cst_11 = arith.constant dense<0.000000e+00> : vector<4x16x16xf32>
    %17 = tpu.matmul %16, %2, %cst_11 {dimension_numbers = #tpu.dot_dimension_numbers<[2], [1], [1], [2], [0, 0, 0, 1, 1, 2], [0], [0]>} : vector<4x16x16xbf16>, vector<4x16x16xbf16>, vector<4x16x16xf32> -> vector<4x16x16xf32>
    "tpu.trace_stop"() : () -> ()
    %c0_12 = arith.constant 0 : index
    %c0_13 = arith.constant 0 : index
    %c0_14 = arith.constant 0 : index
    %18 = vector.load %arg4[%c0_12, %c0_13, %c0_14] : memref<4x16x16xf32, #tpu.memory_space<vmem>>, vector<4x16x16xf32>
    tpu.vector_store %arg4[%c0_12, %c0_13, %c0_14], %17 {strides = array<i32>} : memref<4x16x16xf32, #tpu.memory_space<vmem>>, vector<4x16x16xf32>,
    return
  }
  func.func @transform_0(%arg0: i32) -> (i32, i32, i32) {
    %c0_i32 = arith.constant 0 : i32
    %c0_i32_0 = arith.constant 0 : i32
    %c0_i32_1 = arith.constant 0 : i32
    %c0_i32_2 = arith.constant 0 : i32
    return %c0_i32, %c0_i32_0, %c0_i32_1 : i32, i32, i32
  }
  func.func @transform_1(%arg0: i32) -> (i32, i32, i32) {
    %c0_i32 = arith.constant 0 : i32
    %c0_i32_0 = arith.constant 0 : i32
    %c0_i32_1 = arith.constant 0 : i32
    %c0_i32_2 = arith.constant 0 : i32
    return %c0_i32, %c0_i32_0, %c0_i32_1 : i32, i32, i32
  }
  func.func @transform_2(%arg0: i32) -> (i32, i32, i32) {
    %c0_i32 = arith.constant 0 : i32
    %c0_i32_0 = arith.constant 0 : i32
    %c0_i32_1 = arith.constant 0 : i32
    %c0_i32_2 = arith.constant 0 : i32
    return %c0_i32, %c0_i32_0, %c0_i32_1 : i32, i32, i32
  }
  func.func @transform_3(%arg0: i32) -> (i32, i32, i32) {
    %c0_i32 = arith.constant 0 : i32
    %c0_i32_0 = arith.constant 0 : i32
    %c0_i32_1 = arith.constant 0 : i32
    %c0_i32_2 = arith.constant 0 : i32
    return %c0_i32, %c0_i32_0, %c0_i32_1 : i32, i32, i32
  }
}

module attributes {stable_mosaic.version = 11 : i64} {
  func.func @_gemm_kernel(%arg0: i32, %arg1: memref<32x32xbf16, #tpu.memory_space<vmem>>, %arg2: memref<32x32xbf16, #tpu.memory_space<vmem>>, %arg3: memref<32x32xf32, #tpu.memory_space<vmem>>) attributes {dimension_semantics = [#tpu.dimension_semantics<arbitrary>], iteration_bounds = array<i64: 1>, scalar_prefetch = 0 : i64, scratch_operands = 0 : i64, tpu.core_type = #tpu.core_type<tc>, window_params = [{pipeline_mode = #tpu.pipeline_mode<synchronous>, transform_indices = @transform_0, window_bounds = array<i64: 32, 32>}, {pipeline_mode = #tpu.pipeline_mode<synchronous>, transform_indices = @transform_1, window_bounds = array<i64: 32, 32>}, {pipeline_mode = #tpu.pipeline_mode<synchronous>, transform_indices = @transform_2, window_bounds = array<i64: 32, 32>}]} {
    %c0 = arith.constant 0 : index
    %c0_0 = arith.constant 0 : index
    %0 = vector.load %arg1[%c0, %c0_0] : memref<32x32xbf16, #tpu.memory_space<vmem>>, vector<32x32xbf16>
    %c0_1 = arith.constant 0 : index
    %c0_2 = arith.constant 0 : index
    %1 = vector.load %arg2[%c0_1, %c0_2] : memref<32x32xbf16, #tpu.memory_space<vmem>>, vector<32x32xbf16>
    %cst = arith.constant dense<0.000000e+00> : vector<32x32xf32>
    %2 = tpu.matmul %0, %1, %cst {dimension_numbers = #tpu.dot_dimension_numbers<[1], [0], [0], [1], [0, 0, 1, 1], [], []>} : vector<32x32xbf16>, vector<32x32xbf16>, vector<32x32xf32> -> vector<32x32xf32>
    %c0_3 = arith.constant 0 : index
    %c0_4 = arith.constant 0 : index
    %3 = vector.load %arg3[%c0_3, %c0_4] : memref<32x32xf32, #tpu.memory_space<vmem>>, vector<32x32xf32>
    tpu.vector_store %arg3[%c0_3, %c0_4], %2 {strides = array<i32>} : memref<32x32xf32, #tpu.memory_space<vmem>>, vector<32x32xf32>,
    return
  }
  func.func @transform_0(%arg0: i32) -> (i32, i32) {
    %c0_i32 = arith.constant 0 : i32
    %c0_i32_0 = arith.constant 0 : i32
    %c0_i32_1 = arith.constant 0 : i32
    return %c0_i32, %c0_i32_0 : i32, i32
  }
  func.func @transform_1(%arg0: i32) -> (i32, i32) {
    %c0_i32 = arith.constant 0 : i32
    %c0_i32_0 = arith.constant 0 : i32
    %c0_i32_1 = arith.constant 0 : i32
    return %c0_i32, %c0_i32_0 : i32, i32
  }
  func.func @transform_2(%arg0: i32) -> (i32, i32) {
    %c0_i32 = arith.constant 0 : i32
    %c0_i32_0 = arith.constant 0 : i32
    %c0_i32_1 = arith.constant 0 : i32
    return %c0_i32, %c0_i32_0 : i32, i32
  }
}

module attributes {stable_mosaic.version = 11 : i64} {
  func.func @_gemm_fused_kernel(%arg0: i32, %arg1: memref<16x32xbf16, #tpu.memory_space<vmem>>, %arg2: memref<32x32xbf16, #tpu.memory_space<vmem>>, %arg3: memref<16x2xf32, #tpu.memory_space<vmem>>, %arg4: memref<16x32xf32, #tpu.memory_space<vmem>>) attributes {dimension_semantics = [#tpu.dimension_semantics<arbitrary>], iteration_bounds = array<i64: 1>, scalar_prefetch = 0 : i64, scratch_operands = 0 : i64, tpu.core_type = #tpu.core_type<tc>, window_params = [{pipeline_mode = #tpu.pipeline_mode<synchronous>, transform_indices = @transform_0, window_bounds = array<i64: 16, 32>}, {pipeline_mode = #tpu.pipeline_mode<synchronous>, transform_indices = @transform_1, window_bounds = array<i64: 32, 32>}, {pipeline_mode = #tpu.pipeline_mode<synchronous>, transform_indices = @transform_2, window_bounds = array<i64: 16, 2>}, {pipeline_mode = #tpu.pipeline_mode<synchronous>, transform_indices = @transform_3, window_bounds = array<i64: 16, 32>}]} {
    %c0 = arith.constant 0 : index
    %c0_0 = arith.constant 0 : index
    %0 = vector.load %arg1[%c0, %c0_0] : memref<16x32xbf16, #tpu.memory_space<vmem>>, vector<16x32xbf16>
    %c0_1 = arith.constant 0 : index
    %c0_2 = arith.constant 0 : index
    %1 = vector.load %arg2[%c0_1, %c0_2] : memref<32x32xbf16, #tpu.memory_space<vmem>>, vector<32x32xbf16>
    %cst = arith.constant dense<0.000000e+00> : vector<16x32xf32>
    %2 = tpu.matmul %0, %1, %cst {dimension_numbers = #tpu.dot_dimension_numbers<[1], [0], [0], [1], [0, 0, 1, 1], [], []>} : vector<16x32xbf16>, vector<32x32xbf16>, vector<16x32xf32> -> vector<16x32xf32>
    %cst_3 = arith.constant dense<0.000000e+00> : vector<16xf32>
    %3 = vector.multi_reduction <add>, %2, %cst_3 [1] : vector<16x32xf32> to vector<16xf32>
    %4 = vector.shape_cast %3 : vector<16xf32> to vector<16x1xf32>
    %cst_4 = arith.constant 3.200000e+01 : f32
    %5 = vector.broadcast %cst_4 : f32 to vector<16x1xf32>
    %6 = arith.divf %4, %5 : vector<16x1xf32>
    %7 = vector.broadcast %6 : vector<16x1xf32> to vector<16x32xf32>
    %8 = arith.subf %2, %7 : vector<16x32xf32>
    %9 = arith.mulf %8, %8 : vector<16x32xf32>
    %cst_5 = arith.constant dense<0.000000e+00> : vector<16xf32>
    %10 = vector.multi_reduction <add>, %9, %cst_5 [1] : vector<16x32xf32> to vector<16xf32>
    %11 = vector.shape_cast %10 : vector<16xf32> to vector<16x1xf32>
    %cst_6 = arith.constant 3.200000e+01 : f32
    %12 = vector.broadcast %cst_6 : f32 to vector<16x1xf32>
    %13 = arith.divf %11, %12 : vector<16x1xf32>
    %cst_7 = arith.constant 9.99999974E-6 : f32
    %14 = vector.broadcast %cst_7 : f32 to vector<16x1xf32>
    %15 = arith.addf %13, %14 : vector<16x1xf32>
    %16 = math.rsqrt %15 : vector<16x1xf32>
    %17 = vector.broadcast %16 : vector<16x1xf32> to vector<16x32xf32>
    %18 = arith.mulf %8, %17 : vector<16x32xf32>
    %c0_8 = arith.constant 0 : index
    %c0_9 = arith.constant 0 : index
    %19 = vector.load %arg3[%c0_8, %c0_9] : memref<16x2xf32, #tpu.memory_space<vmem>>, vector<16x1xf32>
    %20 = vector.broadcast %19 : vector<16x1xf32> to vector<16x32xf32>
    %21 = arith.mulf %18, %20 : vector<16x32xf32>
    %c0_10 = arith.constant 0 : index
    %c1 = arith.constant 1 : index
    %22 = vector.load %arg3[%c0_10, %c1] : memref<16x2xf32, #tpu.memory_space<vmem>>, vector<16x1xf32>
    %23 = vector.broadcast %22 : vector<16x1xf32> to vector<16x32xf32>
    %24 = arith.addf %21, %23 : vector<16x32xf32>
    %cst_11 = arith.constant 0.000000e+00 : f32
    %25 = vector.broadcast %cst_11 : f32 to vector<16x32xf32>
    %26 = arith.maximumf %24, %25 : vector<16x32xf32>
    %c0_12 = arith.constant 0 : index
    %c0_13 = arith.constant 0 : index
    %27 = vector.load %arg4[%c0_12, %c0_13] : memref<16x32xf32, #tpu.memory_space<vmem>>, vector<16x32xf32>
    tpu.vector_store %arg4[%c0_12, %c0_13], %26 {strides = array<i32>} : memref<16x32xf32, #tpu.memory_space<vmem>>, vector<16x32xf32>,
    return
  }
  func.func @transform_0(%arg0: i32) -> (i32, i32) {
    %c0_i32 = arith.constant 0 : i32
    %c0_i32_0 = arith.constant 0 : i32
    %c0_i32_1 = arith.constant 0 : i32
    return %c0_i32, %c0_i32_0 : i32, i32
  }
  func.func @transform_1(%arg0: i32) -> (i32, i32) {
    %c0_i32 = arith.constant 0 : i32
    %c0_i32_0 = arith.constant 0 : i32
    %c0_i32_1 = arith.constant 0 : i32
    return %c0_i32, %c0_i32_0 : i32, i32
  }
  func.func @transform_2(%arg0: i32) -> (i32, i32) {
    %c0_i32 = arith.constant 0 : i32
    %c0_i32_0 = arith.constant 0 : i32
    %c0_i32_1 = arith.constant 0 : i32
    return %c0_i32, %c0_i32_0 : i32, i32
  }
  func.func @transform_3(%arg0: i32) -> (i32, i32) {
    %c0_i32 = arith.constant 0 : i32
    %c0_i32_0 = arith.constant 0 : i32
    %c0_i32_1 = arith.constant 0 : i32
    return %c0_i32, %c0_i32_0 : i32, i32
  }
}

module attributes {stable_mosaic.version = 11 : i64} {
  func.func @_gemm_kernel(%arg0: i32, %arg1: memref<32x16xbf16, #tpu.memory_space<vmem>>, %arg2: memref<16x32xbf16, #tpu.memory_space<vmem>>, %arg3: memref<32x32xf32, #tpu.memory_space<vmem>>) attributes {dimension_semantics = [#tpu.dimension_semantics<arbitrary>], iteration_bounds = array<i64: 1>, scalar_prefetch = 0 : i64, scratch_operands = 0 : i64, tpu.core_type = #tpu.core_type<tc>, window_params = [{pipeline_mode = #tpu.pipeline_mode<synchronous>, transform_indices = @transform_0, window_bounds = array<i64: 32, 16>}, {pipeline_mode = #tpu.pipeline_mode<synchronous>, transform_indices = @transform_1, window_bounds = array<i64: 16, 32>}, {pipeline_mode = #tpu.pipeline_mode<synchronous>, transform_indices = @transform_2, window_bounds = array<i64: 32, 32>}]} {
    %c0 = arith.constant 0 : index
    %c0_0 = arith.constant 0 : index
    %0 = vector.load %arg1[%c0, %c0_0] : memref<32x16xbf16, #tpu.memory_space<vmem>>, vector<32x16xbf16>
    %c0_1 = arith.constant 0 : index
    %c0_2 = arith.constant 0 : index
    %1 = vector.load %arg2[%c0_1, %c0_2] : memref<16x32xbf16, #tpu.memory_space<vmem>>, vector<16x32xbf16>
    %cst = arith.constant dense<0.000000e+00> : vector<32x32xf32>
    %2 = tpu.matmul %0, %1, %cst {dimension_numbers = #tpu.dot_dimension_numbers<[1], [0], [0], [1], [0, 0, 1, 1], [], []>} : vector<32x16xbf16>, vector<16x32xbf16>, vector<32x32xf32> -> vector<32x32xf32>
    %c0_3 = arith.constant 0 : index
    %c0_4 = arith.constant 0 : index
    %3 = vector.load %arg3[%c0_3, %c0_4] : memref<32x32xf32, #tpu.memory_space<vmem>>, vector<32x32xf32>
    tpu.vector_store %arg3[%c0_3, %c0_4], %2 {strides = array<i32>} : memref<32x32xf32, #tpu.memory_space<vmem>>, vector<32x32xf32>,
    return
  }
  func.func @transform_0(%arg0: i32) -> (i32, i32) {
    %c0_i32 = arith.constant 0 : i32
    %c0_i32_0 = arith.constant 0 : i32
    %c0_i32_1 = arith.constant 0 : i32
    return %c0_i32, %c0_i32_0 : i32, i32
  }
  func.func @transform_1(%arg0: i32) -> (i32, i32) {
    %c0_i32 = arith.constant 0 : i32
    %c0_i32_0 = arith.constant 0 : i32
    %c0_i32_1 = arith.constant 0 : i32
    return %c0_i32, %c0_i32_0 : i32, i32
  }
  func.func @transform_2(%arg0: i32) -> (i32, i32) {
    %c0_i32 = arith.constant 0 : i32
    %c0_i32_0 = arith.constant 0 : i32
    %c0_i32_1 = arith.constant 0 : i32
    return %c0_i32, %c0_i32_0 : i32, i32
  }
}

module attributes {stable_mosaic.version = 11 : i64} {
  func.func @_gemm_kernel(%arg0: i32, %arg1: memref<16x16xbf16, #tpu.memory_space<vmem>>, %arg2: memref<16x32xbf16, #tpu.memory_space<vmem>>, %arg3: memref<16x32xf32, #tpu.memory_space<vmem>>) attributes {dimension_semantics = [#tpu.dimension_semantics<arbitrary>], iteration_bounds = array<i64: 1>, scalar_prefetch = 0 : i64, scratch_operands = 0 : i64, tpu.core_type = #tpu.core_type<tc>, window_params = [{pipeline_mode = #tpu.pipeline_mode<synchronous>, transform_indices = @transform_0, window_bounds = array<i64: 16, 16>}, {pipeline_mode = #tpu.pipeline_mode<synchronous>, transform_indices = @transform_1, window_bounds = array<i64: 16, 32>}, {pipeline_mode = #tpu.pipeline_mode<synchronous>, transform_indices = @transform_2, window_bounds = array<i64: 16, 32>}]} {
    %c0 = arith.constant 0 : index
    %c0_0 = arith.constant 0 : index
    %0 = vector.load %arg1[%c0, %c0_0] : memref<16x16xbf16, #tpu.memory_space<vmem>>, vector<16x16xbf16>
    %c0_1 = arith.constant 0 : index
    %c0_2 = arith.constant 0 : index
    %1 = vector.load %arg2[%c0_1, %c0_2] : memref<16x32xbf16, #tpu.memory_space<vmem>>, vector<16x32xbf16>
    %cst = arith.constant dense<0.000000e+00> : vector<16x32xf32>
    %2 = tpu.matmul %0, %1, %cst {dimension_numbers = #tpu.dot_dimension_numbers<[1], [0], [0], [1], [0, 0, 1, 1], [], []>} : vector<16x16xbf16>, vector<16x32xbf16>, vector<16x32xf32> -> vector<16x32xf32>
    %c0_3 = arith.constant 0 : index
    %c0_4 = arith.constant 0 : index
    %3 = vector.load %arg3[%c0_3, %c0_4] : memref<16x32xf32, #tpu.memory_space<vmem>>, vector<16x32xf32>
    tpu.vector_store %arg3[%c0_3, %c0_4], %2 {strides = array<i32>} : memref<16x32xf32, #tpu.memory_space<vmem>>, vector<16x32xf32>,
    return
  }
  func.func @transform_0(%arg0: i32) -> (i32, i32) {
    %c0_i32 = arith.constant 0 : i32
    %c0_i32_0 = arith.constant 0 : i32
    %c0_i32_1 = arith.constant 0 : i32
    return %c0_i32, %c0_i32_0 : i32, i32
  }
  func.func @transform_1(%arg0: i32) -> (i32, i32) {
    %c0_i32 = arith.constant 0 : i32
    %c0_i32_0 = arith.constant 0 : i32
    %c0_i32_1 = arith.constant 0 : i32
    return %c0_i32, %c0_i32_0 : i32, i32
  }
  func.func @transform_2(%arg0: i32) -> (i32, i32) {
    %c0_i32 = arith.constant 0 : i32
    %c0_i32_0 = arith.constant 0 : i32
    %c0_i32_1 = arith.constant 0 : i32
    return %c0_i32, %c0_i32_0 : i32, i32
  }
}

module attributes {stable_mosaic.version = 11 : i64} {
  func.func @_attn_kernel(%arg0: i32, %arg1: memref<4x16x8xbf16, #tpu.memory_space<vmem>>, %arg2: memref<4x16x8xbf16, #tpu.memory_space<vmem>>, %arg3: memref<4x16x8xbf16, #tpu.memory_space<vmem>>, %arg4: memref<4x16x8xf32, #tpu.memory_space<vmem>>) attributes {dimension_semantics = [#tpu.dimension_semantics<arbitrary>], iteration_bounds = array<i64: 1>, scalar_prefetch = 0 : i64, scratch_operands = 0 : i64, tpu.core_type = #tpu.core_type<tc>, window_params = [{pipeline_mode = #tpu.pipeline_mode<synchronous>, transform_indices = @transform_0, window_bounds = array<i64: 4, 16, 8>}, {pipeline_mode = #tpu.pipeline_mode<synchronous>, transform_indices = @transform_1, window_bounds = array<i64: 4, 16, 8>}, {pipeline_mode = #tpu.pipeline_mode<synchronous>, transform_indices = @transform_2, window_bounds = array<i64: 4, 16, 8>}, {pipeline_mode = #tpu.pipeline_mode<synchronous>, transform_indices = @transform_3, window_bounds = array<i64: 4, 16, 8>}]} {
    %c0 = arith.constant 0 : index
    %c0_0 = arith.constant 0 : index
    %c0_1 = arith.constant 0 : index
    %0 = vector.load %arg1[%c0, %c0_0, %c0_1] : memref<4x16x8xbf16, #tpu.memory_space<vmem>>, vector<4x16x8xbf16>
    %c0_2 = arith.constant 0 : index
    %c0_3 = arith.constant 0 : index
    %c0_4 = arith.constant 0 : index
    %1 = vector.load %arg2[%c0_2, %c0_3, %c0_4] : memref<4x16x8xbf16, #tpu.memory_space<vmem>>, vector<4x16x8xbf16>
    %c0_5 = arith.constant 0 : index
    %c0_6 = arith.constant 0 : index
    %c0_7 = arith.constant 0 : index
    %2 = vector.load %arg3[%c0_5, %c0_6, %c0_7] : memref<4x16x8xbf16, #tpu.memory_space<vmem>>, vector<4x16x8xbf16>
    "tpu.trace_start"() <{level = 10 : i32, message = "bqd,bkd->bqk"}> : () -> ()
    %cst = arith.constant dense<0.000000e+00> : vector<4x16x16xf32>
    %3 = tpu.matmul %0, %1, %cst {dimension_numbers = #tpu.dot_dimension_numbers<[2], [2], [1], [1], [0, 0, 0, 1, 1, 1], [0], [0]>} : vector<4x16x8xbf16>, vector<4x16x8xbf16>, vector<4x16x16xf32> -> vector<4x16x16xf32>
    "tpu.trace_stop"() : () -> ()
    %cst_8 = arith.constant 0.353553385 : f32
    %4 = vector.broadcast %cst_8 : f32 to vector<4x16x16xf32>
    %5 = arith.mulf %3, %4 : vector<4x16x16xf32>
    %cst_9 = arith.constant dense<0xFF800000> : vector<4x16xf32>
    %6 = vector.multi_reduction <maximumf>, %5, %cst_9 [2] : vector<4x16x16xf32> to vector<4x16xf32>
    %7 = vector.shape_cast %6 : vector<4x16xf32> to vector<4x16x1xf32>
    %8 = vector.broadcast %7 : vector<4x16x1xf32> to vector<4x16x16xf32>
    %9 = arith.subf %5, %8 : vector<4x16x16xf32>
    %10 = math.exp %9 : vector<4x16x16xf32>
    %cst_10 = arith.constant dense<0.000000e+00> : vector<4x16xf32>
    %11 = vector.multi_reduction <add>, %10, %cst_10 [2] : vector<4x16x16xf32> to vector<4x16xf32>
    %12 = vector.shape_cast %11 : vector<4x16xf32> to vector<4x16x1xf32>
    %13 = tpu.reciprocal %12 {approx = true} : vector<4x16x1xf32> -> vector<4x16x1xf32>
    %14 = vector.broadcast %13 : vector<4x16x1xf32> to vector<4x16x16xf32>
    %15 = arith.mulf %10, %14 : vector<4x16x16xf32>
    %16 = arith.truncf %15 : vector<4x16x16xf32> to vector<4x16x16xbf16>
    "tpu.trace_start"() <{level = 10 : i32, message = "bqk,bkd->bqd"}> : () -> ()
    %cst_11 = arith.constant dense<0.000000e+00> : vector<4x16x8xf32>
    %17 = tpu.matmul %16, %2, %cst_11 {dimension_numbers = #tpu.dot_dimension_numbers<[2], [1], [1], [2], [0, 0, 0, 1, 1, 2], [0], [0]>} : vector<4x16x16xbf16>, vector<4x16x8xbf16>, vector<4x16x8xf32> -> vector<4x16x8xf32>
    "tpu.trace_stop"() : () -> ()
    %c0_12 = arith.constant 0 : index
    %c0_13 = arith.constant 0 : index
    %c0_14 = arith.constant 0 : index
    %18 = vector.load %arg4[%c0_12, %c0_13, %c0_14] : memref<4x16x8xf32, #tpu.memory_space<vmem>>, vector<4x16x8xf32>
    tpu.vector_store %arg4[%c0_12, %c0_13, %c0_14], %17 {strides = array<i32>} : memref<4x16x8xf32, #tpu.memory_space<vmem>>, vector<4x16x8xf32>,
    return
  }
  func.func @transform_0(%arg0: i32) -> (i32, i32, i32) {
    %c0_i32 = arith.constant 0 : i32
    %c0_i32_0 = arith.constant 0 : i32
    %c0_i32_1 = arith.constant 0 : i32
    %c0_i32_2 = arith.constant 0 : i32
    return %c0_i32, %c0_i32_0, %c0_i32_1 : i32, i32, i32
  }
  func.func @transform_1(%arg0: i32) -> (i32, i32, i32) {
    %c0_i32 = arith.constant 0 : i32
    %c0_i32_0 = arith.constant 0 : i32
    %c0_i32_1 = arith.constant 0 : i32
    %c0_i32_2 = arith.constant 0 : i32
    return %c0_i32, %c0_i32_0, %c0_i32_1 : i32, i32, i32
  }
  func.func @transform_2(%arg0: i32) -> (i32, i32, i32) {
    %c0_i32 = arith.constant 0 : i32
    %c0_i32_0 = arith.constant 0 : i32
    %c0_i32_1 = arith.constant 0 : i32
    %c0_i32_2 = arith.constant 0 : i32
    return %c0_i32, %c0_i32_0, %c0_i32_1 : i32, i32, i32
  }
  func.func @transform_3(%arg0: i32) -> (i32, i32, i32) {
    %c0_i32 = arith.constant 0 : i32
    %c0_i32_0 = arith.constant 0 : i32
    %c0_i32_1 = arith.constant 0 : i32
    %c0_i32_2 = arith.constant 0 : i32
    return %c0_i32, %c0_i32_0, %c0_i32_1 : i32, i32, i32
  }
}

module attributes {stable_mosaic.version = 11 : i64} {
  func.func @_gemm_fused_kernel(%arg0: i32, %arg1: memref<16x16xbf16, #tpu.memory_space<vmem>>, %arg2: memref<16x32xbf16, #tpu.memory_space<vmem>>, %arg3: memref<16x2xf32, #tpu.memory_space<vmem>>, %arg4: memref<16x32xf32, #tpu.memory_space<vmem>>) attributes {dimension_semantics = [#tpu.dimension_semantics<arbitrary>], iteration_bounds = array<i64: 1>, scalar_prefetch = 0 : i64, scratch_operands = 0 : i64, tpu.core_type = #tpu.core_type<tc>, window_params = [{pipeline_mode = #tpu.pipeline_mode<synchronous>, transform_indices = @transform_0, window_bounds = array<i64: 16, 16>}, {pipeline_mode = #tpu.pipeline_mode<synchronous>, transform_indices = @transform_1, window_bounds = array<i64: 16, 32>}, {pipeline_mode = #tpu.pipeline_mode<synchronous>, transform_indices = @transform_2, window_bounds = array<i64: 16, 2>}, {pipeline_mode = #tpu.pipeline_mode<synchronous>, transform_indices = @transform_3, window_bounds = array<i64: 16, 32>}]} {
    %c0 = arith.constant 0 : index
    %c0_0 = arith.constant 0 : index
    %0 = vector.load %arg1[%c0, %c0_0] : memref<16x16xbf16, #tpu.memory_space<vmem>>, vector<16x16xbf16>
    %c0_1 = arith.constant 0 : index
    %c0_2 = arith.constant 0 : index
    %1 = vector.load %arg2[%c0_1, %c0_2] : memref<16x32xbf16, #tpu.memory_space<vmem>>, vector<16x32xbf16>
    %cst = arith.constant dense<0.000000e+00> : vector<16x32xf32>
    %2 = tpu.matmul %0, %1, %cst {dimension_numbers = #tpu.dot_dimension_numbers<[1], [0], [0], [1], [0, 0, 1, 1], [], []>} : vector<16x16xbf16>, vector<16x32xbf16>, vector<16x32xf32> -> vector<16x32xf32>
    %cst_3 = arith.constant dense<0.000000e+00> : vector<16xf32>
    %3 = vector.multi_reduction <add>, %2, %cst_3 [1] : vector<16x32xf32> to vector<16xf32>
    %4 = vector.shape_cast %3 : vector<16xf32> to vector<16x1xf32>
    %cst_4 = arith.constant 3.200000e+01 : f32
    %5 = vector.broadcast %cst_4 : f32 to vector<16x1xf32>
    %6 = arith.divf %4, %5 : vector<16x1xf32>
    %7 = vector.broadcast %6 : vector<16x1xf32> to vector<16x32xf32>
    %8 = arith.subf %2, %7 : vector<16x32xf32>
    %9 = arith.mulf %8, %8 : vector<16x32xf32>
    %cst_5 = arith.constant dense<0.000000e+00> : vector<16xf32>
    %10 = vector.multi_reduction <add>, %9, %cst_5 [1] : vector<16x32xf32> to vector<16xf32>
    %11 = vector.shape_cast %10 : vector<16xf32> to vector<16x1xf32>
    %cst_6 = arith.constant 3.200000e+01 : f32
    %12 = vector.broadcast %cst_6 : f32 to vector<16x1xf32>
    %13 = arith.divf %11, %12 : vector<16x1xf32>
    %cst_7 = arith.constant 9.99999974E-6 : f32
    %14 = vector.broadcast %cst_7 : f32 to vector<16x1xf32>
    %15 = arith.addf %13, %14 : vector<16x1xf32>
    %16 = math.rsqrt %15 : vector<16x1xf32>
    %17 = vector.broadcast %16 : vector<16x1xf32> to vector<16x32xf32>
    %18 = arith.mulf %8, %17 : vector<16x32xf32>
    %c0_8 = arith.constant 0 : index
    %c0_9 = arith.constant 0 : index
    %19 = vector.load %arg3[%c0_8, %c0_9] : memref<16x2xf32, #tpu.memory_space<vmem>>, vector<16x1xf32>
    %20 = vector.broadcast %19 : vector<16x1xf32> to vector<16x32xf32>
    %21 = arith.mulf %18, %20 : vector<16x32xf32>
    %c0_10 = arith.constant 0 : index
    %c1 = arith.constant 1 : index
    %22 = vector.load %arg3[%c0_10, %c1] : memref<16x2xf32, #tpu.memory_space<vmem>>, vector<16x1xf32>
    %23 = vector.broadcast %22 : vector<16x1xf32> to vector<16x32xf32>
    %24 = arith.addf %21, %23 : vector<16x32xf32>
    %cst_11 = arith.constant 0.000000e+00 : f32
    %25 = vector.broadcast %cst_11 : f32 to vector<16x32xf32>
    %26 = arith.maximumf %24, %25 : vector<16x32xf32>
    %c0_12 = arith.constant 0 : index
    %c0_13 = arith.constant 0 : index
    %27 = vector.load %arg4[%c0_12, %c0_13] : memref<16x32xf32, #tpu.memory_space<vmem>>, vector<16x32xf32>
    tpu.vector_store %arg4[%c0_12, %c0_13], %26 {strides = array<i32>} : memref<16x32xf32, #tpu.memory_space<vmem>>, vector<16x32xf32>,
    return
  }
  func.func @transform_0(%arg0: i32) -> (i32, i32) {
    %c0_i32 = arith.constant 0 : i32
    %c0_i32_0 = arith.constant 0 : i32
    %c0_i32_1 = arith.constant 0 : i32
    return %c0_i32, %c0_i32_0 : i32, i32
  }
  func.func @transform_1(%arg0: i32) -> (i32, i32) {
    %c0_i32 = arith.constant 0 : i32
    %c0_i32_0 = arith.constant 0 : i32
    %c0_i32_1 = arith.constant 0 : i32
    return %c0_i32, %c0_i32_0 : i32, i32
  }
  func.func @transform_2(%arg0: i32) -> (i32, i32) {
    %c0_i32 = arith.constant 0 : i32
    %c0_i32_0 = arith.constant 0 : i32
    %c0_i32_1 = arith.constant 0 : i32
    return %c0_i32, %c0_i32_0 : i32, i32
  }
  func.func @transform_3(%arg0: i32) -> (i32, i32) {
    %c0_i32 = arith.constant 0 : i32
    %c0_i32_0 = arith.constant 0 : i32
    %c0_i32_1 = arith.constant 0 : i32
    return %c0_i32, %c0_i32_0 : i32, i32
  }
}

module attributes {stable_mosaic.version = 11 : i64} {
  func.func @_gemm_fused_kernel(%arg0: i32, %arg1: memref<16x16xbf16, #tpu.memory_space<vmem>>, %arg2: memref<16x32xbf16, #tpu.memory_space<vmem>>, %arg3: memref<16x2xf32, #tpu.memory_space<vmem>>, %arg4: memref<16x32xf32, #tpu.memory_space<vmem>>) attributes {dimension_semantics = [#tpu.dimension_semantics<arbitrary>], iteration_bounds = array<i64: 1>, scalar_prefetch = 0 : i64, scratch_operands = 0 : i64, tpu.core_type = #tpu.core_type<tc>, window_params = [{pipeline_mode = #tpu.pipeline_mode<synchronous>, transform_indices = @transform_0, window_bounds = array<i64: 16, 16>}, {pipeline_mode = #tpu.pipeline_mode<synchronous>, transform_indices = @transform_1, window_bounds = array<i64: 16, 32>}, {pipeline_mode = #tpu.pipeline_mode<synchronous>, transform_indices = @transform_2, window_bounds = array<i64: 16, 2>}, {pipeline_mode = #tpu.pipeline_mode<synchronous>, transform_indices = @transform_3, window_bounds = array<i64: 16, 32>}]} {
    %c0 = arith.constant 0 : index
    %c0_0 = arith.constant 0 : index
    %0 = vector.load %arg1[%c0, %c0_0] : memref<16x16xbf16, #tpu.memory_space<vmem>>, vector<16x16xbf16>
    %c0_1 = arith.constant 0 : index
    %c0_2 = arith.constant 0 : index
    %1 = vector.load %arg2[%c0_1, %c0_2] : memref<16x32xbf16, #tpu.memory_space<vmem>>, vector<16x32xbf16>
    %cst = arith.constant dense<0.000000e+00> : vector<16x32xf32>
    %2 = tpu.matmul %0, %1, %cst {dimension_numbers = #tpu.dot_dimension_numbers<[1], [0], [0], [1], [0, 0, 1, 1], [], []>} : vector<16x16xbf16>, vector<16x32xbf16>, vector<16x32xf32> -> vector<16x32xf32>
    %cst_3 = arith.constant dense<0.000000e+00> : vector<16xf32>
    %3 = vector.multi_reduction <add>, %2, %cst_3 [1] : vector<16x32xf32> to vector<16xf32>
    %4 = vector.shape_cast %3 : vector<16xf32> to vector<16x1xf32>
    %cst_4 = arith.constant 3.200000e+01 : f32
    %5 = vector.broadcast %cst_4 : f32 to vector<16x1xf32>
    %6 = arith.divf %4, %5 : vector<16x1xf32>
    %7 = vector.broadcast %6 : vector<16x1xf32> to vector<16x32xf32>
    %8 = arith.subf %2, %7 : vector<16x32xf32>
    %9 = arith.mulf %8, %8 : vector<16x32xf32>
    %cst_5 = arith.constant dense<0.000000e+00> : vector<16xf32>
    %10 = vector.multi_reduction <add>, %9, %cst_5 [1] : vector<16x32xf32> to vector<16xf32>
    %11 = vector.shape_cast %10 : vector<16xf32> to vector<16x1xf32>
    %cst_6 = arith.constant 3.200000e+01 : f32
    %12 = vector.broadcast %cst_6 : f32 to vector<16x1xf32>
    %13 = arith.divf %11, %12 : vector<16x1xf32>
    %cst_7 = arith.constant 9.99999974E-6 : f32
    %14 = vector.broadcast %cst_7 : f32 to vector<16x1xf32>
    %15 = arith.addf %13, %14 : vector<16x1xf32>
    %16 = math.rsqrt %15 : vector<16x1xf32>
    %17 = vector.broadcast %16 : vector<16x1xf32> to vector<16x32xf32>
    %18 = arith.mulf %8, %17 : vector<16x32xf32>
    %c0_8 = arith.constant 0 : index
    %c0_9 = arith.constant 0 : index
    %19 = vector.load %arg3[%c0_8, %c0_9] : memref<16x2xf32, #tpu.memory_space<vmem>>, vector<16x1xf32>
    %20 = vector.broadcast %19 : vector<16x1xf32> to vector<16x32xf32>
    %21 = arith.mulf %18, %20 : vector<16x32xf32>
    %c0_10 = arith.constant 0 : index
    %c1 = arith.constant 1 : index
    %22 = vector.load %arg3[%c0_10, %c1] : memref<16x2xf32, #tpu.memory_space<vmem>>, vector<16x1xf32>
    %23 = vector.broadcast %22 : vector<16x1xf32> to vector<16x32xf32>
    %24 = arith.addf %21, %23 : vector<16x32xf32>
    %cst_11 = arith.constant 0.000000e+00 : f32
    %25 = vector.broadcast %cst_11 : f32 to vector<16x32xf32>
    %26 = arith.subf %25, %24 : vector<16x32xf32>
    %27 = math.exp %26 : vector<16x32xf32>
    %cst_12 = arith.constant 1.000000e+00 : f32
    %28 = vector.broadcast %cst_12 : f32 to vector<16x32xf32>
    %29 = arith.addf %28, %27 : vector<16x32xf32>
    %cst_13 = arith.constant 1.000000e+00 : f32
    %30 = vector.broadcast %cst_13 : f32 to vector<16x32xf32>
    %31 = arith.divf %30, %29 : vector<16x32xf32>
    %c0_14 = arith.constant 0 : index
    %c0_15 = arith.constant 0 : index
    %32 = vector.load %arg4[%c0_14, %c0_15] : memref<16x32xf32, #tpu.memory_space<vmem>>, vector<16x32xf32>
    tpu.vector_store %arg4[%c0_14, %c0_15], %31 {strides = array<i32>} : memref<16x32xf32, #tpu.memory_space<vmem>>, vector<16x32xf32>,
    return
  }
  func.func @transform_0(%arg0: i32) -> (i32, i32) {
    %c0_i32 = arith.constant 0 : i32
    %c0_i32_0 = arith.constant 0 : i32
    %c0_i32_1 = arith.constant 0 : i32
    return %c0_i32, %c0_i32_0 : i32, i32
  }
  func.func @transform_1(%arg0: i32) -> (i32, i32) {
    %c0_i32 = arith.constant 0 : i32
    %c0_i32_0 = arith.constant 0 : i32
    %c0_i32_1 = arith.constant 0 : i32
    return %c0_i32, %c0_i32_0 : i32, i32
  }
  func.func @transform_2(%arg0: i32) -> (i32, i32) {
    %c0_i32 = arith.constant 0 : i32
    %c0_i32_0 = arith.constant 0 : i32
    %c0_i32_1 = arith.constant 0 : i32
    return %c0_i32, %c0_i32_0 : i32, i32
  }
  func.func @transform_3(%arg0: i32) -> (i32, i32) {
    %c0_i32 = arith.constant 0 : i32
    %c0_i32_0 = arith.constant 0 : i32
    %c0_i32_1 = arith.constant 0 : i32
    return %c0_i32, %c0_i32_0 : i32, i32
  }
}

module attributes {stable_mosaic.version = 11 : i64} {
  func.func @_gemm_kernel(%arg0: i32, %arg1: memref<64x16xbf16, #tpu.memory_space<vmem>>, %arg2: memref<16x32xbf16, #tpu.memory_space<vmem>>, %arg3: memref<64x32xf32, #tpu.memory_space<vmem>>) attributes {dimension_semantics = [#tpu.dimension_semantics<arbitrary>], iteration_bounds = array<i64: 1>, scalar_prefetch = 0 : i64, scratch_operands = 0 : i64, tpu.core_type = #tpu.core_type<tc>, window_params = [{pipeline_mode = #tpu.pipeline_mode<synchronous>, transform_indices = @transform_0, window_bounds = array<i64: 64, 16>}, {pipeline_mode = #tpu.pipeline_mode<synchronous>, transform_indices = @transform_1, window_bounds = array<i64: 16, 32>}, {pipeline_mode = #tpu.pipeline_mode<synchronous>, transform_indices = @transform_2, window_bounds = array<i64: 64, 32>}]} {
    %c0 = arith.constant 0 : index
    %c0_0 = arith.constant 0 : index
    %0 = vector.load %arg1[%c0, %c0_0] : memref<64x16xbf16, #tpu.memory_space<vmem>>, vector<64x16xbf16>
    %c0_1 = arith.constant 0 : index
    %c0_2 = arith.constant 0 : index
    %1 = vector.load %arg2[%c0_1, %c0_2] : memref<16x32xbf16, #tpu.memory_space<vmem>>, vector<16x32xbf16>
    %cst = arith.constant dense<0.000000e+00> : vector<64x32xf32>
    %2 = tpu.matmul %0, %1, %cst {dimension_numbers = #tpu.dot_dimension_numbers<[1], [0], [0], [1], [0, 0, 1, 1], [], []>} : vector<64x16xbf16>, vector<16x32xbf16>, vector<64x32xf32> -> vector<64x32xf32>
    %c0_3 = arith.constant 0 : index
    %c0_4 = arith.constant 0 : index
    %3 = vector.load %arg3[%c0_3, %c0_4] : memref<64x32xf32, #tpu.memory_space<vmem>>, vector<64x32xf32>
    tpu.vector_store %arg3[%c0_3, %c0_4], %2 {strides = array<i32>} : memref<64x32xf32, #tpu.memory_space<vmem>>, vector<64x32xf32>,
    return
  }
  func.func @transform_0(%arg0: i32) -> (i32, i32) {
    %c0_i32 = arith.constant 0 : i32
    %c0_i32_0 = arith.constant 0 : i32
    %c0_i32_1 = arith.constant 0 : i32
    return %c0_i32, %c0_i32_0 : i32, i32
  }
  func.func @transform_1(%arg0: i32) -> (i32, i32) {
    %c0_i32 = arith.constant 0 : i32
    %c0_i32_0 = arith.constant 0 : i32
    %c0_i32_1 = arith.constant 0 : i32
    return %c0_i32, %c0_i32_0 : i32, i32
  }
  func.func @transform_2(%arg0: i32) -> (i32, i32) {
    %c0_i32 = arith.constant 0 : i32
    %c0_i32_0 = arith.constant 0 : i32
    %c0_i32_1 = arith.constant 0 : i32
    return %c0_i32, %c0_i32_0 : i32, i32
  }
}

module attributes {stable_mosaic.version = 11 : i64} {
  func.func @_gemm_kernel(%arg0: i32, %arg1: memref<64x32xbf16, #tpu.memory_space<vmem>>, %arg2: memref<32x32xbf16, #tpu.memory_space<vmem>>, %arg3: memref<64x32xf32, #tpu.memory_space<vmem>>) attributes {dimension_semantics = [#tpu.dimension_semantics<arbitrary>], iteration_bounds = array<i64: 1>, scalar_prefetch = 0 : i64, scratch_operands = 0 : i64, tpu.core_type = #tpu.core_type<tc>, window_params = [{pipeline_mode = #tpu.pipeline_mode<synchronous>, transform_indices = @transform_0, window_bounds = array<i64: 64, 32>}, {pipeline_mode = #tpu.pipeline_mode<synchronous>, transform_indices = @transform_1, window_bounds = array<i64: 32, 32>}, {pipeline_mode = #tpu.pipeline_mode<synchronous>, transform_indices = @transform_2, window_bounds = array<i64: 64, 32>}]} {
    %c0 = arith.constant 0 : index
    %c0_0 = arith.constant 0 : index
    %0 = vector.load %arg1[%c0, %c0_0] : memref<64x32xbf16, #tpu.memory_space<vmem>>, vector<64x32xbf16>
    %c0_1 = arith.constant 0 : index
    %c0_2 = arith.constant 0 : index
    %1 = vector.load %arg2[%c0_1, %c0_2] : memref<32x32xbf16, #tpu.memory_space<vmem>>, vector<32x32xbf16>
    %cst = arith.constant dense<0.000000e+00> : vector<64x32xf32>
    %2 = tpu.matmul %0, %1, %cst {dimension_numbers = #tpu.dot_dimension_numbers<[1], [0], [0], [1], [0, 0, 1, 1], [], []>} : vector<64x32xbf16>, vector<32x32xbf16>, vector<64x32xf32> -> vector<64x32xf32>
    %c0_3 = arith.constant 0 : index
    %c0_4 = arith.constant 0 : index
    %3 = vector.load %arg3[%c0_3, %c0_4] : memref<64x32xf32, #tpu.memory_space<vmem>>, vector<64x32xf32>
    tpu.vector_store %arg3[%c0_3, %c0_4], %2 {strides = array<i32>} : memref<64x32xf32, #tpu.memory_space<vmem>>, vector<64x32xf32>,
    return
  }
  func.func @transform_0(%arg0: i32) -> (i32, i32) {
    %c0_i32 = arith.constant 0 : i32
    %c0_i32_0 = arith.constant 0 : i32
    %c0_i32_1 = arith.constant 0 : i32
    return %c0_i32, %c0_i32_0 : i32, i32
  }
  func.func @transform_1(%arg0: i32) -> (i32, i32) {
    %c0_i32 = arith.constant 0 : i32
    %c0_i32_0 = arith.constant 0 : i32
    %c0_i32_1 = arith.constant 0 : i32
    return %c0_i32, %c0_i32_0 : i32, i32
  }
  func.func @transform_2(%arg0: i32) -> (i32, i32) {
    %c0_i32 = arith.constant 0 : i32
    %c0_i32_0 = arith.constant 0 : i32
    %c0_i32_1 = arith.constant 0 : i32
    return %c0_i32, %c0_i32_0 : i32, i32
  }
}

module attributes {stable_mosaic.version = 11 : i64} {
  func.func @_gemm_fused_kernel(%arg0: i32, %arg1: memref<16x288xbf16, #tpu.memory_space<vmem>>, %arg2: memref<288x128xbf16, #tpu.memory_space<vmem>>, %arg3: memref<16x2xf32, #tpu.memory_space<vmem>>, %arg4: memref<16x128xf32, #tpu.memory_space<vmem>>) attributes {dimension_semantics = [#tpu.dimension_semantics<arbitrary>], iteration_bounds = array<i64: 1>, scalar_prefetch = 0 : i64, scratch_operands = 0 : i64, tpu.core_type = #tpu.core_type<tc>, window_params = [{pipeline_mode = #tpu.pipeline_mode<synchronous>, transform_indices = @transform_0, window_bounds = array<i64: 16, 288>}, {pipeline_mode = #tpu.pipeline_mode<synchronous>, transform_indices = @transform_1, window_bounds = array<i64: 288, 128>}, {pipeline_mode = #tpu.pipeline_mode<synchronous>, transform_indices = @transform_2, window_bounds = array<i64: 16, 2>}, {pipeline_mode = #tpu.pipeline_mode<synchronous>, transform_indices = @transform_3, window_bounds = array<i64: 16, 128>}]} {
    %c0 = arith.constant 0 : index
    %c0_0 = arith.constant 0 : index
    %0 = vector.load %arg1[%c0, %c0_0] : memref<16x288xbf16, #tpu.memory_space<vmem>>, vector<16x288xbf16>
    %c0_1 = arith.constant 0 : index
    %c0_2 = arith.constant 0 : index
    %1 = vector.load %arg2[%c0_1, %c0_2] : memref<288x128xbf16, #tpu.memory_space<vmem>>, vector<288x128xbf16>
    %cst = arith.constant dense<0.000000e+00> : vector<16x128xf32>
    %2 = tpu.matmul %0, %1, %cst {dimension_numbers = #tpu.dot_dimension_numbers<[1], [0], [0], [1], [0, 0, 1, 1], [], []>} : vector<16x288xbf16>, vector<288x128xbf16>, vector<16x128xf32> -> vector<16x128xf32>
    %cst_3 = arith.constant dense<0.000000e+00> : vector<16xf32>
    %3 = vector.multi_reduction <add>, %2, %cst_3 [1] : vector<16x128xf32> to vector<16xf32>
    %4 = vector.shape_cast %3 : vector<16xf32> to vector<16x1xf32>
    %cst_4 = arith.constant 1.280000e+02 : f32
    %5 = vector.broadcast %cst_4 : f32 to vector<16x1xf32>
    %6 = arith.divf %4, %5 : vector<16x1xf32>
    %7 = vector.broadcast %6 : vector<16x1xf32> to vector<16x128xf32>
    %8 = arith.subf %2, %7 : vector<16x128xf32>
    %9 = arith.mulf %8, %8 : vector<16x128xf32>
    %cst_5 = arith.constant dense<0.000000e+00> : vector<16xf32>
    %10 = vector.multi_reduction <add>, %9, %cst_5 [1] : vector<16x128xf32> to vector<16xf32>
    %11 = vector.shape_cast %10 : vector<16xf32> to vector<16x1xf32>
    %cst_6 = arith.constant 1.280000e+02 : f32
    %12 = vector.broadcast %cst_6 : f32 to vector<16x1xf32>
    %13 = arith.divf %11, %12 : vector<16x1xf32>
    %cst_7 = arith.constant 9.99999974E-6 : f32
    %14 = vector.broadcast %cst_7 : f32 to vector<16x1xf32>
    %15 = arith.addf %13, %14 : vector<16x1xf32>
    %16 = math.rsqrt %15 : vector<16x1xf32>
    %17 = vector.broadcast %16 : vector<16x1xf32> to vector<16x128xf32>
    %18 = arith.mulf %8, %17 : vector<16x128xf32>
    %c0_8 = arith.constant 0 : index
    %c0_9 = arith.constant 0 : index
    %19 = vector.load %arg3[%c0_8, %c0_9] : memref<16x2xf32, #tpu.memory_space<vmem>>, vector<16x1xf32>
    %20 = vector.broadcast %19 : vector<16x1xf32> to vector<16x128xf32>
    %21 = arith.mulf %18, %20 : vector<16x128xf32>
    %c0_10 = arith.constant 0 : index
    %c1 = arith.constant 1 : index
    %22 = vector.load %arg3[%c0_10, %c1] : memref<16x2xf32, #tpu.memory_space<vmem>>, vector<16x1xf32>
    %23 = vector.broadcast %22 : vector<16x1xf32> to vector<16x128xf32>
    %24 = arith.addf %21, %23 : vector<16x128xf32>
    %cst_11 = arith.constant 0.000000e+00 : f32
    %25 = vector.broadcast %cst_11 : f32 to vector<16x128xf32>
    %26 = arith.maximumf %24, %25 : vector<16x128xf32>
    %c0_12 = arith.constant 0 : index
    %c0_13 = arith.constant 0 : index
    %27 = vector.load %arg4[%c0_12, %c0_13] : memref<16x128xf32, #tpu.memory_space<vmem>>, vector<16x128xf32>
    tpu.vector_store %arg4[%c0_12, %c0_13], %26 {strides = array<i32>} : memref<16x128xf32, #tpu.memory_space<vmem>>, vector<16x128xf32>,
    return
  }
  func.func @transform_0(%arg0: i32) -> (i32, i32) {
    %c0_i32 = arith.constant 0 : i32
    %c0_i32_0 = arith.constant 0 : i32
    %c0_i32_1 = arith.constant 0 : i32
    return %c0_i32, %c0_i32_0 : i32, i32
  }
  func.func @transform_1(%arg0: i32) -> (i32, i32) {
    %c0_i32 = arith.constant 0 : i32
    %c0_i32_0 = arith.constant 0 : i32
    %c0_i32_1 = arith.constant 0 : i32
    return %c0_i32, %c0_i32_0 : i32, i32
  }
  func.func @transform_2(%arg0: i32) -> (i32, i32) {
    %c0_i32 = arith.constant 0 : i32
    %c0_i32_0 = arith.constant 0 : i32
    %c0_i32_1 = arith.constant 0 : i32
    return %c0_i32, %c0_i32_0 : i32, i32
  }
  func.func @transform_3(%arg0: i32) -> (i32, i32) {
    %c0_i32 = arith.constant 0 : i32
    %c0_i32_0 = arith.constant 0 : i32
    %c0_i32_1 = arith.constant 0 : i32
    return %c0_i32, %c0_i32_0 : i32, i32
  }
}

module attributes {stable_mosaic.version = 11 : i64} {
  func.func @_gemm_fused_kernel(%arg0: i32, %arg1: memref<8x16xbf16, #tpu.memory_space<vmem>>, %arg2: memref<16x128xbf16, #tpu.memory_space<vmem>>, %arg3: memref<8x2xf32, #tpu.memory_space<vmem>>, %arg4: memref<8x128xf32, #tpu.memory_space<vmem>>) attributes {dimension_semantics = [#tpu.dimension_semantics<arbitrary>], iteration_bounds = array<i64: 1>, scalar_prefetch = 0 : i64, scratch_operands = 0 : i64, tpu.core_type = #tpu.core_type<tc>, window_params = [{pipeline_mode = #tpu.pipeline_mode<synchronous>, transform_indices = @transform_0, window_bounds = array<i64: 8, 16>}, {pipeline_mode = #tpu.pipeline_mode<synchronous>, transform_indices = @transform_1, window_bounds = array<i64: 16, 128>}, {pipeline_mode = #tpu.pipeline_mode<synchronous>, transform_indices = @transform_2, window_bounds = array<i64: 8, 2>}, {pipeline_mode = #tpu.pipeline_mode<synchronous>, transform_indices = @transform_3, window_bounds = array<i64: 8, 128>}]} {
    %c0 = arith.constant 0 : index
    %c0_0 = arith.constant 0 : index
    %0 = vector.load %arg1[%c0, %c0_0] : memref<8x16xbf16, #tpu.memory_space<vmem>>, vector<8x16xbf16>
    %c0_1 = arith.constant 0 : index
    %c0_2 = arith.constant 0 : index
    %1 = vector.load %arg2[%c0_1, %c0_2] : memref<16x128xbf16, #tpu.memory_space<vmem>>, vector<16x128xbf16>
    %cst = arith.constant dense<0.000000e+00> : vector<8x128xf32>
    %2 = tpu.matmul %0, %1, %cst {dimension_numbers = #tpu.dot_dimension_numbers<[1], [0], [0], [1], [0, 0, 1, 1], [], []>} : vector<8x16xbf16>, vector<16x128xbf16>, vector<8x128xf32> -> vector<8x128xf32>
    %cst_3 = arith.constant dense<0.000000e+00> : vector<8xf32>
    %3 = vector.multi_reduction <add>, %2, %cst_3 [1] : vector<8x128xf32> to vector<8xf32>
    %4 = vector.shape_cast %3 : vector<8xf32> to vector<8x1xf32>
    %cst_4 = arith.constant 1.280000e+02 : f32
    %5 = vector.broadcast %cst_4 : f32 to vector<8x1xf32>
    %6 = arith.divf %4, %5 : vector<8x1xf32>
    %7 = vector.broadcast %6 : vector<8x1xf32> to vector<8x128xf32>
    %8 = arith.subf %2, %7 : vector<8x128xf32>
    %9 = arith.mulf %8, %8 : vector<8x128xf32>
    %cst_5 = arith.constant dense<0.000000e+00> : vector<8xf32>
    %10 = vector.multi_reduction <add>, %9, %cst_5 [1] : vector<8x128xf32> to vector<8xf32>
    %11 = vector.shape_cast %10 : vector<8xf32> to vector<8x1xf32>
    %cst_6 = arith.constant 1.280000e+02 : f32
    %12 = vector.broadcast %cst_6 : f32 to vector<8x1xf32>
    %13 = arith.divf %11, %12 : vector<8x1xf32>
    %cst_7 = arith.constant 9.99999974E-6 : f32
    %14 = vector.broadcast %cst_7 : f32 to vector<8x1xf32>
    %15 = arith.addf %13, %14 : vector<8x1xf32>
    %16 = math.rsqrt %15 : vector<8x1xf32>
    %17 = vector.broadcast %16 : vector<8x1xf32> to vector<8x128xf32>
    %18 = arith.mulf %8, %17 : vector<8x128xf32>
    %c0_8 = arith.constant 0 : index
    %c0_9 = arith.constant 0 : index
    %19 = vector.load %arg3[%c0_8, %c0_9] : memref<8x2xf32, #tpu.memory_space<vmem>>, vector<8x1xf32>
    %20 = vector.broadcast %19 : vector<8x1xf32> to vector<8x128xf32>
    %21 = arith.mulf %18, %20 : vector<8x128xf32>
    %c0_10 = arith.constant 0 : index
    %c1 = arith.constant 1 : index
    %22 = vector.load %arg3[%c0_10, %c1] : memref<8x2xf32, #tpu.memory_space<vmem>>, vector<8x1xf32>
    %23 = vector.broadcast %22 : vector<8x1xf32> to vector<8x128xf32>
    %24 = arith.addf %21, %23 : vector<8x128xf32>
    %cst_11 = arith.constant 0.000000e+00 : f32
    %25 = vector.broadcast %cst_11 : f32 to vector<8x128xf32>
    %26 = arith.maximumf %24, %25 : vector<8x128xf32>
    %c0_12 = arith.constant 0 : index
    %c0_13 = arith.constant 0 : index
    %27 = vector.load %arg4[%c0_12, %c0_13] : memref<8x128xf32, #tpu.memory_space<vmem>>, vector<8x128xf32>
    tpu.vector_store %arg4[%c0_12, %c0_13], %26 {strides = array<i32>} : memref<8x128xf32, #tpu.memory_space<vmem>>, vector<8x128xf32>,
    return
  }
  func.func @transform_0(%arg0: i32) -> (i32, i32) {
    %c0_i32 = arith.constant 0 : i32
    %c0_i32_0 = arith.constant 0 : i32
    %c0_i32_1 = arith.constant 0 : i32
    return %c0_i32, %c0_i32_0 : i32, i32
  }
  func.func @transform_1(%arg0: i32) -> (i32, i32) {
    %c0_i32 = arith.constant 0 : i32
    %c0_i32_0 = arith.constant 0 : i32
    %c0_i32_1 = arith.constant 0 : i32
    return %c0_i32, %c0_i32_0 : i32, i32
  }
  func.func @transform_2(%arg0: i32) -> (i32, i32) {
    %c0_i32 = arith.constant 0 : i32
    %c0_i32_0 = arith.constant 0 : i32
    %c0_i32_1 = arith.constant 0 : i32
    return %c0_i32, %c0_i32_0 : i32, i32
  }
  func.func @transform_3(%arg0: i32) -> (i32, i32) {
    %c0_i32 = arith.constant 0 : i32
    %c0_i32_0 = arith.constant 0 : i32
    %c0_i32_1 = arith.constant 0 : i32
    return %c0_i32, %c0_i32_0 : i32, i32
  }
}

module attributes {stable_mosaic.version = 11 : i64} {
  func.func @_gemm_kernel(%arg0: i32, %arg1: memref<16x8xbf16, #tpu.memory_space<vmem>>, %arg2: memref<8x128xbf16, #tpu.memory_space<vmem>>, %arg3: memref<16x128xf32, #tpu.memory_space<vmem>>) attributes {dimension_semantics = [#tpu.dimension_semantics<arbitrary>], iteration_bounds = array<i64: 1>, scalar_prefetch = 0 : i64, scratch_operands = 0 : i64, tpu.core_type = #tpu.core_type<tc>, window_params = [{pipeline_mode = #tpu.pipeline_mode<synchronous>, transform_indices = @transform_0, window_bounds = array<i64: 16, 8>}, {pipeline_mode = #tpu.pipeline_mode<synchronous>, transform_indices = @transform_1, window_bounds = array<i64: 8, 128>}, {pipeline_mode = #tpu.pipeline_mode<synchronous>, transform_indices = @transform_2, window_bounds = array<i64: 16, 128>}]} {
    %c0 = arith.constant 0 : index
    %c0_0 = arith.constant 0 : index
    %0 = vector.load %arg1[%c0, %c0_0] : memref<16x8xbf16, #tpu.memory_space<vmem>>, vector<16x8xbf16>
    %c0_1 = arith.constant 0 : index
    %c0_2 = arith.constant 0 : index
    %1 = vector.load %arg2[%c0_1, %c0_2] : memref<8x128xbf16, #tpu.memory_space<vmem>>, vector<8x128xbf16>
    %cst = arith.constant dense<0.000000e+00> : vector<16x128xf32>
    %2 = tpu.matmul %0, %1, %cst {dimension_numbers = #tpu.dot_dimension_numbers<[1], [0], [0], [1], [0, 0, 1, 1], [], []>} : vector<16x8xbf16>, vector<8x128xbf16>, vector<16x128xf32> -> vector<16x128xf32>
    %c0_3 = arith.constant 0 : index
    %c0_4 = arith.constant 0 : index
    %3 = vector.load %arg3[%c0_3, %c0_4] : memref<16x128xf32, #tpu.memory_space<vmem>>, vector<16x128xf32>
    tpu.vector_store %arg3[%c0_3, %c0_4], %2 {strides = array<i32>} : memref<16x128xf32, #tpu.memory_space<vmem>>, vector<16x128xf32>,
    return
  }
  func.func @transform_0(%arg0: i32) -> (i32, i32) {
    %c0_i32 = arith.constant 0 : i32
    %c0_i32_0 = arith.constant 0 : i32
    %c0_i32_1 = arith.constant 0 : i32
    return %c0_i32, %c0_i32_0 : i32, i32
  }
  func.func @transform_1(%arg0: i32) -> (i32, i32) {
    %c0_i32 = arith.constant 0 : i32
    %c0_i32_0 = arith.constant 0 : i32
    %c0_i32_1 = arith.constant 0 : i32
    return %c0_i32, %c0_i32_0 : i32, i32
  }
  func.func @transform_2(%arg0: i32) -> (i32, i32) {
    %c0_i32 = arith.constant 0 : i32
    %c0_i32_0 = arith.constant 0 : i32
    %c0_i32_1 = arith.constant 0 : i32
    return %c0_i32, %c0_i32_0 : i32, i32
  }
}

module attributes {stable_mosaic.version = 11 : i64} {
  func.func @_gemm_fused_kernel(%arg0: i32, %arg1: memref<8x8xbf16, #tpu.memory_space<vmem>>, %arg2: memref<8x128xbf16, #tpu.memory_space<vmem>>, %arg3: memref<8x2xf32, #tpu.memory_space<vmem>>, %arg4: memref<8x128xf32, #tpu.memory_space<vmem>>) attributes {dimension_semantics = [#tpu.dimension_semantics<arbitrary>], iteration_bounds = array<i64: 1>, scalar_prefetch = 0 : i64, scratch_operands = 0 : i64, tpu.core_type = #tpu.core_type<tc>, window_params = [{pipeline_mode = #tpu.pipeline_mode<synchronous>, transform_indices = @transform_0, window_bounds = array<i64: 8, 8>}, {pipeline_mode = #tpu.pipeline_mode<synchronous>, transform_indices = @transform_1, window_bounds = array<i64: 8, 128>}, {pipeline_mode = #tpu.pipeline_mode<synchronous>, transform_indices = @transform_2, window_bounds = array<i64: 8, 2>}, {pipeline_mode = #tpu.pipeline_mode<synchronous>, transform_indices = @transform_3, window_bounds = array<i64: 8, 128>}]} {
    %c0 = arith.constant 0 : index
    %c0_0 = arith.constant 0 : index
    %0 = vector.load %arg1[%c0, %c0_0] : memref<8x8xbf16, #tpu.memory_space<vmem>>, vector<8x8xbf16>
    %c0_1 = arith.constant 0 : index
    %c0_2 = arith.constant 0 : index
    %1 = vector.load %arg2[%c0_1, %c0_2] : memref<8x128xbf16, #tpu.memory_space<vmem>>, vector<8x128xbf16>
    %cst = arith.constant dense<0.000000e+00> : vector<8x128xf32>
    %2 = tpu.matmul %0, %1, %cst {dimension_numbers = #tpu.dot_dimension_numbers<[1], [0], [0], [1], [0, 0, 1, 1], [], []>} : vector<8x8xbf16>, vector<8x128xbf16>, vector<8x128xf32> -> vector<8x128xf32>
    %cst_3 = arith.constant dense<0.000000e+00> : vector<8xf32>
    %3 = vector.multi_reduction <add>, %2, %cst_3 [1] : vector<8x128xf32> to vector<8xf32>
    %4 = vector.shape_cast %3 : vector<8xf32> to vector<8x1xf32>
    %cst_4 = arith.constant 1.280000e+02 : f32
    %5 = vector.broadcast %cst_4 : f32 to vector<8x1xf32>
    %6 = arith.divf %4, %5 : vector<8x1xf32>
    %7 = vector.broadcast %6 : vector<8x1xf32> to vector<8x128xf32>
    %8 = arith.subf %2, %7 : vector<8x128xf32>
    %9 = arith.mulf %8, %8 : vector<8x128xf32>
    %cst_5 = arith.constant dense<0.000000e+00> : vector<8xf32>
    %10 = vector.multi_reduction <add>, %9, %cst_5 [1] : vector<8x128xf32> to vector<8xf32>
    %11 = vector.shape_cast %10 : vector<8xf32> to vector<8x1xf32>
    %cst_6 = arith.constant 1.280000e+02 : f32
    %12 = vector.broadcast %cst_6 : f32 to vector<8x1xf32>
    %13 = arith.divf %11, %12 : vector<8x1xf32>
    %cst_7 = arith.constant 9.99999974E-6 : f32
    %14 = vector.broadcast %cst_7 : f32 to vector<8x1xf32>
    %15 = arith.addf %13, %14 : vector<8x1xf32>
    %16 = math.rsqrt %15 : vector<8x1xf32>
    %17 = vector.broadcast %16 : vector<8x1xf32> to vector<8x128xf32>
    %18 = arith.mulf %8, %17 : vector<8x128xf32>
    %c0_8 = arith.constant 0 : index
    %c0_9 = arith.constant 0 : index
    %19 = vector.load %arg3[%c0_8, %c0_9] : memref<8x2xf32, #tpu.memory_space<vmem>>, vector<8x1xf32>
    %20 = vector.broadcast %19 : vector<8x1xf32> to vector<8x128xf32>
    %21 = arith.mulf %18, %20 : vector<8x128xf32>
    %c0_10 = arith.constant 0 : index
    %c1 = arith.constant 1 : index
    %22 = vector.load %arg3[%c0_10, %c1] : memref<8x2xf32, #tpu.memory_space<vmem>>, vector<8x1xf32>
    %23 = vector.broadcast %22 : vector<8x1xf32> to vector<8x128xf32>
    %24 = arith.addf %21, %23 : vector<8x128xf32>
    %cst_11 = arith.constant 0.000000e+00 : f32
    %25 = vector.broadcast %cst_11 : f32 to vector<8x128xf32>
    %26 = arith.maximumf %24, %25 : vector<8x128xf32>
    %c0_12 = arith.constant 0 : index
    %c0_13 = arith.constant 0 : index
    %27 = vector.load %arg4[%c0_12, %c0_13] : memref<8x128xf32, #tpu.memory_space<vmem>>, vector<8x128xf32>
    tpu.vector_store %arg4[%c0_12, %c0_13], %26 {strides = array<i32>} : memref<8x128xf32, #tpu.memory_space<vmem>>, vector<8x128xf32>,
    return
  }
  func.func @transform_0(%arg0: i32) -> (i32, i32) {
    %c0_i32 = arith.constant 0 : i32
    %c0_i32_0 = arith.constant 0 : i32
    %c0_i32_1 = arith.constant 0 : i32
    return %c0_i32, %c0_i32_0 : i32, i32
  }
  func.func @transform_1(%arg0: i32) -> (i32, i32) {
    %c0_i32 = arith.constant 0 : i32
    %c0_i32_0 = arith.constant 0 : i32
    %c0_i32_1 = arith.constant 0 : i32
    return %c0_i32, %c0_i32_0 : i32, i32
  }
  func.func @transform_2(%arg0: i32) -> (i32, i32) {
    %c0_i32 = arith.constant 0 : i32
    %c0_i32_0 = arith.constant 0 : i32
    %c0_i32_1 = arith.constant 0 : i32
    return %c0_i32, %c0_i32_0 : i32, i32
  }
  func.func @transform_3(%arg0: i32) -> (i32, i32) {
    %c0_i32 = arith.constant 0 : i32
    %c0_i32_0 = arith.constant 0 : i32
    %c0_i32_1 = arith.constant 0 : i32
    return %c0_i32, %c0_i32_0 : i32, i32
  }
}

module attributes {stable_mosaic.version = 11 : i64} {
  func.func @_gemm_kernel(%arg0: i32, %arg1: memref<8x8xbf16, #tpu.memory_space<vmem>>, %arg2: memref<8x128xbf16, #tpu.memory_space<vmem>>, %arg3: memref<8x128xf32, #tpu.memory_space<vmem>>) attributes {dimension_semantics = [#tpu.dimension_semantics<arbitrary>], iteration_bounds = array<i64: 1>, scalar_prefetch = 0 : i64, scratch_operands = 0 : i64, tpu.core_type = #tpu.core_type<tc>, window_params = [{pipeline_mode = #tpu.pipeline_mode<synchronous>, transform_indices = @transform_0, window_bounds = array<i64: 8, 8>}, {pipeline_mode = #tpu.pipeline_mode<synchronous>, transform_indices = @transform_1, window_bounds = array<i64: 8, 128>}, {pipeline_mode = #tpu.pipeline_mode<synchronous>, transform_indices = @transform_2, window_bounds = array<i64: 8, 128>}]} {
    %c0 = arith.constant 0 : index
    %c0_0 = arith.constant 0 : index
    %0 = vector.load %arg1[%c0, %c0_0] : memref<8x8xbf16, #tpu.memory_space<vmem>>, vector<8x8xbf16>
    %c0_1 = arith.constant 0 : index
    %c0_2 = arith.constant 0 : index
    %1 = vector.load %arg2[%c0_1, %c0_2] : memref<8x128xbf16, #tpu.memory_space<vmem>>, vector<8x128xbf16>
    %cst = arith.constant dense<0.000000e+00> : vector<8x128xf32>
    %2 = tpu.matmul %0, %1, %cst {dimension_numbers = #tpu.dot_dimension_numbers<[1], [0], [0], [1], [0, 0, 1, 1], [], []>} : vector<8x8xbf16>, vector<8x128xbf16>, vector<8x128xf32> -> vector<8x128xf32>
    %c0_3 = arith.constant 0 : index
    %c0_4 = arith.constant 0 : index
    %3 = vector.load %arg3[%c0_3, %c0_4] : memref<8x128xf32, #tpu.memory_space<vmem>>, vector<8x128xf32>
    tpu.vector_store %arg3[%c0_3, %c0_4], %2 {strides = array<i32>} : memref<8x128xf32, #tpu.memory_space<vmem>>, vector<8x128xf32>,
    return
  }
  func.func @transform_0(%arg0: i32) -> (i32, i32) {
    %c0_i32 = arith.constant 0 : i32
    %c0_i32_0 = arith.constant 0 : i32
    %c0_i32_1 = arith.constant 0 : i32
    return %c0_i32, %c0_i32_0 : i32, i32
  }
  func.func @transform_1(%arg0: i32) -> (i32, i32) {
    %c0_i32 = arith.constant 0 : i32
    %c0_i32_0 = arith.constant 0 : i32
    %c0_i32_1 = arith.constant 0 : i32
    return %c0_i32, %c0_i32_0 : i32, i32
  }
  func.func @transform_2(%arg0: i32) -> (i32, i32) {
    %c0_i32 = arith.constant 0 : i32
    %c0_i32_0 = arith.constant 0 : i32
    %c0_i32_1 = arith.constant 0 : i32
    return %c0_i32, %c0_i32_0 : i32, i32
  }
}

module attributes {stable_mosaic.version = 11 : i64} {
  func.func @_attn_kernel(%arg0: i32, %arg1: memref<4x64x4xbf16, #tpu.memory_space<vmem>>, %arg2: memref<4x64x4xbf16, #tpu.memory_space<vmem>>, %arg3: memref<4x64x4xbf16, #tpu.memory_space<vmem>>, %arg4: memref<4x64x4xf32, #tpu.memory_space<vmem>>) attributes {dimension_semantics = [#tpu.dimension_semantics<arbitrary>], iteration_bounds = array<i64: 1>, scalar_prefetch = 0 : i64, scratch_operands = 0 : i64, tpu.core_type = #tpu.core_type<tc>, window_params = [{pipeline_mode = #tpu.pipeline_mode<synchronous>, transform_indices = @transform_0, window_bounds = array<i64: 4, 64, 4>}, {pipeline_mode = #tpu.pipeline_mode<synchronous>, transform_indices = @transform_1, window_bounds = array<i64: 4, 64, 4>}, {pipeline_mode = #tpu.pipeline_mode<synchronous>, transform_indices = @transform_2, window_bounds = array<i64: 4, 64, 4>}, {pipeline_mode = #tpu.pipeline_mode<synchronous>, transform_indices = @transform_3, window_bounds = array<i64: 4, 64, 4>}]} {
    %c0 = arith.constant 0 : index
    %c0_0 = arith.constant 0 : index
    %c0_1 = arith.constant 0 : index
    %0 = vector.load %arg1[%c0, %c0_0, %c0_1] : memref<4x64x4xbf16, #tpu.memory_space<vmem>>, vector<4x64x4xbf16>
    %c0_2 = arith.constant 0 : index
    %c0_3 = arith.constant 0 : index
    %c0_4 = arith.constant 0 : index
    %1 = vector.load %arg2[%c0_2, %c0_3, %c0_4] : memref<4x64x4xbf16, #tpu.memory_space<vmem>>, vector<4x64x4xbf16>
    %c0_5 = arith.constant 0 : index
    %c0_6 = arith.constant 0 : index
    %c0_7 = arith.constant 0 : index
    %2 = vector.load %arg3[%c0_5, %c0_6, %c0_7] : memref<4x64x4xbf16, #tpu.memory_space<vmem>>, vector<4x64x4xbf16>
    "tpu.trace_start"() <{level = 10 : i32, message = "bqd,bkd->bqk"}> : () -> ()
    %cst = arith.constant dense<0.000000e+00> : vector<4x64x64xf32>
    %3 = tpu.matmul %0, %1, %cst {dimension_numbers = #tpu.dot_dimension_numbers<[2], [2], [1], [1], [0, 0, 0, 1, 1, 1], [0], [0]>} : vector<4x64x4xbf16>, vector<4x64x4xbf16>, vector<4x64x64xf32> -> vector<4x64x64xf32>
    "tpu.trace_stop"() : () -> ()
    %cst_8 = arith.constant 5.000000e-01 : f32
    %4 = vector.broadcast %cst_8 : f32 to vector<4x64x64xf32>
    %5 = arith.mulf %3, %4 : vector<4x64x64xf32>
    %cst_9 = arith.constant dense<0xFF800000> : vector<4x64xf32>
    %6 = vector.multi_reduction <maximumf>, %5, %cst_9 [2] : vector<4x64x64xf32> to vector<4x64xf32>
    %7 = vector.shape_cast %6 : vector<4x64xf32> to vector<4x64x1xf32>
    %8 = vector.broadcast %7 : vector<4x64x1xf32> to vector<4x64x64xf32>
    %9 = arith.subf %5, %8 : vector<4x64x64xf32>
    %10 = math.exp %9 : vector<4x64x64xf32>
    %cst_10 = arith.constant dense<0.000000e+00> : vector<4x64xf32>
    %11 = vector.multi_reduction <add>, %10, %cst_10 [2] : vector<4x64x64xf32> to vector<4x64xf32>
    %12 = vector.shape_cast %11 : vector<4x64xf32> to vector<4x64x1xf32>
    %13 = tpu.reciprocal %12 {approx = true} : vector<4x64x1xf32> -> vector<4x64x1xf32>
    %14 = vector.broadcast %13 : vector<4x64x1xf32> to vector<4x64x64xf32>
    %15 = arith.mulf %10, %14 : vector<4x64x64xf32>
    %16 = arith.truncf %15 : vector<4x64x64xf32> to vector<4x64x64xbf16>
    "tpu.trace_start"() <{level = 10 : i32, message = "bqk,bkd->bqd"}> : () -> ()
    %cst_11 = arith.constant dense<0.000000e+00> : vector<4x64x4xf32>
    %17 = tpu.matmul %16, %2, %cst_11 {dimension_numbers = #tpu.dot_dimension_numbers<[2], [1], [1], [2], [0, 0, 0, 1, 1, 2], [0], [0]>} : vector<4x64x64xbf16>, vector<4x64x4xbf16>, vector<4x64x4xf32> -> vector<4x64x4xf32>
    "tpu.trace_stop"() : () -> ()
    %c0_12 = arith.constant 0 : index
    %c0_13 = arith.constant 0 : index
    %c0_14 = arith.constant 0 : index
    %18 = vector.load %arg4[%c0_12, %c0_13, %c0_14] : memref<4x64x4xf32, #tpu.memory_space<vmem>>, vector<4x64x4xf32>
    tpu.vector_store %arg4[%c0_12, %c0_13, %c0_14], %17 {strides = array<i32>} : memref<4x64x4xf32, #tpu.memory_space<vmem>>, vector<4x64x4xf32>,
    return
  }
  func.func @transform_0(%arg0: i32) -> (i32, i32, i32) {
    %c0_i32 = arith.constant 0 : i32
    %c0_i32_0 = arith.constant 0 : i32
    %c0_i32_1 = arith.constant 0 : i32
    %c0_i32_2 = arith.constant 0 : i32
    return %c0_i32, %c0_i32_0, %c0_i32_1 : i32, i32, i32
  }
  func.func @transform_1(%arg0: i32) -> (i32, i32, i32) {
    %c0_i32 = arith.constant 0 : i32
    %c0_i32_0 = arith.constant 0 : i32
    %c0_i32_1 = arith.constant 0 : i32
    %c0_i32_2 = arith.constant 0 : i32
    return %c0_i32, %c0_i32_0, %c0_i32_1 : i32, i32, i32
  }
  func.func @transform_2(%arg0: i32) -> (i32, i32, i32) {
    %c0_i32 = arith.constant 0 : i32
    %c0_i32_0 = arith.constant 0 : i32
    %c0_i32_1 = arith.constant 0 : i32
    %c0_i32_2 = arith.constant 0 : i32
    return %c0_i32, %c0_i32_0, %c0_i32_1 : i32, i32, i32
  }
  func.func @transform_3(%arg0: i32) -> (i32, i32, i32) {
    %c0_i32 = arith.constant 0 : i32
    %c0_i32_0 = arith.constant 0 : i32
    %c0_i32_1 = arith.constant 0 : i32
    %c0_i32_2 = arith.constant 0 : i32
    return %c0_i32, %c0_i32_0, %c0_i32_1 : i32, i32, i32
  }
}

module attributes {stable_mosaic.version = 11 : i64} {
  func.func @_gemm_fused_kernel(%arg0: i32, %arg1: memref<8x8xbf16, #tpu.memory_space<vmem>>, %arg2: memref<8x128xbf16, #tpu.memory_space<vmem>>, %arg3: memref<8x2xf32, #tpu.memory_space<vmem>>, %arg4: memref<8x128xf32, #tpu.memory_space<vmem>>) attributes {dimension_semantics = [#tpu.dimension_semantics<arbitrary>], iteration_bounds = array<i64: 1>, scalar_prefetch = 0 : i64, scratch_operands = 0 : i64, tpu.core_type = #tpu.core_type<tc>, window_params = [{pipeline_mode = #tpu.pipeline_mode<synchronous>, transform_indices = @transform_0, window_bounds = array<i64: 8, 8>}, {pipeline_mode = #tpu.pipeline_mode<synchronous>, transform_indices = @transform_1, window_bounds = array<i64: 8, 128>}, {pipeline_mode = #tpu.pipeline_mode<synchronous>, transform_indices = @transform_2, window_bounds = array<i64: 8, 2>}, {pipeline_mode = #tpu.pipeline_mode<synchronous>, transform_indices = @transform_3, window_bounds = array<i64: 8, 128>}]} {
    %c0 = arith.constant 0 : index
    %c0_0 = arith.constant 0 : index
    %0 = vector.load %arg1[%c0, %c0_0] : memref<8x8xbf16, #tpu.memory_space<vmem>>, vector<8x8xbf16>
    %c0_1 = arith.constant 0 : index
    %c0_2 = arith.constant 0 : index
    %1 = vector.load %arg2[%c0_1, %c0_2] : memref<8x128xbf16, #tpu.memory_space<vmem>>, vector<8x128xbf16>
    %cst = arith.constant dense<0.000000e+00> : vector<8x128xf32>
    %2 = tpu.matmul %0, %1, %cst {dimension_numbers = #tpu.dot_dimension_numbers<[1], [0], [0], [1], [0, 0, 1, 1], [], []>} : vector<8x8xbf16>, vector<8x128xbf16>, vector<8x128xf32> -> vector<8x128xf32>
    %cst_3 = arith.constant dense<0.000000e+00> : vector<8xf32>
    %3 = vector.multi_reduction <add>, %2, %cst_3 [1] : vector<8x128xf32> to vector<8xf32>
    %4 = vector.shape_cast %3 : vector<8xf32> to vector<8x1xf32>
    %cst_4 = arith.constant 1.280000e+02 : f32
    %5 = vector.broadcast %cst_4 : f32 to vector<8x1xf32>
    %6 = arith.divf %4, %5 : vector<8x1xf32>
    %7 = vector.broadcast %6 : vector<8x1xf32> to vector<8x128xf32>
    %8 = arith.subf %2, %7 : vector<8x128xf32>
    %9 = arith.mulf %8, %8 : vector<8x128xf32>
    %cst_5 = arith.constant dense<0.000000e+00> : vector<8xf32>
    %10 = vector.multi_reduction <add>, %9, %cst_5 [1] : vector<8x128xf32> to vector<8xf32>
    %11 = vector.shape_cast %10 : vector<8xf32> to vector<8x1xf32>
    %cst_6 = arith.constant 1.280000e+02 : f32
    %12 = vector.broadcast %cst_6 : f32 to vector<8x1xf32>
    %13 = arith.divf %11, %12 : vector<8x1xf32>
    %cst_7 = arith.constant 9.99999974E-6 : f32
    %14 = vector.broadcast %cst_7 : f32 to vector<8x1xf32>
    %15 = arith.addf %13, %14 : vector<8x1xf32>
    %16 = math.rsqrt %15 : vector<8x1xf32>
    %17 = vector.broadcast %16 : vector<8x1xf32> to vector<8x128xf32>
    %18 = arith.mulf %8, %17 : vector<8x128xf32>
    %c0_8 = arith.constant 0 : index
    %c0_9 = arith.constant 0 : index
    %19 = vector.load %arg3[%c0_8, %c0_9] : memref<8x2xf32, #tpu.memory_space<vmem>>, vector<8x1xf32>
    %20 = vector.broadcast %19 : vector<8x1xf32> to vector<8x128xf32>
    %21 = arith.mulf %18, %20 : vector<8x128xf32>
    %c0_10 = arith.constant 0 : index
    %c1 = arith.constant 1 : index
    %22 = vector.load %arg3[%c0_10, %c1] : memref<8x2xf32, #tpu.memory_space<vmem>>, vector<8x1xf32>
    %23 = vector.broadcast %22 : vector<8x1xf32> to vector<8x128xf32>
    %24 = arith.addf %21, %23 : vector<8x128xf32>
    %cst_11 = arith.constant 0.000000e+00 : f32
    %25 = vector.broadcast %cst_11 : f32 to vector<8x128xf32>
    %26 = arith.subf %25, %24 : vector<8x128xf32>
    %27 = math.exp %26 : vector<8x128xf32>
    %cst_12 = arith.constant 1.000000e+00 : f32
    %28 = vector.broadcast %cst_12 : f32 to vector<8x128xf32>
    %29 = arith.addf %28, %27 : vector<8x128xf32>
    %cst_13 = arith.constant 1.000000e+00 : f32
    %30 = vector.broadcast %cst_13 : f32 to vector<8x128xf32>
    %31 = arith.divf %30, %29 : vector<8x128xf32>
    %c0_14 = arith.constant 0 : index
    %c0_15 = arith.constant 0 : index
    %32 = vector.load %arg4[%c0_14, %c0_15] : memref<8x128xf32, #tpu.memory_space<vmem>>, vector<8x128xf32>
    tpu.vector_store %arg4[%c0_14, %c0_15], %31 {strides = array<i32>} : memref<8x128xf32, #tpu.memory_space<vmem>>, vector<8x128xf32>,
    return
  }
  func.func @transform_0(%arg0: i32) -> (i32, i32) {
    %c0_i32 = arith.constant 0 : i32
    %c0_i32_0 = arith.constant 0 : i32
    %c0_i32_1 = arith.constant 0 : i32
    return %c0_i32, %c0_i32_0 : i32, i32
  }
  func.func @transform_1(%arg0: i32) -> (i32, i32) {
    %c0_i32 = arith.constant 0 : i32
    %c0_i32_0 = arith.constant 0 : i32
    %c0_i32_1 = arith.constant 0 : i32
    return %c0_i32, %c0_i32_0 : i32, i32
  }
  func.func @transform_2(%arg0: i32) -> (i32, i32) {
    %c0_i32 = arith.constant 0 : i32
    %c0_i32_0 = arith.constant 0 : i32
    %c0_i32_1 = arith.constant 0 : i32
    return %c0_i32, %c0_i32_0 : i32, i32
  }
  func.func @transform_3(%arg0: i32) -> (i32, i32) {
    %c0_i32 = arith.constant 0 : i32
    %c0_i32_0 = arith.constant 0 : i32
    %c0_i32_1 = arith.constant 0 : i32
    return %c0_i32, %c0_i32_0 : i32, i32
  }
}

module attributes {stable_mosaic.version = 11 : i64} {
  func.func @_gemm_kernel(%arg0: i32, %arg1: memref<32x8xbf16, #tpu.memory_space<vmem>>, %arg2: memref<8x128xbf16, #tpu.memory_space<vmem>>, %arg3: memref<32x128xf32, #tpu.memory_space<vmem>>) attributes {dimension_semantics = [#tpu.dimension_semantics<arbitrary>], iteration_bounds = array<i64: 1>, scalar_prefetch = 0 : i64, scratch_operands = 0 : i64, tpu.core_type = #tpu.core_type<tc>, window_params = [{pipeline_mode = #tpu.pipeline_mode<synchronous>, transform_indices = @transform_0, window_bounds = array<i64: 32, 8>}, {pipeline_mode = #tpu.pipeline_mode<synchronous>, transform_indices = @transform_1, window_bounds = array<i64: 8, 128>}, {pipeline_mode = #tpu.pipeline_mode<synchronous>, transform_indices = @transform_2, window_bounds = array<i64: 32, 128>}]} {
    %c0 = arith.constant 0 : index
    %c0_0 = arith.constant 0 : index
    %0 = vector.load %arg1[%c0, %c0_0] : memref<32x8xbf16, #tpu.memory_space<vmem>>, vector<32x8xbf16>
    %c0_1 = arith.constant 0 : index
    %c0_2 = arith.constant 0 : index
    %1 = vector.load %arg2[%c0_1, %c0_2] : memref<8x128xbf16, #tpu.memory_space<vmem>>, vector<8x128xbf16>
    %cst = arith.constant dense<0.000000e+00> : vector<32x128xf32>
    %2 = tpu.matmul %0, %1, %cst {dimension_numbers = #tpu.dot_dimension_numbers<[1], [0], [0], [1], [0, 0, 1, 1], [], []>} : vector<32x8xbf16>, vector<8x128xbf16>, vector<32x128xf32> -> vector<32x128xf32>
    %c0_3 = arith.constant 0 : index
    %c0_4 = arith.constant 0 : index
    %3 = vector.load %arg3[%c0_3, %c0_4] : memref<32x128xf32, #tpu.memory_space<vmem>>, vector<32x128xf32>
    tpu.vector_store %arg3[%c0_3, %c0_4], %2 {strides = array<i32>} : memref<32x128xf32, #tpu.memory_space<vmem>>, vector<32x128xf32>,
    return
  }
  func.func @transform_0(%arg0: i32) -> (i32, i32) {
    %c0_i32 = arith.constant 0 : i32
    %c0_i32_0 = arith.constant 0 : i32
    %c0_i32_1 = arith.constant 0 : i32
    return %c0_i32, %c0_i32_0 : i32, i32
  }
  func.func @transform_1(%arg0: i32) -> (i32, i32) {
    %c0_i32 = arith.constant 0 : i32
    %c0_i32_0 = arith.constant 0 : i32
    %c0_i32_1 = arith.constant 0 : i32
    return %c0_i32, %c0_i32_0 : i32, i32
  }
  func.func @transform_2(%arg0: i32) -> (i32, i32) {
    %c0_i32 = arith.constant 0 : i32
    %c0_i32_0 = arith.constant 0 : i32
    %c0_i32_1 = arith.constant 0 : i32
    return %c0_i32, %c0_i32_0 : i32, i32
  }
}

module attributes {stable_mosaic.version = 11 : i64} {
  func.func @_gemm_kernel(%arg0: i32, %arg1: memref<32x16xbf16, #tpu.memory_space<vmem>>, %arg2: memref<16x128xbf16, #tpu.memory_space<vmem>>, %arg3: memref<32x128xf32, #tpu.memory_space<vmem>>) attributes {dimension_semantics = [#tpu.dimension_semantics<arbitrary>], iteration_bounds = array<i64: 1>, scalar_prefetch = 0 : i64, scratch_operands = 0 : i64, tpu.core_type = #tpu.core_type<tc>, window_params = [{pipeline_mode = #tpu.pipeline_mode<synchronous>, transform_indices = @transform_0, window_bounds = array<i64: 32, 16>}, {pipeline_mode = #tpu.pipeline_mode<synchronous>, transform_indices = @transform_1, window_bounds = array<i64: 16, 128>}, {pipeline_mode = #tpu.pipeline_mode<synchronous>, transform_indices = @transform_2, window_bounds = array<i64: 32, 128>}]} {
    %c0 = arith.constant 0 : index
    %c0_0 = arith.constant 0 : index
    %0 = vector.load %arg1[%c0, %c0_0] : memref<32x16xbf16, #tpu.memory_space<vmem>>, vector<32x16xbf16>
    %c0_1 = arith.constant 0 : index
    %c0_2 = arith.constant 0 : index
    %1 = vector.load %arg2[%c0_1, %c0_2] : memref<16x128xbf16, #tpu.memory_space<vmem>>, vector<16x128xbf16>
    %cst = arith.constant dense<0.000000e+00> : vector<32x128xf32>
    %2 = tpu.matmul %0, %1, %cst {dimension_numbers = #tpu.dot_dimension_numbers<[1], [0], [0], [1], [0, 0, 1, 1], [], []>} : vector<32x16xbf16>, vector<16x128xbf16>, vector<32x128xf32> -> vector<32x128xf32>
    %c0_3 = arith.constant 0 : index
    %c0_4 = arith.constant 0 : index
    %3 = vector.load %arg3[%c0_3, %c0_4] : memref<32x128xf32, #tpu.memory_space<vmem>>, vector<32x128xf32>
    tpu.vector_store %arg3[%c0_3, %c0_4], %2 {strides = array<i32>} : memref<32x128xf32, #tpu.memory_space<vmem>>, vector<32x128xf32>,
    return
  }
  func.func @transform_0(%arg0: i32) -> (i32, i32) {
    %c0_i32 = arith.constant 0 : i32
    %c0_i32_0 = arith.constant 0 : i32
    %c0_i32_1 = arith.constant 0 : i32
    return %c0_i32, %c0_i32_0 : i32, i32
  }
  func.func @transform_1(%arg0: i32) -> (i32, i32) {
    %c0_i32 = arith.constant 0 : i32
    %c0_i32_0 = arith.constant 0 : i32
    %c0_i32_1 = arith.constant 0 : i32
    return %c0_i32, %c0_i32_0 : i32, i32
  }
  func.func @transform_2(%arg0: i32) -> (i32, i32) {
    %c0_i32 = arith.constant 0 : i32
    %c0_i32_0 = arith.constant 0 : i32
    %c0_i32_1 = arith.constant 0 : i32
    return %c0_i32, %c0_i32_0 : i32, i32
  }
}

module attributes {stable_mosaic.version = 11 : i64} {
  func.func @_gemm_fused_kernel(%arg0: i32, %arg1: memref<8x144xbf16, #tpu.memory_space<vmem>>, %arg2: memref<144x512xbf16, #tpu.memory_space<vmem>>, %arg3: memref<8x2xf32, #tpu.memory_space<vmem>>, %arg4: memref<8x512xf32, #tpu.memory_space<vmem>>) attributes {dimension_semantics = [#tpu.dimension_semantics<arbitrary>], iteration_bounds = array<i64: 1>, scalar_prefetch = 0 : i64, scratch_operands = 0 : i64, tpu.core_type = #tpu.core_type<tc>, window_params = [{pipeline_mode = #tpu.pipeline_mode<synchronous>, transform_indices = @transform_0, window_bounds = array<i64: 8, 144>}, {pipeline_mode = #tpu.pipeline_mode<synchronous>, transform_indices = @transform_1, window_bounds = array<i64: 144, 512>}, {pipeline_mode = #tpu.pipeline_mode<synchronous>, transform_indices = @transform_2, window_bounds = array<i64: 8, 2>}, {pipeline_mode = #tpu.pipeline_mode<synchronous>, transform_indices = @transform_3, window_bounds = array<i64: 8, 512>}]} {
    %c0 = arith.constant 0 : index
    %c0_0 = arith.constant 0 : index
    %0 = vector.load %arg1[%c0, %c0_0] : memref<8x144xbf16, #tpu.memory_space<vmem>>, vector<8x144xbf16>
    %c0_1 = arith.constant 0 : index
    %c0_2 = arith.constant 0 : index
    %1 = vector.load %arg2[%c0_1, %c0_2] : memref<144x512xbf16, #tpu.memory_space<vmem>>, vector<144x512xbf16>
    %cst = arith.constant dense<0.000000e+00> : vector<8x512xf32>
    %2 = tpu.matmul %0, %1, %cst {dimension_numbers = #tpu.dot_dimension_numbers<[1], [0], [0], [1], [0, 0, 1, 1], [], []>} : vector<8x144xbf16>, vector<144x512xbf16>, vector<8x512xf32> -> vector<8x512xf32>
    %cst_3 = arith.constant dense<0.000000e+00> : vector<8xf32>
    %3 = vector.multi_reduction <add>, %2, %cst_3 [1] : vector<8x512xf32> to vector<8xf32>
    %4 = vector.shape_cast %3 : vector<8xf32> to vector<8x1xf32>
    %cst_4 = arith.constant 5.120000e+02 : f32
    %5 = vector.broadcast %cst_4 : f32 to vector<8x1xf32>
    %6 = arith.divf %4, %5 : vector<8x1xf32>
    %7 = vector.broadcast %6 : vector<8x1xf32> to vector<8x512xf32>
    %8 = arith.subf %2, %7 : vector<8x512xf32>
    %9 = arith.mulf %8, %8 : vector<8x512xf32>
    %cst_5 = arith.constant dense<0.000000e+00> : vector<8xf32>
    %10 = vector.multi_reduction <add>, %9, %cst_5 [1] : vector<8x512xf32> to vector<8xf32>
    %11 = vector.shape_cast %10 : vector<8xf32> to vector<8x1xf32>
    %cst_6 = arith.constant 5.120000e+02 : f32
    %12 = vector.broadcast %cst_6 : f32 to vector<8x1xf32>
    %13 = arith.divf %11, %12 : vector<8x1xf32>
    %cst_7 = arith.constant 9.99999974E-6 : f32
    %14 = vector.broadcast %cst_7 : f32 to vector<8x1xf32>
    %15 = arith.addf %13, %14 : vector<8x1xf32>
    %16 = math.rsqrt %15 : vector<8x1xf32>
    %17 = vector.broadcast %16 : vector<8x1xf32> to vector<8x512xf32>
    %18 = arith.mulf %8, %17 : vector<8x512xf32>
    %c0_8 = arith.constant 0 : index
    %c0_9 = arith.constant 0 : index
    %19 = vector.load %arg3[%c0_8, %c0_9] : memref<8x2xf32, #tpu.memory_space<vmem>>, vector<8x1xf32>
    %20 = vector.broadcast %19 : vector<8x1xf32> to vector<8x512xf32>
    %21 = arith.mulf %18, %20 : vector<8x512xf32>
    %c0_10 = arith.constant 0 : index
    %c1 = arith.constant 1 : index
    %22 = vector.load %arg3[%c0_10, %c1] : memref<8x2xf32, #tpu.memory_space<vmem>>, vector<8x1xf32>
    %23 = vector.broadcast %22 : vector<8x1xf32> to vector<8x512xf32>
    %24 = arith.addf %21, %23 : vector<8x512xf32>
    %cst_11 = arith.constant 0.000000e+00 : f32
    %25 = vector.broadcast %cst_11 : f32 to vector<8x512xf32>
    %26 = arith.maximumf %24, %25 : vector<8x512xf32>
    %c0_12 = arith.constant 0 : index
    %c0_13 = arith.constant 0 : index
    %27 = vector.load %arg4[%c0_12, %c0_13] : memref<8x512xf32, #tpu.memory_space<vmem>>, vector<8x512xf32>
    tpu.vector_store %arg4[%c0_12, %c0_13], %26 {strides = array<i32>} : memref<8x512xf32, #tpu.memory_space<vmem>>, vector<8x512xf32>,
    return
  }
  func.func @transform_0(%arg0: i32) -> (i32, i32) {
    %c0_i32 = arith.constant 0 : i32
    %c0_i32_0 = arith.constant 0 : i32
    %c0_i32_1 = arith.constant 0 : i32
    return %c0_i32, %c0_i32_0 : i32, i32
  }
  func.func @transform_1(%arg0: i32) -> (i32, i32) {
    %c0_i32 = arith.constant 0 : i32
    %c0_i32_0 = arith.constant 0 : i32
    %c0_i32_1 = arith.constant 0 : i32
    return %c0_i32, %c0_i32_0 : i32, i32
  }
  func.func @transform_2(%arg0: i32) -> (i32, i32) {
    %c0_i32 = arith.constant 0 : i32
    %c0_i32_0 = arith.constant 0 : i32
    %c0_i32_1 = arith.constant 0 : i32
    return %c0_i32, %c0_i32_0 : i32, i32
  }
  func.func @transform_3(%arg0: i32) -> (i32, i32) {
    %c0_i32 = arith.constant 0 : i32
    %c0_i32_0 = arith.constant 0 : i32
    %c0_i32_1 = arith.constant 0 : i32
    return %c0_i32, %c0_i32_0 : i32, i32
  }
}

module attributes {stable_mosaic.version = 11 : i64} {
  func.func @_gemm_fused_kernel(%arg0: i32, %arg1: memref<1x8xbf16, #tpu.memory_space<vmem>>, %arg2: memref<8x512xbf16, #tpu.memory_space<vmem>>, %arg3: memref<1x2xf32, #tpu.memory_space<vmem>>, %arg4: memref<1x512xf32, #tpu.memory_space<vmem>>) attributes {dimension_semantics = [#tpu.dimension_semantics<arbitrary>], iteration_bounds = array<i64: 1>, scalar_prefetch = 0 : i64, scratch_operands = 0 : i64, tpu.core_type = #tpu.core_type<tc>, window_params = [{pipeline_mode = #tpu.pipeline_mode<synchronous>, transform_indices = @transform_0, window_bounds = array<i64: 1, 8>}, {pipeline_mode = #tpu.pipeline_mode<synchronous>, transform_indices = @transform_1, window_bounds = array<i64: 8, 512>}, {pipeline_mode = #tpu.pipeline_mode<synchronous>, transform_indices = @transform_2, window_bounds = array<i64: 1, 2>}, {pipeline_mode = #tpu.pipeline_mode<synchronous>, transform_indices = @transform_3, window_bounds = array<i64: 1, 512>}]} {
    %c0 = arith.constant 0 : index
    %c0_0 = arith.constant 0 : index
    %0 = vector.load %arg1[%c0, %c0_0] : memref<1x8xbf16, #tpu.memory_space<vmem>>, vector<1x8xbf16>
    %c0_1 = arith.constant 0 : index
    %c0_2 = arith.constant 0 : index
    %1 = vector.load %arg2[%c0_1, %c0_2] : memref<8x512xbf16, #tpu.memory_space<vmem>>, vector<8x512xbf16>
    %cst = arith.constant dense<0.000000e+00> : vector<1x512xf32>
    %2 = tpu.matmul %0, %1, %cst {dimension_numbers = #tpu.dot_dimension_numbers<[1], [0], [0], [1], [0, 0, 1, 1], [], []>} : vector<1x8xbf16>, vector<8x512xbf16>, vector<1x512xf32> -> vector<1x512xf32>
    %c0_3 = arith.constant 0 : index
    %c0_4 = arith.constant 0 : index
    %3 = vector.load %arg3[%c0_3, %c0_4] : memref<1x2xf32, #tpu.memory_space<vmem>>, vector<1x1xf32>
    %4 = vector.broadcast %3 : vector<1x1xf32> to vector<1x512xf32>
    %5 = arith.addf %2, %4 : vector<1x512xf32>
    %c0_5 = arith.constant 0 : index
    %c0_6 = arith.constant 0 : index
    %6 = vector.load %arg4[%c0_5, %c0_6] : memref<1x512xf32, #tpu.memory_space<vmem>>, vector<1x512xf32>
    tpu.vector_store %arg4[%c0_5, %c0_6], %5 {strides = array<i32>} : memref<1x512xf32, #tpu.memory_space<vmem>>, vector<1x512xf32>,
    return
  }
  func.func @transform_0(%arg0: i32) -> (i32, i32) {
    %c0_i32 = arith.constant 0 : i32
    %c0_i32_0 = arith.constant 0 : i32
    %c0_i32_1 = arith.constant 0 : i32
    return %c0_i32, %c0_i32_0 : i32, i32
  }
  func.func @transform_1(%arg0: i32) -> (i32, i32) {
    %c0_i32 = arith.constant 0 : i32
    %c0_i32_0 = arith.constant 0 : i32
    %c0_i32_1 = arith.constant 0 : i32
    return %c0_i32, %c0_i32_0 : i32, i32
  }
  func.func @transform_2(%arg0: i32) -> (i32, i32) {
    %c0_i32 = arith.constant 0 : i32
    %c0_i32_0 = arith.constant 0 : i32
    %c0_i32_1 = arith.constant 0 : i32
    return %c0_i32, %c0_i32_0 : i32, i32
  }
  func.func @transform_3(%arg0: i32) -> (i32, i32) {
    %c0_i32 = arith.constant 0 : i32
    %c0_i32_0 = arith.constant 0 : i32
    %c0_i32_1 = arith.constant 0 : i32
    return %c0_i32, %c0_i32_0 : i32, i32
  }
}

</mosaic_0001>

<bundles_post_ra>
// kernel: transformer_unet_forward.32
= control target key start
LH: loop header
LB: loop body
LE: loop exit
PB: predicated region body
PF: predicated region fallthrough
CT: control target
= control target key end

     0   :  { %vm80_vm0 = vcmask 1041408   ;;  %vm76_vm1 = vcmask 293888   ;;  %v271_v50 = vmov 512.0   ;;  %v272_v54 = vmov 0   ;;  %s370_s1 = inlined_call_operand.vmem [shape: bf16[36,512], index: 1, kind: input, shape index: {}]   ;;  %s371_s0 = inlined_call_operand.vmem [shape: bf16[8,36], index: 0, kind: input, shape index: {}]   ;;  %s372_s2 = inlined_call_operand.vmem [shape: f32[8,2], index: 2, kind: input, shape index: {}]   ;;  %s373_s3 = inlined_call_operand.vmem [shape: f32[8,512], index: 3, kind: output, shape index: {}]  }
   0x1   :  { %v24_v0 = vld [vmem:[%s370_s1 + $0x40] sm:$0x33]  ;;  %v25_v1 = vld [vmem:[%s370_s1 + $0x48] sm:$0x33]  ;;  %v259_v7 = vld [vmem:[%s370_s1 + $0x2c] sm:$0xf0]  ;;  %267 = vrcp.f32 %v271_v50  ;;  %264 = vset.pattern.permute.xlu1 %v272_v54 }
   0x2   :  { %v52_v2 = vunpack.c.l.b16 %v24_v0  ;;  %v53_v3 = vunpack.c.h.b16 %v24_v0  ;;  %v54_v4 = vunpack.c.l.b16 %v25_v1  ;;  %v55_v5 = vunpack.c.h.b16 %v25_v1  ;;  %v235_v6 = vld [vmem:[%s370_s1 + $0x20] sm:$0xf]  ;;  %v257_v12 = vld [vmem:[%s370_s1 + $0x24] sm:$0xf]  ;;  %v237_v13 = vld [vmem:[%s370_s1 + $0x30] sm:$0xf0] }
   0x3   :  { %v243_v14 = vld [vmem:[%s370_s1 + $0x28] sm:$0xf]  ;;  %v260_v15 = vld [vmem:[%s370_s1 + $0x34] sm:$0xf0]  ;;  %v258_v16 = vld [vmem:[%s370_s1 + $0x2c] sm:$0xf]  ;;  %v236_v22 = vor.u32 %v259_v7, %v235_v6  ;;  %v240_v23 = vor.u32 %v257_v12, %v237_v13 }
   0x4   :  { %v64_v8 = vpack.c.b16 %v52_v2, %v52_v2  ;;  %v65_v9 = vpack.c.b16 %v53_v3, %v53_v3  ;;  %v66_v10 = vpack.c.b16 %v54_v4, %v54_v4  ;;  %v67_v11 = vpack.c.b16 %v55_v5, %v55_v5  ;;  %v245_v17 = vld [vmem:[%s370_s1 + $0x38] sm:$0xf0]  ;;  %v219_v24 = vld [vmem:[%s370_s1] sm:$0xf]  ;;  %v255_v25 = vld [vmem:[%s370_s1 + $0xc] sm:$0xf0] }
   0x5   :  { %v244_v26 = vor.u32 %v260_v15, %v243_v14  ;;  %v248_v27 = vor.u32 %v258_v16, %v245_v17  ;;  %v253_v28 = vld [vmem:[%s370_s1 + $0x4] sm:$0xf]  ;;  %v221_v29 = vld [vmem:[%s370_s1 + $0x10] sm:$0xf0]  ;;  %v227_v30 = vld [vmem:[%s370_s1 + $0x8] sm:$0xf]  ;;  %v220_v34 = vor.u32 %v255_v25, %v219_v24 }
   0x6   :  { %v82_v18 = vsel %vm80_vm0, %v64_v8, 0  ;;  %v85_v19 = vsel %vm80_vm0, %v65_v9, 0  ;;  %v88_v20 = vsel %vm80_vm0, %v66_v10, 0  ;;  %v91_v21 = vsel %vm80_vm0, %v67_v11, 0  ;;  %v256_v31 = vld [vmem:[%s370_s1 + $0x14] sm:$0xf0] }
   0x7   :  { %98 = vmatpush.bf16.msra.mxu0 %v82_v18  ;;  %111 = vmatpush.bf16.msra.mxu1 %v85_v19  ;;  %v254_v32 = vld [vmem:[%s370_s1 + $0xc] sm:$0xf]  ;;  %v229_v33 = vld [vmem:[%s370_s1 + $0x18] sm:$0xf0]  ;;  %v224_v35 = vor.u32 %v253_v28, %v221_v29  ;;  %v228_v36 = vor.u32 %v256_v31, %v227_v30  ;;  %v15_v38 = vld [vmem:[%s371_s0] sm:$0xf]  ;;  %v268_v51 = vpop.eup %267 }
   0x8   :  { %124 = vmatpush.bf16.msra.mxu2 %v88_v20  ;;  %137 = vmatpush.bf16.msra.mxu3 %v91_v21  ;;  %v232_v37 = vor.u32 %v254_v32, %v229_v33  ;;  %v187_v52 = vld [vmem:[%s372_s2] sm:$0xff]  ;;  %v151_v53 = vmul.f32 512.0, %v268_v51  ;;  %v273_v55 = vmov 1   ;;  %vm155_vm2 = vweird.f32 %v268_v51 }
   0x9   :  { %266 = vset.pattern.permute.xlu0 %v273_v55  ;;  %190 = vperm.xlu1 %264, %v187_v52  }
   0xa   :  { %v152_v56 = vsub.f32 1.0, %v151_v53 }
   0xb   :  { %99 = vmatpush.bf16.msra.mxu0 %v236_v22  ;;  %112 = vmatpush.bf16.msra.mxu1 %v240_v23 }
   0xc   :  { %125 = vmatpush.bf16.msra.mxu2 %v244_v26  ;;  %138 = vmatpush.bf16.msra.mxu3 %v248_v27  ;;  %v153_v57 = vmul.f32 %v268_v51, %v152_v56 }
   0xe   :  { %v154_v58 = vadd.f32 %v268_v51, %v153_v57 }
   0xf   :  { %100 = vmatpush.bf16.msra.mxu0 %v220_v34  ;;  %113 = vmatpush.bf16.msra.mxu1 %v224_v35 }
  0x10   :  { %126 = vmatpush.bf16.msra.mxu2 %v228_v36  ;;  %139 = vmatpush.bf16.msra.mxu3 %v232_v37  ;;  %v156_v59 = vsel %vm155_vm2, %v268_v51, %v154_v58 }
  0x11   :  { %265 = vset.pattern.permute.xlu1 %v273_v55 }
  0x12   :  { %249 = vmatmul.msk.bf16.vlgmr.msra.gmra.mxu0 %vm76_vm1, %v15_v38  ;;  %250 = vmatmul.msk.bf16.vlgmr.msra.gmra.mxu1 %vm76_vm1, %v15_v38 }
  0x13   :  { %251 = vmatmul.msk.bf16.vlgmr.msra.gmra.mxu2 %vm76_vm1, %v15_v38  ;;  %252 = vmatmul.msk.bf16.vlgmr.msra.gmra.mxu3 %vm76_vm1, %v15_v38 }
  0x14   :  { %198 = vperm.xlu1 %265, %v187_v52  }
  0x7b   :  { %v191_v15 = vpop.permute.xlu1 %190 }
  0x86   :  { %v199_v24 = vpop.permute.xlu1 %198 }
  0x8f   :  { %v102_v39 = vpop.f32.mrf.mxu0  ;;  %v115_v40 = vpop.f32.mrf.mxu1 }
  0x90   :  { %v145_v41 = vadd.f32 %v115_v40, %v102_v39 }
  0x96   :  { %v128_v42 = vpop.f32.mrf.mxu2  ;;  %v141_v43 = vpop.f32.mrf.mxu3 }
  0x97   :  { %v146_v44 = vadd.f32 %v145_v41, %v128_v42  ;;  %v104_v45 = vpop.f32.mrf.mxu0  ;;  %v117_v46 = vpop.f32.mrf.mxu1 }
  0x99   :  { %v147_v47 = vadd.f32 %v146_v44, %v141_v43 }
  0x9b   :  { %148 = vadd.xlane.f32.xlu0 %v147_v47 }
  0x9e   :  { %v130_v48 = vpop.f32.mrf.mxu2  ;;  %v143_v49 = vpop.f32.mrf.mxu3 }
 0x10e   :  { %v149_v60 = vpop.xlane.xlu0 %148 }
 0x10f   :  { %v157_v61 = vmul.f32 %v156_v59, %v149_v60 }
 0x111   :  { %v158_v62 = vsub.f32 %v102_v39, %v157_v61  ;;  %v159_v63 = vsub.f32 %v115_v40, %v157_v61  ;;  %v160_v0 = vsub.f32 %v128_v42, %v157_v61  ;;  %v161_v1 = vsub.f32 %v141_v43, %v157_v61 }
 0x113   :  { %v162_v2 = vmul.f32 %v158_v62, %v158_v62  ;;  %v163_v3 = vmul.f32 %v159_v63, %v159_v63  ;;  %v164_v4 = vmul.f32 %v160_v0, %v160_v0  ;;  %v165_v6 = vmul.f32 %v161_v1, %v161_v1 }
 0x115   :  { %v166_v5 = vadd.f32 %v163_v3, %v162_v2 }
 0x117   :  { %v167_v7 = vadd.f32 %v166_v5, %v164_v4 }
 0x119   :  { %v168_v8 = vadd.f32 %v167_v7, %v165_v6 }
 0x11b   :  { %169 = vadd.xlane.f32.xlu0 %v168_v8 }
 0x18e   :  { %v170_v9 = vpop.xlane.xlu0 %169 }
 0x18f   :  { %v171_v10 = vmul.f32 %v170_v9, %v156_v59 }
 0x191   :  { %v172_v11 = vadd.f32 1e-05, %v171_v10 }
 0x193   :  { %269 = vrsqrt.f32 %v172_v11  ;;  %vm179_vm4 = vweird.f32 %v172_v11 }
 0x199   :  { %v270_v12 = vpop.eup %269 }
 0x19a   :  { %v174_v13 = vmul.f32 %v270_v12, %v172_v11  ;;  %vm180_vm3 = vweird.f32 %v270_v12 }
 0x19b   :  { %vm181_vm5 = vmor %vm179_vm4, %vm180_vm3 }
 0x19c   :  { %v175_v14 = vmul.f32 %v270_v12, %v174_v13 }
 0x19e   :  { %v176_v16 = vmul.f32 0.5, %v175_v14 }
 0x1a0   :  { %v177_v17 = vsub.f32 1.5, %v176_v16 }
 0x1a2   :  { %v178_v18 = vmul.f32 %v270_v12, %v177_v17 }
 0x1a4   :  { %v182_v19 = vsel %vm181_vm5, %v270_v12, %v178_v18 }
 0x1a5   :  { %v183_v20 = vmul.f32 %v182_v19, %v158_v62  ;;  %v184_v21 = vmul.f32 %v182_v19, %v159_v63  ;;  %v185_v22 = vmul.f32 %v182_v19, %v160_v0  ;;  %v186_v23 = vmul.f32 %v182_v19, %v161_v1 }
 0x1a7   :  { %v193_v25 = vmul.f32 %v191_v15, %v183_v20  ;;  %v194_v26 = vmul.f32 %v191_v15, %v184_v21  ;;  %v195_v27 = vmul.f32 %v191_v15, %v185_v22  ;;  %v196_v28 = vmul.f32 %v191_v15, %v186_v23 }
 0x1a9   :  { %v201_v29 = vadd.f32 %v199_v24, %v193_v25  ;;  %v202_v30 = vadd.f32 %v199_v24, %v194_v26  ;;  %v203_v31 = vadd.f32 %v199_v24, %v195_v27  ;;  %v204_v32 = vadd.f32 %v199_v24, %v196_v28 }
 0x1ab   :  { %v205_v33 = vmax.f32 %v201_v29, 0.0  ;;  %v206_v34 = vmax.f32 %v202_v30, 0.0  ;;  %v207_v35 = vmax.f32 %v203_v31, 0.0  ;;  %v208_v36 = vmax.f32 %v204_v32, 0.0 }
 0x1ad   :  { %209 = vst [vmem:[%s373_s3] sm:$0xff] %v205_v33 }
 0x1ae   :  { %210 = vst [vmem:[%s373_s3 + $0x8] sm:$0xff] %v206_v34 }
 0x1af   :  { %211 = vst [vmem:[%s373_s3 + $0x10] sm:$0xff] %v207_v35 }
 0x1b0   :  { %212 = vst [vmem:[%s373_s3 + $0x18] sm:$0xff] %v208_v36 }

// kernel: transformer_unet_forward.33
= control target key start
LH: loop header
LB: loop body
LE: loop exit
PB: predicated region body
PF: predicated region fallthrough
CT: control target
= control target key end

     0   :  { %vm128_vm0 = vcmask 1043456   ;;  %vm124_vm1 = vcmask 588800   ;;  %s506_s1 = inlined_call_operand.vmem [shape: bf16[72,512], index: 1, kind: input, shape index: {}]   ;;  %s507_s0 = inlined_call_operand.vmem [shape: bf16[8,72], index: 0, kind: input, shape index: {}]   ;;  %s508_s2 = inlined_call_operand.vmem [shape: f32[8,2], index: 2, kind: input, shape index: {}]   ;;  %s509_s3 = inlined_call_operand.vmem [shape: f32[8,512], index: 3, kind: output, shape index: {}]  }
   0x1   :  { %v32_v0 = vld [vmem:[%s506_s1 + $0x80] sm:$0xff]  ;;  %v33_v1 = vld [vmem:[%s506_s1 + $0x88] sm:$0xff]  ;;  %v347_v7 = vld [vmem:[%s506_s1 + $0x6c] sm:$0xf0] }
   0x2   :  { %v84_v2 = vunpack.c.l.b16 %v32_v0  ;;  %v85_v3 = vunpack.c.h.b16 %v32_v0  ;;  %v86_v4 = vunpack.c.l.b16 %v33_v1  ;;  %v87_v5 = vunpack.c.h.b16 %v33_v1  ;;  %v315_v6 = vld [vmem:[%s506_s1 + $0x60] sm:$0xf]  ;;  %v345_v12 = vld [vmem:[%s506_s1 + $0x64] sm:$0xf]  ;;  %v317_v13 = vld [vmem:[%s506_s1 + $0x70] sm:$0xf0] }
   0x3   :  { %v323_v14 = vld [vmem:[%s506_s1 + $0x68] sm:$0xf]  ;;  %v348_v15 = vld [vmem:[%s506_s1 + $0x74] sm:$0xf0]  ;;  %v346_v16 = vld [vmem:[%s506_s1 + $0x6c] sm:$0xf]  ;;  %v316_v22 = vor.u32 %v347_v7, %v315_v6  ;;  %v320_v23 = vor.u32 %v345_v12, %v317_v13 }
   0x4   :  { %v104_v8 = vpack.c.b16 %v84_v2, %v84_v2  ;;  %v105_v9 = vpack.c.b16 %v85_v3, %v85_v3  ;;  %v106_v10 = vpack.c.b16 %v86_v4, %v86_v4  ;;  %v107_v11 = vpack.c.b16 %v87_v5, %v87_v5  ;;  %v325_v17 = vld [vmem:[%s506_s1 + $0x78] sm:$0xf0]  ;;  %v299_v24 = vld [vmem:[%s506_s1 + $0x40] sm:$0xf]  ;;  %v343_v25 = vld [vmem:[%s506_s1 + $0x4c] sm:$0xf0] }
   0x5   :  { %v324_v26 = vor.u32 %v348_v15, %v323_v14  ;;  %v328_v27 = vor.u32 %v346_v16, %v325_v17  ;;  %v341_v28 = vld [vmem:[%s506_s1 + $0x44] sm:$0xf]  ;;  %v301_v29 = vld [vmem:[%s506_s1 + $0x50] sm:$0xf0]  ;;  %v307_v30 = vld [vmem:[%s506_s1 + $0x48] sm:$0xf]  ;;  %v300_v34 = vor.u32 %v343_v25, %v299_v24 }
   0x6   :  { %v130_v18 = vsel %vm128_vm0, %v104_v8, 0  ;;  %v133_v19 = vsel %vm128_vm0, %v105_v9, 0  ;;  %v136_v20 = vsel %vm128_vm0, %v106_v10, 0  ;;  %v139_v21 = vsel %vm128_vm0, %v107_v11, 0  ;;  %v344_v31 = vld [vmem:[%s506_s1 + $0x54] sm:$0xf0] }
   0x7   :  { %144 = vmatpush.bf16.msra.mxu0 %v130_v18  ;;  %157 = vmatpush.bf16.msra.mxu1 %v133_v19  ;;  %v342_v32 = vld [vmem:[%s506_s1 + $0x4c] sm:$0xf]  ;;  %v309_v33 = vld [vmem:[%s506_s1 + $0x58] sm:$0xf0]  ;;  %v304_v35 = vor.u32 %v341_v28, %v301_v29  ;;  %v283_v36 = vld [vmem:[%s506_s1 + $0x20] sm:$0xf]  ;;  %v308_v38 = vor.u32 %v344_v31, %v307_v30 }
   0x8   :  { %170 = vmatpush.bf16.msra.mxu2 %v136_v20  ;;  %183 = vmatpush.bf16.msra.mxu3 %v139_v21  ;;  %v339_v37 = vld [vmem:[%s506_s1 + $0x2c] sm:$0xf0]  ;;  %v312_v39 = vor.u32 %v342_v32, %v309_v33  ;;  %v337_v40 = vld [vmem:[%s506_s1 + $0x24] sm:$0xf]  ;;  %v285_v41 = vld [vmem:[%s506_s1 + $0x30] sm:$0xf0] }
   0x9   :  { %v291_v42 = vld [vmem:[%s506_s1 + $0x28] sm:$0xf]  ;;  %v340_v43 = vld [vmem:[%s506_s1 + $0x34] sm:$0xf0]  ;;  %v338_v44 = vld [vmem:[%s506_s1 + $0x2c] sm:$0xf]  ;;  %v284_v46 = vor.u32 %v339_v37, %v283_v36  ;;  %v288_v47 = vor.u32 %v337_v40, %v285_v41 }
   0xa   :  { %v293_v45 = vld [vmem:[%s506_s1 + $0x38] sm:$0xf0]  ;;  %v267_v48 = vld [vmem:[%s506_s1] sm:$0xf]  ;;  %v335_v49 = vld [vmem:[%s506_s1 + $0xc] sm:$0xf0]  ;;  %v292_v50 = vor.u32 %v340_v43, %v291_v42 }
   0xb   :  { %145 = vmatpush.bf16.msra.mxu0 %v316_v22  ;;  %158 = vmatpush.bf16.msra.mxu1 %v320_v23  ;;  %v296_v51 = vor.u32 %v338_v44, %v293_v45  ;;  %v333_v52 = vld [vmem:[%s506_s1 + $0x4] sm:$0xf]  ;;  %v269_v53 = vld [vmem:[%s506_s1 + $0x10] sm:$0xf0]  ;;  %v275_v54 = vld [vmem:[%s506_s1 + $0x8] sm:$0xf]  ;;  %v268_v58 = vor.u32 %v335_v49, %v267_v48 }
   0xc   :  { %171 = vmatpush.bf16.msra.mxu2 %v324_v26  ;;  %184 = vmatpush.bf16.msra.mxu3 %v328_v27  ;;  %v336_v55 = vld [vmem:[%s506_s1 + $0x14] sm:$0xf0]  ;;  %v334_v56 = vld [vmem:[%s506_s1 + $0xc] sm:$0xf]  ;;  %v277_v57 = vld [vmem:[%s506_s1 + $0x18] sm:$0xf0]  ;;  %v272_v59 = vor.u32 %v333_v52, %v269_v53 }
   0xd   :  { %v276_v60 = vor.u32 %v336_v55, %v275_v54  ;;  %v280_v61 = vor.u32 %v334_v56, %v277_v57  ;;  %v15_v62 = vld [vmem:[%s507_s0] sm:$0xf]  ;;  %v359_v10 = vmov 512.0   ;;  %v360_v14 = vmov 0  }
   0xe   :  { %355 = vrcp.f32 %v359_v10  ;;  %v235_v12 = vld [vmem:[%s508_s2] sm:$0xff]  ;;  %352 = vset.pattern.permute.xlu1 %v360_v14  ;;  %v361_v15 = vmov 1  }
   0xf   :  { %146 = vmatpush.bf16.msra.mxu0 %v300_v34  ;;  %159 = vmatpush.bf16.msra.mxu1 %v304_v35 }
  0x10   :  { %172 = vmatpush.bf16.msra.mxu2 %v308_v38  ;;  %185 = vmatpush.bf16.msra.mxu3 %v312_v39 }
  0x11   :  { %354 = vset.pattern.permute.xlu0 %v361_v15  ;;  %238 = vperm.xlu1 %352, %v235_v12  }
  0x13   :  { %147 = vmatpush.bf16.msra.mxu0 %v284_v46  ;;  %160 = vmatpush.bf16.msra.mxu1 %v288_v47 }
  0x14   :  { %173 = vmatpush.bf16.msra.mxu2 %v292_v50  ;;  %186 = vmatpush.bf16.msra.mxu3 %v296_v51  ;;  %v356_v11 = vpop.eup %355 }
  0x15   :  { %v199_v13 = vmul.f32 512.0, %v356_v11  ;;  %vm203_vm2 = vweird.f32 %v356_v11 }
  0x17   :  { %148 = vmatpush.bf16.msra.mxu0 %v268_v58  ;;  %161 = vmatpush.bf16.msra.mxu1 %v272_v59  ;;  %v200_v16 = vsub.f32 1.0, %v199_v13 }
  0x18   :  { %174 = vmatpush.bf16.msra.mxu2 %v276_v60  ;;  %187 = vmatpush.bf16.msra.mxu3 %v280_v61 }
  0x19   :  { %v201_v17 = vmul.f32 %v356_v11, %v200_v16  ;;  %353 = vset.pattern.permute.xlu1 %v361_v15 }
  0x1a   :  { %329 = vmatmul.msk.bf16.vlgmr.msra.gmra.mxu0 %vm124_vm1, %v15_v62  ;;  %330 = vmatmul.msk.bf16.vlgmr.msra.gmra.mxu1 %vm124_vm1, %v15_v62 }
  0x1b   :  { %331 = vmatmul.msk.bf16.vlgmr.msra.gmra.mxu2 %vm124_vm1, %v15_v62  ;;  %332 = vmatmul.msk.bf16.vlgmr.msra.gmra.mxu3 %vm124_vm1, %v15_v62  ;;  %v202_v18 = vadd.f32 %v356_v11, %v201_v17 }
  0x1c   :  { %246 = vperm.xlu1 %353, %v235_v12  }
  0x1d   :  { %v204_v19 = vsel %vm203_vm2, %v356_v11, %v202_v18 }
  0x83   :  { %v239_v39 = vpop.permute.xlu1 %238 }
  0x8e   :  { %v247_v48 = vpop.permute.xlu1 %246 }
  0x97   :  { %v150_v63 = vpop.f32.mrf.mxu0  ;;  %v163_v0 = vpop.f32.mrf.mxu1 }
  0x98   :  { %v193_v1 = vadd.f32 %v163_v0, %v150_v63 }
  0x9e   :  { %v176_v2 = vpop.f32.mrf.mxu2  ;;  %v189_v3 = vpop.f32.mrf.mxu3 }
  0x9f   :  { %v194_v4 = vadd.f32 %v193_v1, %v176_v2  ;;  %v152_v5 = vpop.f32.mrf.mxu0  ;;  %v165_v6 = vpop.f32.mrf.mxu1 }
  0xa1   :  { %v195_v7 = vadd.f32 %v194_v4, %v189_v3 }
  0xa3   :  { %196 = vadd.xlane.f32.xlu0 %v195_v7 }
  0xa6   :  { %v178_v8 = vpop.f32.mrf.mxu2  ;;  %v191_v9 = vpop.f32.mrf.mxu3 }
 0x116   :  { %v197_v20 = vpop.xlane.xlu0 %196 }
 0x117   :  { %v205_v21 = vmul.f32 %v204_v19, %v197_v20 }
 0x119   :  { %v206_v22 = vsub.f32 %v150_v63, %v205_v21  ;;  %v207_v23 = vsub.f32 %v163_v0, %v205_v21  ;;  %v208_v24 = vsub.f32 %v176_v2, %v205_v21  ;;  %v209_v25 = vsub.f32 %v189_v3, %v205_v21 }
 0x11b   :  { %v210_v26 = vmul.f32 %v206_v22, %v206_v22  ;;  %v211_v27 = vmul.f32 %v207_v23, %v207_v23  ;;  %v212_v28 = vmul.f32 %v208_v24, %v208_v24  ;;  %v213_v30 = vmul.f32 %v209_v25, %v209_v25 }
 0x11d   :  { %v214_v29 = vadd.f32 %v211_v27, %v210_v26 }
 0x11f   :  { %v215_v31 = vadd.f32 %v214_v29, %v212_v28 }
 0x121   :  { %v216_v32 = vadd.f32 %v215_v31, %v213_v30 }
 0x123   :  { %217 = vadd.xlane.f32.xlu0 %v216_v32 }
 0x196   :  { %v218_v33 = vpop.xlane.xlu0 %217 }
 0x197   :  { %v219_v34 = vmul.f32 %v218_v33, %v204_v19 }
 0x199   :  { %v220_v35 = vadd.f32 1e-05, %v219_v34 }
 0x19b   :  { %357 = vrsqrt.f32 %v220_v35  ;;  %vm227_vm4 = vweird.f32 %v220_v35 }
 0x1a1   :  { %v358_v36 = vpop.eup %357 }
 0x1a2   :  { %v222_v37 = vmul.f32 %v358_v36, %v220_v35  ;;  %vm228_vm3 = vweird.f32 %v358_v36 }
 0x1a3   :  { %vm229_vm5 = vmor %vm227_vm4, %vm228_vm3 }
 0x1a4   :  { %v223_v38 = vmul.f32 %v358_v36, %v222_v37 }
 0x1a6   :  { %v224_v40 = vmul.f32 0.5, %v223_v38 }
 0x1a8   :  { %v225_v41 = vsub.f32 1.5, %v224_v40 }
 0x1aa   :  { %v226_v42 = vmul.f32 %v358_v36, %v225_v41 }
 0x1ac   :  { %v230_v43 = vsel %vm229_vm5, %v358_v36, %v226_v42 }
 0x1ad   :  { %v231_v44 = vmul.f32 %v230_v43, %v206_v22  ;;  %v232_v45 = vmul.f32 %v230_v43, %v207_v23  ;;  %v233_v46 = vmul.f32 %v230_v43, %v208_v24  ;;  %v234_v47 = vmul.f32 %v230_v43, %v209_v25 }
 0x1af   :  { %v241_v49 = vmul.f32 %v239_v39, %v231_v44  ;;  %v242_v50 = vmul.f32 %v239_v39, %v232_v45  ;;  %v243_v51 = vmul.f32 %v239_v39, %v233_v46  ;;  %v244_v52 = vmul.f32 %v239_v39, %v234_v47 }
 0x1b1   :  { %v249_v53 = vadd.f32 %v247_v48, %v241_v49  ;;  %v250_v54 = vadd.f32 %v247_v48, %v242_v50  ;;  %v251_v55 = vadd.f32 %v247_v48, %v243_v51  ;;  %v252_v56 = vadd.f32 %v247_v48, %v244_v52 }
 0x1b3   :  { %v253_v57 = vmax.f32 %v249_v53, 0.0  ;;  %v254_v58 = vmax.f32 %v250_v54, 0.0  ;;  %v255_v59 = vmax.f32 %v251_v55, 0.0  ;;  %v256_v60 = vmax.f32 %v252_v56, 0.0 }
 0x1b5   :  { %257 = vst [vmem:[%s509_s3] sm:$0xff] %v253_v57 }
 0x1b6   :  { %258 = vst [vmem:[%s509_s3 + $0x8] sm:$0xff] %v254_v58 }
 0x1b7   :  { %259 = vst [vmem:[%s509_s3 + $0x10] sm:$0xff] %v255_v59 }
 0x1b8   :  { %260 = vst [vmem:[%s509_s3 + $0x18] sm:$0xff] %v256_v60 }

// kernel: transformer_unet_forward.34
= control target key start
LH: loop header
LB: loop body
LE: loop exit
PB: predicated region body
PF: predicated region fallthrough
CT: control target
= control target key end

     0   :  { %vm62_vm0 = vcmask 1043456   ;;  %vm58_vm1 = vcmask 588800   ;;  %v197_v11 = vmov 128.0   ;;  %v198_v15 = vmov 1   ;;  %s250_s1 = inlined_call_operand.vmem [shape: bf16[72,128], index: 1, kind: input, shape index: {}]   ;;  %s251_s0 = inlined_call_operand.vmem [shape: bf16[16,72], index: 0, kind: input, shape index: {}]   ;;  %s252_s2 = inlined_call_operand.vmem [shape: f32[16,2], index: 2, kind: input, shape index: {}]   ;;  %s253_s3 = inlined_call_operand.vmem [shape: f32[16,128], index: 3, kind: output, shape index: {}]  }
   0x1   :  { %v25_v0 = vld [vmem:[%s250_s1 + $0x20] sm:$0xf]  ;;  %v184_v4 = vld [vmem:[%s250_s1 + $0x18] sm:$0xff]  ;;  %v183_v5 = vld [vmem:[%s250_s1 + $0x10] sm:$0xff]  ;;  %191 = vrcp.f32 %v197_v11  ;;  %189 = vset.pattern.permute.xlu0 %v198_v15  ;;  %190 = vset.pattern.permute.xlu1 %v198_v15  ;;  %v199_v26 = vmov 0  }
   0x2   :  { %v48_v1 = vunpack.c.l.b16 %v25_v0  ;;  %v182_v6 = vld [vmem:[%s250_s1 + $0x8] sm:$0xff]  ;;  %v181_v7 = vld [vmem:[%s250_s1] sm:$0xff]  ;;  %188 = vset.pattern.permute.xlu2 %v199_v26 }
   0x3   :  { %v180_v8 = vld [vmem:[%s251_s0] sm:$0xff]  ;;  %v128_v29 = vld [vmem:[%s252_s2 + $0x8] sm:$0xff] }
   0x4   :  { %v53_v2 = vpack.c.b16 %v48_v1, %v48_v1  ;;  %v127_v14 = vld [vmem:[%s252_s2] sm:$0xff] }
   0x5   :  { %131 = vperm.xlu2 %188, %v127_v14  }
   0x6   :  { %v64_v3 = vsel %vm62_vm0, %v53_v2, 0 }
   0x7   :  { %69 = vmatpush.bf16.msra.mxu0 %v64_v3  ;;  %v192_v12 = vpop.eup %191 }
   0x8   :  { %v85_v13 = vmul.f32 128.0, %v192_v12  ;;  %vm89_vm2 = vweird.f32 %v192_v12 }
   0xa   :  { %v86_v16 = vsub.f32 1.0, %v85_v13 }
   0xb   :  { %70 = vmatpush.bf16.msra.mxu0 %v184_v4 }
   0xc   :  { %v87_v17 = vmul.f32 %v192_v12, %v86_v16 }
   0xd   :  { %136 = vperm.xlu2 %188, %v128_v29  }
   0xe   :  { %v88_v18 = vadd.f32 %v192_v12, %v87_v17 }
   0xf   :  { %71 = vmatpush.bf16.msra.mxu0 %v183_v5 }
  0x10   :  { %v90_v19 = vsel %vm89_vm2, %v192_v12, %v88_v18 }
  0x13   :  { %72 = vmatpush.bf16.msra.mxu0 %v182_v6 }
  0x17   :  { %73 = vmatpush.bf16.msra.mxu0 %v181_v7 }
  0x1a   :  { %179 = vmatmul.msk.bf16.vlgmr.msra.gmra.mxu0 %vm58_vm1, %v180_v8 }
  0x5f   :  { %v132_v45 = vpop.permute.xlu2 %131 }
  0x67   :  { %v137_v57 = vpop.permute.xlu2 %136 }
  0x97   :  { %v75_v9 = vpop.f32.mrf.mxu0 }
  0x98   :  { %80 = vadd.xlane.f32.xlu0 %v75_v9 }
  0x9f   :  { %v77_v10 = vpop.f32.mrf.mxu0 }
  0xa0   :  { %82 = vadd.xlane.f32.xlu0 %v77_v10 }
  0xb4   :  { %142 = vperm.xlu0 %189, %v127_v14  }
 0x10b   :  { %v81_v20 = vpop.xlane.xlu0 %80 }
 0x10c   :  { %v91_v21 = vmul.f32 %v90_v19, %v81_v20 }
 0x10e   :  { %v93_v22 = vsub.f32 %v75_v9, %v91_v21 }
 0x110   :  { %v95_v23 = vmul.f32 %v93_v22, %v93_v22 }
 0x112   :  { %97 = vadd.xlane.f32.xlu1 %v95_v23 }
 0x113   :  { %v83_v24 = vpop.xlane.xlu0 %82 }
 0x114   :  { %v92_v25 = vmul.f32 %v90_v19, %v83_v24 }
 0x116   :  { %v94_v27 = vsub.f32 %v77_v10, %v92_v25 }
 0x118   :  { %v96_v28 = vmul.f32 %v94_v27, %v94_v27 }
 0x11a   :  { %99 = vadd.xlane.f32.xlu1 %v96_v28 }
 0x126   :  { %v143_v49 = vpop.permute.xlu0 %142 }
 0x133   :  { %146 = vperm.xlu1 %190, %v128_v29  }
 0x185   :  { %v98_v30 = vpop.xlane.xlu1 %97 }
 0x186   :  { %v101_v31 = vmul.f32 %v98_v30, %v90_v19 }
 0x188   :  { %v103_v32 = vadd.f32 1e-05, %v101_v31 }
 0x18a   :  { %193 = vrsqrt.f32 %v103_v32  ;;  %vm111_vm4 = vweird.f32 %v103_v32 }
 0x18d   :  { %v100_v33 = vpop.xlane.xlu1 %99 }
 0x18e   :  { %v102_v34 = vmul.f32 %v100_v33, %v90_v19 }
 0x190   :  { %v194_v35 = vpop.eup %193  ;;  %v104_v36 = vadd.f32 1e-05, %v102_v34 }
 0x191   :  { %v106_v37 = vmul.f32 %v194_v35, %v103_v32  ;;  %vm112_vm3 = vweird.f32 %v194_v35 }
 0x192   :  { %195 = vrsqrt.f32 %v104_v36  ;;  %vm113_vm5 = vmor %vm111_vm4, %vm112_vm3  ;;  %vm121_vm7 = vweird.f32 %v104_v36 }
 0x193   :  { %v107_v38 = vmul.f32 %v194_v35, %v106_v37 }
 0x195   :  { %v108_v39 = vmul.f32 0.5, %v107_v38 }
 0x197   :  { %v109_v40 = vsub.f32 1.5, %v108_v39 }
 0x198   :  { %v196_v41 = vpop.eup %195 }
 0x199   :  { %v116_v42 = vmul.f32 %v196_v41, %v104_v36  ;;  %v110_v43 = vmul.f32 %v194_v35, %v109_v40  ;;  %vm122_vm6 = vweird.f32 %v196_v41 }
 0x19a   :  { %vm123_vm8 = vmor %vm121_vm7, %vm122_vm6 }
 0x19b   :  { %v117_v44 = vmul.f32 %v196_v41, %v116_v42  ;;  %v114_v46 = vsel %vm113_vm5, %v194_v35, %v110_v43 }
 0x19c   :  { %v125_v47 = vmul.f32 %v114_v46, %v93_v22 }
 0x19d   :  { %v118_v48 = vmul.f32 0.5, %v117_v44 }
 0x19e   :  { %v139_v50 = vmul.f32 %v132_v45, %v125_v47 }
 0x19f   :  { %v119_v51 = vsub.f32 1.5, %v118_v48 }
 0x1a0   :  { %v149_v52 = vadd.f32 %v143_v49, %v139_v50 }
 0x1a1   :  { %v120_v53 = vmul.f32 %v196_v41, %v119_v51 }
 0x1a2   :  { %v151_v54 = vmax.f32 %v149_v52, 0.0 }
 0x1a3   :  { %v124_v55 = vsel %vm123_vm8, %v196_v41, %v120_v53 }
 0x1a4   :  { %v126_v56 = vmul.f32 %v124_v55, %v94_v27  ;;  %153 = vst [vmem:[%s253_s3] sm:$0xff] %v151_v54 }
 0x1a5   :  { %v147_v58 = vpop.permute.xlu1 %146 }
 0x1a6   :  { %v140_v59 = vmul.f32 %v137_v57, %v126_v56 }
 0x1a8   :  { %v150_v60 = vadd.f32 %v147_v58, %v140_v59 }
 0x1aa   :  { %v152_v61 = vmax.f32 %v150_v60, 0.0 }
 0x1ac   :  { %154 = vst [vmem:[%s253_s3 + $0x8] sm:$0xff] %v152_v61 }

// kernel: transformer_unet_forward.35
= control target key start
LH: loop header
LB: loop body
LE: loop exit
PB: predicated region body
PF: predicated region fallthrough
CT: control target
= control target key end

     0   :  { %vm98_vm0 = vcmask 130048   ;;  %v277_v21 = vmov 128.0   ;;  %v278_v25 = vmov 1   ;;  %v279_v36 = vmov 0   ;;  %s351_s1 = inlined_call_operand.vmem [shape: bf16[144,128], index: 1, kind: input, shape index: {}]   ;;  %s352_s0 = inlined_call_operand.vmem [shape: bf16[16,144], index: 0, kind: input, shape index: {}]   ;;  %s353_s2 = inlined_call_operand.vmem [shape: f32[16,2], index: 2, kind: input, shape index: {}]   ;;  %s354_s3 = inlined_call_operand.vmem [shape: f32[16,128], index: 3, kind: output, shape index: {}]  }
   0x1   :  { %v263_v0 = vld [vmem:[%s351_s1 + $0x38] sm:$0xff]  ;;  %v262_v1 = vld [vmem:[%s351_s1 + $0x30] sm:$0xff]  ;;  %v264_v2 = vld [vmem:[%s351_s1 + $0x40] sm:$0xff]  ;;  %271 = vrcp.f32 %v277_v21  ;;  %269 = vset.pattern.permute.xlu0 %v278_v25  ;;  %270 = vset.pattern.permute.xlu1 %v278_v25 }
   0x2   :  { %102 = vmatpush.bf16.msra.mxu0 %v263_v0  ;;  %v254_v3 = vld [vmem:[%s352_s0 + $0x4] sm:$0xf]  ;;  %v213_v4 = vld [vmem:[%s352_s0 + $0x8] sm:$0xf0]  ;;  %123 = vmatpush.bf16.msra.mxu1 %v264_v2  ;;  %v259_v8 = vld [vmem:[%s351_s1 + $0x18] sm:$0xff] }
   0x3   :  { %v216_v5 = vor.u32 %v254_v3, %v213_v4  ;;  %v261_v6 = vld [vmem:[%s351_s1 + $0x28] sm:$0xff]  ;;  %v260_v7 = vld [vmem:[%s351_s1 + $0x20] sm:$0xff]  ;;  %v258_v9 = vld [vmem:[%s351_s1 + $0x10] sm:$0xff]  ;;  %268 = vset.pattern.permute.xlu2 %v279_v36 }
   0x4   :  { %v257_v10 = vld [vmem:[%s351_s1 + $0x8] sm:$0xff]  ;;  %v256_v11 = vld [vmem:[%s351_s1] sm:$0xff] }
   0x5   :  { %253 = vmatmul.msk.bf16.vlgmr.msra.gmra.mxu1 %vm98_vm0, %v216_v5  ;;  %v211_v12 = vld [vmem:[%s352_s0] sm:$0xf]  ;;  %v255_v13 = vld [vmem:[%s352_s0 + $0x4] sm:$0xf0] }
   0x6   :  { %103 = vmatpush.bf16.msra.mxu0 %v262_v1  ;;  %v212_v14 = vor.u32 %v255_v13, %v211_v12  ;;  %v177_v24 = vld [vmem:[%s353_s2] sm:$0xff]  ;;  %v178_v39 = vld [vmem:[%s353_s2 + $0x8] sm:$0xff] }
   0x7   :  { %v272_v22 = vpop.eup %271  ;;  %181 = vperm.xlu2 %268, %v177_v24  }
   0x8   :  { %v135_v23 = vmul.f32 128.0, %v272_v22  ;;  %vm139_vm1 = vweird.f32 %v272_v22 }
   0xa   :  { %104 = vmatpush.bf16.msra.mxu0 %v261_v6  ;;  %v136_v26 = vsub.f32 1.0, %v135_v23 }
   0xc   :  { %v137_v27 = vmul.f32 %v272_v22, %v136_v26 }
   0xe   :  { %105 = vmatpush.bf16.msra.mxu0 %v260_v7  ;;  %v138_v28 = vadd.f32 %v272_v22, %v137_v27 }
   0xf   :  { %186 = vperm.xlu2 %268, %v178_v39  }
  0x10   :  { %v140_v29 = vsel %vm139_vm1, %v272_v22, %v138_v28 }
  0x12   :  { %106 = vmatpush.bf16.msra.mxu0 %v259_v8 }
  0x16   :  { %107 = vmatpush.bf16.msra.mxu0 %v258_v9 }
  0x1a   :  { %108 = vmatpush.bf16.msra.mxu0 %v257_v10 }
  0x1e   :  { %109 = vmatpush.bf16.msra.mxu0 %v256_v11 }
  0x21   :  { %110 = vmatmul.bf16.vlgmr.msra.gmra.mxu0 %v212_v14 }
  0x61   :  { %v182_v55 = vpop.permute.xlu2 %181 }
  0x69   :  { %v187_v3 = vpop.permute.xlu2 %186 }
  0x82   :  { %v125_v15 = vpop.f32.mrf.mxu1 }
  0x8a   :  { %v127_v18 = vpop.f32.mrf.mxu1 }
  0x9e   :  { %v111_v16 = vpop.f32.mrf.mxu0 }
  0x9f   :  { %v126_v17 = vadd.f32 %v125_v15, %v111_v16 }
  0xa1   :  { %130 = vadd.xlane.f32.xlu0 %v126_v17 }
  0xa6   :  { %v113_v19 = vpop.f32.mrf.mxu0 }
  0xa7   :  { %v128_v20 = vadd.f32 %v127_v18, %v113_v19 }
  0xa9   :  { %132 = vadd.xlane.f32.xlu0 %v128_v20 }
  0xbd   :  { %192 = vperm.xlu0 %269, %v177_v24  }
 0x114   :  { %v131_v30 = vpop.xlane.xlu0 %130 }
 0x115   :  { %v141_v31 = vmul.f32 %v140_v29, %v131_v30 }
 0x117   :  { %v143_v32 = vsub.f32 %v126_v17, %v141_v31 }
 0x119   :  { %v145_v33 = vmul.f32 %v143_v32, %v143_v32 }
 0x11b   :  { %147 = vadd.xlane.f32.xlu1 %v145_v33 }
 0x11c   :  { %v133_v34 = vpop.xlane.xlu0 %132 }
 0x11d   :  { %v142_v35 = vmul.f32 %v140_v29, %v133_v34 }
 0x11f   :  { %v144_v37 = vsub.f32 %v128_v20, %v142_v35 }
 0x121   :  { %v146_v38 = vmul.f32 %v144_v37, %v144_v37 }
 0x123   :  { %149 = vadd.xlane.f32.xlu1 %v146_v38 }
 0x12f   :  { %v193_v59 = vpop.permute.xlu0 %192 }
 0x13c   :  { %196 = vperm.xlu1 %270, %v178_v39  }
 0x18e   :  { %v148_v40 = vpop.xlane.xlu1 %147 }
 0x18f   :  { %v151_v41 = vmul.f32 %v148_v40, %v140_v29 }
 0x191   :  { %v153_v42 = vadd.f32 1e-05, %v151_v41 }
 0x193   :  { %273 = vrsqrt.f32 %v153_v42  ;;  %vm161_vm3 = vweird.f32 %v153_v42 }
 0x196   :  { %v150_v43 = vpop.xlane.xlu1 %149 }
 0x197   :  { %v152_v44 = vmul.f32 %v150_v43, %v140_v29 }
 0x199   :  { %v274_v45 = vpop.eup %273  ;;  %v154_v46 = vadd.f32 1e-05, %v152_v44 }
 0x19a   :  { %v156_v47 = vmul.f32 %v274_v45, %v153_v42  ;;  %vm162_vm2 = vweird.f32 %v274_v45 }
 0x19b   :  { %275 = vrsqrt.f32 %v154_v46  ;;  %vm163_vm4 = vmor %vm161_vm3, %vm162_vm2  ;;  %vm171_vm6 = vweird.f32 %v154_v46 }
 0x19c   :  { %v157_v48 = vmul.f32 %v274_v45, %v156_v47 }
 0x19e   :  { %v158_v49 = vmul.f32 0.5, %v157_v48 }
 0x1a0   :  { %v159_v50 = vsub.f32 1.5, %v158_v49 }
 0x1a1   :  { %v276_v51 = vpop.eup %275 }
 0x1a2   :  { %v166_v52 = vmul.f32 %v276_v51, %v154_v46  ;;  %v160_v53 = vmul.f32 %v274_v45, %v159_v50  ;;  %vm172_vm5 = vweird.f32 %v276_v51 }
 0x1a3   :  { %vm173_vm7 = vmor %vm171_vm6, %vm172_vm5 }
 0x1a4   :  { %v167_v54 = vmul.f32 %v276_v51, %v166_v52  ;;  %v164_v56 = vsel %vm163_vm4, %v274_v45, %v160_v53 }
 0x1a5   :  { %v175_v57 = vmul.f32 %v164_v56, %v143_v32 }
 0x1a6   :  { %v168_v58 = vmul.f32 0.5, %v167_v54 }
 0x1a7   :  { %v189_v60 = vmul.f32 %v182_v55, %v175_v57 }
 0x1a8   :  { %v169_v61 = vsub.f32 1.5, %v168_v58 }
 0x1a9   :  { %v199_v62 = vadd.f32 %v193_v59, %v189_v60 }
 0x1aa   :  { %v170_v63 = vmul.f32 %v276_v51, %v169_v61 }
 0x1ab   :  { %v201_v0 = vmax.f32 %v199_v62, 0.0 }
 0x1ac   :  { %v174_v1 = vsel %vm173_vm7, %v276_v51, %v170_v63 }
 0x1ad   :  { %v176_v2 = vmul.f32 %v174_v1, %v144_v37  ;;  %203 = vst [vmem:[%s354_s3] sm:$0xff] %v201_v0 }
 0x1ae   :  { %v197_v4 = vpop.permute.xlu1 %196 }
 0x1af   :  { %v190_v5 = vmul.f32 %v187_v3, %v176_v2 }
 0x1b1   :  { %v200_v6 = vadd.f32 %v197_v4, %v190_v5 }
 0x1b3   :  { %v202_v7 = vmax.f32 %v200_v6, 0.0 }
 0x1b5   :  { %204 = vst [vmem:[%s354_s3 + $0x8] sm:$0xff] %v202_v7 }

// kernel: transformer_unet_forward.36
= control target key start
LH: loop header
LB: loop body
LE: loop exit
PB: predicated region body
PF: predicated region fallthrough
CT: control target
= control target key end

     0   :  { %vm109_vm0 = vcmask 130048   ;;  %v404_v23 = vmov 0   ;;  %vm154_vm1 = vcmask 261120   ;;  %v405_v41 = vmov 1   ;;  %s542_s1 = inlined_call_operand.vmem [shape: bf16[144,32], index: 1, kind: input, shape index: {}]   ;;  %s543_s0 = inlined_call_operand.vmem [shape: bf16[32,144], index: 0, kind: input, shape index: {}]   ;;  %s544_s2 = inlined_call_operand.vmem [shape: f32[32,2], index: 2, kind: input, shape index: {}]   ;;  %s545_s3 = inlined_call_operand.vmem [shape: f32[32,32], index: 3, kind: output, shape index: {}]  }
   0x1   :  { %v375_v0 = vld [vmem:[%s542_s1 + $0x38] sm:$0xff]  ;;  %v376_v1 = vld [vmem:[%s542_s1 + $0x40] sm:$0xff]  ;;  %v374_v2 = vld [vmem:[%s542_s1 + $0x30] sm:$0xff]  ;;  %388 = vset.pattern.permute.xlu2 %v404_v23  ;;  %390 = vset.pattern.permute.xlu1 %v404_v23  ;;  %v406_v42 = vmov 32.0  }
   0x2   :  { %116 = vmatpush.bf16.msra.mxu0 %v375_v0  ;;  %377 = vmatpush.bf16.msra.mxu2 %v375_v0  ;;  %v364_v3 = vld [vmem:[%s543_s0 + $0x4] sm:$0xf]  ;;  %v314_v4 = vld [vmem:[%s543_s0 + $0x8] sm:$0xf0]  ;;  %v371_v8 = vld [vmem:[%s542_s1 + $0x18] sm:$0xff]  ;;  %394 = vrcp.f32 %v406_v42 }
   0x3   :  { %142 = vmatpush.bf16.msra.mxu1 %v376_v1  ;;  %v317_v5 = vor.u32 %v364_v3, %v314_v4  ;;  %v373_v6 = vld [vmem:[%s542_s1 + $0x28] sm:$0xff]  ;;  %v372_v7 = vld [vmem:[%s542_s1 + $0x20] sm:$0xff]  ;;  %v366_v9 = vld [vmem:[%s543_s0 + $0x14] sm:$0xf]  ;;  %389 = vset.pattern.permute.xlu0 %v404_v23 }
   0x4   :  { %v322_v10 = vld [vmem:[%s543_s0 + $0x18] sm:$0xf0]  ;;  %v370_v11 = vld [vmem:[%s542_s1 + $0x10] sm:$0xff]  ;;  %v369_v13 = vld [vmem:[%s542_s1 + $0x8] sm:$0xff] }
   0x5   :  { %v325_v12 = vor.u32 %v366_v9, %v322_v10  ;;  %v368_v14 = vld [vmem:[%s542_s1] sm:$0xff]  ;;  %v365_v16 = vld [vmem:[%s543_s0 + $0x4] sm:$0xf0]  ;;  %v320_v17 = vld [vmem:[%s543_s0 + $0x10] sm:$0xf] }
   0x6   :  { %117 = vmatpush.bf16.msra.mxu0 %v374_v2  ;;  %378 = vmatpush.bf16.msra.mxu2 %v374_v2  ;;  %v312_v15 = vld [vmem:[%s543_s0] sm:$0xf]  ;;  %v367_v18 = vld [vmem:[%s543_s0 + $0x14] sm:$0xf0]  ;;  %v252_v39 = vld [vmem:[%s544_s2 + $0x10] sm:$0xff] }
   0x7   :  { %362 = vmatmul.msk.bf16.vlgmr.msra.gmra.mxu1 %vm109_vm0, %v317_v5  ;;  %v313_v19 = vor.u32 %v365_v16, %v312_v15  ;;  %v321_v20 = vor.u32 %v367_v18, %v320_v17  ;;  %v250_v22 = vld [vmem:[%s544_s2] sm:$0xff]  ;;  %v251_v40 = vld [vmem:[%s544_s2 + $0x8] sm:$0xff]  ;;  %v253_v0 = vld [vmem:[%s544_s2 + $0x18] sm:$0xff] }
   0x8   :  { %256 = vperm.xlu2 %388, %v250_v22   ;;  %v395_v43 = vpop.eup %394 }
   0x9   :  { %v168_v44 = vmul.f32 32.0, %v395_v43  ;;  %vm172_vm2 = vweird.f32 %v395_v43 }
   0xa   :  { %118 = vmatpush.bf16.msra.mxu0 %v373_v6  ;;  %379 = vmatpush.bf16.msra.mxu2 %v373_v6 }
   0xb   :  { %v169_v45 = vsub.f32 1.0, %v168_v44 }
   0xd   :  { %v170_v46 = vmul.f32 %v395_v43, %v169_v45 }
   0xe   :  { %119 = vmatpush.bf16.msra.mxu0 %v372_v7  ;;  %380 = vmatpush.bf16.msra.mxu2 %v372_v7 }
   0xf   :  { %v171_v47 = vadd.f32 %v395_v43, %v170_v46 }
  0x11   :  { %v493_v48 = vsel %vm172_vm2, %v395_v43, %v171_v47 }
  0x12   :  { %120 = vmatpush.bf16.msra.mxu0 %v371_v8  ;;  %381 = vmatpush.bf16.msra.mxu2 %v371_v8 }
  0x16   :  { %121 = vmatpush.bf16.msra.mxu0 %v370_v11  ;;  %382 = vmatpush.bf16.msra.mxu2 %v370_v11 }
  0x17   :  { %363 = vmatmul.msk.bf16.gmra.mxu1 %vm109_vm0, %v325_v12 }
  0x1a   :  { %122 = vmatpush.bf16.msra.mxu0 %v369_v13  ;;  %383 = vmatpush.bf16.msra.mxu2 %v369_v13 }
  0x1e   :  { %123 = vmatpush.bf16.msra.mxu0 %v368_v14  ;;  %384 = vmatpush.bf16.msra.mxu2 %v368_v14 }
  0x21   :  { %124 = vmatmul.bf16.vlgmr.msra.gmra.mxu0 %v313_v19  ;;  %129 = vmatmul.bf16.vlgmr.msra.gmra.mxu2 %v321_v20 }
  0x62   :  { %v257_v6 = vpop.permute.xlu2 %256 }
  0x84   :  { %v144_v21 = vpop.f32.mrf.mxu1 }
  0x8c   :  { %v146_v24 = vpop.f32.mrf.mxu1 }
  0x94   :  { %v149_v27 = vpop.f32.mrf.mxu1 }
  0x9c   :  { %v151_v35 = vpop.f32.mrf.mxu1 }
  0x9e   :  { %v125_v25 = vpop.f32.mrf.mxu0 }
  0x9f   :  { %v145_v26 = vadd.f32 %v144_v21, %v125_v25 }
  0xa1   :  { %v155_v28 = vsel %vm154_vm1, %v145_v26, 0.0 }
  0xa2   :  { %156 = vadd.xlane.f32.xlu0 %v155_v28 }
  0xa4   :  { %v130_v29 = vpop.f32.mrf.mxu2 }
  0xa5   :  { %v150_v30 = vadd.f32 %v149_v27, %v130_v29 }
  0xa6   :  { %v127_v31 = vpop.f32.mrf.mxu0 }
  0xa7   :  { %v147_v32 = vadd.f32 %v146_v24, %v127_v31  ;;  %v161_v33 = vsel %vm154_vm1, %v150_v30, 0.0 }
  0xa8   :  { %162 = vadd.xlane.f32.xlu1 %v161_v33 }
  0xa9   :  { %v158_v34 = vsel %vm154_vm1, %v147_v32, 0.0 }
  0xaa   :  { %159 = vadd.xlane.f32.xlu0 %v158_v34 }
  0xac   :  { %v132_v36 = vpop.f32.mrf.mxu2 }
  0xad   :  { %v152_v37 = vadd.f32 %v151_v35, %v132_v36 }
  0xaf   :  { %v164_v38 = vsel %vm154_vm1, %v152_v37, 0.0 }
  0xb0   :  { %165 = vadd.xlane.f32.xlu1 %v164_v38 }
  0xc9   :  { %266 = vperm.xlu1 %390, %v252_v39  }
  0xd1   :  { %392 = vset.pattern.permute.xlu1 %v405_v41 }
  0xd2   :  { %283 = vperm.xlu1 %392, %v251_v40  }
 0x115   :  { %v157_v49 = vpop.xlane.xlu0 %156 }
 0x116   :  { %v174_v50 = vmul.f32 %v493_v48, %v157_v49 }
 0x118   :  { %v178_v51 = vsub.f32 %v145_v26, %v174_v50 }
 0x11a   :  { %v182_v52 = vmul.f32 %v178_v51, %v178_v51 }
 0x11b   :  { %v163_v53 = vpop.xlane.xlu1 %162 }
 0x11c   :  { %v176_v54 = vmul.f32 %v493_v48, %v163_v53  ;;  %v186_v55 = vsel %vm154_vm1, %v182_v52, 0.0 }
 0x11d   :  { %187 = vadd.xlane.f32.xlu2 %v186_v55  ;;  %v160_v1 = vpop.xlane.xlu0 %159 }
 0x11e   :  { %v498_v56 = vsub.f32 %v150_v30, %v176_v54  ;;  %v175_v2 = vmul.f32 %v493_v48, %v160_v1 }
 0x120   :  { %v184_v57 = vmul.f32 %v498_v56, %v498_v56  ;;  %v509_v3 = vsub.f32 %v147_v32, %v175_v2 }
 0x122   :  { %v192_v58 = vsel %vm154_vm1, %v184_v57, 0.0  ;;  %v183_v4 = vmul.f32 %v509_v3, %v509_v3 }
 0x123   :  { %v166_v59 = vpop.xlane.xlu1 %165  ;;  %193 = vadd.xlane.f32.xlu0 %v192_v58 }
 0x124   :  { %v177_v60 = vmul.f32 %v493_v48, %v166_v59  ;;  %v189_v5 = vsel %vm154_vm1, %v183_v4, 0.0 }
 0x126   :  { %v181_v61 = vsub.f32 %v152_v37, %v177_v60 }
 0x128   :  { %v185_v62 = vmul.f32 %v181_v61, %v181_v61 }
 0x12a   :  { %v195_v63 = vsel %vm154_vm1, %v185_v62, 0.0 }
 0x12b   :  { %196 = vadd.xlane.f32.xlu1 %v195_v63 }
 0x135   :  { %271 = vperm.xlu2 %388, %v253_v0  }
 0x137   :  { %261 = vperm.xlu0 %389, %v251_v40  }
 0x13b   :  { %v514_v7 = vpop.permute.xlu1 %266 }
 0x13d   :  { %391 = vset.pattern.permute.xlu2 %v405_v41 }
 0x13e   :  { %279 = vperm.xlu2 %391, %v250_v22  }
 0x13f   :  { %393 = vset.pattern.permute.xlu0 %v405_v41 }
 0x144   :  { %291 = vperm.xlu1 %392, %v253_v0   ;;  %v517_v11 = vpop.permute.xlu1 %283 }
 0x167   :  { %190 = vadd.xlane.f32.xlu2 %v189_v5 }
 0x17f   :  { %287 = vperm.xlu2 %391, %v252_v39  }
 0x190   :  { %v188_v8 = vpop.xlane.xlu2 %187 }
 0x191   :  { %v198_v9 = vmul.f32 %v188_v8, %v493_v48 }
 0x193   :  { %v202_v10 = vadd.f32 1e-05, %v198_v9 }
 0x195   :  { %396 = vrsqrt.f32 %v202_v10  ;;  %vm212_vm4 = vweird.f32 %v202_v10 }
 0x196   :  { %v194_v33 = vpop.xlane.xlu0 %193 }
 0x197   :  { %v200_v36 = vmul.f32 %v194_v33, %v493_v48 }
 0x198   :  { %v272_v18 = vpop.permute.xlu2 %271 }
 0x199   :  { %v204_v40 = vadd.f32 1e-05, %v200_v36 }
 0x19b   :  { %v397_v12 = vpop.eup %396  ;;  %vm232_vm10 = vweird.f32 %v204_v40 }
 0x19c   :  { %v207_v13 = vmul.f32 %v397_v12, %v202_v10  ;;  %vm213_vm3 = vweird.f32 %v397_v12 }
 0x19d   :  { %vm214_vm5 = vmor %vm212_vm4, %vm213_vm3 }
 0x19e   :  { %v208_v14 = vmul.f32 %v397_v12, %v207_v13  ;;  %v197_v15 = vpop.xlane.xlu1 %196 }
 0x19f   :  { %v201_v16 = vmul.f32 %v197_v15, %v493_v48 }
 0x1a0   :  { %v209_v17 = vmul.f32 0.5, %v208_v14  ;;  %v280_v27 = vpop.permute.xlu2 %279 }
 0x1a1   :  { %v205_v19 = vadd.f32 1e-05, %v201_v16 }
 0x1a2   :  { %v210_v20 = vsub.f32 1.5, %v209_v17 }
 0x1a3   :  { %398 = vrsqrt.f32 %v205_v19  ;;  %vm242_vm7 = vweird.f32 %v205_v19 }
 0x1a4   :  { %v211_v21 = vmul.f32 %v397_v12, %v210_v20  ;;  %400 = vrsqrt.f32 %v204_v40 }
 0x1a6   :  { %v215_v22 = vsel %vm214_vm5, %v397_v12, %v211_v21 }
 0x1a7   :  { %v246_v23 = vmul.f32 %v215_v22, %v178_v51 }
 0x1a9   :  { %v399_v24 = vpop.eup %398  ;;  %v274_v25 = vmul.f32 %v257_v6, %v246_v23  ;;  %v262_v1 = vpop.permute.xlu0 %261 }
 0x1aa   :  { %v237_v26 = vmul.f32 %v399_v24, %v205_v19  ;;  %vm243_vm6 = vweird.f32 %v399_v24  ;;  %v401_v43 = vpop.eup %400 }
 0x1ab   :  { %v294_v28 = vadd.f32 %v280_v27, %v274_v25  ;;  %vm244_vm8 = vmor %vm242_vm7, %vm243_vm6  ;;  %v227_v44 = vmul.f32 %v401_v43, %v204_v40  ;;  %vm233_vm9 = vweird.f32 %v401_v43 }
 0x1ac   :  { %v238_v29 = vmul.f32 %v399_v24, %v237_v26  ;;  %vm234_vm11 = vmor %vm232_vm10, %vm233_vm9 }
 0x1ad   :  { %v298_v30 = vmax.f32 %v294_v28, 0.0  ;;  %v228_v45 = vmul.f32 %v401_v43, %v227_v44 }
 0x1ae   :  { %v239_v31 = vmul.f32 0.5, %v238_v29 }
 0x1af   :  { %302 = vst.msk [vmem:[%s545_s3] sm:$0xff] %vm154_vm1, %v298_v30  ;;  %v229_v46 = vmul.f32 0.5, %v228_v45 }
 0x1b0   :  { %v240_v32 = vsub.f32 1.5, %v239_v31 }
 0x1b1   :  { %v230_v47 = vsub.f32 1.5, %v229_v46 }
 0x1b2   :  { %v241_v34 = vmul.f32 %v399_v24, %v240_v32 }
 0x1b3   :  { %v231_v49 = vmul.f32 %v401_v43, %v230_v47 }
 0x1b4   :  { %v245_v35 = vsel %vm244_vm8, %v399_v24, %v241_v34 }
 0x1b5   :  { %v249_v37 = vmul.f32 %v245_v35, %v181_v61  ;;  %v235_v51 = vsel %vm234_vm11, %v401_v43, %v231_v49 }
 0x1b6   :  { %v292_v39 = vpop.permute.xlu1 %291  ;;  %v248_v54 = vmul.f32 %v235_v51, %v498_v56 }
 0x1b7   :  { %v277_v38 = vmul.f32 %v272_v18, %v249_v37 }
 0x1b8   :  { %v276_v55 = vmul.f32 %v514_v7, %v248_v54 }
 0x1b9   :  { %v297_v41 = vadd.f32 %v292_v39, %v277_v38 }
 0x1bb   :  { %v301_v42 = vmax.f32 %v297_v41, 0.0 }
 0x1bd   :  { %305 = vst.msk [vmem:[%s545_s3 + $0x18] sm:$0xff] %vm154_vm1, %v301_v42 }
 0x1da   :  { %v191_v50 = vpop.xlane.xlu2 %190 }
 0x1db   :  { %v199_v52 = vmul.f32 %v191_v50, %v493_v48 }
 0x1dd   :  { %v203_v53 = vadd.f32 1e-05, %v199_v52 }
 0x1df   :  { %402 = vrsqrt.f32 %v203_v53  ;;  %vm222_vm13 = vweird.f32 %v203_v53 }
 0x1e2   :  { %v288_v57 = vpop.permute.xlu2 %287 }
 0x1e3   :  { %v296_v58 = vadd.f32 %v288_v57, %v276_v55 }
 0x1e5   :  { %v403_v59 = vpop.eup %402  ;;  %v300_v60 = vmax.f32 %v296_v58, 0.0 }
 0x1e6   :  { %v217_v61 = vmul.f32 %v403_v59, %v203_v53  ;;  %vm223_vm12 = vweird.f32 %v403_v59 }
 0x1e7   :  { %304 = vst.msk [vmem:[%s545_s3 + $0x10] sm:$0xff] %vm154_vm1, %v300_v60  ;;  %vm224_vm14 = vmor %vm222_vm13, %vm223_vm12 }
 0x1e8   :  { %v218_v62 = vmul.f32 %v403_v59, %v217_v61 }
 0x1ea   :  { %v219_v63 = vmul.f32 0.5, %v218_v62 }
 0x1ec   :  { %v220_v0 = vsub.f32 1.5, %v219_v63 }
 0x1ee   :  { %v221_v48 = vmul.f32 %v403_v59, %v220_v0 }
 0x1f0   :  { %v225_v56 = vsel %vm224_vm14, %v403_v59, %v221_v48 }
 0x1f1   :  { %v247_v2 = vmul.f32 %v225_v56, %v509_v3 }
 0x1f3   :  { %v275_v4 = vmul.f32 %v262_v1, %v247_v2 }
 0x1f5   :  { %v295_v5 = vadd.f32 %v517_v11, %v275_v4 }
 0x1f7   :  { %v299_v6 = vmax.f32 %v295_v5, 0.0 }
 0x1f9   :  { %303 = vst.msk [vmem:[%s545_s3 + $0x8] sm:$0xff] %vm154_vm1, %v299_v6 }

// kernel: transformer_unet_forward.37
= control target key start
LH: loop header
LB: loop body
LE: loop exit
PB: predicated region body
PF: predicated region fallthrough
CT: control target
= control target key end

     0   :  { %vm197_vm0 = vcmask 261120   ;;  %v565_v38 = vmov 0   ;;  %s751_s1 = inlined_call_operand.vmem [shape: bf16[288,32], index: 1, kind: input, shape index: {}]   ;;  %s752_s0 = inlined_call_operand.vmem [shape: bf16[32,288], index: 0, kind: input, shape index: {}]   ;;  %s753_s2 = inlined_call_operand.vmem [shape: f32[32,2], index: 2, kind: input, shape index: {}]   ;;  %s754_s3 = inlined_call_operand.vmem [shape: f32[32,32], index: 3, kind: output, shape index: {}]  }
   0x1   :  { %v527_v0 = vld [vmem:[%s751_s1 + $0x38] sm:$0xff]  ;;  %v526_v2 = vld [vmem:[%s751_s1 + $0x30] sm:$0xff]  ;;  %v537_v4 = vld [vmem:[%s751_s1 + $0x88] sm:$0xff]  ;;  %549 = vset.pattern.permute.xlu2 %v565_v38  ;;  %551 = vset.pattern.permute.xlu1 %v565_v38 }
   0x2   :  { %v535_v1 = vld [vmem:[%s751_s1 + $0x78] sm:$0xff]  ;;  %204 = vmatpush.bf16.msra.mxu0 %v527_v0  ;;  %v534_v3 = vld [vmem:[%s751_s1 + $0x70] sm:$0xff]  ;;  %538 = vmatpush.bf16.msra.mxu3 %v527_v0  ;;  %v536_v5 = vld [vmem:[%s751_s1 + $0x80] sm:$0xff]  ;;  %v566_v0 = vmov 1  }
   0x3   :  { %223 = vmatpush.bf16.msra.mxu1 %v535_v1  ;;  %248 = vmatpush.bf16.msra.mxu2 %v537_v4  ;;  %v426_v6 = vld [vmem:[%s752_s0 + $0x8] sm:$0xf]  ;;  %v516_v7 = vld [vmem:[%s752_s0 + $0x10] sm:$0xf0]  ;;  %v524_v11 = vld [vmem:[%s751_s1 + $0x20] sm:$0xff]  ;;  %v567_v1 = vmov 32.0  }
   0x4   :  { %v525_v8 = vld [vmem:[%s751_s1 + $0x28] sm:$0xff]  ;;  %v427_v10 = vor.u32 %v516_v7, %v426_v6  ;;  %v532_v12 = vld [vmem:[%s751_s1 + $0x60] sm:$0xff]  ;;  %v523_v13 = vld [vmem:[%s751_s1 + $0x18] sm:$0xff]  ;;  %550 = vset.pattern.permute.xlu0 %v565_v38  ;;  %555 = vrcp.f32 %v567_v1 }
   0x5   :  { %v533_v9 = vld [vmem:[%s751_s1 + $0x68] sm:$0xff]  ;;  %v531_v14 = vld [vmem:[%s751_s1 + $0x58] sm:$0xff]  ;;  %v522_v15 = vld [vmem:[%s751_s1 + $0x10] sm:$0xff] }
   0x6   :  { %205 = vmatpush.bf16.msra.mxu0 %v526_v2  ;;  %539 = vmatpush.bf16.msra.mxu3 %v526_v2  ;;  %v530_v16 = vld [vmem:[%s751_s1 + $0x50] sm:$0xff]  ;;  %v438_v17 = vld [vmem:[%s752_s0 + $0x20] sm:$0xf]  ;;  %v519_v18 = vld [vmem:[%s752_s0 + $0x28] sm:$0xf0] }
   0x7   :  { %224 = vmatpush.bf16.msra.mxu1 %v534_v3  ;;  %249 = vmatpush.bf16.msra.mxu2 %v536_v5  ;;  %v521_v19 = vld [vmem:[%s751_s1 + $0x8] sm:$0xff]  ;;  %v439_v21 = vor.u32 %v519_v18, %v438_v17  ;;  %v520_v22 = vld [vmem:[%s751_s1] sm:$0xff]  ;;  %v420_v27 = vld [vmem:[%s752_s0 + $0xc] sm:$0xf0] }
   0x8   :  { %v529_v20 = vld [vmem:[%s751_s1 + $0x48] sm:$0xff]  ;;  %v528_v23 = vld [vmem:[%s751_s1 + $0x40] sm:$0xff]  ;;  %v430_v28 = vld [vmem:[%s752_s0 + $0x18] sm:$0xf] }
   0x9   :  { %v418_v24 = vld [vmem:[%s752_s0] sm:$0xf]  ;;  %v515_v25 = vld [vmem:[%s752_s0 + $0x8] sm:$0xf0]  ;;  %v514_v26 = vld [vmem:[%s752_s0 + $0x4] sm:$0xf] }
   0xa   :  { %206 = vmatpush.bf16.msra.mxu0 %v525_v8  ;;  %540 = vmatpush.bf16.msra.mxu3 %v525_v8  ;;  %v518_v29 = vld [vmem:[%s752_s0 + $0x20] sm:$0xf0]  ;;  %v419_v30 = vor.u32 %v515_v25, %v418_v24  ;;  %v423_v31 = vor.u32 %v514_v26, %v420_v27  ;;  %v517_v33 = vld [vmem:[%s752_s0 + $0x1c] sm:$0xf]  ;;  %v432_v34 = vld [vmem:[%s752_s0 + $0x24] sm:$0xf0]  ;;  %v556_v2 = vpop.eup %555 }
   0xb   :  { %225 = vmatpush.bf16.msra.mxu1 %v533_v9  ;;  %512 = vmatmul.msk.bf16.vlgmr.msra.gmra.mxu2 %vm197_vm0, %v427_v10  ;;  %v431_v32 = vor.u32 %v518_v29, %v430_v28  ;;  %v435_v35 = vor.u32 %v517_v33, %v432_v34  ;;  %v683_v37 = vld [vmem:[%s753_s2] sm:$0xff]  ;;  %v358_v62 = vld [vmem:[%s753_s2 + $0x10] sm:$0xff]  ;;  %v357_v63 = vld [vmem:[%s753_s2 + $0x8] sm:$0xff]  ;;  %v274_v3 = vmul.f32 32.0, %v556_v2  ;;  %vm278_vm1 = vweird.f32 %v556_v2 }
   0xc   :  { %362 = vperm.xlu2 %549, %v683_v37   ;;  %v359_v28 = vld [vmem:[%s753_s2 + $0x18] sm:$0xff] }
   0xd   :  { %v275_v4 = vsub.f32 1.0, %v274_v3 }
   0xe   :  { %207 = vmatpush.bf16.msra.mxu0 %v524_v11  ;;  %541 = vmatpush.bf16.msra.mxu3 %v524_v11 }
   0xf   :  { %226 = vmatpush.bf16.msra.mxu1 %v532_v12  ;;  %v276_v5 = vmul.f32 %v556_v2, %v275_v4 }
  0x11   :  { %v277_v6 = vadd.f32 %v556_v2, %v276_v5 }
  0x12   :  { %208 = vmatpush.bf16.msra.mxu0 %v523_v13  ;;  %542 = vmatpush.bf16.msra.mxu3 %v523_v13 }
  0x13   :  { %227 = vmatpush.bf16.msra.mxu1 %v531_v14  ;;  %v696_v7 = vsel %vm278_vm1, %v556_v2, %v277_v6 }
  0x16   :  { %209 = vmatpush.bf16.msra.mxu0 %v522_v15  ;;  %543 = vmatpush.bf16.msra.mxu3 %v522_v15 }
  0x17   :  { %228 = vmatpush.bf16.msra.mxu1 %v530_v16 }
  0x1a   :  { %210 = vmatpush.bf16.msra.mxu0 %v521_v19  ;;  %544 = vmatpush.bf16.msra.mxu3 %v521_v19 }
  0x1b   :  { %229 = vmatpush.bf16.msra.mxu1 %v529_v20  ;;  %513 = vmatmul.msk.bf16.gmra.mxu2 %vm197_vm0, %v439_v21 }
  0x1e   :  { %211 = vmatpush.bf16.msra.mxu0 %v520_v22  ;;  %545 = vmatpush.bf16.msra.mxu3 %v520_v22 }
  0x1f   :  { %230 = vmatpush.bf16.msra.mxu1 %v528_v23 }
  0x21   :  { %212 = vmatmul.bf16.vlgmr.msra.gmra.mxu0 %v419_v30  ;;  %217 = vmatmul.bf16.vlgmr.msra.gmra.mxu3 %v431_v32 }
  0x22   :  { %231 = vmatmul.bf16.vlgmr.msra.gmra.mxu1 %v423_v31 }
  0x32   :  { %236 = vmatmul.bf16.gmra.mxu1 %v435_v35 }
  0x66   :  { %v363_v29 = vpop.permute.xlu2 %362 }
  0x8e   :  { %v251_v36 = vpop.f32.mrf.mxu2 }
  0x96   :  { %v253_v44 = vpop.f32.mrf.mxu2 }
  0x9e   :  { %v213_v39 = vpop.f32.mrf.mxu0  ;;  %v256_v51 = vpop.f32.mrf.mxu2 }
  0x9f   :  { %v232_v40 = vpop.f32.mrf.mxu1 }
  0xa0   :  { %v233_v41 = vadd.f32 %v232_v40, %v213_v39 }
  0xa2   :  { %v252_v42 = vadd.f32 %v251_v36, %v233_v41 }
  0xa4   :  { %v261_v43 = vsel %vm197_vm0, %v252_v42, 0.0  ;;  %v218_v50 = vpop.f32.mrf.mxu3 }
  0xa5   :  { %262 = vadd.xlane.f32.xlu0 %v261_v43 }
  0xa6   :  { %v215_v45 = vpop.f32.mrf.mxu0  ;;  %v258_v59 = vpop.f32.mrf.mxu2 }
  0xa7   :  { %v234_v46 = vpop.f32.mrf.mxu1 }
  0xa8   :  { %v235_v47 = vadd.f32 %v234_v46, %v215_v45 }
  0xaa   :  { %v254_v48 = vadd.f32 %v253_v44, %v235_v47 }
  0xac   :  { %v264_v49 = vsel %vm197_vm0, %v254_v48, 0.0  ;;  %v220_v56 = vpop.f32.mrf.mxu3 }
  0xad   :  { %265 = vadd.xlane.f32.xlu0 %v264_v49 }
  0xaf   :  { %v237_v52 = vpop.f32.mrf.mxu1 }
  0xb0   :  { %v238_v53 = vadd.f32 %v237_v52, %v218_v50 }
  0xb2   :  { %v257_v54 = vadd.f32 %v256_v51, %v238_v53 }
  0xb4   :  { %v267_v55 = vsel %vm197_vm0, %v257_v54, 0.0 }
  0xb5   :  { %268 = vadd.xlane.f32.xlu1 %v267_v55 }
  0xb7   :  { %v239_v57 = vpop.f32.mrf.mxu1 }
  0xb8   :  { %v240_v58 = vadd.f32 %v239_v57, %v220_v56 }
  0xba   :  { %v259_v60 = vadd.f32 %v258_v59, %v240_v58 }
  0xbc   :  { %v270_v61 = vsel %vm197_vm0, %v259_v60, 0.0 }
  0xbd   :  { %271 = vadd.xlane.f32.xlu1 %v270_v61 }
  0xd6   :  { %372 = vperm.xlu1 %551, %v358_v62  }
  0xde   :  { %553 = vset.pattern.permute.xlu1 %v566_v0 }
  0xdf   :  { %389 = vperm.xlu1 %553, %v357_v63  }
 0x118   :  { %v263_v8 = vpop.xlane.xlu0 %262 }
 0x119   :  { %v280_v9 = vmul.f32 %v696_v7, %v263_v8 }
 0x11b   :  { %v284_v10 = vsub.f32 %v252_v42, %v280_v9 }
 0x11d   :  { %v288_v11 = vmul.f32 %v284_v10, %v284_v10 }
 0x11f   :  { %v292_v12 = vsel %vm197_vm0, %v288_v11, 0.0 }
 0x120   :  { %293 = vadd.xlane.f32.xlu2 %v292_v12  ;;  %v266_v13 = vpop.xlane.xlu0 %265 }
 0x121   :  { %v281_v14 = vmul.f32 %v696_v7, %v266_v13 }
 0x123   :  { %v701_v15 = vsub.f32 %v254_v48, %v281_v14 }
 0x125   :  { %v289_v16 = vmul.f32 %v701_v15, %v701_v15 }
 0x127   :  { %v295_v17 = vsel %vm197_vm0, %v289_v16, 0.0 }
 0x128   :  { %v269_v18 = vpop.xlane.xlu1 %268  ;;  %296 = vadd.xlane.f32.xlu2 %v295_v17 }
 0x129   :  { %v282_v19 = vmul.f32 %v696_v7, %v269_v18 }
 0x12b   :  { %v707_v20 = vsub.f32 %v257_v54, %v282_v19 }
 0x12d   :  { %v290_v21 = vmul.f32 %v707_v20, %v707_v20 }
 0x12f   :  { %v298_v22 = vsel %vm197_vm0, %v290_v21, 0.0 }
 0x130   :  { %v272_v23 = vpop.xlane.xlu1 %271  ;;  %299 = vadd.xlane.f32.xlu0 %v298_v22 }
 0x131   :  { %v283_v24 = vmul.f32 %v696_v7, %v272_v23 }
 0x133   :  { %v713_v25 = vsub.f32 %v259_v60, %v283_v24 }
 0x135   :  { %v291_v26 = vmul.f32 %v713_v25, %v713_v25 }
 0x137   :  { %v301_v27 = vsel %vm197_vm0, %v291_v26, 0.0 }
 0x138   :  { %302 = vadd.xlane.f32.xlu1 %v301_v27 }
 0x140   :  { %377 = vperm.xlu2 %549, %v359_v28  }
 0x144   :  { %367 = vperm.xlu0 %550, %v357_v63  }
 0x148   :  { %552 = vset.pattern.permute.xlu2 %v566_v0  ;;  %v723_v33 = vpop.permute.xlu1 %372 }
 0x149   :  { %385 = vperm.xlu2 %552, %v683_v37  }
 0x14c   :  { %554 = vset.pattern.permute.xlu0 %v566_v0 }
 0x151   :  { %397 = vperm.xlu1 %553, %v359_v28   ;;  %393 = vperm.xlu2 %552, %v358_v62   ;;  %v390_v37 = vpop.permute.xlu1 %389 }
 0x193   :  { %v294_v30 = vpop.xlane.xlu2 %293 }
 0x194   :  { %v304_v31 = vmul.f32 %v294_v30, %v696_v7 }
 0x196   :  { %v308_v32 = vadd.f32 1e-05, %v304_v31 }
 0x198   :  { %557 = vrsqrt.f32 %v308_v32  ;;  %vm318_vm3 = vweird.f32 %v308_v32 }
 0x19b   :  { %v297_v34 = vpop.xlane.xlu2 %296 }
 0x19c   :  { %v305_v35 = vmul.f32 %v297_v34, %v696_v7 }
 0x19e   :  { %v558_v36 = vpop.eup %557  ;;  %v309_v38 = vadd.f32 1e-05, %v305_v35 }
 0x19f   :  { %v313_v39 = vmul.f32 %v558_v36, %v308_v32  ;;  %vm319_vm2 = vweird.f32 %v558_v36 }
 0x1a0   :  { %559 = vrsqrt.f32 %v309_v38  ;;  %vm320_vm4 = vmor %vm318_vm3, %vm319_vm2  ;;  %vm328_vm6 = vweird.f32 %v309_v38 }
 0x1a1   :  { %v314_v40 = vmul.f32 %v558_v36, %v313_v39 }
 0x1a3   :  { %v315_v41 = vmul.f32 0.5, %v314_v40  ;;  %v726_v42 = vpop.permute.xlu2 %377  ;;  %v300_v43 = vpop.xlane.xlu0 %299 }
 0x1a4   :  { %v306_v44 = vmul.f32 %v300_v43, %v696_v7 }
 0x1a5   :  { %v316_v45 = vsub.f32 1.5, %v315_v41 }
 0x1a6   :  { %v560_v46 = vpop.eup %559  ;;  %v310_v47 = vadd.f32 1e-05, %v306_v44 }
 0x1a7   :  { %v323_v48 = vmul.f32 %v560_v46, %v309_v38  ;;  %v317_v49 = vmul.f32 %v558_v36, %v316_v45  ;;  %vm329_vm5 = vweird.f32 %v560_v46 }
 0x1a8   :  { %561 = vrsqrt.f32 %v310_v47  ;;  %vm330_vm7 = vmor %vm328_vm6, %vm329_vm5  ;;  %vm338_vm9 = vweird.f32 %v310_v47 }
 0x1a9   :  { %v324_v50 = vmul.f32 %v560_v46, %v323_v48  ;;  %v321_v51 = vsel %vm320_vm4, %v558_v36, %v317_v49 }
 0x1aa   :  { %v352_v52 = vmul.f32 %v321_v51, %v284_v10 }
 0x1ab   :  { %v325_v53 = vmul.f32 0.5, %v324_v50  ;;  %v303_v54 = vpop.xlane.xlu1 %302  ;;  %v386_v55 = vpop.permute.xlu2 %385 }
 0x1ac   :  { %v307_v56 = vmul.f32 %v303_v54, %v696_v7  ;;  %v380_v57 = vmul.f32 %v363_v29, %v352_v52 }
 0x1ad   :  { %v326_v58 = vsub.f32 1.5, %v325_v53 }
 0x1ae   :  { %v562_v59 = vpop.eup %561  ;;  %v311_v60 = vadd.f32 1e-05, %v307_v56  ;;  %v400_v61 = vadd.f32 %v386_v55, %v380_v57 }
 0x1af   :  { %v333_v62 = vmul.f32 %v562_v59, %v310_v47  ;;  %v327_v63 = vmul.f32 %v560_v46, %v326_v58  ;;  %vm339_vm8 = vweird.f32 %v562_v59 }
 0x1b0   :  { %563 = vrsqrt.f32 %v311_v60  ;;  %v404_v0 = vmax.f32 %v400_v61, 0.0  ;;  %vm340_vm10 = vmor %vm338_vm9, %vm339_vm8  ;;  %vm348_vm12 = vweird.f32 %v311_v60 }
 0x1b1   :  { %v334_v1 = vmul.f32 %v562_v59, %v333_v62  ;;  %v331_v2 = vsel %vm330_vm7, %v560_v46, %v327_v63 }
 0x1b2   :  { %408 = vst.msk [vmem:[%s754_s3] sm:$0xff] %vm197_vm0, %v404_v0  ;;  %v353_v5 = vmul.f32 %v331_v2, %v701_v15 }
 0x1b3   :  { %v335_v3 = vmul.f32 0.5, %v334_v1  ;;  %v394_v18 = vpop.permute.xlu2 %393 }
 0x1b5   :  { %v336_v4 = vsub.f32 1.5, %v335_v3 }
 0x1b6   :  { %v564_v6 = vpop.eup %563  ;;  %v368_v7 = vpop.permute.xlu0 %367 }
 0x1b7   :  { %v343_v8 = vmul.f32 %v564_v6, %v311_v60  ;;  %v381_v9 = vmul.f32 %v368_v7, %v353_v5  ;;  %v337_v10 = vmul.f32 %v562_v59, %v336_v4  ;;  %vm349_vm11 = vweird.f32 %v564_v6 }
 0x1b8   :  { %vm350_vm13 = vmor %vm348_vm12, %vm349_vm11 }
 0x1b9   :  { %v344_v11 = vmul.f32 %v564_v6, %v343_v8  ;;  %v401_v12 = vadd.f32 %v390_v37, %v381_v9  ;;  %v341_v13 = vsel %vm340_vm10, %v562_v59, %v337_v10 }
 0x1ba   :  { %v354_v14 = vmul.f32 %v341_v13, %v707_v20 }
 0x1bb   :  { %v345_v16 = vmul.f32 0.5, %v344_v11  ;;  %v405_v17 = vmax.f32 %v401_v12, 0.0 }
 0x1bc   :  { %v382_v19 = vmul.f32 %v723_v33, %v354_v14 }
 0x1bd   :  { %v346_v21 = vsub.f32 1.5, %v345_v16  ;;  %409 = vst.msk [vmem:[%s754_s3 + $0x8] sm:$0xff] %vm197_vm0, %v405_v17 }
 0x1be   :  { %v402_v15 = vadd.f32 %v394_v18, %v382_v19 }
 0x1bf   :  { %v347_v22 = vmul.f32 %v564_v6, %v346_v21 }
 0x1c0   :  { %v406_v23 = vmax.f32 %v402_v15, 0.0 }
 0x1c1   :  { %v351_v24 = vsel %vm350_vm13, %v564_v6, %v347_v22 }
 0x1c2   :  { %410 = vst.msk [vmem:[%s754_s3 + $0x10] sm:$0xff] %vm197_vm0, %v406_v23  ;;  %v355_v20 = vmul.f32 %v351_v24, %v713_v25 }
 0x1c3   :  { %v398_v27 = vpop.permute.xlu1 %397 }
 0x1c4   :  { %v383_v26 = vmul.f32 %v726_v42, %v355_v20 }
 0x1c6   :  { %v403_v28 = vadd.f32 %v398_v27, %v383_v26 }
 0x1c8   :  { %v407_v29 = vmax.f32 %v403_v28, 0.0 }
 0x1ca   :  { %411 = vst.msk [vmem:[%s754_s3 + $0x18] sm:$0xff] %vm197_vm0, %v407_v29 }

// kernel: transformer_unet_forward.38
= control target key start
LH: loop header
LB: loop body
LE: loop exit
PB: predicated region body
PF: predicated region fallthrough
CT: control target
= control target key end

     0   :  { %vm70_vm0 = vcmask 261120   ;;  %s289_s1 = inlined_call_operand.vmem [shape: bf16[32,32], index: 1, kind: input, shape index: {}]   ;;  %s290_s0 = inlined_call_operand.vmem [shape: bf16[96,32], index: 0, kind: input, shape index: {}]   ;;  %s291_s2 = inlined_call_operand.vmem [shape: f32[96,32], index: 2, kind: output, shape index: {}]  }
   0x1   :  { %v189_v0 = vld [vmem:[%s289_s1 + $0x8] sm:$0xff]  ;;  %v188_v1 = vld [vmem:[%s289_s1] sm:$0xff]  ;;  %v185_v3 = vld [vmem:[%s290_s0 + $0x18] sm:$0xff] }
   0x2   :  { %190 = vmatpush.bf16.msra.mxu1 %v189_v0  ;;  %191 = vmatpush.bf16.msra.mxu2 %v189_v0  ;;  %v183_v2 = vld [vmem:[%s290_s0 + $0x8] sm:$0xff]  ;;  %v182_v5 = vld [vmem:[%s290_s0] sm:$0xff]  ;;  %v184_v6 = vld [vmem:[%s290_s0 + $0x10] sm:$0xff] }
   0x3   :  { %192 = vmatpush.bf16.msra.mxu3 %v189_v0  ;;  %95 = vmatpush.bf16.msra.mxu0 %v189_v0  ;;  %v187_v4 = vld [vmem:[%s290_s0 + $0x28] sm:$0xff]  ;;  %v186_v7 = vld [vmem:[%s290_s0 + $0x20] sm:$0xff] }
   0x6   :  { %193 = vmatpush.bf16.msra.mxu1 %v188_v1  ;;  %194 = vmatpush.bf16.msra.mxu2 %v188_v1 }
   0x7   :  { %195 = vmatpush.bf16.msra.mxu3 %v188_v1  ;;  %96 = vmatpush.bf16.msra.mxu0 %v188_v1 }
   0x9   :  { %177 = vmatmul.msk.bf16.vlgmr.msra.gmra.mxu1 %vm70_vm0, %v183_v2  ;;  %179 = vmatmul.msk.bf16.vlgmr.msra.gmra.mxu2 %vm70_vm0, %v185_v3 }
   0xa   :  { %181 = vmatmul.msk.bf16.vlgmr.msra.gmra.mxu3 %vm70_vm0, %v187_v4  ;;  %176 = vmatmul.msk.bf16.vlgmr.msra.gmra.mxu0 %vm70_vm0, %v182_v5 }
  0x19   :  { %178 = vmatmul.msk.bf16.gmra.mxu1 %vm70_vm0, %v184_v6  ;;  %180 = vmatmul.msk.bf16.gmra.mxu2 %vm70_vm0, %v186_v7 }
  0x86   :  { %v103_v8 = vpop.f32.mrf.mxu1 }
  0x87   :  { %130 = vst.msk [vmem:[%s291_s2 + $0x10] sm:$0xff] %vm70_vm0, %v103_v8  ;;  %v98_v9 = vpop.f32.mrf.mxu0 }
  0x88   :  { %128 = vst.msk [vmem:[%s291_s2] sm:$0xff] %vm70_vm0, %v98_v9 }
  0x8c   :  { %v113_v10 = vpop.f32.mrf.mxu2 }
  0x8d   :  { %134 = vst.msk [vmem:[%s291_s2 + $0x30] sm:$0xff] %vm70_vm0, %v113_v10  ;;  %v123_v11 = vpop.f32.mrf.mxu3 }
  0x8e   :  { %v105_v12 = vpop.f32.mrf.mxu1  ;;  %138 = vst.msk [vmem:[%s291_s2 + $0x50] sm:$0xff] %vm70_vm0, %v123_v11 }
  0x8f   :  { %131 = vst.msk [vmem:[%s291_s2 + $0x18] sm:$0xff] %vm70_vm0, %v105_v12  ;;  %v100_v13 = vpop.f32.mrf.mxu0 }
  0x90   :  { %129 = vst.msk [vmem:[%s291_s2 + $0x8] sm:$0xff] %vm70_vm0, %v100_v13 }
  0x94   :  { %v115_v14 = vpop.f32.mrf.mxu2 }
  0x95   :  { %135 = vst.msk [vmem:[%s291_s2 + $0x38] sm:$0xff] %vm70_vm0, %v115_v14  ;;  %v125_v15 = vpop.f32.mrf.mxu3 }
  0x96   :  { %v108_v16 = vpop.f32.mrf.mxu1  ;;  %139 = vst.msk [vmem:[%s291_s2 + $0x58] sm:$0xff] %vm70_vm0, %v125_v15 }
  0x97   :  { %132 = vst.msk [vmem:[%s291_s2 + $0x20] sm:$0xff] %vm70_vm0, %v108_v16 }
  0x9c   :  { %v118_v17 = vpop.f32.mrf.mxu2 }
  0x9d   :  { %136 = vst.msk [vmem:[%s291_s2 + $0x40] sm:$0xff] %vm70_vm0, %v118_v17 }
  0x9e   :  { %v110_v18 = vpop.f32.mrf.mxu1 }
  0x9f   :  { %133 = vst.msk [vmem:[%s291_s2 + $0x28] sm:$0xff] %vm70_vm0, %v110_v18 }
  0xa4   :  { %v120_v19 = vpop.f32.mrf.mxu2 }
  0xa5   :  { %137 = vst.msk [vmem:[%s291_s2 + $0x48] sm:$0xff] %vm70_vm0, %v120_v19 }

// kernel: transformer_unet_forward.39
= control target key start
LH: loop header
LB: loop body
LE: loop exit
PB: predicated region body
PF: predicated region fallthrough
CT: control target
= control target key end

     0   :  { %vm49_vm0 = vcmask 130048   ;;  %s612_s1 = inlined_call_operand.vmem [shape: bf16[4,16,16], index: 1, kind: input, shape index: {}]   ;;  %s613_s0 = inlined_call_operand.vmem [shape: bf16[4,16,16], index: 0, kind: input, shape index: {}]   ;;  %s614_s2 = inlined_call_operand.vmem [shape: bf16[4,16,16], index: 2, kind: input, shape index: {}]   ;;  %s615_s3 = inlined_call_operand.vmem [shape: f32[4,16,16], index: 3, kind: output, shape index: {}]  }
   0x1   :  { %v448_v0 = vld [vmem:[%s612_s1] sm:$0xff]  ;;  %v450_v1 = vld [vmem:[%s612_s1 + $0x10] sm:$0xff]  ;;  %v451_v2 = vld [vmem:[%s612_s1 + $0x18] sm:$0xff] }
   0x2   :  { %v449_v3 = vld [vmem:[%s612_s1 + $0x8] sm:$0xff]  ;;  %v54_v4 = vsel %vm49_vm0, %v448_v0, 0  ;;  %v114_v5 = vsel %vm49_vm0, %v450_v1, 0  ;;  %v144_v6 = vsel %vm49_vm0, %v451_v2, 0  ;;  %v444_v8 = vld [vmem:[%s613_s0] sm:$0xff]  ;;  %v446_v9 = vld [vmem:[%s613_s0 + $0x10] sm:$0xff] }
   0x3   :  { %63 = vmatpush.bf16.xpose.msra.mxu0 %v54_v4  ;;  %123 = vmatpush.bf16.xpose.msra.mxu2 %v114_v5  ;;  %v84_v7 = vsel %vm49_vm0, %v449_v3, 0  ;;  %v447_v10 = vld [vmem:[%s613_s0 + $0x18] sm:$0xff]  ;;  %v445_v11 = vld [vmem:[%s613_s0 + $0x8] sm:$0xff] }
   0x4   :  { %153 = vmatpush.bf16.xpose.msra.mxu3 %v144_v6  ;;  %93 = vmatpush.bf16.xpose.msra.mxu1 %v84_v7 }
   0xa   :  { %396 = vmatmul.msk.bf16.vlgmr.msra.gmra.mxu0 %vm49_vm0, %v444_v8  ;;  %414 = vmatmul.msk.bf16.vlgmr.msra.gmra.mxu2 %vm49_vm0, %v446_v9 }
   0xb   :  { %423 = vmatmul.msk.bf16.vlgmr.msra.gmra.mxu3 %vm49_vm0, %v447_v10  ;;  %405 = vmatmul.msk.bf16.vlgmr.msra.gmra.mxu1 %vm49_vm0, %v445_v11 }
  0x87   :  { %v65_v12 = vpop.f32.mrf.mxu0 }
  0x88   :  { %v160_v13 = vmul.f32 0.25, %v65_v12  ;;  %v95_v20 = vpop.f32.mrf.mxu1  ;;  %v454_v12 = vld [vmem:[%s614_s2 + $0x10] sm:$0xff] }
  0x89   :  { %v162_v32 = vmul.f32 0.25, %v95_v20  ;;  %341 = vmatpush.bf16.msrb.mxu2 %v454_v12 }
  0x8a   :  { %v168_v14 = vsel %vm49_vm0, %v160_v13, -inf }
  0x8b   :  { %169 = vmax.xlane.f32.xlu2 %v168_v14  ;;  %v174_v34 = vsel %vm49_vm0, %v162_v32, -inf  ;;  %v452_v14 = vld [vmem:[%s614_s2] sm:$0xff] }
  0x8c   :  { %285 = vmatpush.bf16.msrb.mxu0 %v452_v14 }
  0x8d   :  { %v125_v15 = vpop.f32.mrf.mxu2 }
  0x8e   :  { %v164_v16 = vmul.f32 0.25, %v125_v15  ;;  %v155_v17 = vpop.f32.mrf.mxu3  ;;  %v453_v15 = vld [vmem:[%s614_s2 + $0x8] sm:$0xff] }
  0x8f   :  { %v166_v18 = vmul.f32 0.25, %v155_v17  ;;  %v67_v19 = vpop.f32.mrf.mxu0  ;;  %313 = vmatpush.bf16.msrb.mxu1 %v453_v15 }
  0x90   :  { %v161_v21 = vmul.f32 0.25, %v67_v19  ;;  %v180_v22 = vsel %vm49_vm0, %v164_v16, -inf  ;;  %v97_v31 = vpop.f32.mrf.mxu1 }
  0x91   :  { %v186_v23 = vsel %vm49_vm0, %v166_v18, -inf  ;;  %181 = vmax.xlane.f32.xlu0 %v180_v22  ;;  %v163_v33 = vmul.f32 0.25, %v97_v31 }
  0x92   :  { %187 = vmax.xlane.f32.xlu1 %v186_v23  ;;  %v171_v24 = vsel %vm49_vm0, %v161_v21, -inf }
  0x93   :  { %172 = vmax.xlane.f32.xlu2 %v171_v24  ;;  %v177_v35 = vsel %vm49_vm0, %v163_v33, -inf }
  0x95   :  { %v127_v25 = vpop.f32.mrf.mxu2 }
  0x96   :  { %v165_v26 = vmul.f32 0.25, %v127_v25  ;;  %v157_v27 = vpop.f32.mrf.mxu3 }
  0x97   :  { %v167_v28 = vmul.f32 0.25, %v157_v27 }
  0x98   :  { %v183_v29 = vsel %vm49_vm0, %v165_v26, -inf }
  0x99   :  { %v189_v30 = vsel %vm49_vm0, %v167_v28, -inf  ;;  %184 = vmax.xlane.f32.xlu0 %v183_v29 }
  0x9a   :  { %190 = vmax.xlane.f32.xlu1 %v189_v30 }
  0xa1   :  { %175 = vmax.xlane.f32.xlu0 %v174_v34 }
  0xa2   :  { %178 = vmax.xlane.f32.xlu1 %v177_v35 }
  0xfe   :  { %v170_v36 = vpop.xlane.xlu2 %169 }
  0xff   :  { %v192_v37 = vsub.f32 %v160_v13, %v170_v36  ;;  %v455_v13 = vld [vmem:[%s614_s2 + $0x18] sm:$0xff] }
 0x100   :  { %369 = vmatpush.bf16.msrb.mxu3 %v455_v13 }
 0x101   :  { %v200_v38 = vmul.f32 1.442695, %v192_v37 }
 0x103   :  { %456 = vpow2.f32 %v200_v38 }
 0x104   :  { %v182_v39 = vpop.xlane.xlu0 %181 }
 0x105   :  { %v188_v40 = vpop.xlane.xlu1 %187  ;;  %v196_v41 = vsub.f32 %v164_v16, %v182_v39 }
 0x106   :  { %v198_v42 = vsub.f32 %v166_v18, %v188_v40  ;;  %v173_v43 = vpop.xlane.xlu2 %172 }
 0x107   :  { %v208_v44 = vmul.f32 1.442695, %v196_v41  ;;  %v193_v46 = vsub.f32 %v161_v21, %v173_v43 }
 0x108   :  { %v212_v45 = vmul.f32 1.442695, %v198_v42 }
 0x109   :  { %v548_v47 = vpop.eup %456  ;;  %458 = vpow2.f32 %v208_v44  ;;  %v202_v49 = vmul.f32 1.442695, %v193_v46 }
 0x10a   :  { %460 = vpow2.f32 %v212_v45  ;;  %v216_v48 = vsel %vm49_vm0, %v548_v47, 0.0 }
 0x10b   :  { %217 = vadd.xlane.f32.xlu0 %v216_v48  ;;  %462 = vpow2.f32 %v202_v49 }
 0x10c   :  { %v185_v50 = vpop.xlane.xlu0 %184 }
 0x10d   :  { %v191_v51 = vpop.xlane.xlu1 %190  ;;  %v197_v52 = vsub.f32 %v165_v26, %v185_v50 }
 0x10e   :  { %v199_v53 = vsub.f32 %v167_v28, %v191_v51 }
 0x10f   :  { %v459_v54 = vpop.eup %458  ;;  %v210_v55 = vmul.f32 1.442695, %v197_v52 }
 0x110   :  { %v461_v56 = vpop.eup %460  ;;  %v214_v57 = vmul.f32 1.442695, %v199_v53  ;;  %v228_v58 = vsel %vm49_vm0, %v459_v54, 0.0 }
 0x111   :  { %464 = vpow2.f32 %v210_v55  ;;  %v234_v59 = vsel %vm49_vm0, %v461_v56, 0.0  ;;  %229 = vadd.xlane.f32.xlu2 %v228_v58  ;;  %v463_v63 = vpop.eup %462 }
 0x112   :  { %466 = vpow2.f32 %v214_v57  ;;  %235 = vadd.xlane.f32.xlu1 %v234_v59  ;;  %v219_v7 = vsel %vm49_vm0, %v463_v63, 0.0 }
 0x114   :  { %v176_v60 = vpop.xlane.xlu0 %175 }
 0x115   :  { %v194_v61 = vsub.f32 %v162_v32, %v176_v60  ;;  %v179_v62 = vpop.xlane.xlu1 %178 }
 0x116   :  { %v195_v0 = vsub.f32 %v163_v33, %v179_v62 }
 0x117   :  { %v465_v1 = vpop.eup %464  ;;  %v204_v2 = vmul.f32 1.442695, %v194_v61 }
 0x118   :  { %v467_v3 = vpop.eup %466  ;;  %v206_v4 = vmul.f32 1.442695, %v195_v0  ;;  %v231_v5 = vsel %vm49_vm0, %v465_v1, 0.0 }
 0x119   :  { %468 = vpow2.f32 %v204_v2  ;;  %232 = vadd.xlane.f32.xlu0 %v231_v5  ;;  %v237_v6 = vsel %vm49_vm0, %v467_v3, 0.0 }
 0x11a   :  { %470 = vpow2.f32 %v206_v4  ;;  %238 = vadd.xlane.f32.xlu2 %v237_v6  ;;  %220 = vadd.xlane.f32.xlu1 %v219_v7 }
 0x11f   :  { %v557_v8 = vpop.eup %468 }
 0x120   :  { %v471_v9 = vpop.eup %470  ;;  %v222_v10 = vsel %vm49_vm0, %v557_v8, 0.0 }
 0x121   :  { %v225_v11 = vsel %vm49_vm0, %v471_v9, 0.0 }
 0x122   :  { %226 = vadd.xlane.f32.xlu0 %v225_v11  ;;  %223 = vadd.xlane.f32.xlu2 %v222_v10 }
 0x17e   :  { %v218_v16 = vpop.xlane.xlu0 %217 }
 0x184   :  { %v230_v17 = vpop.xlane.xlu2 %229 }
 0x185   :  { %v236_v18 = vpop.xlane.xlu1 %235  ;;  %472 = vrcp.f32 %v230_v17 }
 0x186   :  { %474 = vrcp.f32 %v218_v16 }
 0x187   :  { %476 = vrcp.f32 %v236_v18 }
 0x18b   :  { %v473_v20 = vpop.eup %472 }
 0x18c   :  { %v233_v19 = vpop.xlane.xlu0 %232  ;;  %v475_v23 = vpop.eup %474  ;;  %v252_v25 = vmul.f32 %v473_v20, %v459_v54 }
 0x18d   :  { %478 = vrcp.f32 %v233_v19  ;;  %v221_v21 = vpop.xlane.xlu1 %220  ;;  %v239_v22 = vpop.xlane.xlu2 %238  ;;  %v248_v26 = vmul.f32 %v475_v23, %v548_v47 }
 0x18e   :  { %480 = vrcp.f32 %v221_v21  ;;  %v477_v24 = vpop.eup %476  ;;  %v260_v30 = vpack.c.bf16 %v252_v25, %v252_v25 }
 0x18f   :  { %482 = vrcp.f32 %v239_v22  ;;  %v254_v27 = vmul.f32 %v477_v24, %v461_v56  ;;  %v256_v33 = vpack.c.bf16 %v248_v26, %v248_v26 }
 0x190   :  { %v322_v41 = vunpack.c.l.b16 %v260_v30 }
 0x191   :  { %v262_v37 = vpack.c.bf16 %v254_v27, %v254_v27  ;;  %v266_v44 = vunpack.c.l.b16 %v256_v33 }
 0x193   :  { %v479_v28 = vpop.eup %478  ;;  %v350_v46 = vunpack.c.l.b16 %v262_v37 }
 0x194   :  { %v481_v29 = vpop.eup %480  ;;  %v253_v31 = vmul.f32 %v479_v28, %v465_v1 }
 0x195   :  { %v483_v32 = vpop.eup %482  ;;  %v249_v34 = vmul.f32 %v481_v29, %v463_v63  ;;  %v227_v35 = vpop.xlane.xlu0 %226 }
 0x196   :  { %v224_v36 = vpop.xlane.xlu2 %223  ;;  %v261_v38 = vpack.c.bf16 %v253_v31, %v253_v31  ;;  %v255_v39 = vmul.f32 %v483_v32, %v467_v3  ;;  %484 = vrcp.f32 %v227_v35 }
 0x197   :  { %v257_v40 = vpack.c.bf16 %v249_v34, %v249_v34  ;;  %486 = vrcp.f32 %v224_v36 }
 0x198   :  { %v323_v42 = vunpack.c.l.b16 %v261_v38  ;;  %v263_v43 = vpack.c.bf16 %v255_v39, %v255_v39 }
 0x199   :  { %v267_v45 = vunpack.c.l.b16 %v257_v40 }
 0x19a   :  { %v351_v47 = vunpack.c.l.b16 %v263_v43  ;;  %v324_v48 = vpack.c.b16 %v323_v42, %v322_v41 }
 0x19b   :  { %v268_v49 = vpack.c.b16 %v267_v45, %v266_v44 }
 0x19c   :  { %v485_v50 = vpop.eup %484  ;;  %438 = vmatmul.msk.bf16.vlgmr.msrb.gmra.mxu2 %vm49_vm0, %v324_v48  ;;  %v352_v51 = vpack.c.b16 %v351_v47, %v350_v46 }
 0x19d   :  { %v487_v52 = vpop.eup %486  ;;  %v251_v53 = vmul.f32 %v485_v50, %v471_v9  ;;  %428 = vmatmul.msk.bf16.vlgmr.msrb.gmra.mxu0 %vm49_vm0, %v268_v49 }
 0x19e   :  { %v250_v54 = vmul.f32 %v487_v52, %v557_v8  ;;  %443 = vmatmul.msk.bf16.vlgmr.msrb.gmra.mxu3 %vm49_vm0, %v352_v51 }
 0x19f   :  { %v259_v55 = vpack.c.bf16 %v251_v53, %v251_v53 }
 0x1a0   :  { %v258_v56 = vpack.c.bf16 %v250_v54, %v250_v54 }
 0x1a1   :  { %v295_v57 = vunpack.c.l.b16 %v259_v55 }
 0x1a2   :  { %v294_v58 = vunpack.c.l.b16 %v258_v56 }
 0x1a4   :  { %v296_v59 = vpack.c.b16 %v295_v57, %v294_v58 }
 0x1a6   :  { %433 = vmatmul.msk.bf16.vlgmr.msrb.gmra.mxu1 %vm49_vm0, %v296_v59 }
 0x21a   :  { %v287_v60 = vpop.f32.mrf.mxu0 }
 0x21b   :  { %376 = vst.msk [vmem:[%s615_s3] sm:$0xff] %vm49_vm0, %v287_v60 }
 0x21f   :  { %v343_v61 = vpop.f32.mrf.mxu2 }
 0x220   :  { %380 = vst.msk [vmem:[%s615_s3 + $0x20] sm:$0xff] %vm49_vm0, %v343_v61 }
 0x221   :  { %v371_v62 = vpop.f32.mrf.mxu3 }
 0x222   :  { %382 = vst.msk [vmem:[%s615_s3 + $0x30] sm:$0xff] %vm49_vm0, %v371_v62  ;;  %v289_v63 = vpop.f32.mrf.mxu0 }
 0x223   :  { %377 = vst.msk [vmem:[%s615_s3 + $0x8] sm:$0xff] %vm49_vm0, %v289_v63  ;;  %v315_v0 = vpop.f32.mrf.mxu1 }
 0x224   :  { %378 = vst.msk [vmem:[%s615_s3 + $0x10] sm:$0xff] %vm49_vm0, %v315_v0 }
 0x227   :  { %v345_v1 = vpop.f32.mrf.mxu2 }
 0x228   :  { %381 = vst.msk [vmem:[%s615_s3 + $0x28] sm:$0xff] %vm49_vm0, %v345_v1 }
 0x229   :  { %v373_v2 = vpop.f32.mrf.mxu3 }
 0x22a   :  { %383 = vst.msk [vmem:[%s615_s3 + $0x38] sm:$0xff] %vm49_vm0, %v373_v2 }
 0x22b   :  { %v317_v3 = vpop.f32.mrf.mxu1 }
 0x22c   :  { %379 = vst.msk [vmem:[%s615_s3 + $0x18] sm:$0xff] %vm49_vm0, %v317_v3 }

// kernel: transformer_unet_forward.40
= control target key start
LH: loop header
LB: loop body
LE: loop exit
PB: predicated region body
PF: predicated region fallthrough
CT: control target
= control target key end

     0   :  { %vm42_vm0 = vcmask 261120   ;;  %s139_s1 = inlined_call_operand.vmem [shape: bf16[32,32], index: 1, kind: input, shape index: {}]   ;;  %s140_s0 = inlined_call_operand.vmem [shape: bf16[32,32], index: 0, kind: input, shape index: {}]   ;;  %s141_s2 = inlined_call_operand.vmem [shape: f32[32,32], index: 2, kind: output, shape index: {}]  }
   0x1   :  { %v97_v0 = vld [vmem:[%s139_s1 + $0x8] sm:$0xff]  ;;  %v96_v1 = vld [vmem:[%s139_s1] sm:$0xff] }
   0x2   :  { %55 = vmatpush.bf16.msra.mxu0 %v97_v0  ;;  %98 = vmatpush.bf16.msra.mxu1 %v97_v0  ;;  %v94_v2 = vld [vmem:[%s140_s0] sm:$0xff]  ;;  %v95_v3 = vld [vmem:[%s140_s0 + $0x8] sm:$0xff] }
   0x6   :  { %56 = vmatpush.bf16.msra.mxu0 %v96_v1  ;;  %99 = vmatpush.bf16.msra.mxu1 %v96_v1 }
   0x9   :  { %92 = vmatmul.msk.bf16.vlgmr.msra.gmra.mxu0 %vm42_vm0, %v94_v2  ;;  %93 = vmatmul.msk.bf16.vlgmr.msra.gmra.mxu1 %vm42_vm0, %v95_v3 }
  0x86   :  { %v58_v4 = vpop.f32.mrf.mxu0  ;;  %v63_v5 = vpop.f32.mrf.mxu1 }
  0x87   :  { %68 = vst.msk [vmem:[%s141_s2] sm:$0xff] %vm42_vm0, %v58_v4 }
  0x88   :  { %70 = vst.msk [vmem:[%s141_s2 + $0x10] sm:$0xff] %vm42_vm0, %v63_v5 }
  0x8e   :  { %v60_v6 = vpop.f32.mrf.mxu0  ;;  %v65_v7 = vpop.f32.mrf.mxu1 }
  0x8f   :  { %69 = vst.msk [vmem:[%s141_s2 + $0x8] sm:$0xff] %vm42_vm0, %v60_v6 }
  0x90   :  { %71 = vst.msk [vmem:[%s141_s2 + $0x18] sm:$0xff] %vm42_vm0, %v65_v7 }

// kernel: transformer_unet_forward.42
= control target key start
LH: loop header
LB: loop body
LE: loop exit
PB: predicated region body
PF: predicated region fallthrough
CT: control target
= control target key end

     0   :  { %vm38_vm0 = vcmask 261120   ;;  %v167_v7 = vmov 32.0   ;;  %v168_v11 = vmov 1   ;;  %v169_v23 = vmov 0   ;;  %s218_s1 = inlined_call_operand.vmem [shape: bf16[32,32], index: 1, kind: input, shape index: {}]   ;;  %s219_s0 = inlined_call_operand.vmem [shape: bf16[16,32], index: 0, kind: input, shape index: {}]   ;;  %s220_s2 = inlined_call_operand.vmem [shape: f32[16,2], index: 2, kind: input, shape index: {}]   ;;  %s221_s3 = inlined_call_operand.vmem [shape: f32[16,32], index: 3, kind: output, shape index: {}]  }
   0x1   :  { %v154_v0 = vld [vmem:[%s218_s1 + $0x8] sm:$0xff]  ;;  %v153_v1 = vld [vmem:[%s218_s1] sm:$0xff]  ;;  %161 = vrcp.f32 %v167_v7  ;;  %159 = vset.pattern.permute.xlu0 %v168_v11  ;;  %160 = vset.pattern.permute.xlu1 %v168_v11 }
   0x2   :  { %48 = vmatpush.bf16.msra.mxu0 %v154_v0  ;;  %v152_v2 = vld [vmem:[%s219_s0] sm:$0xff]  ;;  %158 = vset.pattern.permute.xlu2 %v169_v23  ;;  %v108_v27 = vld [vmem:[%s220_s2 + $0x8] sm:$0xff] }
   0x3   :  { %v107_v10 = vld [vmem:[%s220_s2] sm:$0xff] }
   0x4   :  { %111 = vperm.xlu2 %158, %v107_v10  }
   0x6   :  { %49 = vmatpush.bf16.msra.mxu0 %v153_v1 }
   0x7   :  { %v162_v8 = vpop.eup %161 }
   0x8   :  { %v63_v9 = vmul.f32 32.0, %v162_v8  ;;  %vm67_vm1 = vweird.f32 %v162_v8 }
   0x9   :  { %151 = vmatmul.msk.bf16.vlgmr.msra.gmra.mxu0 %vm38_vm0, %v152_v2 }
   0xa   :  { %v64_v12 = vsub.f32 1.0, %v63_v9 }
   0xc   :  { %v65_v13 = vmul.f32 %v162_v8, %v64_v12  ;;  %116 = vperm.xlu2 %158, %v108_v27  }
   0xe   :  { %v66_v14 = vadd.f32 %v162_v8, %v65_v13 }
  0x10   :  { %v68_v15 = vsel %vm67_vm1, %v162_v8, %v66_v14 }
  0x5e   :  { %v112_v43 = vpop.permute.xlu2 %111 }
  0x66   :  { %v117_v55 = vpop.permute.xlu2 %116 }
  0x86   :  { %v51_v3 = vpop.f32.mrf.mxu0 }
  0x87   :  { %v56_v4 = vsel %vm38_vm0, %v51_v3, 0.0 }
  0x88   :  { %57 = vadd.xlane.f32.xlu0 %v56_v4 }
  0x8e   :  { %v53_v5 = vpop.f32.mrf.mxu0 }
  0x8f   :  { %v59_v6 = vsel %vm38_vm0, %v53_v5, 0.0 }
  0x90   :  { %60 = vadd.xlane.f32.xlu0 %v59_v6 }
  0xa4   :  { %122 = vperm.xlu0 %159, %v107_v10  }
  0xfb   :  { %v58_v16 = vpop.xlane.xlu0 %57 }
  0xfc   :  { %v69_v17 = vmul.f32 %v68_v15, %v58_v16 }
  0xfe   :  { %v71_v18 = vsub.f32 %v51_v3, %v69_v17 }
 0x100   :  { %v73_v19 = vmul.f32 %v71_v18, %v71_v18 }
 0x102   :  { %v75_v20 = vsel %vm38_vm0, %v73_v19, 0.0 }
 0x103   :  { %76 = vadd.xlane.f32.xlu1 %v75_v20  ;;  %v61_v21 = vpop.xlane.xlu0 %60 }
 0x104   :  { %v70_v22 = vmul.f32 %v68_v15, %v61_v21 }
 0x106   :  { %v72_v24 = vsub.f32 %v53_v5, %v70_v22 }
 0x108   :  { %v74_v25 = vmul.f32 %v72_v24, %v72_v24 }
 0x10a   :  { %v78_v26 = vsel %vm38_vm0, %v74_v25, 0.0 }
 0x10b   :  { %79 = vadd.xlane.f32.xlu1 %v78_v26 }
 0x116   :  { %v123_v47 = vpop.permute.xlu0 %122 }
 0x124   :  { %126 = vperm.xlu1 %160, %v108_v27  }
 0x176   :  { %v77_v28 = vpop.xlane.xlu1 %76 }
 0x177   :  { %v81_v29 = vmul.f32 %v77_v28, %v68_v15 }
 0x179   :  { %v83_v30 = vadd.f32 1e-05, %v81_v29 }
 0x17b   :  { %163 = vrsqrt.f32 %v83_v30  ;;  %vm91_vm3 = vweird.f32 %v83_v30 }
 0x17e   :  { %v80_v31 = vpop.xlane.xlu1 %79 }
 0x17f   :  { %v82_v32 = vmul.f32 %v80_v31, %v68_v15 }
 0x181   :  { %v164_v33 = vpop.eup %163  ;;  %v84_v34 = vadd.f32 1e-05, %v82_v32 }
 0x182   :  { %v86_v35 = vmul.f32 %v164_v33, %v83_v30  ;;  %vm92_vm2 = vweird.f32 %v164_v33 }
 0x183   :  { %165 = vrsqrt.f32 %v84_v34  ;;  %vm93_vm4 = vmor %vm91_vm3, %vm92_vm2  ;;  %vm101_vm6 = vweird.f32 %v84_v34 }
 0x184   :  { %v87_v36 = vmul.f32 %v164_v33, %v86_v35 }
 0x186   :  { %v88_v37 = vmul.f32 0.5, %v87_v36 }
 0x188   :  { %v89_v38 = vsub.f32 1.5, %v88_v37 }
 0x189   :  { %v166_v39 = vpop.eup %165 }
 0x18a   :  { %v96_v40 = vmul.f32 %v166_v39, %v84_v34  ;;  %v90_v41 = vmul.f32 %v164_v33, %v89_v38  ;;  %vm102_vm5 = vweird.f32 %v166_v39 }
 0x18b   :  { %vm103_vm7 = vmor %vm101_vm6, %vm102_vm5 }
 0x18c   :  { %v97_v42 = vmul.f32 %v166_v39, %v96_v40  ;;  %v94_v44 = vsel %vm93_vm4, %v164_v33, %v90_v41 }
 0x18d   :  { %v105_v45 = vmul.f32 %v94_v44, %v71_v18 }
 0x18e   :  { %v98_v46 = vmul.f32 0.5, %v97_v42 }
 0x18f   :  { %v119_v48 = vmul.f32 %v112_v43, %v105_v45 }
 0x190   :  { %v99_v49 = vsub.f32 1.5, %v98_v46 }
 0x191   :  { %v129_v50 = vadd.f32 %v123_v47, %v119_v48 }
 0x192   :  { %v100_v51 = vmul.f32 %v166_v39, %v99_v49 }
 0x193   :  { %v131_v52 = vmax.f32 %v129_v50, 0.0 }
 0x194   :  { %v104_v53 = vsel %vm103_vm7, %v166_v39, %v100_v51 }
 0x195   :  { %v106_v54 = vmul.f32 %v104_v53, %v72_v24  ;;  %133 = vst.msk [vmem:[%s221_s3] sm:$0xff] %vm38_vm0, %v131_v52 }
 0x196   :  { %v127_v56 = vpop.permute.xlu1 %126 }
 0x197   :  { %v120_v57 = vmul.f32 %v117_v55, %v106_v54 }
 0x199   :  { %v130_v58 = vadd.f32 %v127_v56, %v120_v57 }
 0x19b   :  { %v132_v59 = vmax.f32 %v130_v58, 0.0 }
 0x19d   :  { %134 = vst.msk [vmem:[%s221_s3 + $0x8] sm:$0xff] %vm38_vm0, %v132_v59 }

// kernel: transformer_unet_forward.43
= control target key start
LH: loop header
LB: loop body
LE: loop exit
PB: predicated region body
PF: predicated region fallthrough
CT: control target
= control target key end

     0   :  { %vm34_vm0 = vcmask 130048   ;;  %vm60_vm1 = vcmask 261120   ;;  %s123_s1 = inlined_call_operand.vmem [shape: bf16[16,32], index: 1, kind: input, shape index: {}]   ;;  %s124_s0 = inlined_call_operand.vmem [shape: bf16[32,16], index: 0, kind: input, shape index: {}]   ;;  %s125_s2 = inlined_call_operand.vmem [shape: f32[32,32], index: 2, kind: output, shape index: {}]  }
   0x1   :  { %v85_v0 = vld [vmem:[%s123_s1] sm:$0xff]  ;;  %v84_v2 = vld [vmem:[%s124_s0 + $0x8] sm:$0xff] }
   0x2   :  { %v83_v1 = vld [vmem:[%s124_s0] sm:$0xff]  ;;  %48 = vmatpush.bf16.msra.mxu0 %v85_v0  ;;  %86 = vmatpush.bf16.msra.mxu1 %v85_v0 }
   0x5   :  { %81 = vmatmul.msk.bf16.vlgmr.msra.gmra.mxu0 %vm34_vm0, %v83_v1  ;;  %82 = vmatmul.msk.bf16.vlgmr.msra.gmra.mxu1 %vm34_vm0, %v84_v2 }
  0x82   :  { %v50_v3 = vpop.f32.mrf.mxu0  ;;  %v55_v4 = vpop.f32.mrf.mxu1 }
  0x83   :  { %61 = vst.msk [vmem:[%s125_s2] sm:$0xff] %vm60_vm1, %v50_v3 }
  0x84   :  { %63 = vst.msk [vmem:[%s125_s2 + $0x10] sm:$0xff] %vm60_vm1, %v55_v4 }
  0x8a   :  { %v52_v5 = vpop.f32.mrf.mxu0  ;;  %v57_v6 = vpop.f32.mrf.mxu1 }
  0x8b   :  { %62 = vst.msk [vmem:[%s125_s2 + $0x8] sm:$0xff] %vm60_vm1, %v52_v5 }
  0x8c   :  { %64 = vst.msk [vmem:[%s125_s2 + $0x18] sm:$0xff] %vm60_vm1, %v57_v6 }

// kernel: transformer_unet_forward.44
= control target key start
LH: loop header
LB: loop body
LE: loop exit
PB: predicated region body
PF: predicated region fallthrough
CT: control target
= control target key end

     0   :  { %vm27_vm0 = vcmask 130048   ;;  %vm45_vm1 = vcmask 261120   ;;  %s90_s1 = inlined_call_operand.vmem [shape: bf16[16,32], index: 1, kind: input, shape index: {}]   ;;  %s91_s0 = inlined_call_operand.vmem [shape: bf16[16,16], index: 0, kind: input, shape index: {}]   ;;  %s92_s2 = inlined_call_operand.vmem [shape: f32[16,32], index: 2, kind: output, shape index: {}]  }
   0x1   :  { %v62_v0 = vld [vmem:[%s90_s1] sm:$0xff] }
   0x2   :  { %v61_v1 = vld [vmem:[%s91_s0] sm:$0xff]  ;;  %38 = vmatpush.bf16.msra.mxu0 %v62_v0 }
   0x5   :  { %60 = vmatmul.msk.bf16.vlgmr.msra.gmra.mxu0 %vm27_vm0, %v61_v1 }
  0x82   :  { %v40_v2 = vpop.f32.mrf.mxu0 }
  0x83   :  { %46 = vst.msk [vmem:[%s92_s2] sm:$0xff] %vm45_vm1, %v40_v2 }
  0x8a   :  { %v42_v3 = vpop.f32.mrf.mxu0 }
  0x8b   :  { %47 = vst.msk [vmem:[%s92_s2 + $0x8] sm:$0xff] %vm45_vm1, %v42_v3 }

// kernel: transformer_unet_forward.41
= control target key start
LH: loop header
LB: loop body
LE: loop exit
PB: predicated region body
PF: predicated region fallthrough
CT: control target
= control target key end

     0   :  { %vm30_vm0 = vcmask 130048   ;;  %vm48_vm1 = vcmask 261120   ;;  %v155_v6 = vmov 32.0   ;;  %v156_v10 = vmov 1   ;;  %s202_s1 = inlined_call_operand.vmem [shape: bf16[16,32], index: 1, kind: input, shape index: {}]   ;;  %s203_s0 = inlined_call_operand.vmem [shape: bf16[16,16], index: 0, kind: input, shape index: {}]   ;;  %s204_s2 = inlined_call_operand.vmem [shape: f32[16,2], index: 2, kind: input, shape index: {}]   ;;  %s205_s3 = inlined_call_operand.vmem [shape: f32[16,32], index: 3, kind: output, shape index: {}]  }
   0x1   :  { %v142_v0 = vld [vmem:[%s202_s1] sm:$0xff]  ;;  %149 = vrcp.f32 %v155_v6  ;;  %147 = vset.pattern.permute.xlu0 %v156_v10  ;;  %148 = vset.pattern.permute.xlu1 %v156_v10  ;;  %v157_v22 = vmov 0   ;;  %v101_v26 = vld [vmem:[%s204_s2 + $0x8] sm:$0xff] }
   0x2   :  { %v141_v1 = vld [vmem:[%s203_s0] sm:$0xff]  ;;  %41 = vmatpush.bf16.msra.mxu0 %v142_v0  ;;  %146 = vset.pattern.permute.xlu2 %v157_v22 }
   0x3   :  { %v100_v9 = vld [vmem:[%s204_s2] sm:$0xff] }
   0x4   :  { %104 = vperm.xlu2 %146, %v100_v9  }
   0x5   :  { %140 = vmatmul.msk.bf16.vlgmr.msra.gmra.mxu0 %vm30_vm0, %v141_v1 }
   0x7   :  { %v150_v7 = vpop.eup %149 }
   0x8   :  { %v56_v8 = vmul.f32 32.0, %v150_v7  ;;  %vm60_vm2 = vweird.f32 %v150_v7 }
   0xa   :  { %v57_v11 = vsub.f32 1.0, %v56_v8 }
   0xc   :  { %v58_v12 = vmul.f32 %v150_v7, %v57_v11  ;;  %109 = vperm.xlu2 %146, %v101_v26  }
   0xe   :  { %v59_v13 = vadd.f32 %v150_v7, %v58_v12 }
  0x10   :  { %v61_v14 = vsel %vm60_vm2, %v150_v7, %v59_v13 }
  0x5e   :  { %v105_v42 = vpop.permute.xlu2 %104 }
  0x66   :  { %v110_v54 = vpop.permute.xlu2 %109 }
  0x82   :  { %v43_v2 = vpop.f32.mrf.mxu0 }
  0x83   :  { %v49_v3 = vsel %vm48_vm1, %v43_v2, 0.0 }
  0x84   :  { %50 = vadd.xlane.f32.xlu0 %v49_v3 }
  0x8a   :  { %v45_v4 = vpop.f32.mrf.mxu0 }
  0x8b   :  { %v52_v5 = vsel %vm48_vm1, %v45_v4, 0.0 }
  0x8c   :  { %53 = vadd.xlane.f32.xlu0 %v52_v5 }
  0xa0   :  { %115 = vperm.xlu0 %147, %v100_v9  }
  0xf7   :  { %v51_v15 = vpop.xlane.xlu0 %50 }
  0xf8   :  { %v62_v16 = vmul.f32 %v61_v14, %v51_v15 }
  0xfa   :  { %v64_v17 = vsub.f32 %v43_v2, %v62_v16 }
  0xfc   :  { %v66_v18 = vmul.f32 %v64_v17, %v64_v17 }
  0xfe   :  { %v68_v19 = vsel %vm48_vm1, %v66_v18, 0.0 }
  0xff   :  { %69 = vadd.xlane.f32.xlu1 %v68_v19  ;;  %v54_v20 = vpop.xlane.xlu0 %53 }
 0x100   :  { %v63_v21 = vmul.f32 %v61_v14, %v54_v20 }
 0x102   :  { %v65_v23 = vsub.f32 %v45_v4, %v63_v21 }
 0x104   :  { %v67_v24 = vmul.f32 %v65_v23, %v65_v23 }
 0x106   :  { %v71_v25 = vsel %vm48_vm1, %v67_v24, 0.0 }
 0x107   :  { %72 = vadd.xlane.f32.xlu1 %v71_v25 }
 0x112   :  { %v116_v46 = vpop.permute.xlu0 %115 }
 0x120   :  { %119 = vperm.xlu1 %148, %v101_v26  }
 0x172   :  { %v70_v27 = vpop.xlane.xlu1 %69 }
 0x173   :  { %v74_v28 = vmul.f32 %v70_v27, %v61_v14 }
 0x175   :  { %v76_v29 = vadd.f32 1e-05, %v74_v28 }
 0x177   :  { %151 = vrsqrt.f32 %v76_v29  ;;  %vm84_vm4 = vweird.f32 %v76_v29 }
 0x17a   :  { %v73_v30 = vpop.xlane.xlu1 %72 }
 0x17b   :  { %v75_v31 = vmul.f32 %v73_v30, %v61_v14 }
 0x17d   :  { %v152_v32 = vpop.eup %151  ;;  %v77_v33 = vadd.f32 1e-05, %v75_v31 }
 0x17e   :  { %v79_v34 = vmul.f32 %v152_v32, %v76_v29  ;;  %vm85_vm3 = vweird.f32 %v152_v32 }
 0x17f   :  { %153 = vrsqrt.f32 %v77_v33  ;;  %vm86_vm5 = vmor %vm84_vm4, %vm85_vm3  ;;  %vm94_vm7 = vweird.f32 %v77_v33 }
 0x180   :  { %v80_v35 = vmul.f32 %v152_v32, %v79_v34 }
 0x182   :  { %v81_v36 = vmul.f32 0.5, %v80_v35 }
 0x184   :  { %v82_v37 = vsub.f32 1.5, %v81_v36 }
 0x185   :  { %v154_v38 = vpop.eup %153 }
 0x186   :  { %v89_v39 = vmul.f32 %v154_v38, %v77_v33  ;;  %v83_v40 = vmul.f32 %v152_v32, %v82_v37  ;;  %vm95_vm6 = vweird.f32 %v154_v38 }
 0x187   :  { %vm96_vm8 = vmor %vm94_vm7, %vm95_vm6 }
 0x188   :  { %v90_v41 = vmul.f32 %v154_v38, %v89_v39  ;;  %v87_v43 = vsel %vm86_vm5, %v152_v32, %v83_v40 }
 0x189   :  { %v98_v44 = vmul.f32 %v87_v43, %v64_v17 }
 0x18a   :  { %v91_v45 = vmul.f32 0.5, %v90_v41 }
 0x18b   :  { %v112_v47 = vmul.f32 %v105_v42, %v98_v44 }
 0x18c   :  { %v92_v48 = vsub.f32 1.5, %v91_v45 }
 0x18d   :  { %v122_v49 = vadd.f32 %v116_v46, %v112_v47 }
 0x18e   :  { %v93_v50 = vmul.f32 %v154_v38, %v92_v48 }
 0x18f   :  { %v124_v51 = vmax.f32 %v122_v49, 0.0 }
 0x190   :  { %v97_v52 = vsel %vm96_vm8, %v154_v38, %v93_v50 }
 0x191   :  { %v99_v53 = vmul.f32 %v97_v52, %v65_v23  ;;  %126 = vst.msk [vmem:[%s205_s3] sm:$0xff] %vm48_vm1, %v124_v51 }
 0x192   :  { %v120_v55 = vpop.permute.xlu1 %119 }
 0x193   :  { %v113_v56 = vmul.f32 %v110_v54, %v99_v53 }
 0x195   :  { %v123_v57 = vadd.f32 %v120_v55, %v113_v56 }
 0x197   :  { %v125_v58 = vmax.f32 %v123_v57, 0.0 }
 0x199   :  { %127 = vst.msk [vmem:[%s205_s3 + $0x8] sm:$0xff] %vm48_vm1, %v125_v58 }

// kernel: transformer_unet_forward.45
= control target key start
LH: loop header
LB: loop body
LE: loop exit
PB: predicated region body
PF: predicated region fallthrough
CT: control target
= control target key end

     0   :  { %vm49_vm0 = vcmask 64512   ;;  %vm168_vm1 = vcmask 130048   ;;  %s613_s1 = inlined_call_operand.vmem [shape: bf16[4,16,8], index: 1, kind: input, shape index: {}]   ;;  %s614_s0 = inlined_call_operand.vmem [shape: bf16[4,16,8], index: 0, kind: input, shape index: {}]   ;;  %s615_s2 = inlined_call_operand.vmem [shape: bf16[4,16,8], index: 2, kind: input, shape index: {}]   ;;  %s616_s3 = inlined_call_operand.vmem [shape: f32[4,16,8], index: 3, kind: output, shape index: {}]  }
   0x1   :  { %v449_v0 = vld [vmem:[%s613_s1] sm:$0xff]  ;;  %v451_v1 = vld [vmem:[%s613_s1 + $0x10] sm:$0xff]  ;;  %v452_v2 = vld [vmem:[%s613_s1 + $0x18] sm:$0xff] }
   0x2   :  { %v450_v3 = vld [vmem:[%s613_s1 + $0x8] sm:$0xff]  ;;  %v54_v4 = vsel %vm49_vm0, %v449_v0, 0  ;;  %v114_v5 = vsel %vm49_vm0, %v451_v1, 0  ;;  %v144_v6 = vsel %vm49_vm0, %v452_v2, 0  ;;  %v445_v8 = vld [vmem:[%s614_s0] sm:$0xff]  ;;  %v447_v9 = vld [vmem:[%s614_s0 + $0x10] sm:$0xff] }
   0x3   :  { %63 = vmatpush.bf16.xpose.msra.mxu0 %v54_v4  ;;  %123 = vmatpush.bf16.xpose.msra.mxu2 %v114_v5  ;;  %v84_v7 = vsel %vm49_vm0, %v450_v3, 0  ;;  %v448_v10 = vld [vmem:[%s614_s0 + $0x18] sm:$0xff]  ;;  %v446_v11 = vld [vmem:[%s614_s0 + $0x8] sm:$0xff] }
   0x4   :  { %153 = vmatpush.bf16.xpose.msra.mxu3 %v144_v6  ;;  %93 = vmatpush.bf16.xpose.msra.mxu1 %v84_v7 }
   0xa   :  { %397 = vmatmul.msk.bf16.vlgmr.msra.gmra.mxu0 %vm49_vm0, %v445_v8  ;;  %415 = vmatmul.msk.bf16.vlgmr.msra.gmra.mxu2 %vm49_vm0, %v447_v9 }
   0xb   :  { %424 = vmatmul.msk.bf16.vlgmr.msra.gmra.mxu3 %vm49_vm0, %v448_v10  ;;  %406 = vmatmul.msk.bf16.vlgmr.msra.gmra.mxu1 %vm49_vm0, %v446_v11 }
  0x87   :  { %v65_v12 = vpop.f32.mrf.mxu0 }
  0x88   :  { %v160_v13 = vmul.f32 0.35355338, %v65_v12  ;;  %v95_v20 = vpop.f32.mrf.mxu1  ;;  %v455_v12 = vld [vmem:[%s615_s2 + $0x10] sm:$0xff] }
  0x89   :  { %v162_v32 = vmul.f32 0.35355338, %v95_v20  ;;  %342 = vmatpush.bf16.msrb.mxu2 %v455_v12 }
  0x8a   :  { %v169_v14 = vsel %vm168_vm1, %v160_v13, -inf }
  0x8b   :  { %170 = vmax.xlane.f32.xlu2 %v169_v14  ;;  %v175_v34 = vsel %vm168_vm1, %v162_v32, -inf  ;;  %v453_v14 = vld [vmem:[%s615_s2] sm:$0xff] }
  0x8c   :  { %286 = vmatpush.bf16.msrb.mxu0 %v453_v14 }
  0x8d   :  { %v125_v15 = vpop.f32.mrf.mxu2 }
  0x8e   :  { %v164_v16 = vmul.f32 0.35355338, %v125_v15  ;;  %v155_v17 = vpop.f32.mrf.mxu3  ;;  %v454_v15 = vld [vmem:[%s615_s2 + $0x8] sm:$0xff] }
  0x8f   :  { %v166_v18 = vmul.f32 0.35355338, %v155_v17  ;;  %v67_v19 = vpop.f32.mrf.mxu0  ;;  %314 = vmatpush.bf16.msrb.mxu1 %v454_v15 }
  0x90   :  { %v161_v21 = vmul.f32 0.35355338, %v67_v19  ;;  %v181_v22 = vsel %vm168_vm1, %v164_v16, -inf  ;;  %v97_v31 = vpop.f32.mrf.mxu1 }
  0x91   :  { %v187_v23 = vsel %vm168_vm1, %v166_v18, -inf  ;;  %182 = vmax.xlane.f32.xlu0 %v181_v22  ;;  %v163_v33 = vmul.f32 0.35355338, %v97_v31 }
  0x92   :  { %188 = vmax.xlane.f32.xlu1 %v187_v23  ;;  %v172_v24 = vsel %vm168_vm1, %v161_v21, -inf }
  0x93   :  { %173 = vmax.xlane.f32.xlu2 %v172_v24  ;;  %v178_v35 = vsel %vm168_vm1, %v163_v33, -inf }
  0x95   :  { %v127_v25 = vpop.f32.mrf.mxu2 }
  0x96   :  { %v165_v26 = vmul.f32 0.35355338, %v127_v25  ;;  %v157_v27 = vpop.f32.mrf.mxu3 }
  0x97   :  { %v167_v28 = vmul.f32 0.35355338, %v157_v27 }
  0x98   :  { %v184_v29 = vsel %vm168_vm1, %v165_v26, -inf }
  0x99   :  { %v190_v30 = vsel %vm168_vm1, %v167_v28, -inf  ;;  %185 = vmax.xlane.f32.xlu0 %v184_v29 }
  0x9a   :  { %191 = vmax.xlane.f32.xlu1 %v190_v30 }
  0xa1   :  { %176 = vmax.xlane.f32.xlu0 %v175_v34 }
  0xa2   :  { %179 = vmax.xlane.f32.xlu1 %v178_v35 }
  0xfe   :  { %v171_v36 = vpop.xlane.xlu2 %170 }
  0xff   :  { %v193_v37 = vsub.f32 %v160_v13, %v171_v36  ;;  %v456_v13 = vld [vmem:[%s615_s2 + $0x18] sm:$0xff] }
 0x100   :  { %370 = vmatpush.bf16.msrb.mxu3 %v456_v13 }
 0x101   :  { %v201_v38 = vmul.f32 1.442695, %v193_v37 }
 0x103   :  { %457 = vpow2.f32 %v201_v38 }
 0x104   :  { %v183_v39 = vpop.xlane.xlu0 %182 }
 0x105   :  { %v189_v40 = vpop.xlane.xlu1 %188  ;;  %v197_v41 = vsub.f32 %v164_v16, %v183_v39 }
 0x106   :  { %v199_v42 = vsub.f32 %v166_v18, %v189_v40  ;;  %v174_v43 = vpop.xlane.xlu2 %173 }
 0x107   :  { %v209_v44 = vmul.f32 1.442695, %v197_v41  ;;  %v194_v46 = vsub.f32 %v161_v21, %v174_v43 }
 0x108   :  { %v213_v45 = vmul.f32 1.442695, %v199_v42 }
 0x109   :  { %v549_v47 = vpop.eup %457  ;;  %459 = vpow2.f32 %v209_v44  ;;  %v203_v49 = vmul.f32 1.442695, %v194_v46 }
 0x10a   :  { %461 = vpow2.f32 %v213_v45  ;;  %v217_v48 = vsel %vm168_vm1, %v549_v47, 0.0 }
 0x10b   :  { %218 = vadd.xlane.f32.xlu0 %v217_v48  ;;  %463 = vpow2.f32 %v203_v49 }
 0x10c   :  { %v186_v50 = vpop.xlane.xlu0 %185 }
 0x10d   :  { %v192_v51 = vpop.xlane.xlu1 %191  ;;  %v198_v52 = vsub.f32 %v165_v26, %v186_v50 }
 0x10e   :  { %v200_v53 = vsub.f32 %v167_v28, %v192_v51 }
 0x10f   :  { %v460_v54 = vpop.eup %459  ;;  %v211_v55 = vmul.f32 1.442695, %v198_v52 }
 0x110   :  { %v462_v56 = vpop.eup %461  ;;  %v215_v57 = vmul.f32 1.442695, %v200_v53  ;;  %v229_v58 = vsel %vm168_vm1, %v460_v54, 0.0 }
 0x111   :  { %465 = vpow2.f32 %v211_v55  ;;  %v235_v59 = vsel %vm168_vm1, %v462_v56, 0.0  ;;  %230 = vadd.xlane.f32.xlu2 %v229_v58  ;;  %v464_v63 = vpop.eup %463 }
 0x112   :  { %467 = vpow2.f32 %v215_v57  ;;  %236 = vadd.xlane.f32.xlu1 %v235_v59  ;;  %v220_v7 = vsel %vm168_vm1, %v464_v63, 0.0 }
 0x114   :  { %v177_v60 = vpop.xlane.xlu0 %176 }
 0x115   :  { %v195_v61 = vsub.f32 %v162_v32, %v177_v60  ;;  %v180_v62 = vpop.xlane.xlu1 %179 }
 0x116   :  { %v196_v0 = vsub.f32 %v163_v33, %v180_v62 }
 0x117   :  { %v466_v1 = vpop.eup %465  ;;  %v205_v2 = vmul.f32 1.442695, %v195_v61 }
 0x118   :  { %v468_v3 = vpop.eup %467  ;;  %v207_v4 = vmul.f32 1.442695, %v196_v0  ;;  %v232_v5 = vsel %vm168_vm1, %v466_v1, 0.0 }
 0x119   :  { %469 = vpow2.f32 %v205_v2  ;;  %233 = vadd.xlane.f32.xlu0 %v232_v5  ;;  %v238_v6 = vsel %vm168_vm1, %v468_v3, 0.0 }
 0x11a   :  { %471 = vpow2.f32 %v207_v4  ;;  %239 = vadd.xlane.f32.xlu2 %v238_v6  ;;  %221 = vadd.xlane.f32.xlu1 %v220_v7 }
 0x11f   :  { %v558_v8 = vpop.eup %469 }
 0x120   :  { %v472_v9 = vpop.eup %471  ;;  %v223_v10 = vsel %vm168_vm1, %v558_v8, 0.0 }
 0x121   :  { %v226_v11 = vsel %vm168_vm1, %v472_v9, 0.0 }
 0x122   :  { %227 = vadd.xlane.f32.xlu0 %v226_v11  ;;  %224 = vadd.xlane.f32.xlu2 %v223_v10 }
 0x17e   :  { %v219_v16 = vpop.xlane.xlu0 %218 }
 0x184   :  { %v231_v17 = vpop.xlane.xlu2 %230 }
 0x185   :  { %v237_v18 = vpop.xlane.xlu1 %236  ;;  %473 = vrcp.f32 %v231_v17 }
 0x186   :  { %475 = vrcp.f32 %v219_v16 }
 0x187   :  { %477 = vrcp.f32 %v237_v18 }
 0x18b   :  { %v474_v20 = vpop.eup %473 }
 0x18c   :  { %v234_v19 = vpop.xlane.xlu0 %233  ;;  %v476_v23 = vpop.eup %475  ;;  %v253_v25 = vmul.f32 %v474_v20, %v460_v54 }
 0x18d   :  { %479 = vrcp.f32 %v234_v19  ;;  %v222_v21 = vpop.xlane.xlu1 %221  ;;  %v240_v22 = vpop.xlane.xlu2 %239  ;;  %v249_v26 = vmul.f32 %v476_v23, %v549_v47 }
 0x18e   :  { %481 = vrcp.f32 %v222_v21  ;;  %v478_v24 = vpop.eup %477  ;;  %v261_v30 = vpack.c.bf16 %v253_v25, %v253_v25 }
 0x18f   :  { %483 = vrcp.f32 %v240_v22  ;;  %v255_v27 = vmul.f32 %v478_v24, %v462_v56  ;;  %v257_v33 = vpack.c.bf16 %v249_v26, %v249_v26 }
 0x190   :  { %v323_v41 = vunpack.c.l.b16 %v261_v30 }
 0x191   :  { %v263_v37 = vpack.c.bf16 %v255_v27, %v255_v27  ;;  %v267_v44 = vunpack.c.l.b16 %v257_v33 }
 0x193   :  { %v480_v28 = vpop.eup %479  ;;  %v351_v46 = vunpack.c.l.b16 %v263_v37 }
 0x194   :  { %v482_v29 = vpop.eup %481  ;;  %v254_v31 = vmul.f32 %v480_v28, %v466_v1 }
 0x195   :  { %v484_v32 = vpop.eup %483  ;;  %v250_v34 = vmul.f32 %v482_v29, %v464_v63  ;;  %v228_v35 = vpop.xlane.xlu0 %227 }
 0x196   :  { %v225_v36 = vpop.xlane.xlu2 %224  ;;  %v262_v38 = vpack.c.bf16 %v254_v31, %v254_v31  ;;  %v256_v39 = vmul.f32 %v484_v32, %v468_v3  ;;  %485 = vrcp.f32 %v228_v35 }
 0x197   :  { %v258_v40 = vpack.c.bf16 %v250_v34, %v250_v34  ;;  %487 = vrcp.f32 %v225_v36 }
 0x198   :  { %v324_v42 = vunpack.c.l.b16 %v262_v38  ;;  %v264_v43 = vpack.c.bf16 %v256_v39, %v256_v39 }
 0x199   :  { %v268_v45 = vunpack.c.l.b16 %v258_v40 }
 0x19a   :  { %v352_v47 = vunpack.c.l.b16 %v264_v43  ;;  %v325_v48 = vpack.c.b16 %v324_v42, %v323_v41 }
 0x19b   :  { %v269_v49 = vpack.c.b16 %v268_v45, %v267_v44 }
 0x19c   :  { %v486_v50 = vpop.eup %485  ;;  %439 = vmatmul.msk.bf16.vlgmr.msrb.gmra.mxu2 %vm168_vm1, %v325_v48  ;;  %v353_v51 = vpack.c.b16 %v352_v47, %v351_v46 }
 0x19d   :  { %v488_v52 = vpop.eup %487  ;;  %v252_v53 = vmul.f32 %v486_v50, %v472_v9  ;;  %429 = vmatmul.msk.bf16.vlgmr.msrb.gmra.mxu0 %vm168_vm1, %v269_v49 }
 0x19e   :  { %v251_v54 = vmul.f32 %v488_v52, %v558_v8  ;;  %444 = vmatmul.msk.bf16.vlgmr.msrb.gmra.mxu3 %vm168_vm1, %v353_v51 }
 0x19f   :  { %v260_v55 = vpack.c.bf16 %v252_v53, %v252_v53 }
 0x1a0   :  { %v259_v56 = vpack.c.bf16 %v251_v54, %v251_v54 }
 0x1a1   :  { %v296_v57 = vunpack.c.l.b16 %v260_v55 }
 0x1a2   :  { %v295_v58 = vunpack.c.l.b16 %v259_v56 }
 0x1a4   :  { %v297_v59 = vpack.c.b16 %v296_v57, %v295_v58 }
 0x1a6   :  { %434 = vmatmul.msk.bf16.vlgmr.msrb.gmra.mxu1 %vm168_vm1, %v297_v59 }
 0x21a   :  { %v288_v60 = vpop.f32.mrf.mxu0 }
 0x21b   :  { %377 = vst.msk [vmem:[%s616_s3] sm:$0xff] %vm49_vm0, %v288_v60 }
 0x21f   :  { %v344_v61 = vpop.f32.mrf.mxu2 }
 0x220   :  { %381 = vst.msk [vmem:[%s616_s3 + $0x20] sm:$0xff] %vm49_vm0, %v344_v61 }
 0x221   :  { %v372_v62 = vpop.f32.mrf.mxu3 }
 0x222   :  { %383 = vst.msk [vmem:[%s616_s3 + $0x30] sm:$0xff] %vm49_vm0, %v372_v62  ;;  %v290_v63 = vpop.f32.mrf.mxu0 }
 0x223   :  { %378 = vst.msk [vmem:[%s616_s3 + $0x8] sm:$0xff] %vm49_vm0, %v290_v63  ;;  %v316_v0 = vpop.f32.mrf.mxu1 }
 0x224   :  { %379 = vst.msk [vmem:[%s616_s3 + $0x10] sm:$0xff] %vm49_vm0, %v316_v0 }
 0x227   :  { %v346_v1 = vpop.f32.mrf.mxu2 }
 0x228   :  { %382 = vst.msk [vmem:[%s616_s3 + $0x28] sm:$0xff] %vm49_vm0, %v346_v1 }
 0x229   :  { %v374_v2 = vpop.f32.mrf.mxu3 }
 0x22a   :  { %384 = vst.msk [vmem:[%s616_s3 + $0x38] sm:$0xff] %vm49_vm0, %v374_v2 }
 0x22b   :  { %v318_v3 = vpop.f32.mrf.mxu1 }
 0x22c   :  { %380 = vst.msk [vmem:[%s616_s3 + $0x18] sm:$0xff] %vm49_vm0, %v318_v3 }

// kernel: transformer_unet_forward.47
= control target key start
LH: loop header
LB: loop body
LE: loop exit
PB: predicated region body
PF: predicated region fallthrough
CT: control target
= control target key end

     0   :  { %vm30_vm0 = vcmask 130048   ;;  %vm48_vm1 = vcmask 261120   ;;  %v199_v6 = vmov 32.0   ;;  %v200_v10 = vmov 1   ;;  %s246_s1 = inlined_call_operand.vmem [shape: bf16[16,32], index: 1, kind: input, shape index: {}]   ;;  %s247_s0 = inlined_call_operand.vmem [shape: bf16[16,16], index: 0, kind: input, shape index: {}]   ;;  %s248_s2 = inlined_call_operand.vmem [shape: f32[16,2], index: 2, kind: input, shape index: {}]   ;;  %s249_s3 = inlined_call_operand.vmem [shape: f32[16,32], index: 3, kind: output, shape index: {}]  }
   0x1   :  { %v178_v0 = vld [vmem:[%s246_s1] sm:$0xff]  ;;  %185 = vrcp.f32 %v199_v6  ;;  %183 = vset.pattern.permute.xlu0 %v200_v10  ;;  %184 = vset.pattern.permute.xlu1 %v200_v10  ;;  %v201_v22 = vmov 0   ;;  %v101_v26 = vld [vmem:[%s248_s2 + $0x8] sm:$0xff] }
   0x2   :  { %v177_v1 = vld [vmem:[%s247_s0] sm:$0xff]  ;;  %41 = vmatpush.bf16.msra.mxu0 %v178_v0  ;;  %182 = vset.pattern.permute.xlu2 %v201_v22 }
   0x3   :  { %v100_v9 = vld [vmem:[%s248_s2] sm:$0xff] }
   0x4   :  { %104 = vperm.xlu2 %182, %v100_v9  }
   0x5   :  { %176 = vmatmul.msk.bf16.vlgmr.msra.gmra.mxu0 %vm30_vm0, %v177_v1 }
   0x7   :  { %v186_v7 = vpop.eup %185 }
   0x8   :  { %v56_v8 = vmul.f32 32.0, %v186_v7  ;;  %vm60_vm2 = vweird.f32 %v186_v7 }
   0xa   :  { %v57_v11 = vsub.f32 1.0, %v56_v8 }
   0xc   :  { %v58_v12 = vmul.f32 %v186_v7, %v57_v11  ;;  %109 = vperm.xlu2 %182, %v101_v26  }
   0xe   :  { %v59_v13 = vadd.f32 %v186_v7, %v58_v12 }
  0x10   :  { %v61_v14 = vsel %vm60_vm2, %v186_v7, %v59_v13 }
  0x5e   :  { %v105_v42 = vpop.permute.xlu2 %104 }
  0x66   :  { %v110_v55 = vpop.permute.xlu2 %109 }
  0x82   :  { %v43_v2 = vpop.f32.mrf.mxu0 }
  0x83   :  { %v49_v3 = vsel %vm48_vm1, %v43_v2, 0.0 }
  0x84   :  { %50 = vadd.xlane.f32.xlu0 %v49_v3 }
  0x8a   :  { %v45_v4 = vpop.f32.mrf.mxu0 }
  0x8b   :  { %v52_v5 = vsel %vm48_vm1, %v45_v4, 0.0 }
  0x8c   :  { %53 = vadd.xlane.f32.xlu0 %v52_v5 }
  0xa0   :  { %115 = vperm.xlu0 %183, %v100_v9  }
  0xf7   :  { %v51_v15 = vpop.xlane.xlu0 %50 }
  0xf8   :  { %v62_v16 = vmul.f32 %v61_v14, %v51_v15 }
  0xfa   :  { %v64_v17 = vsub.f32 %v43_v2, %v62_v16 }
  0xfc   :  { %v66_v18 = vmul.f32 %v64_v17, %v64_v17 }
  0xfe   :  { %v68_v19 = vsel %vm48_vm1, %v66_v18, 0.0 }
  0xff   :  { %69 = vadd.xlane.f32.xlu1 %v68_v19  ;;  %v54_v20 = vpop.xlane.xlu0 %53 }
 0x100   :  { %v63_v21 = vmul.f32 %v61_v14, %v54_v20 }
 0x102   :  { %v65_v23 = vsub.f32 %v45_v4, %v63_v21 }
 0x104   :  { %v67_v24 = vmul.f32 %v65_v23, %v65_v23 }
 0x106   :  { %v71_v25 = vsel %vm48_vm1, %v67_v24, 0.0 }
 0x107   :  { %72 = vadd.xlane.f32.xlu1 %v71_v25 }
 0x112   :  { %v116_v46 = vpop.permute.xlu0 %115 }
 0x120   :  { %119 = vperm.xlu1 %184, %v101_v26  }
 0x172   :  { %v70_v27 = vpop.xlane.xlu1 %69 }
 0x173   :  { %v74_v28 = vmul.f32 %v70_v27, %v61_v14 }
 0x175   :  { %v76_v29 = vadd.f32 1e-05, %v74_v28 }
 0x177   :  { %187 = vrsqrt.f32 %v76_v29  ;;  %vm84_vm4 = vweird.f32 %v76_v29 }
 0x17a   :  { %v73_v30 = vpop.xlane.xlu1 %72 }
 0x17b   :  { %v75_v31 = vmul.f32 %v73_v30, %v61_v14 }
 0x17d   :  { %v188_v32 = vpop.eup %187  ;;  %v77_v33 = vadd.f32 1e-05, %v75_v31 }
 0x17e   :  { %v79_v34 = vmul.f32 %v188_v32, %v76_v29  ;;  %vm85_vm3 = vweird.f32 %v188_v32 }
 0x17f   :  { %189 = vrsqrt.f32 %v77_v33  ;;  %vm86_vm5 = vmor %vm84_vm4, %vm85_vm3  ;;  %vm94_vm7 = vweird.f32 %v77_v33 }
 0x180   :  { %v80_v35 = vmul.f32 %v188_v32, %v79_v34 }
 0x182   :  { %v81_v36 = vmul.f32 0.5, %v80_v35 }
 0x184   :  { %v82_v37 = vsub.f32 1.5, %v81_v36 }
 0x185   :  { %v190_v38 = vpop.eup %189 }
 0x186   :  { %v89_v39 = vmul.f32 %v190_v38, %v77_v33  ;;  %v83_v40 = vmul.f32 %v188_v32, %v82_v37  ;;  %vm95_vm6 = vweird.f32 %v190_v38 }
 0x187   :  { %vm96_vm8 = vmor %vm94_vm7, %vm95_vm6 }
 0x188   :  { %v90_v41 = vmul.f32 %v190_v38, %v89_v39  ;;  %v87_v43 = vsel %vm86_vm5, %v188_v32, %v83_v40 }
 0x189   :  { %v98_v44 = vmul.f32 %v87_v43, %v64_v17 }
 0x18a   :  { %v91_v45 = vmul.f32 0.5, %v90_v41 }
 0x18b   :  { %v112_v47 = vmul.f32 %v105_v42, %v98_v44 }
 0x18c   :  { %v92_v48 = vsub.f32 1.5, %v91_v45 }
 0x18d   :  { %v122_v49 = vadd.f32 %v116_v46, %v112_v47 }
 0x18e   :  { %v93_v50 = vmul.f32 %v190_v38, %v92_v48 }
 0x18f   :  { %v124_v51 = vsub.f32 0.0, %v122_v49 }
 0x190   :  { %v97_v52 = vsel %vm96_vm8, %v190_v38, %v93_v50 }
 0x191   :  { %v99_v53 = vmul.f32 %v97_v52, %v65_v23  ;;  %v126_v54 = vmul.f32 1.442695, %v124_v51 }
 0x192   :  { %v120_v56 = vpop.permute.xlu1 %119 }
 0x193   :  { %v113_v57 = vmul.f32 %v110_v55, %v99_v53  ;;  %191 = vpow2.f32 %v126_v54 }
 0x195   :  { %v123_v58 = vadd.f32 %v120_v56, %v113_v57 }
 0x197   :  { %v125_v59 = vsub.f32 0.0, %v123_v58 }
 0x199   :  { %v192_v60 = vpop.eup %191  ;;  %v128_v61 = vmul.f32 1.442695, %v125_v59 }
 0x19a   :  { %v130_v62 = vadd.f32 1.0, %v192_v60 }
 0x19b   :  { %193 = vpow2.f32 %v128_v61 }
 0x19c   :  { %195 = vrcp.f32 %v130_v62  ;;  %v143_v4 = vand.u32 2147483648, %v130_v62  ;;  %v141_v6 = vand.u32 2147483647, %v130_v62  ;;  %vm137_vm10 = vweird.f32 %v130_v62 }
 0x19e   :  { %v144_v9 = vor.u32 1.1754944e-38, %v143_v4  ;;  %vm142_vm12 = vcmp.eq.f32.partialorder %v141_v6, 8.507059e+37 }
 0x1a1   :  { %v194_v63 = vpop.eup %193 }
 0x1a2   :  { %v196_v0 = vpop.eup %195  ;;  %v131_v1 = vadd.f32 1.0, %v194_v63 }
 0x1a3   :  { %v133_v2 = vmul.f32 %v196_v0, %v130_v62  ;;  %vm138_vm9 = vweird.f32 %v196_v0 }
 0x1a4   :  { %197 = vrcp.f32 %v131_v1  ;;  %vm139_vm11 = vmor %vm137_vm10, %vm138_vm9  ;;  %v158_v14 = vand.u32 2147483648, %v131_v1  ;;  %v156_v16 = vand.u32 2147483647, %v131_v1  ;;  %vm152_vm14 = vweird.f32 %v131_v1 }
 0x1a5   :  { %v134_v3 = vsub.f32 1.0, %v133_v2 }
 0x1a6   :  { %v159_v18 = vor.u32 1.1754944e-38, %v158_v14  ;;  %vm157_vm0 = vcmp.eq.f32.partialorder %v156_v16, 8.507059e+37 }
 0x1a7   :  { %v135_v5 = vmul.f32 %v196_v0, %v134_v3 }
 0x1a9   :  { %v136_v7 = vadd.f32 %v196_v0, %v135_v5 }
 0x1aa   :  { %v198_v8 = vpop.eup %197 }
 0x1ab   :  { %v140_v10 = vsel %vm139_vm11, %v196_v0, %v136_v7  ;;  %v148_v11 = vmul.f32 %v198_v8, %v131_v1  ;;  %vm153_vm13 = vweird.f32 %v198_v8 }
 0x1ac   :  { %v145_v12 = vsel %vm142_vm12, %v144_v9, %v140_v10  ;;  %vm154_vm15 = vmor %vm152_vm14, %vm153_vm13 }
 0x1ad   :  { %162 = vst.msk [vmem:[%s249_s3] sm:$0xff] %vm48_vm1, %v145_v12  ;;  %v149_v13 = vsub.f32 1.0, %v148_v11 }
 0x1af   :  { %v150_v15 = vmul.f32 %v198_v8, %v149_v13 }
 0x1b1   :  { %v151_v17 = vadd.f32 %v198_v8, %v150_v15 }
 0x1b3   :  { %v155_v19 = vsel %vm154_vm15, %v198_v8, %v151_v17 }
 0x1b4   :  { %v160_v20 = vsel %vm157_vm0, %v159_v18, %v155_v19 }
 0x1b5   :  { %163 = vst.msk [vmem:[%s249_s3 + $0x8] sm:$0xff] %vm48_vm1, %v160_v20 }

// kernel: transformer_unet_forward.48
= control target key start
LH: loop header
LB: loop body
LE: loop exit
PB: predicated region body
PF: predicated region fallthrough
CT: control target
= control target key end

     0   :  { %vm48_vm0 = vcmask 130048   ;;  %vm90_vm1 = vcmask 261120   ;;  %s197_s1 = inlined_call_operand.vmem [shape: bf16[16,32], index: 1, kind: input, shape index: {}]   ;;  %s198_s0 = inlined_call_operand.vmem [shape: bf16[64,16], index: 0, kind: input, shape index: {}]   ;;  %s199_s2 = inlined_call_operand.vmem [shape: f32[64,32], index: 2, kind: output, shape index: {}]  }
   0x1   :  { %v131_v0 = vld [vmem:[%s197_s1] sm:$0xff]  ;;  %v128_v2 = vld [vmem:[%s198_s0 + $0x8] sm:$0xff]  ;;  %v129_v3 = vld [vmem:[%s198_s0 + $0x10] sm:$0xff] }
   0x2   :  { %v127_v1 = vld [vmem:[%s198_s0] sm:$0xff]  ;;  %68 = vmatpush.bf16.msra.mxu0 %v131_v0  ;;  %132 = vmatpush.bf16.msra.mxu1 %v131_v0  ;;  %v130_v4 = vld [vmem:[%s198_s0 + $0x18] sm:$0xff] }
   0x3   :  { %133 = vmatpush.bf16.msra.mxu2 %v131_v0  ;;  %134 = vmatpush.bf16.msra.mxu3 %v131_v0 }
   0x5   :  { %123 = vmatmul.msk.bf16.vlgmr.msra.gmra.mxu0 %vm48_vm0, %v127_v1  ;;  %124 = vmatmul.msk.bf16.vlgmr.msra.gmra.mxu1 %vm48_vm0, %v128_v2 }
   0x6   :  { %125 = vmatmul.msk.bf16.vlgmr.msra.gmra.mxu2 %vm48_vm0, %v129_v3  ;;  %126 = vmatmul.msk.bf16.vlgmr.msra.gmra.mxu3 %vm48_vm0, %v130_v4 }
  0x82   :  { %v70_v5 = vpop.f32.mrf.mxu0  ;;  %v75_v6 = vpop.f32.mrf.mxu1 }
  0x83   :  { %91 = vst.msk [vmem:[%s199_s2] sm:$0xff] %vm90_vm1, %v70_v5 }
  0x84   :  { %93 = vst.msk [vmem:[%s199_s2 + $0x10] sm:$0xff] %vm90_vm1, %v75_v6 }
  0x89   :  { %v80_v7 = vpop.f32.mrf.mxu2  ;;  %v85_v8 = vpop.f32.mrf.mxu3 }
  0x8a   :  { %95 = vst.msk [vmem:[%s199_s2 + $0x20] sm:$0xff] %vm90_vm1, %v80_v7  ;;  %v72_v9 = vpop.f32.mrf.mxu0  ;;  %v77_v10 = vpop.f32.mrf.mxu1 }
  0x8b   :  { %97 = vst.msk [vmem:[%s199_s2 + $0x30] sm:$0xff] %vm90_vm1, %v85_v8 }
  0x8c   :  { %92 = vst.msk [vmem:[%s199_s2 + $0x8] sm:$0xff] %vm90_vm1, %v72_v9 }
  0x8d   :  { %94 = vst.msk [vmem:[%s199_s2 + $0x18] sm:$0xff] %vm90_vm1, %v77_v10 }
  0x91   :  { %v82_v11 = vpop.f32.mrf.mxu2  ;;  %v87_v12 = vpop.f32.mrf.mxu3 }
  0x92   :  { %96 = vst.msk [vmem:[%s199_s2 + $0x28] sm:$0xff] %vm90_vm1, %v82_v11 }
  0x93   :  { %98 = vst.msk [vmem:[%s199_s2 + $0x38] sm:$0xff] %vm90_vm1, %v87_v12 }

// kernel: transformer_unet_forward.49
= control target key start
LH: loop header
LB: loop body
LE: loop exit
PB: predicated region body
PF: predicated region fallthrough
CT: control target
= control target key end

     0   :  { %vm56_vm0 = vcmask 261120   ;;  %s219_s1 = inlined_call_operand.vmem [shape: bf16[32,32], index: 1, kind: input, shape index: {}]   ;;  %s220_s0 = inlined_call_operand.vmem [shape: bf16[64,32], index: 0, kind: input, shape index: {}]   ;;  %s221_s2 = inlined_call_operand.vmem [shape: f32[64,32], index: 2, kind: output, shape index: {}]  }
   0x1   :  { %v143_v0 = vld [vmem:[%s219_s1 + $0x8] sm:$0xff]  ;;  %v142_v1 = vld [vmem:[%s219_s1] sm:$0xff]  ;;  %v140_v4 = vld [vmem:[%s220_s0 + $0x10] sm:$0xff] }
   0x2   :  { %75 = vmatpush.bf16.msra.mxu0 %v143_v0  ;;  %144 = vmatpush.bf16.msra.mxu1 %v143_v0  ;;  %v138_v2 = vld [vmem:[%s220_s0] sm:$0xff]  ;;  %v139_v3 = vld [vmem:[%s220_s0 + $0x8] sm:$0xff]  ;;  %v141_v5 = vld [vmem:[%s220_s0 + $0x18] sm:$0xff] }
   0x3   :  { %145 = vmatpush.bf16.msra.mxu2 %v143_v0  ;;  %146 = vmatpush.bf16.msra.mxu3 %v143_v0 }
   0x6   :  { %76 = vmatpush.bf16.msra.mxu0 %v142_v1  ;;  %147 = vmatpush.bf16.msra.mxu1 %v142_v1 }
   0x7   :  { %148 = vmatpush.bf16.msra.mxu2 %v142_v1  ;;  %149 = vmatpush.bf16.msra.mxu3 %v142_v1 }
   0x9   :  { %134 = vmatmul.msk.bf16.vlgmr.msra.gmra.mxu0 %vm56_vm0, %v138_v2  ;;  %135 = vmatmul.msk.bf16.vlgmr.msra.gmra.mxu1 %vm56_vm0, %v139_v3 }
   0xa   :  { %136 = vmatmul.msk.bf16.vlgmr.msra.gmra.mxu2 %vm56_vm0, %v140_v4  ;;  %137 = vmatmul.msk.bf16.vlgmr.msra.gmra.mxu3 %vm56_vm0, %v141_v5 }
  0x86   :  { %v78_v6 = vpop.f32.mrf.mxu0  ;;  %v83_v7 = vpop.f32.mrf.mxu1 }
  0x87   :  { %98 = vst.msk [vmem:[%s221_s2] sm:$0xff] %vm56_vm0, %v78_v6 }
  0x88   :  { %100 = vst.msk [vmem:[%s221_s2 + $0x10] sm:$0xff] %vm56_vm0, %v83_v7 }
  0x8d   :  { %v88_v8 = vpop.f32.mrf.mxu2  ;;  %v93_v9 = vpop.f32.mrf.mxu3 }
  0x8e   :  { %102 = vst.msk [vmem:[%s221_s2 + $0x20] sm:$0xff] %vm56_vm0, %v88_v8  ;;  %v80_v10 = vpop.f32.mrf.mxu0  ;;  %v85_v11 = vpop.f32.mrf.mxu1 }
  0x8f   :  { %104 = vst.msk [vmem:[%s221_s2 + $0x30] sm:$0xff] %vm56_vm0, %v93_v9 }
  0x90   :  { %99 = vst.msk [vmem:[%s221_s2 + $0x8] sm:$0xff] %vm56_vm0, %v80_v10 }
  0x91   :  { %101 = vst.msk [vmem:[%s221_s2 + $0x18] sm:$0xff] %vm56_vm0, %v85_v11 }
  0x95   :  { %v90_v12 = vpop.f32.mrf.mxu2  ;;  %v95_v13 = vpop.f32.mrf.mxu3 }
  0x96   :  { %103 = vst.msk [vmem:[%s221_s2 + $0x28] sm:$0xff] %vm56_vm0, %v90_v12 }
  0x97   :  { %105 = vst.msk [vmem:[%s221_s2 + $0x38] sm:$0xff] %vm56_vm0, %v95_v13 }

// kernel: transformer_unet_forward.53
= control target key start
LH: loop header
LB: loop body
LE: loop exit
PB: predicated region body
PF: predicated region fallthrough
CT: control target
= control target key end

     0   :  { %vm24_vm0 = vcmask 130048   ;;  %v102_v4 = vmov 128.0   ;;  %v103_v6 = vmov 0   ;;  %v104_v7 = vmov 1   ;;  %s137_s1 = inlined_call_operand.vmem [shape: bf16[16,128], index: 1, kind: input, shape index: {}]   ;;  %s138_s0 = inlined_call_operand.vmem [shape: bf16[8,16], index: 0, kind: input, shape index: {}]   ;;  %s139_s2 = inlined_call_operand.vmem [shape: f32[8,2], index: 2, kind: input, shape index: {}]   ;;  %s140_s3 = inlined_call_operand.vmem [shape: f32[8,128], index: 3, kind: output, shape index: {}]  }
   0x1   :  { %v91_v0 = vld [vmem:[%s137_s1] sm:$0xff]  ;;  %98 = vrcp.f32 %v102_v4  ;;  %95 = vset.pattern.permute.xlu1 %v103_v6  ;;  %97 = vset.pattern.permute.xlu0 %v104_v7 }
   0x2   :  { %35 = vmatpush.bf16.msra.mxu0 %v91_v0  ;;  %v15_v1 = vld [vmem:[%s138_s0] sm:$0xf] }
   0x3   :  { %v68_v5 = vld [vmem:[%s139_s2] sm:$0xff] }
   0x4   :  { %71 = vperm.xlu1 %95, %v68_v5  }
   0x5   :  { %90 = vmatmul.msk.bf16.vlgmr.msra.gmra.mxu0 %vm24_vm0, %v15_v1 }
   0x7   :  { %v99_v8 = vpop.eup %98 }
   0x8   :  { %v44_v9 = vmul.f32 128.0, %v99_v8  ;;  %vm48_vm1 = vweird.f32 %v99_v8 }
   0xa   :  { %v45_v10 = vsub.f32 1.0, %v44_v9 }
   0xc   :  { %96 = vset.pattern.permute.xlu1 %v104_v7  ;;  %v46_v11 = vmul.f32 %v99_v8, %v45_v10 }
   0xd   :  { %76 = vperm.xlu1 %96, %v68_v5  }
   0xe   :  { %v47_v12 = vadd.f32 %v99_v8, %v46_v11 }
  0x10   :  { %v49_v13 = vsel %vm48_vm1, %v99_v8, %v47_v12 }
  0x76   :  { %v72_v24 = vpop.permute.xlu1 %71 }
  0x7f   :  { %v77_v30 = vpop.permute.xlu1 %76 }
  0x82   :  { %v37_v2 = vpop.f32.mrf.mxu0 }
  0x83   :  { %41 = vadd.xlane.f32.xlu0 %v37_v2 }
  0x8a   :  { %v39_v3 = vpop.f32.mrf.mxu0 }
  0xf6   :  { %v42_v14 = vpop.xlane.xlu0 %41 }
  0xf7   :  { %v50_v15 = vmul.f32 %v49_v13, %v42_v14 }
  0xf9   :  { %v51_v16 = vsub.f32 %v37_v2, %v50_v15 }
  0xfb   :  { %v52_v17 = vmul.f32 %v51_v16, %v51_v16 }
  0xfd   :  { %53 = vadd.xlane.f32.xlu0 %v52_v17 }
 0x170   :  { %v54_v18 = vpop.xlane.xlu0 %53 }
 0x171   :  { %v55_v19 = vmul.f32 %v54_v18, %v49_v13 }
 0x173   :  { %v56_v20 = vadd.f32 1e-05, %v55_v19 }
 0x175   :  { %100 = vrsqrt.f32 %v56_v20  ;;  %vm63_vm3 = vweird.f32 %v56_v20 }
 0x17b   :  { %v101_v21 = vpop.eup %100 }
 0x17c   :  { %v58_v22 = vmul.f32 %v101_v21, %v56_v20  ;;  %vm64_vm2 = vweird.f32 %v101_v21 }
 0x17d   :  { %vm65_vm4 = vmor %vm63_vm3, %vm64_vm2 }
 0x17e   :  { %v59_v23 = vmul.f32 %v101_v21, %v58_v22 }
 0x180   :  { %v60_v25 = vmul.f32 0.5, %v59_v23 }
 0x182   :  { %v61_v26 = vsub.f32 1.5, %v60_v25 }
 0x184   :  { %v62_v27 = vmul.f32 %v101_v21, %v61_v26 }
 0x186   :  { %v66_v28 = vsel %vm65_vm4, %v101_v21, %v62_v27 }
 0x187   :  { %v67_v29 = vmul.f32 %v66_v28, %v51_v16 }
 0x189   :  { %v74_v31 = vmul.f32 %v72_v24, %v67_v29 }
 0x18b   :  { %v79_v32 = vadd.f32 %v77_v30, %v74_v31 }
 0x18d   :  { %v80_v33 = vmax.f32 %v79_v32, 0.0 }
 0x18f   :  { %81 = vst [vmem:[%s140_s3] sm:$0xff] %v80_v33 }

// kernel: transformer_unet_forward.50
= control target key start
LH: loop header
LB: loop body
LE: loop exit
PB: predicated region body
PF: predicated region fallthrough
CT: control target
= control target key end

     0   :  { %vm178_vm0 = vcmask 261120   ;;  %v421_v37 = vmov 128.0   ;;  %v422_v41 = vmov 1   ;;  %v423_v52 = vmov 0   ;;  %s528_s1 = inlined_call_operand.vmem [shape: bf16[288,128], index: 1, kind: input, shape index: {}]   ;;  %s529_s0 = inlined_call_operand.vmem [shape: bf16[16,288], index: 0, kind: input, shape index: {}]   ;;  %s530_s2 = inlined_call_operand.vmem [shape: f32[16,2], index: 2, kind: input, shape index: {}]   ;;  %s531_s3 = inlined_call_operand.vmem [shape: f32[16,128], index: 3, kind: output, shape index: {}]  }
   0x1   :  { %v398_v0 = vld [vmem:[%s528_s1 + $0x38] sm:$0xff]  ;;  %v397_v2 = vld [vmem:[%s528_s1 + $0x30] sm:$0xff]  ;;  %v408_v4 = vld [vmem:[%s528_s1 + $0x88] sm:$0xff]  ;;  %415 = vrcp.f32 %v421_v37  ;;  %413 = vset.pattern.permute.xlu0 %v422_v41  ;;  %414 = vset.pattern.permute.xlu1 %v422_v41 }
   0x2   :  { %v406_v1 = vld [vmem:[%s528_s1 + $0x78] sm:$0xff]  ;;  %182 = vmatpush.bf16.msra.mxu0 %v398_v0  ;;  %v405_v3 = vld [vmem:[%s528_s1 + $0x70] sm:$0xff]  ;;  %216 = vmatpush.bf16.msra.mxu2 %v408_v4  ;;  %v407_v5 = vld [vmem:[%s528_s1 + $0x80] sm:$0xff] }
   0x3   :  { %196 = vmatpush.bf16.msra.mxu1 %v406_v1  ;;  %v313_v6 = vld [vmem:[%s529_s0 + $0x8] sm:$0xf]  ;;  %v390_v7 = vld [vmem:[%s529_s0 + $0x10] sm:$0xf0]  ;;  %v395_v11 = vld [vmem:[%s528_s1 + $0x20] sm:$0xff]  ;;  %412 = vset.pattern.permute.xlu2 %v423_v52 }
   0x4   :  { %v396_v8 = vld [vmem:[%s528_s1 + $0x28] sm:$0xff]  ;;  %v314_v10 = vor.u32 %v390_v7, %v313_v6  ;;  %v403_v12 = vld [vmem:[%s528_s1 + $0x60] sm:$0xff]  ;;  %v394_v13 = vld [vmem:[%s528_s1 + $0x18] sm:$0xff] }
   0x5   :  { %v404_v9 = vld [vmem:[%s528_s1 + $0x68] sm:$0xff]  ;;  %v402_v14 = vld [vmem:[%s528_s1 + $0x58] sm:$0xff]  ;;  %v393_v15 = vld [vmem:[%s528_s1 + $0x10] sm:$0xff] }
   0x6   :  { %183 = vmatpush.bf16.msra.mxu0 %v397_v2  ;;  %217 = vmatpush.bf16.msra.mxu2 %v407_v5  ;;  %v401_v16 = vld [vmem:[%s528_s1 + $0x50] sm:$0xff]  ;;  %v392_v17 = vld [vmem:[%s528_s1 + $0x8] sm:$0xff]  ;;  %v391_v19 = vld [vmem:[%s528_s1] sm:$0xff] }
   0x7   :  { %197 = vmatpush.bf16.msra.mxu1 %v405_v3  ;;  %v400_v18 = vld [vmem:[%s528_s1 + $0x48] sm:$0xff]  ;;  %v399_v20 = vld [vmem:[%s528_s1 + $0x40] sm:$0xff]  ;;  %v307_v24 = vld [vmem:[%s529_s0 + $0xc] sm:$0xf0]  ;;  %v416_v38 = vpop.eup %415 }
   0x8   :  { %v305_v21 = vld [vmem:[%s529_s0] sm:$0xf]  ;;  %v389_v22 = vld [vmem:[%s529_s0 + $0x8] sm:$0xf0]  ;;  %v388_v23 = vld [vmem:[%s529_s0 + $0x4] sm:$0xf]  ;;  %vm233_vm1 = vweird.f32 %v416_v38 }
   0x9   :  { %387 = vmatmul.msk.bf16.vlgmr.msra.gmra.mxu2 %vm178_vm0, %v314_v10  ;;  %v306_v25 = vor.u32 %v389_v22, %v305_v21  ;;  %v310_v26 = vor.u32 %v388_v23, %v307_v24  ;;  %v229_v39 = vmul.f32 128.0, %v416_v38  ;;  %v271_v40 = vld [vmem:[%s530_s2] sm:$0xff]  ;;  %v272_v55 = vld [vmem:[%s530_s2 + $0x8] sm:$0xff] }
   0xa   :  { %184 = vmatpush.bf16.msra.mxu0 %v396_v8  ;;  %275 = vperm.xlu2 %412, %v271_v40  }
   0xb   :  { %198 = vmatpush.bf16.msra.mxu1 %v404_v9  ;;  %v230_v42 = vsub.f32 1.0, %v229_v39 }
   0xd   :  { %v231_v43 = vmul.f32 %v416_v38, %v230_v42 }
   0xe   :  { %185 = vmatpush.bf16.msra.mxu0 %v395_v11 }
   0xf   :  { %199 = vmatpush.bf16.msra.mxu1 %v403_v12  ;;  %v232_v44 = vadd.f32 %v416_v38, %v231_v43 }
  0x11   :  { %v234_v45 = vsel %vm233_vm1, %v416_v38, %v232_v44 }
  0x12   :  { %186 = vmatpush.bf16.msra.mxu0 %v394_v13  ;;  %280 = vperm.xlu2 %412, %v272_v55  }
  0x13   :  { %200 = vmatpush.bf16.msra.mxu1 %v402_v14 }
  0x16   :  { %187 = vmatpush.bf16.msra.mxu0 %v393_v15 }
  0x17   :  { %201 = vmatpush.bf16.msra.mxu1 %v401_v16 }
  0x1a   :  { %188 = vmatpush.bf16.msra.mxu0 %v392_v17 }
  0x1b   :  { %202 = vmatpush.bf16.msra.mxu1 %v400_v18 }
  0x1e   :  { %189 = vmatpush.bf16.msra.mxu0 %v391_v19 }
  0x1f   :  { %203 = vmatpush.bf16.msra.mxu1 %v399_v20 }
  0x21   :  { %190 = vmatmul.bf16.vlgmr.msra.gmra.mxu0 %v306_v25 }
  0x22   :  { %204 = vmatmul.bf16.vlgmr.msra.gmra.mxu1 %v310_v26 }
  0x64   :  { %v276_v7 = vpop.permute.xlu2 %275 }
  0x6c   :  { %v281_v19 = vpop.permute.xlu2 %280 }
  0x8c   :  { %v219_v27 = vpop.f32.mrf.mxu2 }
  0x94   :  { %v221_v35 = vpop.f32.mrf.mxu2 }
  0x9e   :  { %v191_v28 = vpop.f32.mrf.mxu0 }
  0x9f   :  { %v205_v29 = vpop.f32.mrf.mxu1 }
  0xa0   :  { %v206_v30 = vadd.f32 %v205_v29, %v191_v28 }
  0xa2   :  { %v220_v31 = vadd.f32 %v219_v27, %v206_v30 }
  0xa4   :  { %224 = vadd.xlane.f32.xlu0 %v220_v31 }
  0xa6   :  { %v193_v32 = vpop.f32.mrf.mxu0 }
  0xa7   :  { %v207_v33 = vpop.f32.mrf.mxu1 }
  0xa8   :  { %v208_v34 = vadd.f32 %v207_v33, %v193_v32 }
  0xaa   :  { %v222_v36 = vadd.f32 %v221_v35, %v208_v34 }
  0xac   :  { %226 = vadd.xlane.f32.xlu0 %v222_v36 }
  0xc0   :  { %286 = vperm.xlu0 %413, %v271_v40  }
 0x117   :  { %v225_v46 = vpop.xlane.xlu0 %224 }
 0x118   :  { %v235_v47 = vmul.f32 %v234_v45, %v225_v46 }
 0x11a   :  { %v237_v48 = vsub.f32 %v220_v31, %v235_v47 }
 0x11c   :  { %v239_v49 = vmul.f32 %v237_v48, %v237_v48 }
 0x11e   :  { %241 = vadd.xlane.f32.xlu1 %v239_v49 }
 0x11f   :  { %v227_v50 = vpop.xlane.xlu0 %226 }
 0x120   :  { %v236_v51 = vmul.f32 %v234_v45, %v227_v50 }
 0x122   :  { %v238_v53 = vsub.f32 %v222_v36, %v236_v51 }
 0x124   :  { %v240_v54 = vmul.f32 %v238_v53, %v238_v53 }
 0x126   :  { %243 = vadd.xlane.f32.xlu1 %v240_v54 }
 0x132   :  { %v287_v11 = vpop.permute.xlu0 %286 }
 0x13f   :  { %290 = vperm.xlu1 %414, %v272_v55  }
 0x191   :  { %v242_v56 = vpop.xlane.xlu1 %241 }
 0x192   :  { %v245_v57 = vmul.f32 %v242_v56, %v234_v45 }
 0x194   :  { %v247_v58 = vadd.f32 1e-05, %v245_v57 }
 0x196   :  { %417 = vrsqrt.f32 %v247_v58  ;;  %vm255_vm3 = vweird.f32 %v247_v58 }
 0x199   :  { %v244_v59 = vpop.xlane.xlu1 %243 }
 0x19a   :  { %v246_v60 = vmul.f32 %v244_v59, %v234_v45 }
 0x19c   :  { %v418_v61 = vpop.eup %417  ;;  %v248_v62 = vadd.f32 1e-05, %v246_v60 }
 0x19d   :  { %v250_v63 = vmul.f32 %v418_v61, %v247_v58  ;;  %vm256_vm2 = vweird.f32 %v418_v61 }
 0x19e   :  { %419 = vrsqrt.f32 %v248_v62  ;;  %vm257_vm4 = vmor %vm255_vm3, %vm256_vm2  ;;  %vm265_vm6 = vweird.f32 %v248_v62 }
 0x19f   :  { %v251_v0 = vmul.f32 %v418_v61, %v250_v63 }
 0x1a1   :  { %v252_v1 = vmul.f32 0.5, %v251_v0 }
 0x1a3   :  { %v253_v2 = vsub.f32 1.5, %v252_v1 }
 0x1a4   :  { %v420_v3 = vpop.eup %419 }
 0x1a5   :  { %v260_v4 = vmul.f32 %v420_v3, %v248_v62  ;;  %v254_v5 = vmul.f32 %v418_v61, %v253_v2  ;;  %vm266_vm5 = vweird.f32 %v420_v3 }
 0x1a6   :  { %vm267_vm7 = vmor %vm265_vm6, %vm266_vm5 }
 0x1a7   :  { %v261_v6 = vmul.f32 %v420_v3, %v260_v4  ;;  %v258_v8 = vsel %vm257_vm4, %v418_v61, %v254_v5 }
 0x1a8   :  { %v269_v9 = vmul.f32 %v258_v8, %v237_v48 }
 0x1a9   :  { %v262_v10 = vmul.f32 0.5, %v261_v6 }
 0x1aa   :  { %v283_v12 = vmul.f32 %v276_v7, %v269_v9 }
 0x1ab   :  { %v263_v13 = vsub.f32 1.5, %v262_v10 }
 0x1ac   :  { %v293_v14 = vadd.f32 %v287_v11, %v283_v12 }
 0x1ad   :  { %v264_v15 = vmul.f32 %v420_v3, %v263_v13 }
 0x1ae   :  { %v295_v16 = vmax.f32 %v293_v14, 0.0 }
 0x1af   :  { %v268_v17 = vsel %vm267_vm7, %v420_v3, %v264_v15 }
 0x1b0   :  { %v270_v18 = vmul.f32 %v268_v17, %v238_v53  ;;  %297 = vst [vmem:[%s531_s3] sm:$0xff] %v295_v16 }
 0x1b1   :  { %v291_v20 = vpop.permute.xlu1 %290 }
 0x1b2   :  { %v284_v21 = vmul.f32 %v281_v19, %v270_v18 }
 0x1b4   :  { %v294_v22 = vadd.f32 %v291_v20, %v284_v21 }
 0x1b6   :  { %v296_v23 = vmax.f32 %v294_v22, 0.0 }
 0x1b8   :  { %298 = vst [vmem:[%s531_s3 + $0x8] sm:$0xff] %v296_v23 }

// kernel: transformer_unet_forward.54
= control target key start
LH: loop header
LB: loop body
LE: loop exit
PB: predicated region body
PF: predicated region fallthrough
CT: control target
= control target key end

     0   :  { %vm24_vm0 = vcmask 1043456   ;;  %vm20_vm1 = vcmask 64512   ;;  %s81_s1 = inlined_call_operand.vmem [shape: bf16[8,128], index: 1, kind: input, shape index: {}]   ;;  %s82_s0 = inlined_call_operand.vmem [shape: bf16[16,8], index: 0, kind: input, shape index: {}]   ;;  %s83_s2 = inlined_call_operand.vmem [shape: f32[16,128], index: 2, kind: output, shape index: {}]  }
   0x1   :  { %v14_v0 = vld [vmem:[%s81_s1] sm:$0xf] }
   0x2   :  { %v26_v1 = vsel %vm24_vm0, %v14_v0, 0  ;;  %v53_v2 = vld [vmem:[%s82_s0] sm:$0xff] }
   0x3   :  { %35 = vmatpush.bf16.msra.mxu0 %v26_v1 }
   0x6   :  { %52 = vmatmul.msk.bf16.vlgmr.msra.gmra.mxu0 %vm20_vm1, %v53_v2 }
  0x83   :  { %v37_v3 = vpop.f32.mrf.mxu0 }
  0x84   :  { %42 = vst [vmem:[%s83_s2] sm:$0xff] %v37_v3 }
  0x8b   :  { %v39_v4 = vpop.f32.mrf.mxu0 }
  0x8c   :  { %43 = vst [vmem:[%s83_s2 + $0x8] sm:$0xff] %v39_v4 }

// kernel: transformer_unet_forward.52
= control target key start
LH: loop header
LB: loop body
LE: loop exit
PB: predicated region body
PF: predicated region fallthrough
CT: control target
= control target key end

     0   :  { %vm21_vm0 = vcmask 1043456   ;;  %vm17_vm1 = vcmask 64512   ;;  %v94_v5 = vmov 128.0   ;;  %v95_v7 = vmov 0   ;;  %s129_s1 = inlined_call_operand.vmem [shape: bf16[8,128], index: 1, kind: input, shape index: {}]   ;;  %s130_s0 = inlined_call_operand.vmem [shape: bf16[8,8], index: 0, kind: input, shape index: {}]   ;;  %s131_s2 = inlined_call_operand.vmem [shape: f32[8,2], index: 2, kind: input, shape index: {}]   ;;  %s132_s3 = inlined_call_operand.vmem [shape: f32[8,128], index: 3, kind: output, shape index: {}]  }
   0x1   :  { %v16_v0 = vld [vmem:[%s129_s1] sm:$0xf]  ;;  %90 = vrcp.f32 %v94_v5  ;;  %87 = vset.pattern.permute.xlu1 %v95_v7  ;;  %v96_v8 = vmov 1  }
   0x2   :  { %v23_v1 = vsel %vm21_vm0, %v16_v0, 0  ;;  %v15_v2 = vld [vmem:[%s130_s0] sm:$0xf]  ;;  %89 = vset.pattern.permute.xlu0 %v96_v8 }
   0x3   :  { %32 = vmatpush.bf16.msra.mxu0 %v23_v1  ;;  %v65_v6 = vld [vmem:[%s131_s2] sm:$0xff] }
   0x4   :  { %68 = vperm.xlu1 %87, %v65_v6  }
   0x6   :  { %83 = vmatmul.msk.bf16.vlgmr.msra.gmra.mxu0 %vm17_vm1, %v15_v2 }
   0x7   :  { %v91_v9 = vpop.eup %90 }
   0x8   :  { %v41_v10 = vmul.f32 128.0, %v91_v9  ;;  %vm45_vm2 = vweird.f32 %v91_v9 }
   0xa   :  { %v42_v11 = vsub.f32 1.0, %v41_v10 }
   0xc   :  { %88 = vset.pattern.permute.xlu1 %v96_v8  ;;  %v43_v12 = vmul.f32 %v91_v9, %v42_v11 }
   0xd   :  { %73 = vperm.xlu1 %88, %v65_v6  }
   0xe   :  { %v44_v13 = vadd.f32 %v91_v9, %v43_v12 }
  0x10   :  { %v46_v14 = vsel %vm45_vm2, %v91_v9, %v44_v13 }
  0x76   :  { %v69_v25 = vpop.permute.xlu1 %68 }
  0x7f   :  { %v74_v31 = vpop.permute.xlu1 %73 }
  0x83   :  { %v34_v3 = vpop.f32.mrf.mxu0 }
  0x84   :  { %38 = vadd.xlane.f32.xlu0 %v34_v3 }
  0x8b   :  { %v36_v4 = vpop.f32.mrf.mxu0 }
  0xf7   :  { %v39_v15 = vpop.xlane.xlu0 %38 }
  0xf8   :  { %v47_v16 = vmul.f32 %v46_v14, %v39_v15 }
  0xfa   :  { %v48_v17 = vsub.f32 %v34_v3, %v47_v16 }
  0xfc   :  { %v49_v18 = vmul.f32 %v48_v17, %v48_v17 }
  0xfe   :  { %50 = vadd.xlane.f32.xlu0 %v49_v18 }
 0x171   :  { %v51_v19 = vpop.xlane.xlu0 %50 }
 0x172   :  { %v52_v20 = vmul.f32 %v51_v19, %v46_v14 }
 0x174   :  { %v53_v21 = vadd.f32 1e-05, %v52_v20 }
 0x176   :  { %92 = vrsqrt.f32 %v53_v21  ;;  %vm60_vm4 = vweird.f32 %v53_v21 }
 0x17c   :  { %v93_v22 = vpop.eup %92 }
 0x17d   :  { %v55_v23 = vmul.f32 %v93_v22, %v53_v21  ;;  %vm61_vm3 = vweird.f32 %v93_v22 }
 0x17e   :  { %vm62_vm5 = vmor %vm60_vm4, %vm61_vm3 }
 0x17f   :  { %v56_v24 = vmul.f32 %v93_v22, %v55_v23 }
 0x181   :  { %v57_v26 = vmul.f32 0.5, %v56_v24 }
 0x183   :  { %v58_v27 = vsub.f32 1.5, %v57_v26 }
 0x185   :  { %v59_v28 = vmul.f32 %v93_v22, %v58_v27 }
 0x187   :  { %v63_v29 = vsel %vm62_vm5, %v93_v22, %v59_v28 }
 0x188   :  { %v64_v30 = vmul.f32 %v63_v29, %v48_v17 }
 0x18a   :  { %v71_v32 = vmul.f32 %v69_v25, %v64_v30 }
 0x18c   :  { %v76_v33 = vadd.f32 %v74_v31, %v71_v32 }
 0x18e   :  { %v77_v34 = vmax.f32 %v76_v33, 0.0 }
 0x190   :  { %78 = vst [vmem:[%s132_s3] sm:$0xff] %v77_v34 }

// kernel: transformer_unet_forward.55
= control target key start
LH: loop header
LB: loop body
LE: loop exit
PB: predicated region body
PF: predicated region fallthrough
CT: control target
= control target key end

     0   :  { %vm18_vm0 = vcmask 1043456   ;;  %vm14_vm1 = vcmask 64512   ;;  %s65_s1 = inlined_call_operand.vmem [shape: bf16[8,128], index: 1, kind: input, shape index: {}]   ;;  %s66_s0 = inlined_call_operand.vmem [shape: bf16[8,8], index: 0, kind: input, shape index: {}]   ;;  %s67_s2 = inlined_call_operand.vmem [shape: f32[8,128], index: 2, kind: output, shape index: {}]  }
   0x1   :  { %v13_v0 = vld [vmem:[%s65_s1] sm:$0xf] }
   0x2   :  { %v20_v1 = vsel %vm18_vm0, %v13_v0, 0  ;;  %v12_v2 = vld [vmem:[%s66_s0] sm:$0xf] }
   0x3   :  { %29 = vmatpush.bf16.msra.mxu0 %v20_v1 }
   0x6   :  { %40 = vmatmul.msk.bf16.vlgmr.msra.gmra.mxu0 %vm14_vm1, %v12_v2 }
  0x83   :  { %v31_v3 = vpop.f32.mrf.mxu0 }
  0x84   :  { %35 = vst [vmem:[%s67_s2] sm:$0xff] %v31_v3 }
  0x8b   :  { %v33_v4 = vpop.f32.mrf.mxu0 }

// kernel: transformer_unet_forward.58
= control target key start
LH: loop header
LB: loop body
LE: loop exit
PB: predicated region body
PF: predicated region fallthrough
CT: control target
= control target key end

     0   :  { %vm21_vm0 = vcmask 1043456   ;;  %vm17_vm1 = vcmask 64512   ;;  %v116_v5 = vmov 128.0   ;;  %v117_v7 = vmov 0   ;;  %s151_s1 = inlined_call_operand.vmem [shape: bf16[8,128], index: 1, kind: input, shape index: {}]   ;;  %s152_s0 = inlined_call_operand.vmem [shape: bf16[8,8], index: 0, kind: input, shape index: {}]   ;;  %s153_s2 = inlined_call_operand.vmem [shape: f32[8,2], index: 2, kind: input, shape index: {}]   ;;  %s154_s3 = inlined_call_operand.vmem [shape: f32[8,128], index: 3, kind: output, shape index: {}]  }
   0x1   :  { %v16_v0 = vld [vmem:[%s151_s1] sm:$0xf]  ;;  %108 = vrcp.f32 %v116_v5  ;;  %105 = vset.pattern.permute.xlu1 %v117_v7  ;;  %v118_v8 = vmov 1  }
   0x2   :  { %v23_v1 = vsel %vm21_vm0, %v16_v0, 0  ;;  %v15_v2 = vld [vmem:[%s152_s0] sm:$0xf]  ;;  %107 = vset.pattern.permute.xlu0 %v118_v8 }
   0x3   :  { %32 = vmatpush.bf16.msra.mxu0 %v23_v1  ;;  %v65_v6 = vld [vmem:[%s153_s2] sm:$0xff] }
   0x4   :  { %68 = vperm.xlu1 %105, %v65_v6  }
   0x6   :  { %101 = vmatmul.msk.bf16.vlgmr.msra.gmra.mxu0 %vm17_vm1, %v15_v2 }
   0x7   :  { %v109_v9 = vpop.eup %108 }
   0x8   :  { %v41_v10 = vmul.f32 128.0, %v109_v9  ;;  %vm45_vm2 = vweird.f32 %v109_v9 }
   0xa   :  { %v42_v11 = vsub.f32 1.0, %v41_v10 }
   0xc   :  { %106 = vset.pattern.permute.xlu1 %v118_v8  ;;  %v43_v12 = vmul.f32 %v109_v9, %v42_v11 }
   0xd   :  { %73 = vperm.xlu1 %106, %v65_v6  }
   0xe   :  { %v44_v13 = vadd.f32 %v109_v9, %v43_v12 }
  0x10   :  { %v46_v14 = vsel %vm45_vm2, %v109_v9, %v44_v13 }
  0x76   :  { %v69_v25 = vpop.permute.xlu1 %68 }
  0x7f   :  { %v74_v31 = vpop.permute.xlu1 %73 }
  0x83   :  { %v34_v3 = vpop.f32.mrf.mxu0 }
  0x84   :  { %38 = vadd.xlane.f32.xlu0 %v34_v3 }
  0x8b   :  { %v36_v4 = vpop.f32.mrf.mxu0 }
  0xf7   :  { %v39_v15 = vpop.xlane.xlu0 %38 }
  0xf8   :  { %v47_v16 = vmul.f32 %v46_v14, %v39_v15 }
  0xfa   :  { %v48_v17 = vsub.f32 %v34_v3, %v47_v16 }
  0xfc   :  { %v49_v18 = vmul.f32 %v48_v17, %v48_v17 }
  0xfe   :  { %50 = vadd.xlane.f32.xlu0 %v49_v18 }
 0x171   :  { %v51_v19 = vpop.xlane.xlu0 %50 }
 0x172   :  { %v52_v20 = vmul.f32 %v51_v19, %v46_v14 }
 0x174   :  { %v53_v21 = vadd.f32 1e-05, %v52_v20 }
 0x176   :  { %110 = vrsqrt.f32 %v53_v21  ;;  %vm60_vm4 = vweird.f32 %v53_v21 }
 0x17c   :  { %v111_v22 = vpop.eup %110 }
 0x17d   :  { %v55_v23 = vmul.f32 %v111_v22, %v53_v21  ;;  %vm61_vm3 = vweird.f32 %v111_v22 }
 0x17e   :  { %vm62_vm5 = vmor %vm60_vm4, %vm61_vm3 }
 0x17f   :  { %v56_v24 = vmul.f32 %v111_v22, %v55_v23 }
 0x181   :  { %v57_v26 = vmul.f32 0.5, %v56_v24 }
 0x183   :  { %v58_v27 = vsub.f32 1.5, %v57_v26 }
 0x185   :  { %v59_v28 = vmul.f32 %v111_v22, %v58_v27 }
 0x187   :  { %v63_v29 = vsel %vm62_vm5, %v111_v22, %v59_v28 }
 0x188   :  { %v64_v30 = vmul.f32 %v63_v29, %v48_v17 }
 0x18a   :  { %v71_v32 = vmul.f32 %v69_v25, %v64_v30 }
 0x18c   :  { %v76_v33 = vadd.f32 %v74_v31, %v71_v32 }
 0x18e   :  { %v77_v34 = vsub.f32 0.0, %v76_v33 }
 0x190   :  { %v78_v35 = vmul.f32 1.442695, %v77_v34 }
 0x192   :  { %112 = vpow2.f32 %v78_v35 }
 0x198   :  { %v113_v36 = vpop.eup %112 }
 0x199   :  { %v80_v37 = vadd.f32 1.0, %v113_v36 }
 0x19b   :  { %114 = vrcp.f32 %v80_v37  ;;  %v92_v41 = vand.u32 2147483648, %v80_v37  ;;  %v90_v43 = vand.u32 2147483647, %v80_v37  ;;  %vm86_vm7 = vweird.f32 %v80_v37 }
 0x19d   :  { %v93_v45 = vor.u32 1.1754944e-38, %v92_v41  ;;  %vm91_vm9 = vcmp.eq.f32.partialorder %v90_v43, 8.507059e+37 }
 0x1a1   :  { %v115_v38 = vpop.eup %114 }
 0x1a2   :  { %v82_v39 = vmul.f32 %v115_v38, %v80_v37  ;;  %vm87_vm6 = vweird.f32 %v115_v38 }
 0x1a3   :  { %vm88_vm8 = vmor %vm86_vm7, %vm87_vm6 }
 0x1a4   :  { %v83_v40 = vsub.f32 1.0, %v82_v39 }
 0x1a6   :  { %v84_v42 = vmul.f32 %v115_v38, %v83_v40 }
 0x1a8   :  { %v85_v44 = vadd.f32 %v115_v38, %v84_v42 }
 0x1aa   :  { %v89_v46 = vsel %vm88_vm8, %v115_v38, %v85_v44 }
 0x1ab   :  { %v94_v47 = vsel %vm91_vm9, %v93_v45, %v89_v46 }
 0x1ac   :  { %96 = vst [vmem:[%s154_s3] sm:$0xff] %v94_v47 }

// kernel: transformer_unet_forward.56
= control target key start
LH: loop header
LB: loop body
LE: loop exit
PB: predicated region body
PF: predicated region fallthrough
CT: control target
= control target key end

     0   :  { %vm151_vm0 = vcmask 31744   ;;  %vm516_vm1 = vcmask 523264   ;;  %s2340_s1 = inlined_call_operand.vmem [shape: bf16[4,64,4], index: 1, kind: input, shape index: {}]   ;;  %s2341_s0 = inlined_call_operand.vmem [shape: bf16[4,64,4], index: 0, kind: input, shape index: {}]   ;;  %s2342_s2 = inlined_call_operand.vmem [shape: bf16[4,64,4], index: 2, kind: input, shape index: {}]   ;;  %s2343_s3 = inlined_call_operand.vmem [shape: f32[4,64,4], index: 3, kind: output, shape index: {}]  }
   0x1   :  { %v1520_v0 = vld [vmem:[%s2340_s1 + $0x18] sm:$0xff]  ;;  %v1519_v8 = vld [vmem:[%s2340_s1 + $0x10] sm:$0xff]  ;;  %v1518_v16 = vld [vmem:[%s2340_s1 + $0x8] sm:$0xff] }
   0x2   :  { %v1524_v1 = vld [vmem:[%s2340_s1 + $0x38] sm:$0xff]  ;;  %v174_v4 = vsel %vm151_vm0, %v1520_v0, 0  ;;  %v1523_v9 = vld [vmem:[%s2340_s1 + $0x30] sm:$0xff]  ;;  %v171_v12 = vsel %vm151_vm0, %v1519_v8, 0  ;;  %v1522_v17 = vld [vmem:[%s2340_s1 + $0x28] sm:$0xff]  ;;  %v168_v20 = vsel %vm151_vm0, %v1518_v16, 0 }
   0x3   :  { %v1528_v2 = vld [vmem:[%s2340_s1 + $0x58] sm:$0xff]  ;;  %v267_v5 = vsel %vm151_vm0, %v1524_v1, 0  ;;  %180 = vmatpush.bf16.xpose.msra.mxu0 %v174_v4  ;;  %v1527_v10 = vld [vmem:[%s2340_s1 + $0x50] sm:$0xff]  ;;  %v264_v13 = vsel %vm151_vm0, %v1523_v9, 0  ;;  %v1526_v18 = vld [vmem:[%s2340_s1 + $0x48] sm:$0xff]  ;;  %v261_v21 = vsel %vm151_vm0, %v1522_v17, 0 }
   0x4   :  { %v1532_v3 = vld [vmem:[%s2340_s1 + $0x78] sm:$0xff]  ;;  %v360_v6 = vsel %vm151_vm0, %v1528_v2, 0  ;;  %273 = vmatpush.bf16.xpose.msra.mxu1 %v267_v5  ;;  %v1531_v11 = vld [vmem:[%s2340_s1 + $0x70] sm:$0xff]  ;;  %v357_v14 = vsel %vm151_vm0, %v1527_v10, 0  ;;  %v1530_v19 = vld [vmem:[%s2340_s1 + $0x68] sm:$0xff]  ;;  %v354_v22 = vsel %vm151_vm0, %v1526_v18, 0 }
   0x5   :  { %v453_v7 = vsel %vm151_vm0, %v1532_v3, 0  ;;  %366 = vmatpush.bf16.xpose.msra.mxu2 %v360_v6  ;;  %v450_v15 = vsel %vm151_vm0, %v1531_v11, 0  ;;  %v447_v23 = vsel %vm151_vm0, %v1530_v19, 0  ;;  %v1517_v24 = vld [vmem:[%s2340_s1] sm:$0xff]  ;;  %v1502_v36 = vld [vmem:[%s2341_s0 + $0x8] sm:$0xff]  ;;  %v1503_v40 = vld [vmem:[%s2341_s0 + $0x10] sm:$0xff] }
   0x6   :  { %459 = vmatpush.bf16.xpose.msra.mxu3 %v453_v7  ;;  %v1521_v25 = vld [vmem:[%s2340_s1 + $0x20] sm:$0xff]  ;;  %v165_v28 = vsel %vm151_vm0, %v1517_v24, 0  ;;  %v1506_v37 = vld [vmem:[%s2341_s0 + $0x28] sm:$0xff]  ;;  %v1507_v41 = vld [vmem:[%s2341_s0 + $0x30] sm:$0xff] }
   0x7   :  { %v1525_v26 = vld [vmem:[%s2340_s1 + $0x40] sm:$0xff]  ;;  %v258_v29 = vsel %vm151_vm0, %v1521_v25, 0  ;;  %v1510_v38 = vld [vmem:[%s2341_s0 + $0x48] sm:$0xff]  ;;  %v1511_v42 = vld [vmem:[%s2341_s0 + $0x50] sm:$0xff] }
   0x8   :  { %v1529_v27 = vld [vmem:[%s2340_s1 + $0x60] sm:$0xff]  ;;  %v351_v30 = vsel %vm151_vm0, %v1525_v26, 0  ;;  %v1514_v39 = vld [vmem:[%s2341_s0 + $0x68] sm:$0xff]  ;;  %v1515_v43 = vld [vmem:[%s2341_s0 + $0x70] sm:$0xff] }
   0x9   :  { %v444_v31 = vsel %vm151_vm0, %v1529_v27, 0  ;;  %v1501_v32 = vld [vmem:[%s2341_s0] sm:$0xff]  ;;  %v1504_v44 = vld [vmem:[%s2341_s0 + $0x18] sm:$0xff] }
   0xa   :  { %v1505_v33 = vld [vmem:[%s2341_s0 + $0x20] sm:$0xff]  ;;  %v1508_v45 = vld [vmem:[%s2341_s0 + $0x38] sm:$0xff] }
   0xb   :  { %181 = vmatpush.bf16.xpose.msra.mxu0 %v171_v12  ;;  %v1509_v34 = vld [vmem:[%s2341_s0 + $0x40] sm:$0xff]  ;;  %v1512_v46 = vld [vmem:[%s2341_s0 + $0x58] sm:$0xff] }
   0xc   :  { %274 = vmatpush.bf16.xpose.msra.mxu1 %v264_v13  ;;  %v1513_v35 = vld [vmem:[%s2341_s0 + $0x60] sm:$0xff]  ;;  %v1516_v47 = vld [vmem:[%s2341_s0 + $0x78] sm:$0xff] }
   0xd   :  { %367 = vmatpush.bf16.xpose.msra.mxu2 %v357_v14 }
   0xe   :  { %460 = vmatpush.bf16.xpose.msra.mxu3 %v450_v15 }
  0x13   :  { %182 = vmatpush.bf16.xpose.msra.mxu0 %v168_v20 }
  0x14   :  { %275 = vmatpush.bf16.xpose.msra.mxu1 %v261_v21 }
  0x15   :  { %368 = vmatpush.bf16.xpose.msra.mxu2 %v354_v22 }
  0x16   :  { %461 = vmatpush.bf16.xpose.msra.mxu3 %v447_v23 }
  0x1b   :  { %183 = vmatpush.bf16.xpose.msra.mxu0 %v165_v28 }
  0x1c   :  { %276 = vmatpush.bf16.xpose.msra.mxu1 %v258_v29 }
  0x1d   :  { %369 = vmatpush.bf16.xpose.msra.mxu2 %v351_v30 }
  0x1e   :  { %462 = vmatpush.bf16.xpose.msra.mxu3 %v444_v31 }
  0x22   :  { %1309 = vmatmul.msk.bf16.vlgmr.msra.gmra.mxu0 %vm151_vm0, %v1501_v32 }
  0x23   :  { %1345 = vmatmul.msk.bf16.vlgmr.msra.gmra.mxu1 %vm151_vm0, %v1505_v33 }
  0x24   :  { %1381 = vmatmul.msk.bf16.vlgmr.msra.gmra.mxu2 %vm151_vm0, %v1509_v34 }
  0x25   :  { %1417 = vmatmul.msk.bf16.vlgmr.msra.gmra.mxu3 %vm151_vm0, %v1513_v35 }
  0x32   :  { %1310 = vmatmul.msk.bf16.gmra.mxu0 %vm151_vm0, %v1502_v36 }
  0x33   :  { %1346 = vmatmul.msk.bf16.gmra.mxu1 %vm151_vm0, %v1506_v37 }
  0x34   :  { %1382 = vmatmul.msk.bf16.gmra.mxu2 %vm151_vm0, %v1510_v38 }
  0x35   :  { %1418 = vmatmul.msk.bf16.gmra.mxu3 %vm151_vm0, %v1514_v39 }
  0x42   :  { %1311 = vmatmul.msk.bf16.gmra.mxu0 %vm151_vm0, %v1503_v40 }
  0x43   :  { %1347 = vmatmul.msk.bf16.gmra.mxu1 %vm151_vm0, %v1507_v41 }
  0x44   :  { %1383 = vmatmul.msk.bf16.gmra.mxu2 %vm151_vm0, %v1511_v42 }
  0x45   :  { %1419 = vmatmul.msk.bf16.gmra.mxu3 %vm151_vm0, %v1515_v43 }
  0x52   :  { %1312 = vmatmul.msk.bf16.gmra.mxu0 %vm151_vm0, %v1504_v44 }
  0x53   :  { %1348 = vmatmul.msk.bf16.gmra.mxu1 %vm151_vm0, %v1508_v45 }
  0x54   :  { %1384 = vmatmul.msk.bf16.gmra.mxu2 %vm151_vm0, %v1512_v46 }
  0x55   :  { %1420 = vmatmul.msk.bf16.gmra.mxu3 %vm151_vm0, %v1516_v47 }
  0x9f   :  { %v185_v48 = vpop.f32.mrf.mxu0 }
  0xa0   :  { %v278_v49 = vpop.f32.mrf.mxu1  ;;  %v1825_v50 = vmul.f32 0.5, %v185_v48 }
  0xa1   :  { %v1827_v51 = vmul.f32 0.5, %v278_v49 }
  0xa2   :  { %v517_v53 = vsel %vm516_vm1, %v1825_v50, -inf }
  0xa3   :  { %v541_v52 = vsel %vm516_vm1, %v1827_v51, -inf  ;;  %518 = vmax.xlane.f32.xlu2 %v517_v53 }
  0xa4   :  { %542 = vmax.xlane.f32.xlu0 %v541_v52 }
  0xa7   :  { %v371_v54 = vpop.f32.mrf.mxu2  ;;  %v187_v58 = vpop.f32.mrf.mxu0 }
  0xa8   :  { %v464_v55 = vpop.f32.mrf.mxu3  ;;  %v1833_v56 = vmul.f32 0.5, %v371_v54  ;;  %v280_v59 = vpop.f32.mrf.mxu1  ;;  %v1837_v60 = vmul.f32 0.5, %v187_v58 }
  0xa9   :  { %v1835_v57 = vmul.f32 0.5, %v464_v55  ;;  %v1845_v0 = vmul.f32 0.5, %v280_v59 }
  0xaa   :  { %v565_v62 = vsel %vm516_vm1, %v1833_v56, -inf  ;;  %v520_v63 = vsel %vm516_vm1, %v1837_v60, -inf }
  0xab   :  { %v589_v61 = vsel %vm516_vm1, %v1835_v57, -inf  ;;  %521 = vmax.xlane.f32.xlu2 %v520_v63  ;;  %v544_v7 = vsel %vm516_vm1, %v1845_v0, -inf }
  0xac   :  { %590 = vmax.xlane.f32.xlu1 %v589_v61  ;;  %566 = vmax.xlane.f32.xlu0 %v565_v62 }
  0xaf   :  { %v373_v1 = vpop.f32.mrf.mxu2  ;;  %v190_v4 = vpop.f32.mrf.mxu0 }
  0xb0   :  { %v466_v2 = vpop.f32.mrf.mxu3  ;;  %v1847_v3 = vmul.f32 0.5, %v373_v1  ;;  %v283_v5 = vpop.f32.mrf.mxu1  ;;  %v1857_v10 = vmul.f32 0.5, %v190_v4 }
  0xb1   :  { %v1849_v6 = vmul.f32 0.5, %v283_v5  ;;  %v1859_v11 = vmul.f32 0.5, %v466_v2 }
  0xb2   :  { %v568_v8 = vsel %vm516_vm1, %v1847_v3, -inf  ;;  %v523_v16 = vsel %vm516_vm1, %v1857_v10, -inf }
  0xb3   :  { %v547_v9 = vsel %vm516_vm1, %v1849_v6, -inf  ;;  %v592_v18 = vsel %vm516_vm1, %v1859_v11, -inf }
  0xb4   :  { %545 = vmax.xlane.f32.xlu1 %v544_v7  ;;  %569 = vmax.xlane.f32.xlu0 %v568_v8 }
  0xb5   :  { %548 = vmax.xlane.f32.xlu2 %v547_v9 }
  0xb7   :  { %v376_v12 = vpop.f32.mrf.mxu2  ;;  %v192_v17 = vpop.f32.mrf.mxu0 }
  0xb8   :  { %v469_v13 = vpop.f32.mrf.mxu3  ;;  %v285_v14 = vpop.f32.mrf.mxu1  ;;  %v1861_v15 = vmul.f32 0.5, %v376_v12  ;;  %v1883_v31 = vmul.f32 0.5, %v192_v17 }
  0xb9   :  { %v1869_v20 = vmul.f32 0.5, %v469_v13  ;;  %v1871_v21 = vmul.f32 0.5, %v285_v14 }
  0xba   :  { %v571_v19 = vsel %vm516_vm1, %v1861_v15, -inf  ;;  %v526_v35 = vsel %vm516_vm1, %v1883_v31, -inf }
  0xbb   :  { %v595_v25 = vsel %vm516_vm1, %v1869_v20, -inf  ;;  %v550_v29 = vsel %vm516_vm1, %v1871_v21, -inf }
  0xbc   :  { %593 = vmax.xlane.f32.xlu1 %v592_v18  ;;  %524 = vmax.xlane.f32.xlu0 %v523_v16 }
  0xbd   :  { %572 = vmax.xlane.f32.xlu2 %v571_v19 }
  0xbf   :  { %v378_v22 = vpop.f32.mrf.mxu2  ;;  %v195_v28 = vpop.f32.mrf.mxu0 }
  0xc0   :  { %v471_v23 = vpop.f32.mrf.mxu3  ;;  %v288_v26 = vpop.f32.mrf.mxu1  ;;  %v1881_v30 = vmul.f32 0.5, %v195_v28  ;;  %v1885_v32 = vmul.f32 0.5, %v378_v22 }
  0xc1   :  { %v1873_v24 = vmul.f32 0.5, %v471_v23  ;;  %v1893_v38 = vmul.f32 0.5, %v288_v26 }
  0xc2   :  { %v529_v34 = vsel %vm516_vm1, %v1881_v30, -inf  ;;  %v574_v37 = vsel %vm516_vm1, %v1885_v32, -inf }
  0xc3   :  { %v598_v27 = vsel %vm516_vm1, %v1873_v24, -inf  ;;  %v553_v43 = vsel %vm516_vm1, %v1893_v38, -inf }
  0xc4   :  { %596 = vmax.xlane.f32.xlu1 %v595_v25  ;;  %551 = vmax.xlane.f32.xlu0 %v550_v29 }
  0xc5   :  { %599 = vmax.xlane.f32.xlu2 %v598_v27 }
  0xc7   :  { %v381_v33 = vpop.f32.mrf.mxu2  ;;  %v197_v42 = vpop.f32.mrf.mxu0 }
  0xc8   :  { %v290_v36 = vpop.f32.mrf.mxu1  ;;  %v474_v39 = vpop.f32.mrf.mxu3  ;;  %v1905_v47 = vmul.f32 0.5, %v381_v33  ;;  %v1907_v48 = vmul.f32 0.5, %v197_v42 }
  0xc9   :  { %v1895_v40 = vmul.f32 0.5, %v474_v39  ;;  %v1897_v41 = vmul.f32 0.5, %v290_v36 }
  0xca   :  { %v577_v54 = vsel %vm516_vm1, %v1905_v47, -inf  ;;  %v532_v58 = vsel %vm516_vm1, %v1907_v48, -inf }
  0xcb   :  { %v601_v44 = vsel %vm516_vm1, %v1895_v40, -inf  ;;  %v556_v45 = vsel %vm516_vm1, %v1897_v41, -inf }
  0xcc   :  { %527 = vmax.xlane.f32.xlu1 %v526_v35  ;;  %575 = vmax.xlane.f32.xlu0 %v574_v37 }
  0xcd   :  { %530 = vmax.xlane.f32.xlu2 %v529_v34 }
  0xcf   :  { %v383_v46 = vpop.f32.mrf.mxu2  ;;  %v200_v53 = vpop.f32.mrf.mxu0 }
  0xd0   :  { %v1909_v49 = vmul.f32 0.5, %v383_v46  ;;  %v476_v52 = vpop.f32.mrf.mxu3  ;;  %v1917_v61 = vmul.f32 0.5, %v200_v53  ;;  %v293_v4 = vpop.f32.mrf.mxu1 }
  0xd1   :  { %v1921_v63 = vmul.f32 0.5, %v476_v52  ;;  %v1929_v9 = vmul.f32 0.5, %v293_v4 }
  0xd2   :  { %v580_v55 = vsel %vm516_vm1, %v1909_v49, -inf  ;;  %v535_v2 = vsel %vm516_vm1, %v1917_v61, -inf }
  0xd3   :  { %v604_v7 = vsel %vm516_vm1, %v1921_v63, -inf  ;;  %v559_v14 = vsel %vm516_vm1, %v1929_v9, -inf }
  0xd4   :  { %554 = vmax.xlane.f32.xlu1 %v553_v43  ;;  %602 = vmax.xlane.f32.xlu0 %v601_v44 }
  0xd5   :  { %557 = vmax.xlane.f32.xlu2 %v556_v45 }
  0xd7   :  { %v386_v59 = vpop.f32.mrf.mxu2  ;;  %v202_v8 = vpop.f32.mrf.mxu0 }
  0xd8   :  { %v1919_v62 = vmul.f32 0.5, %v386_v59  ;;  %v479_v5 = vpop.f32.mrf.mxu3  ;;  %v1933_v13 = vmul.f32 0.5, %v202_v8  ;;  %v295_v19 = vpop.f32.mrf.mxu1 }
  0xd9   :  { %v1931_v12 = vmul.f32 0.5, %v479_v5  ;;  %v1943_v25 = vmul.f32 0.5, %v295_v19 }
  0xda   :  { %v583_v1 = vsel %vm516_vm1, %v1919_v62, -inf  ;;  %v538_v18 = vsel %vm516_vm1, %v1933_v13, -inf }
  0xdb   :  { %v607_v16 = vsel %vm516_vm1, %v1931_v12, -inf  ;;  %v562_v28 = vsel %vm516_vm1, %v1943_v25, -inf }
  0xdc   :  { %578 = vmax.xlane.f32.xlu1 %v577_v54  ;;  %533 = vmax.xlane.f32.xlu0 %v532_v58 }
  0xdd   :  { %581 = vmax.xlane.f32.xlu2 %v580_v55 }
  0xdf   :  { %v388_v17 = vpop.f32.mrf.mxu2 }
  0xe0   :  { %v481_v22 = vpop.f32.mrf.mxu3  ;;  %v1941_v23 = vmul.f32 0.5, %v388_v17 }
  0xe1   :  { %v1945_v26 = vmul.f32 0.5, %v481_v22 }
  0xe2   :  { %v586_v27 = vsel %vm516_vm1, %v1941_v23, -inf }
  0xe3   :  { %v610_v29 = vsel %vm516_vm1, %v1945_v26, -inf }
  0xe4   :  { %605 = vmax.xlane.f32.xlu1 %v604_v7  ;;  %584 = vmax.xlane.f32.xlu0 %v583_v1 }
  0xe5   :  { %536 = vmax.xlane.f32.xlu2 %v535_v2 }
  0xec   :  { %560 = vmax.xlane.f32.xlu1 %v559_v14  ;;  %539 = vmax.xlane.f32.xlu0 %v538_v18 }
  0xed   :  { %608 = vmax.xlane.f32.xlu2 %v607_v16 }
  0xf4   :  { %587 = vmax.xlane.f32.xlu1 %v586_v27  ;;  %611 = vmax.xlane.f32.xlu0 %v610_v29 }
  0xf5   :  { %563 = vmax.xlane.f32.xlu2 %v562_v28 }
 0x116   :  { %v519_v34 = vpop.xlane.xlu2 %518 }
 0x117   :  { %v543_v33 = vpop.xlane.xlu0 %542  ;;  %v613_v36 = vsub.f32 %v1825_v50, %v519_v34 }
 0x118   :  { %v621_v35 = vsub.f32 %v1827_v51, %v543_v33 }
 0x119   :  { %v645_v39 = vmul.f32 1.442695, %v613_v36 }
 0x11a   :  { %v661_v37 = vmul.f32 1.442695, %v621_v35 }
 0x11c   :  { %1549 = vpow2.f32 %v661_v37 }
 0x11d   :  { %1551 = vpow2.f32 %v645_v39 }
 0x11e   :  { %v522_v45 = vpop.xlane.xlu2 %521 }
 0x11f   :  { %v591_v42 = vpop.xlane.xlu1 %590  ;;  %v567_v44 = vpop.xlane.xlu0 %566  ;;  %v614_v55 = vsub.f32 %v1837_v60, %v522_v45 }
 0x120   :  { %v637_v43 = vsub.f32 %v1835_v57, %v591_v42  ;;  %v629_v46 = vsub.f32 %v1833_v56, %v567_v44 }
 0x121   :  { %v647_v58 = vmul.f32 1.442695, %v614_v55 }
 0x122   :  { %v693_v52 = vmul.f32 1.442695, %v637_v43  ;;  %v1957_v53 = vpop.eup %1549  ;;  %v677_v54 = vmul.f32 1.442695, %v629_v46 }
 0x123   :  { %v1960_v51 = vpop.eup %1551  ;;  %v733_v50 = vsel %vm516_vm1, %v1957_v53, 0.0 }
 0x124   :  { %1553 = vpow2.f32 %v693_v52  ;;  %734 = vadd.xlane.f32.xlu2 %v733_v50  ;;  %v709_v57 = vsel %vm516_vm1, %v1960_v51, 0.0 }
 0x125   :  { %1555 = vpow2.f32 %v677_v54  ;;  %710 = vadd.xlane.f32.xlu0 %v709_v57 }
 0x126   :  { %1557 = vpow2.f32 %v647_v58 }
 0x127   :  { %v546_v56 = vpop.xlane.xlu1 %545  ;;  %v570_v1 = vpop.xlane.xlu0 %569 }
 0x128   :  { %v622_v59 = vsub.f32 %v1845_v0, %v546_v56  ;;  %v549_v2 = vpop.xlane.xlu2 %548  ;;  %v630_v60 = vsub.f32 %v1847_v3, %v570_v1 }
 0x129   :  { %v623_v33 = vsub.f32 %v1849_v6, %v549_v2 }
 0x12a   :  { %v1968_v4 = vpop.eup %1553  ;;  %v663_v5 = vmul.f32 1.442695, %v622_v59  ;;  %v679_v8 = vmul.f32 1.442695, %v630_v60 }
 0x12b   :  { %v1970_v7 = vpop.eup %1555  ;;  %v781_v0 = vsel %vm516_vm1, %v1968_v4, 0.0  ;;  %v665_v36 = vmul.f32 1.442695, %v623_v33 }
 0x12c   :  { %1559 = vpow2.f32 %v663_v5  ;;  %v757_v14 = vsel %vm516_vm1, %v1970_v7, 0.0  ;;  %v1977_v19 = vpop.eup %1557 }
 0x12d   :  { %1561 = vpow2.f32 %v679_v8  ;;  %758 = vadd.xlane.f32.xlu1 %v757_v14  ;;  %782 = vadd.xlane.f32.xlu0 %v781_v0  ;;  %v712_v35 = vsel %vm516_vm1, %v1977_v19, 0.0 }
 0x12f   :  { %v594_v16 = vpop.xlane.xlu1 %593  ;;  %v525_v18 = vpop.xlane.xlu0 %524 }
 0x130   :  { %v638_v3 = vsub.f32 %v1859_v11, %v594_v16  ;;  %v573_v17 = vpop.xlane.xlu2 %572  ;;  %v615_v22 = vsub.f32 %v1857_v10, %v525_v18 }
 0x131   :  { %v631_v46 = vsub.f32 %v1861_v15, %v573_v17 }
 0x132   :  { %v1980_v27 = vpop.eup %1559  ;;  %v695_v28 = vmul.f32 1.442695, %v638_v3  ;;  %v649_v34 = vmul.f32 1.442695, %v615_v22 }
 0x133   :  { %v1982_v29 = vpop.eup %1561  ;;  %v736_v10 = vsel %vm516_vm1, %v1980_v27, 0.0 }
 0x134   :  { %1563 = vpow2.f32 %v695_v28  ;;  %v760_v11 = vsel %vm516_vm1, %v1982_v29, 0.0 }
 0x135   :  { %713 = vadd.xlane.f32.xlu1 %v712_v35  ;;  %761 = vadd.xlane.f32.xlu2 %v760_v11  ;;  %1565 = vpow2.f32 %v649_v34 }
 0x136   :  { %737 = vadd.xlane.f32.xlu0 %v736_v10  ;;  %1567 = vpow2.f32 %v665_v36 }
 0x137   :  { %v597_v37 = vpop.xlane.xlu1 %596  ;;  %v552_v42 = vpop.xlane.xlu0 %551 }
 0x138   :  { %v639_v39 = vsub.f32 %v1869_v20, %v597_v37  ;;  %v600_v6 = vpop.xlane.xlu2 %599  ;;  %v624_v43 = vsub.f32 %v1871_v21, %v552_v42  ;;  %v681_v21 = vmul.f32 1.442695, %v631_v46 }
 0x139   :  { %v640_v60 = vsub.f32 %v1873_v24, %v600_v6 }
 0x13a   :  { %v1993_v44 = vpop.eup %1563  ;;  %v697_v45 = vmul.f32 1.442695, %v639_v39  ;;  %v667_v52 = vmul.f32 1.442695, %v624_v43 }
 0x13b   :  { %v1996_v54 = vpop.eup %1565  ;;  %v784_v55 = vsel %vm516_vm1, %v1993_v44, 0.0  ;;  %v699_v0 = vmul.f32 1.442695, %v640_v60 }
 0x13c   :  { %1569 = vpow2.f32 %v697_v45  ;;  %v715_v20 = vsel %vm516_vm1, %v1996_v54, 0.0  ;;  %v2003_v15 = vpop.eup %1567 }
 0x13d   :  { %785 = vadd.xlane.f32.xlu1 %v784_v55  ;;  %1571 = vpow2.f32 %v667_v52  ;;  %716 = vadd.xlane.f32.xlu2 %v715_v20 }
 0x13e   :  { %1573 = vpow2.f32 %v681_v21 }
 0x13f   :  { %v528_v50 = vpop.xlane.xlu1 %527  ;;  %v576_v58 = vpop.xlane.xlu0 %575 }
 0x140   :  { %v616_v57 = vsub.f32 %v1883_v31, %v528_v50  ;;  %v531_v56 = vpop.xlane.xlu2 %530  ;;  %v632_v59 = vsub.f32 %v1885_v32, %v576_v58  ;;  %v739_v31 = vsel %vm516_vm1, %v2003_v15, 0.0 }
 0x141   :  { %v617_v35 = vsub.f32 %v1881_v30, %v531_v56 }
 0x142   :  { %v2006_v1 = vpop.eup %1569  ;;  %v651_v2 = vmul.f32 1.442695, %v616_v57  ;;  %v683_v5 = vmul.f32 1.442695, %v632_v59 }
 0x143   :  { %v787_v8 = vsel %vm516_vm1, %v2006_v1, 0.0  ;;  %v2011_v14 = vpop.eup %1571  ;;  %v653_v36 = vmul.f32 1.442695, %v617_v35 }
 0x144   :  { %1575 = vpow2.f32 %v651_v2  ;;  %788 = vadd.xlane.f32.xlu0 %v787_v8  ;;  %v742_v32 = vsel %vm516_vm1, %v2011_v14, 0.0  ;;  %v2020_v18 = vpop.eup %1573 }
 0x145   :  { %1577 = vpow2.f32 %v683_v5  ;;  %740 = vadd.xlane.f32.xlu1 %v739_v31  ;;  %743 = vadd.xlane.f32.xlu2 %v742_v32 }
 0x146   :  { %1579 = vpow2.f32 %v699_v0 }
 0x147   :  { %v555_v16 = vpop.xlane.xlu1 %554  ;;  %v603_v3 = vpop.xlane.xlu0 %602 }
 0x148   :  { %v625_v24 = vsub.f32 %v1893_v38, %v555_v16  ;;  %v2018_v17 = vpop.xlane.xlu2 %557  ;;  %v641_v22 = vsub.f32 %v1895_v40, %v603_v3  ;;  %v763_v38 = vsel %vm516_vm1, %v2020_v18, 0.0  ;;  %v1536_v3 = vld [vmem:[%s2342_s2 + $0x18] sm:$0xff] }
 0x149   :  { %v626_v31 = vsub.f32 %v1897_v41, %v2018_v17  ;;  %v1544_v41 = vld [vmem:[%s2342_s2 + $0x58] sm:$0xff]  ;;  %961 = vmatpush.bf16.msrb.mxu0 %v1536_v3  ;;  %v1543_v3 = vld [vmem:[%s2342_s2 + $0x50] sm:$0xff] }
 0x14a   :  { %v2023_v28 = vpop.eup %1575  ;;  %v669_v33 = vmul.f32 1.442695, %v625_v24  ;;  %v701_v11 = vmul.f32 1.442695, %v641_v22  ;;  %v1548_v24 = vld [vmem:[%s2342_s2 + $0x78] sm:$0xff]  ;;  %1131 = vmatpush.bf16.msrb.mxu2 %v1544_v41 }
 0x14b   :  { %v2025_v34 = vpop.eup %1577  ;;  %v718_v10 = vsel %vm516_vm1, %v2023_v28, 0.0  ;;  %v671_v17 = vmul.f32 1.442695, %v626_v31  ;;  %1216 = vmatpush.bf16.msrb.mxu3 %v1548_v24 }
 0x14c   :  { %1581 = vpow2.f32 %v669_v33  ;;  %719 = vadd.xlane.f32.xlu0 %v718_v10  ;;  %v766_v40 = vsel %vm516_vm1, %v2025_v34, 0.0  ;;  %v2035_v42 = vpop.eup %1579  ;;  %v1540_v33 = vld [vmem:[%s2342_s2 + $0x38] sm:$0xff] }
 0x14d   :  { %1583 = vpow2.f32 %v701_v11  ;;  %764 = vadd.xlane.f32.xlu1 %v763_v38  ;;  %767 = vadd.xlane.f32.xlu2 %v766_v40 }
 0x14e   :  { %1585 = vpow2.f32 %v653_v36  ;;  %1046 = vmatpush.bf16.msrb.mxu1 %v1540_v33  ;;  %v1539_v33 = vld [vmem:[%s2342_s2 + $0x30] sm:$0xff]  ;;  %1132 = vmatpush.bf16.msrb.mxu2 %v1543_v3 }
 0x14f   :  { %v579_v37 = vpop.xlane.xlu1 %578  ;;  %v534_v6 = vpop.xlane.xlu0 %533 }
 0x150   :  { %v633_v39 = vsub.f32 %v1905_v47, %v579_v37  ;;  %v582_v30 = vpop.xlane.xlu2 %581  ;;  %v618_v43 = vsub.f32 %v1907_v48, %v534_v6  ;;  %v790_v47 = vsel %vm516_vm1, %v2035_v42, 0.0 }
 0x151   :  { %v634_v55 = vsub.f32 %v1909_v49, %v582_v30 }
 0x152   :  { %v2038_v45 = vpop.eup %1581  ;;  %v685_v46 = vmul.f32 1.442695, %v633_v39  ;;  %v655_v20 = vmul.f32 1.442695, %v618_v43  ;;  %1047 = vmatpush.bf16.msrb.mxu1 %v1539_v33 }
 0x153   :  { %v2040_v52 = vpop.eup %1583  ;;  %v745_v21 = vsel %vm516_vm1, %v2038_v45, 0.0  ;;  %v687_v50 = vmul.f32 1.442695, %v634_v55 }
 0x154   :  { %1587 = vpow2.f32 %v685_v46  ;;  %746 = vadd.xlane.f32.xlu0 %v745_v21  ;;  %v793_v48 = vsel %vm516_vm1, %v2040_v52, 0.0  ;;  %v2050_v59 = vpop.eup %1585 }
 0x155   :  { %791 = vadd.xlane.f32.xlu1 %v790_v47  ;;  %1589 = vpow2.f32 %v655_v20  ;;  %794 = vadd.xlane.f32.xlu2 %v793_v48 }
 0x156   :  { %1591 = vpow2.f32 %v687_v50 }
 0x157   :  { %v606_v57 = vpop.xlane.xlu1 %605  ;;  %v585_v49 = vpop.xlane.xlu0 %584 }
 0x158   :  { %v642_v58 = vsub.f32 %v1921_v63, %v606_v57  ;;  %v537_v56 = vpop.xlane.xlu2 %536  ;;  %v635_v2 = vsub.f32 %v1919_v62, %v585_v49  ;;  %v721_v62 = vsel %vm516_vm1, %v2050_v59, 0.0 }
 0x159   :  { %v619_v8 = vsub.f32 %v1917_v61, %v537_v56 }
 0x15a   :  { %v2053_v60 = vpop.eup %1587  ;;  %v703_v5 = vmul.f32 1.442695, %v642_v58  ;;  %v689_v32 = vmul.f32 1.442695, %v635_v2 }
 0x15b   :  { %v769_v0 = vsel %vm516_vm1, %v2053_v60, 0.0  ;;  %v2060_v63 = vpop.eup %1589  ;;  %v657_v16 = vmul.f32 1.442695, %v619_v8 }
 0x15c   :  { %1593 = vpow2.f32 %v703_v5  ;;  %770 = vadd.xlane.f32.xlu0 %v769_v0  ;;  %v724_v61 = vsel %vm516_vm1, %v2060_v63, 0.0  ;;  %v2078_v10 = vpop.eup %1591 }
 0x15d   :  { %1595 = vpow2.f32 %v689_v32  ;;  %722 = vadd.xlane.f32.xlu1 %v721_v62  ;;  %725 = vadd.xlane.f32.xlu2 %v724_v61  ;;  %v772_v39 = vsel %vm516_vm1, %v2078_v10, 0.0 }
 0x15e   :  { %1597 = vpow2.f32 %v657_v16 }
 0x15f   :  { %v561_v22 = vpop.xlane.xlu1 %560  ;;  %v540_v11 = vpop.xlane.xlu0 %539  ;;  %1599 = vpow2.f32 %v671_v17  ;;  %v1547_v17 = vld [vmem:[%s2342_s2 + $0x70] sm:$0xff] }
 0x160   :  { %v609_v35 = vpop.xlane.xlu2 %608  ;;  %v620_v57 = vsub.f32 %v1933_v13, %v540_v11  ;;  %v627_v56 = vsub.f32 %v1929_v9, %v561_v22  ;;  %v1535_v22 = vld [vmem:[%s2342_s2 + $0x10] sm:$0xff]  ;;  %1217 = vmatpush.bf16.msrb.mxu3 %v1547_v17  ;;  %v1534_v11 = vld [vmem:[%s2342_s2 + $0x8] sm:$0xff] }
 0x161   :  { %v643_v36 = vsub.f32 %v1931_v12, %v609_v35  ;;  %962 = vmatpush.bf16.msrb.mxu0 %v1535_v22  ;;  %v1542_v35 = vld [vmem:[%s2342_s2 + $0x48] sm:$0xff] }
 0x162   :  { %v2080_v38 = vpop.eup %1593  ;;  %v673_v5 = vmul.f32 1.442695, %v627_v56  ;;  %1133 = vmatpush.bf16.msrb.mxu2 %v1542_v35 }
 0x163   :  { %v2082_v40 = vpop.eup %1595  ;;  %v796_v37 = vsel %vm516_vm1, %v2080_v38, 0.0  ;;  %v705_v6 = vmul.f32 1.442695, %v643_v36  ;;  %v1538_v36 = vld [vmem:[%s2342_s2 + $0x28] sm:$0xff] }
 0x164   :  { %797 = vadd.xlane.f32.xlu0 %v796_v37  ;;  %v775_v30 = vsel %vm516_vm1, %v2082_v40, 0.0  ;;  %v2091_v46 = vpop.eup %1597  ;;  %1048 = vmatpush.bf16.msrb.mxu1 %v1538_v36  ;;  %v1533_v37 = vld [vmem:[%s2342_s2] sm:$0xff] }
 0x165   :  { %773 = vadd.xlane.f32.xlu1 %v772_v39  ;;  %776 = vadd.xlane.f32.xlu2 %v775_v30  ;;  %v2094_v21 = vpop.eup %1599  ;;  %1601 = vpow2.f32 %v705_v6  ;;  %v727_v49 = vsel %vm516_vm1, %v2091_v46, 0.0  ;;  %v1537_v39 = vld [vmem:[%s2342_s2 + $0x20] sm:$0xff]  ;;  %v1546_v6 = vld [vmem:[%s2342_s2 + $0x68] sm:$0xff] }
 0x166   :  { %963 = vmatpush.bf16.msrb.mxu0 %v1534_v11  ;;  %v1541_v30 = vld [vmem:[%s2342_s2 + $0x40] sm:$0xff]  ;;  %1218 = vmatpush.bf16.msrb.mxu3 %v1546_v6 }
 0x167   :  { %v588_v43 = vpop.xlane.xlu1 %587  ;;  %v612_v12 = vpop.xlane.xlu0 %611  ;;  %1134 = vmatpush.bf16.msrb.mxu2 %v1541_v30 }
 0x168   :  { %v636_v55 = vsub.f32 %v1941_v23, %v588_v43  ;;  %v564_v20 = vpop.xlane.xlu2 %563  ;;  %v644_v47 = vsub.f32 %v1945_v26, %v612_v12  ;;  %v748_v23 = vsel %vm516_vm1, %v2094_v21, 0.0  ;;  %v659_v26 = vmul.f32 1.442695, %v620_v57  ;;  %1049 = vmatpush.bf16.msrb.mxu1 %v1537_v39 }
 0x169   :  { %v628_v50 = vsub.f32 %v1943_v25, %v564_v20 }
 0x16a   :  { %v691_v48 = vmul.f32 1.442695, %v636_v55  ;;  %v707_v58 = vmul.f32 1.442695, %v644_v47  ;;  %964 = vmatpush.bf16.msrb.mxu0 %v1533_v37  ;;  %v1545_v55 = vld [vmem:[%s2342_s2 + $0x60] sm:$0xff] }
 0x16b   :  { %v675_v2 = vmul.f32 1.442695, %v628_v50  ;;  %v2104_v25 = vpop.eup %1601  ;;  %1219 = vmatpush.bf16.msrb.mxu3 %v1545_v55 }
 0x16c   :  { %1603 = vpow2.f32 %v691_v48  ;;  %728 = vadd.xlane.f32.xlu0 %v727_v49  ;;  %v799_v31 = vsel %vm516_vm1, %v2104_v25, 0.0 }
 0x16d   :  { %749 = vadd.xlane.f32.xlu1 %v748_v23  ;;  %1605 = vpow2.f32 %v707_v58 }
 0x16e   :  { %1607 = vpow2.f32 %v675_v2 }
 0x16f   :  { %1609 = vpow2.f32 %v659_v26 }
 0x170   :  { %1611 = vpow2.f32 %v673_v5 }
 0x172   :  { %v2106_v8 = vpop.eup %1603 }
 0x173   :  { %v778_v13 = vsel %vm516_vm1, %v2106_v8, 0.0  ;;  %v2110_v9 = vpop.eup %1605 }
 0x174   :  { %779 = vadd.xlane.f32.xlu0 %v778_v13  ;;  %v802_v32 = vsel %vm516_vm1, %v2110_v9, 0.0  ;;  %v2116_v0 = vpop.eup %1607 }
 0x175   :  { %800 = vadd.xlane.f32.xlu1 %v799_v31  ;;  %803 = vadd.xlane.f32.xlu2 %v802_v32  ;;  %v2118_v62 = vpop.eup %1609  ;;  %v754_v16 = vsel %vm516_vm1, %v2116_v0, 0.0 }
 0x176   :  { %v2120_v61 = vpop.eup %1611  ;;  %v730_v41 = vsel %vm516_vm1, %v2118_v62, 0.0 }
 0x177   :  { %v751_v24 = vsel %vm516_vm1, %v2120_v61, 0.0 }
 0x17c   :  { %755 = vadd.xlane.f32.xlu0 %v754_v16 }
 0x17d   :  { %731 = vadd.xlane.f32.xlu1 %v730_v41  ;;  %752 = vadd.xlane.f32.xlu2 %v751_v24 }
 0x197   :  { %v735_v20 = vpop.xlane.xlu2 %734 }
 0x198   :  { %v711_v43 = vpop.xlane.xlu0 %710 }
 0x199   :  { %1613 = vrcp.f32 %v711_v43 }
 0x19f   :  { %v1614_v57 = vpop.eup %1613 }
 0x1a0   :  { %v759_v12 = vpop.xlane.xlu1 %758  ;;  %v783_v47 = vpop.xlane.xlu0 %782  ;;  %v837_v23 = vmul.f32 %v1614_v57, %v1960_v51 }
 0x1a1   :  { %1615 = vrcp.f32 %v759_v12 }
 0x1a2   :  { %1617 = vrcp.f32 %v735_v20  ;;  %v869_v32 = vpack.c.bf16 %v837_v23, %v837_v23 }
 0x1a3   :  { %1619 = vrcp.f32 %v783_v47 }
 0x1a4   :  { %v909_v11 = vunpack.c.l.b16 %v869_v32 }
 0x1a7   :  { %v1616_v49 = vpop.eup %1615 }
 0x1a8   :  { %v714_v48 = vpop.xlane.xlu1 %713  ;;  %v762_v50 = vpop.xlane.xlu2 %761  ;;  %v853_v2 = vmul.f32 %v1616_v49, %v1970_v7 }
 0x1a9   :  { %1621 = vrcp.f32 %v714_v48  ;;  %v738_v58 = vpop.xlane.xlu0 %737  ;;  %v1618_v56 = vpop.eup %1617 }
 0x1aa   :  { %1623 = vrcp.f32 %v762_v50  ;;  %v1620_v26 = vpop.eup %1619  ;;  %v845_v5 = vmul.f32 %v1618_v56, %v1957_v53  ;;  %v885_v3 = vpack.c.bf16 %v853_v2, %v853_v2 }
 0x1ab   :  { %1625 = vrcp.f32 %v738_v58  ;;  %v861_v53 = vmul.f32 %v1620_v26, %v1968_v4 }
 0x1ac   :  { %v877_v33 = vpack.c.bf16 %v845_v5, %v845_v5  ;;  %v1079_v39 = vunpack.c.l.b16 %v885_v3 }
 0x1ad   :  { %v893_v12 = vpack.c.bf16 %v861_v53, %v861_v53 }
 0x1af   :  { %v1622_v13 = vpop.eup %1621  ;;  %v1164_v57 = vunpack.c.l.b16 %v893_v12 }
 0x1b0   :  { %v1624_v31 = vpop.eup %1623  ;;  %v838_v16 = vmul.f32 %v1622_v13, %v1977_v19  ;;  %v786_v41 = vpop.xlane.xlu1 %785  ;;  %v994_v19 = vunpack.c.l.b16 %v877_v33 }
 0x1b1   :  { %v1626_v24 = vpop.eup %1625  ;;  %v854_v17 = vmul.f32 %v1624_v31, %v1982_v29  ;;  %1627 = vrcp.f32 %v786_v41  ;;  %v717_v22 = vpop.xlane.xlu2 %716 }
 0x1b2   :  { %v870_v35 = vpack.c.bf16 %v838_v16, %v838_v16  ;;  %v846_v51 = vmul.f32 %v1626_v24, %v1980_v27  ;;  %1629 = vrcp.f32 %v717_v22 }
 0x1b3   :  { %v886_v7 = vpack.c.bf16 %v854_v17, %v854_v17 }
 0x1b4   :  { %v910_v36 = vunpack.c.l.b16 %v870_v35  ;;  %v878_v37 = vpack.c.bf16 %v846_v51, %v846_v51 }
 0x1b5   :  { %v1080_v30 = vunpack.c.l.b16 %v886_v7 }
 0x1b6   :  { %v995_v6 = vunpack.c.l.b16 %v878_v37  ;;  %v917_v43 = vpack.c.b16 %v910_v36, %v909_v11 }
 0x1b7   :  { %v1628_v55 = vpop.eup %1627  ;;  %v789_v20 = vpop.xlane.xlu0 %788  ;;  %v1087_v29 = vpack.c.b16 %v1080_v30, %v1079_v39 }
 0x1b8   :  { %v862_v47 = vmul.f32 %v1628_v55, %v1993_v44  ;;  %v741_v48 = vpop.xlane.xlu1 %740  ;;  %1437 = vmatmul.msk.bf16.vlgmr.msrb.gmra.mxu0 %vm516_vm1, %v917_v43  ;;  %v1002_v27 = vpack.c.b16 %v995_v6, %v994_v19  ;;  %v1630_v49 = vpop.eup %1629 }
 0x1b9   :  { %1631 = vrcp.f32 %v741_v48  ;;  %1477 = vmatmul.msk.bf16.vlgmr.msrb.gmra.mxu2 %vm516_vm1, %v1087_v29  ;;  %v744_v4 = vpop.xlane.xlu2 %743  ;;  %v839_v41 = vmul.f32 %v1630_v49, %v1996_v54 }
 0x1ba   :  { %v894_v50 = vpack.c.bf16 %v862_v47, %v862_v47  ;;  %1633 = vrcp.f32 %v744_v4  ;;  %1457 = vmatmul.msk.bf16.vlgmr.msrb.gmra.mxu1 %vm516_vm1, %v1002_v27 }
 0x1bb   :  { %v871_v7 = vpack.c.bf16 %v839_v41, %v839_v41 }
 0x1bc   :  { %v1165_v58 = vunpack.c.l.b16 %v894_v50 }
 0x1bd   :  { %v911_v30 = vunpack.c.l.b16 %v871_v7 }
 0x1be   :  { %v1172_v56 = vpack.c.b16 %v1165_v58, %v1164_v57 }
 0x1bf   :  { %v1632_v23 = vpop.eup %1631  ;;  %v720_v2 = vpop.xlane.xlu0 %719 }
 0x1c0   :  { %v1634_v44 = vpop.eup %1633  ;;  %1635 = vrcp.f32 %v720_v2  ;;  %v765_v26 = vpop.xlane.xlu1 %764  ;;  %1497 = vmatmul.msk.bf16.vlgmr.msrb.gmra.mxu3 %vm516_vm1, %v1172_v56  ;;  %v847_v5 = vmul.f32 %v1632_v23, %v2003_v15 }
 0x1c1   :  { %1637 = vrcp.f32 %v765_v26  ;;  %v768_v13 = vpop.xlane.xlu2 %767  ;;  %v848_v31 = vmul.f32 %v1634_v44, %v2011_v14 }
 0x1c2   :  { %1639 = vrcp.f32 %v768_v13  ;;  %v879_v32 = vpack.c.bf16 %v847_v5, %v847_v5 }
 0x1c3   :  { %1641 = vrcp.f32 %v789_v20  ;;  %v880_v16 = vpack.c.bf16 %v848_v31, %v848_v31 }
 0x1c4   :  { %v996_v24 = vunpack.c.l.b16 %v879_v32 }
 0x1c5   :  { %v997_v3 = vunpack.c.l.b16 %v880_v16 }
 0x1c6   :  { %v1636_v17 = vpop.eup %1635 }
 0x1c7   :  { %v1638_v22 = vpop.eup %1637  ;;  %v747_v33 = vpop.xlane.xlu0 %746  ;;  %v1003_v35 = vpack.c.b16 %v997_v3, %v996_v24  ;;  %v840_v51 = vmul.f32 %v1636_v17, %v2023_v28 }
 0x1c8   :  { %v1640_v15 = vpop.eup %1639  ;;  %v792_v11 = vpop.xlane.xlu1 %791  ;;  %v855_v53 = vmul.f32 %v1638_v22, %v2020_v18 }
 0x1c9   :  { %v1642_v14 = vpop.eup %1641  ;;  %1643 = vrcp.f32 %v792_v11  ;;  %v795_v36 = vpop.xlane.xlu2 %794  ;;  %v872_v37 = vpack.c.bf16 %v840_v51, %v840_v51  ;;  %v856_v39 = vmul.f32 %v1640_v15, %v2025_v34 }
 0x1ca   :  { %1458 = vmatmul.msk.bf16.gmra.mxu1 %vm516_vm1, %v1003_v35  ;;  %v887_v54 = vpack.c.bf16 %v855_v53, %v855_v53  ;;  %v863_v28 = vmul.f32 %v1642_v14, %v2006_v1  ;;  %1645 = vrcp.f32 %v795_v36 }
 0x1cb   :  { %v912_v19 = vunpack.c.l.b16 %v872_v37  ;;  %v888_v6 = vpack.c.bf16 %v856_v39, %v856_v39 }
 0x1cc   :  { %v1081_v43 = vunpack.c.l.b16 %v887_v54  ;;  %v895_v48 = vpack.c.bf16 %v863_v28, %v863_v28 }
 0x1cd   :  { %v918_v55 = vpack.c.b16 %v912_v19, %v911_v30  ;;  %v1082_v20 = vunpack.c.l.b16 %v888_v6 }
 0x1ce   :  { %v1166_v1 = vunpack.c.l.b16 %v895_v48 }
 0x1cf   :  { %v1644_v29 = vpop.eup %1643  ;;  %1438 = vmatmul.msk.bf16.gmra.mxu0 %vm516_vm1, %v918_v55  ;;  %v771_v18 = vpop.xlane.xlu0 %770  ;;  %v1088_v12 = vpack.c.b16 %v1082_v20, %v1081_v43 }
 0x1d0   :  { %v723_v47 = vpop.xlane.xlu1 %722  ;;  %v864_v34 = vmul.f32 %v1644_v29, %v2035_v42  ;;  %v1646_v57 = vpop.eup %1645 }
 0x1d1   :  { %1647 = vrcp.f32 %v723_v47  ;;  %1478 = vmatmul.msk.bf16.gmra.mxu2 %vm516_vm1, %v1088_v12  ;;  %v726_v27 = vpop.xlane.xlu2 %725  ;;  %v865_v16 = vmul.f32 %v1646_v57, %v2040_v52 }
 0x1d2   :  { %1649 = vrcp.f32 %v726_v27  ;;  %v896_v4 = vpack.c.bf16 %v864_v34, %v864_v34 }
 0x1d3   :  { %1651 = vrcp.f32 %v771_v18  ;;  %v897_v15 = vpack.c.bf16 %v865_v16, %v865_v16 }
 0x1d4   :  { %v1167_v50 = vunpack.c.l.b16 %v896_v4 }
 0x1d5   :  { %v1168_v36 = vunpack.c.l.b16 %v897_v15 }
 0x1d6   :  { %v1173_v58 = vpack.c.b16 %v1167_v50, %v1166_v1 }
 0x1d7   :  { %v1648_v49 = vpop.eup %1647  ;;  %v798_v56 = vpop.xlane.xlu0 %797 }
 0x1d8   :  { %v1650_v23 = vpop.eup %1649  ;;  %1653 = vrcp.f32 %v798_v56  ;;  %v774_v2 = vpop.xlane.xlu1 %773  ;;  %1498 = vmatmul.msk.bf16.gmra.mxu3 %vm516_vm1, %v1173_v58  ;;  %v841_v42 = vmul.f32 %v1648_v49, %v2050_v59 }
 0x1d9   :  { %v1652_v44 = vpop.eup %1651  ;;  %1655 = vrcp.f32 %v774_v2  ;;  %v842_v26 = vmul.f32 %v1650_v23, %v2060_v63  ;;  %v777_v59 = vpop.xlane.xlu2 %776 }
 0x1da   :  { %v873_v5 = vpack.c.bf16 %v841_v42, %v841_v42  ;;  %1657 = vrcp.f32 %v747_v33  ;;  %v857_v32 = vmul.f32 %v1652_v44, %v2053_v60 }
 0x1db   :  { %v874_v13 = vpack.c.bf16 %v842_v26, %v842_v26 }
 0x1dc   :  { %v913_v31 = vunpack.c.l.b16 %v873_v5  ;;  %v889_v63 = vpack.c.bf16 %v857_v32, %v857_v32 }
 0x1dd   :  { %v914_v41 = vunpack.c.l.b16 %v874_v13 }
 0x1de   :  { %v1654_v24 = vpop.eup %1653  ;;  %v1083_v53 = vunpack.c.l.b16 %v889_v63 }
 0x1df   :  { %v1656_v3 = vpop.eup %1655  ;;  %v729_v17 = vpop.xlane.xlu0 %728  ;;  %v919_v22 = vpack.c.b16 %v914_v41, %v913_v31  ;;  %v866_v35 = vmul.f32 %v1654_v24, %v2080_v38 }
 0x1e0   :  { %v750_v51 = vpop.xlane.xlu1 %749  ;;  %v858_v7 = vmul.f32 %v1656_v3, %v2078_v10  ;;  %v1658_v33 = vpop.eup %1657 }
 0x1e1   :  { %1659 = vrcp.f32 %v750_v51  ;;  %1439 = vmatmul.msk.bf16.gmra.mxu0 %vm516_vm1, %v919_v22  ;;  %v898_v60 = vpack.c.bf16 %v866_v35, %v866_v35  ;;  %v849_v37 = vmul.f32 %v1658_v33, %v2038_v45 }
 0x1e2   :  { %v890_v11 = vpack.c.bf16 %v858_v7, %v858_v7  ;;  %1661 = vrcp.f32 %v777_v59 }
 0x1e3   :  { %v1169_v52 = vunpack.c.l.b16 %v898_v60  ;;  %v881_v6 = vpack.c.bf16 %v849_v37, %v849_v37 }
 0x1e4   :  { %v1084_v14 = vunpack.c.l.b16 %v890_v11 }
 0x1e5   :  { %v1174_v39 = vpack.c.b16 %v1169_v52, %v1168_v36  ;;  %v998_v45 = vunpack.c.l.b16 %v881_v6 }
 0x1e6   :  { %v1089_v38 = vpack.c.b16 %v1084_v14, %v1083_v53 }
 0x1e7   :  { %v1660_v54 = vpop.eup %1659  ;;  %v780_v30 = vpop.xlane.xlu0 %779 }
 0x1e8   :  { %1663 = vrcp.f32 %v780_v30  ;;  %v801_v10 = vpop.xlane.xlu1 %800  ;;  %1479 = vmatmul.msk.bf16.gmra.mxu2 %vm516_vm1, %v1089_v38  ;;  %1499 = vmatmul.msk.bf16.gmra.mxu3 %vm516_vm1, %v1174_v39  ;;  %v850_v19 = vmul.f32 %v1660_v54, %v2094_v21  ;;  %v1662_v43 = vpop.eup %1661 }
 0x1e9   :  { %1665 = vrcp.f32 %v801_v10  ;;  %v804_v28 = vpop.xlane.xlu2 %803  ;;  %v859_v29 = vmul.f32 %v1662_v43, %v2082_v40 }
 0x1ea   :  { %1667 = vrcp.f32 %v804_v28  ;;  %v882_v55 = vpack.c.bf16 %v850_v19, %v850_v19 }
 0x1eb   :  { %1669 = vrcp.f32 %v729_v17  ;;  %v891_v4 = vpack.c.bf16 %v859_v29, %v859_v29 }
 0x1ec   :  { %v999_v20 = vunpack.c.l.b16 %v882_v55 }
 0x1ed   :  { %v1085_v2 = vunpack.c.l.b16 %v891_v4 }
 0x1ee   :  { %v1664_v18 = vpop.eup %1663  ;;  %v1004_v12 = vpack.c.b16 %v999_v20, %v998_v45 }
 0x1ef   :  { %v1666_v47 = vpop.eup %1665  ;;  %v756_v34 = vpop.xlane.xlu0 %755  ;;  %v860_v48 = vmul.f32 %v1664_v18, %v2106_v8 }
 0x1f0   :  { %v1668_v27 = vpop.eup %1667  ;;  %1671 = vrcp.f32 %v756_v34  ;;  %v732_v21 = vpop.xlane.xlu1 %731  ;;  %1459 = vmatmul.msk.bf16.gmra.mxu1 %vm516_vm1, %v1004_v12  ;;  %v867_v1 = vmul.f32 %v1666_v47, %v2104_v25 }
 0x1f1   :  { %v1670_v50 = vpop.eup %1669  ;;  %1673 = vrcp.f32 %v732_v21  ;;  %v753_v57 = vpop.xlane.xlu2 %752  ;;  %v892_v58 = vpack.c.bf16 %v860_v48, %v860_v48  ;;  %v868_v40 = vmul.f32 %v1668_v27, %v2110_v9 }
 0x1f2   :  { %1675 = vrcp.f32 %v753_v57  ;;  %v899_v49 = vpack.c.bf16 %v867_v1, %v867_v1  ;;  %v843_v42 = vmul.f32 %v1670_v50, %v2091_v46 }
 0x1f3   :  { %v1086_v56 = vunpack.c.l.b16 %v892_v58  ;;  %v900_v23 = vpack.c.bf16 %v868_v40, %v868_v40 }
 0x1f4   :  { %v1170_v8 = vunpack.c.l.b16 %v899_v49  ;;  %v875_v9 = vpack.c.bf16 %v843_v42, %v843_v42 }
 0x1f5   :  { %v1171_v44 = vunpack.c.l.b16 %v900_v23  ;;  %v1090_v5 = vpack.c.b16 %v1086_v56, %v1085_v2 }
 0x1f6   :  { %v1672_v26 = vpop.eup %1671  ;;  %v915_v17 = vunpack.c.l.b16 %v875_v9 }
 0x1f7   :  { %v1674_v13 = vpop.eup %1673  ;;  %v852_v25 = vmul.f32 %v1672_v26, %v2116_v0  ;;  %v1175_v31 = vpack.c.b16 %v1171_v44, %v1170_v8 }
 0x1f8   :  { %v1676_v32 = vpop.eup %1675  ;;  %v844_v16 = vmul.f32 %v1674_v13, %v2118_v62  ;;  %1480 = vmatmul.msk.bf16.gmra.mxu2 %vm516_vm1, %v1090_v5 }
 0x1f9   :  { %v851_v41 = vmul.f32 %v1676_v32, %v2120_v61  ;;  %1500 = vmatmul.msk.bf16.gmra.mxu3 %vm516_vm1, %v1175_v31  ;;  %v884_v24 = vpack.c.bf16 %v852_v25, %v852_v25 }
 0x1fa   :  { %v876_v3 = vpack.c.bf16 %v844_v16, %v844_v16 }
 0x1fb   :  { %v883_v46 = vpack.c.bf16 %v851_v41, %v851_v41  ;;  %v1001_v59 = vunpack.c.l.b16 %v884_v24 }
 0x1fc   :  { %v916_v22 = vunpack.c.l.b16 %v876_v3 }
 0x1fd   :  { %v1000_v35 = vunpack.c.l.b16 %v883_v46 }
 0x1fe   :  { %v920_v51 = vpack.c.b16 %v916_v22, %v915_v17 }
 0x1ff   :  { %v1005_v0 = vpack.c.b16 %v1001_v59, %v1000_v35 }
 0x200   :  { %1440 = vmatmul.msk.bf16.gmra.mxu0 %vm516_vm1, %v920_v51 }
 0x201   :  { %1460 = vmatmul.msk.bf16.gmra.mxu1 %vm516_vm1, %v1005_v0 }
 0x235   :  { %v966_v62 = vpop.f32.mrf.mxu0 }
 0x236   :  { %1241 = vst.msk [vmem:[%s2343_s3] sm:$0xff] %vm151_vm0, %v966_v62 }
 0x237   :  { %v1051_v61 = vpop.f32.mrf.mxu1 }
 0x238   :  { %1249 = vst.msk [vmem:[%s2343_s3 + $0x40] sm:$0xff] %vm151_vm0, %v1051_v61 }
 0x23c   :  { %v1136_v7 = vpop.f32.mrf.mxu2 }
 0x23d   :  { %1257 = vst.msk [vmem:[%s2343_s3 + $0x80] sm:$0xff] %vm151_vm0, %v1136_v7  ;;  %v968_v63 = vpop.f32.mrf.mxu0 }
 0x23e   :  { %1242 = vst.msk [vmem:[%s2343_s3 + $0x8] sm:$0xff] %vm151_vm0, %v968_v63 }
 0x23f   :  { %v1053_v15 = vpop.f32.mrf.mxu1 }
 0x240   :  { %1250 = vst.msk [vmem:[%s2343_s3 + $0x48] sm:$0xff] %vm151_vm0, %v1053_v15 }
 0x243   :  { %v1221_v33 = vpop.f32.mrf.mxu3 }
 0x244   :  { %v1138_v60 = vpop.f32.mrf.mxu2  ;;  %1265 = vst.msk [vmem:[%s2343_s3 + $0xc0] sm:$0xff] %vm151_vm0, %v1221_v33 }
 0x245   :  { %1258 = vst.msk [vmem:[%s2343_s3 + $0x88] sm:$0xff] %vm151_vm0, %v1138_v60 }
 0x247   :  { %v1056_v11 = vpop.f32.mrf.mxu1 }
 0x248   :  { %1251 = vst.msk [vmem:[%s2343_s3 + $0x50] sm:$0xff] %vm151_vm0, %v1056_v11 }
 0x24b   :  { %v1223_v52 = vpop.f32.mrf.mxu3 }
 0x24c   :  { %v971_v53 = vpop.f32.mrf.mxu0  ;;  %1266 = vst.msk [vmem:[%s2343_s3 + $0xc8] sm:$0xff] %vm151_vm0, %v1223_v52 }
 0x24d   :  { %1243 = vst.msk [vmem:[%s2343_s3 + $0x10] sm:$0xff] %vm151_vm0, %v971_v53 }
 0x24f   :  { %v1058_v14 = vpop.f32.mrf.mxu1 }
 0x250   :  { %1252 = vst.msk [vmem:[%s2343_s3 + $0x58] sm:$0xff] %vm151_vm0, %v1058_v14 }
 0x254   :  { %v973_v36 = vpop.f32.mrf.mxu0  ;;  %v1141_v37 = vpop.f32.mrf.mxu2 }
 0x255   :  { %1244 = vst.msk [vmem:[%s2343_s3 + $0x18] sm:$0xff] %vm151_vm0, %v973_v36 }
 0x256   :  { %1259 = vst.msk [vmem:[%s2343_s3 + $0x90] sm:$0xff] %vm151_vm0, %v1141_v37 }
 0x25b   :  { %v1226_v38 = vpop.f32.mrf.mxu3 }
 0x25c   :  { %v1143_v39 = vpop.f32.mrf.mxu2  ;;  %1267 = vst.msk [vmem:[%s2343_s3 + $0xd0] sm:$0xff] %vm151_vm0, %v1226_v38 }
 0x25d   :  { %1260 = vst.msk [vmem:[%s2343_s3 + $0x98] sm:$0xff] %vm151_vm0, %v1143_v39 }
 0x25e   :  { %v976_v54 = vpop.f32.mrf.mxu0 }
 0x25f   :  { %1245 = vst.msk [vmem:[%s2343_s3 + $0x20] sm:$0xff] %vm151_vm0, %v976_v54 }
 0x263   :  { %v1228_v30 = vpop.f32.mrf.mxu3 }
 0x264   :  { %1268 = vst.msk [vmem:[%s2343_s3 + $0xd8] sm:$0xff] %vm151_vm0, %v1228_v30 }
 0x266   :  { %v978_v10 = vpop.f32.mrf.mxu0 }
 0x267   :  { %1246 = vst.msk [vmem:[%s2343_s3 + $0x28] sm:$0xff] %vm151_vm0, %v978_v10 }
 0x26b   :  { %v1146_v19 = vpop.f32.mrf.mxu2  ;;  %v1231_v6 = vpop.f32.mrf.mxu3 }
 0x26c   :  { %1261 = vst.msk [vmem:[%s2343_s3 + $0xa0] sm:$0xff] %vm151_vm0, %v1146_v19 }
 0x26d   :  { %1269 = vst.msk [vmem:[%s2343_s3 + $0xe0] sm:$0xff] %vm151_vm0, %v1231_v6  ;;  %v1061_v43 = vpop.f32.mrf.mxu1 }
 0x26e   :  { %1253 = vst.msk [vmem:[%s2343_s3 + $0x60] sm:$0xff] %vm151_vm0, %v1061_v43 }
 0x273   :  { %v1148_v28 = vpop.f32.mrf.mxu2  ;;  %v1233_v55 = vpop.f32.mrf.mxu3 }
 0x274   :  { %1262 = vst.msk [vmem:[%s2343_s3 + $0xa8] sm:$0xff] %vm151_vm0, %v1148_v28 }
 0x275   :  { %1270 = vst.msk [vmem:[%s2343_s3 + $0xe8] sm:$0xff] %vm151_vm0, %v1233_v55  ;;  %v1063_v45 = vpop.f32.mrf.mxu1 }
 0x276   :  { %1254 = vst.msk [vmem:[%s2343_s3 + $0x68] sm:$0xff] %vm151_vm0, %v1063_v45 }
 0x27b   :  { %v1151_v20 = vpop.f32.mrf.mxu2 }
 0x27c   :  { %1263 = vst.msk [vmem:[%s2343_s3 + $0xb0] sm:$0xff] %vm151_vm0, %v1151_v20  ;;  %v1236_v29 = vpop.f32.mrf.mxu3 }
 0x27d   :  { %1271 = vst.msk [vmem:[%s2343_s3 + $0xf0] sm:$0xff] %vm151_vm0, %v1236_v29  ;;  %v981_v18 = vpop.f32.mrf.mxu0 }
 0x27e   :  { %1247 = vst.msk [vmem:[%s2343_s3 + $0x30] sm:$0xff] %vm151_vm0, %v981_v18  ;;  %v1066_v12 = vpop.f32.mrf.mxu1 }
 0x27f   :  { %1255 = vst.msk [vmem:[%s2343_s3 + $0x70] sm:$0xff] %vm151_vm0, %v1066_v12 }
 0x283   :  { %v1153_v47 = vpop.f32.mrf.mxu2 }
 0x284   :  { %1264 = vst.msk [vmem:[%s2343_s3 + $0xb8] sm:$0xff] %vm151_vm0, %v1153_v47  ;;  %v1238_v34 = vpop.f32.mrf.mxu3 }
 0x285   :  { %1272 = vst.msk [vmem:[%s2343_s3 + $0xf8] sm:$0xff] %vm151_vm0, %v1238_v34  ;;  %v983_v48 = vpop.f32.mrf.mxu0 }
 0x286   :  { %1248 = vst.msk [vmem:[%s2343_s3 + $0x38] sm:$0xff] %vm151_vm0, %v983_v48  ;;  %v1068_v27 = vpop.f32.mrf.mxu1 }
 0x287   :  { %1256 = vst.msk [vmem:[%s2343_s3 + $0x78] sm:$0xff] %vm151_vm0, %v1068_v27 }

// kernel: transformer_unet_forward.59
= control target key start
LH: loop header
LB: loop body
LE: loop exit
PB: predicated region body
PF: predicated region fallthrough
CT: control target
= control target key end

     0   :  { %vm34_vm0 = vcmask 1043456   ;;  %vm27_vm1 = vcmask 64512   ;;  %s114_s1 = inlined_call_operand.vmem [shape: bf16[8,128], index: 1, kind: input, shape index: {}]   ;;  %s115_s0 = inlined_call_operand.vmem [shape: bf16[32,8], index: 0, kind: input, shape index: {}]   ;;  %s116_s2 = inlined_call_operand.vmem [shape: f32[32,128], index: 2, kind: output, shape index: {}]  }
   0x1   :  { %v16_v0 = vld [vmem:[%s114_s1] sm:$0xf]  ;;  %v76_v3 = vld [vmem:[%s115_s0 + $0x8] sm:$0xff] }
   0x2   :  { %v36_v1 = vsel %vm34_vm0, %v16_v0, 0  ;;  %v75_v2 = vld [vmem:[%s115_s0] sm:$0xff] }
   0x3   :  { %45 = vmatpush.bf16.msra.mxu0 %v36_v1  ;;  %77 = vmatpush.bf16.msra.mxu1 %v36_v1 }
   0x6   :  { %73 = vmatmul.msk.bf16.vlgmr.msra.gmra.mxu0 %vm27_vm1, %v75_v2  ;;  %74 = vmatmul.msk.bf16.vlgmr.msra.gmra.mxu1 %vm27_vm1, %v76_v3 }
  0x83   :  { %v47_v4 = vpop.f32.mrf.mxu0  ;;  %v52_v5 = vpop.f32.mrf.mxu1 }
  0x84   :  { %57 = vst [vmem:[%s116_s2] sm:$0xff] %v47_v4 }
  0x85   :  { %59 = vst [vmem:[%s116_s2 + $0x10] sm:$0xff] %v52_v5 }
  0x8b   :  { %v49_v6 = vpop.f32.mrf.mxu0  ;;  %v54_v7 = vpop.f32.mrf.mxu1 }
  0x8c   :  { %58 = vst [vmem:[%s116_s2 + $0x8] sm:$0xff] %v49_v6 }
  0x8d   :  { %60 = vst [vmem:[%s116_s2 + $0x18] sm:$0xff] %v54_v7 }

// kernel: transformer_unet_forward.60
= control target key start
LH: loop header
LB: loop body
LE: loop exit
PB: predicated region body
PF: predicated region fallthrough
CT: control target
= control target key end

     0   :  { %vm34_vm0 = vcmask 130048   ;;  %s122_s1 = inlined_call_operand.vmem [shape: bf16[16,128], index: 1, kind: input, shape index: {}]   ;;  %s123_s0 = inlined_call_operand.vmem [shape: bf16[32,16], index: 0, kind: input, shape index: {}]   ;;  %s124_s2 = inlined_call_operand.vmem [shape: f32[32,128], index: 2, kind: output, shape index: {}]  }
   0x1   :  { %v84_v0 = vld [vmem:[%s122_s1] sm:$0xff]  ;;  %v83_v2 = vld [vmem:[%s123_s0 + $0x8] sm:$0xff] }
   0x2   :  { %v82_v1 = vld [vmem:[%s123_s0] sm:$0xff]  ;;  %48 = vmatpush.bf16.msra.mxu0 %v84_v0  ;;  %85 = vmatpush.bf16.msra.mxu1 %v84_v0 }
   0x5   :  { %80 = vmatmul.msk.bf16.vlgmr.msra.gmra.mxu0 %vm34_vm0, %v82_v1  ;;  %81 = vmatmul.msk.bf16.vlgmr.msra.gmra.mxu1 %vm34_vm0, %v83_v2 }
  0x82   :  { %v50_v3 = vpop.f32.mrf.mxu0  ;;  %v55_v4 = vpop.f32.mrf.mxu1 }
  0x83   :  { %60 = vst [vmem:[%s124_s2] sm:$0xff] %v50_v3 }
  0x84   :  { %62 = vst [vmem:[%s124_s2 + $0x10] sm:$0xff] %v55_v4 }
  0x8a   :  { %v52_v5 = vpop.f32.mrf.mxu0  ;;  %v57_v6 = vpop.f32.mrf.mxu1 }
  0x8b   :  { %61 = vst [vmem:[%s124_s2 + $0x8] sm:$0xff] %v52_v5 }
  0x8c   :  { %63 = vst [vmem:[%s124_s2 + $0x18] sm:$0xff] %v57_v6 }

// kernel: transformer_unet_forward.61
= control target key start
LH: loop header
LB: loop body
LE: loop exit
PB: predicated region body
PF: predicated region fallthrough
CT: control target
= control target key end

     0   :  { %vm238_vm0 = vcmask 130048   ;;  %s883_s1 = inlined_call_operand.vmem [shape: bf16[144,512], index: 1, kind: input, shape index: {}]   ;;  %s884_s0 = inlined_call_operand.vmem [shape: bf16[8,144], index: 0, kind: input, shape index: {}]   ;;  %s885_s2 = inlined_call_operand.vmem [shape: f32[8,2], index: 2, kind: input, shape index: {}]   ;;  %s886_s3 = inlined_call_operand.vmem [shape: f32[8,512], index: 3, kind: output, shape index: {}]  }
   0x1   :  { %v594_v0 = vld [vmem:[%s883_s1 + $0xe4] sm:$0xf]  ;;  %v534_v1 = vld [vmem:[%s883_s1 + $0xf0] sm:$0xf0]  ;;  %v532_v2 = vld [vmem:[%s883_s1 + $0xe0] sm:$0xf] }
   0x2   :  { %v537_v3 = vor.u32 %v594_v0, %v534_v1  ;;  %v596_v4 = vld [vmem:[%s883_s1 + $0xec] sm:$0xf0]  ;;  %v590_v5 = vld [vmem:[%s883_s1 + $0xc4] sm:$0xf]  ;;  %v518_v6 = vld [vmem:[%s883_s1 + $0xd0] sm:$0xf0] }
   0x3   :  { %v533_v7 = vor.u32 %v596_v4, %v532_v2  ;;  %v516_v8 = vld [vmem:[%s883_s1 + $0xc0] sm:$0xf]  ;;  %v592_v9 = vld [vmem:[%s883_s1 + $0xcc] sm:$0xf0]  ;;  %v586_v10 = vld [vmem:[%s883_s1 + $0xa4] sm:$0xf]  ;;  %v521_v11 = vor.u32 %v590_v5, %v518_v6 }
   0x4   :  { %268 = vmatpush.bf16.msra.mxu2 %v537_v3  ;;  %v502_v12 = vld [vmem:[%s883_s1 + $0xb0] sm:$0xf0]  ;;  %v548_v13 = vld [vmem:[%s883_s1 + $0x100] sm:$0xf]  ;;  %v600_v14 = vld [vmem:[%s883_s1 + $0x10c] sm:$0xf0]  ;;  %v517_v15 = vor.u32 %v592_v9, %v516_v8 }
   0x5   :  { %242 = vmatpush.bf16.msra.mxu0 %v533_v7  ;;  %v549_v16 = vor.u32 %v600_v14, %v548_v13  ;;  %v500_v17 = vld [vmem:[%s883_s1 + $0xa0] sm:$0xf]  ;;  %v588_v18 = vld [vmem:[%s883_s1 + $0xac] sm:$0xf0]  ;;  %v540_v19 = vld [vmem:[%s883_s1 + $0xe8] sm:$0xf]  ;;  %v505_v26 = vor.u32 %v586_v10, %v502_v12 }
   0x6   :  { %v597_v20 = vld [vmem:[%s883_s1 + $0xf4] sm:$0xf0]  ;;  %v556_v21 = vld [vmem:[%s883_s1 + $0x108] sm:$0xf]  ;;  %v595_v25 = vld [vmem:[%s883_s1 + $0xec] sm:$0xf]  ;;  %v501_v30 = vor.u32 %v588_v18, %v500_v17 }
   0x7   :  { %v601_v22 = vld [vmem:[%s883_s1 + $0x114] sm:$0xf0]  ;;  %262 = vmatpush.bf16.msra.mxu1 %v549_v16  ;;  %v541_v23 = vor.u32 %v597_v20, %v540_v19  ;;  %v582_v27 = vld [vmem:[%s883_s1 + $0x84] sm:$0xf]  ;;  %v486_v28 = vld [vmem:[%s883_s1 + $0x90] sm:$0xf0] }
   0x8   :  { %v557_v24 = vor.u32 %v601_v22, %v556_v21  ;;  %269 = vmatpush.bf16.msra.mxu2 %v521_v11  ;;  %v542_v29 = vld [vmem:[%s883_s1 + $0xf8] sm:$0xf0]  ;;  %v484_v32 = vld [vmem:[%s883_s1 + $0x80] sm:$0xf]  ;;  %v524_v33 = vld [vmem:[%s883_s1 + $0xc8] sm:$0xf]  ;;  %v489_v41 = vor.u32 %v582_v27, %v486_v28 }
   0x9   :  { %243 = vmatpush.bf16.msra.mxu0 %v517_v15  ;;  %v545_v31 = vor.u32 %v595_v25, %v542_v29  ;;  %v593_v34 = vld [vmem:[%s883_s1 + $0xd4] sm:$0xf0]  ;;  %v584_v35 = vld [vmem:[%s883_s1 + $0x8c] sm:$0xf0]  ;;  %v591_v37 = vld [vmem:[%s883_s1 + $0xcc] sm:$0xf] }
   0xa   :  { %314 = vmatpush.bf16.msra.mxu3 %v557_v24  ;;  %v525_v36 = vor.u32 %v593_v34, %v524_v33  ;;  %v526_v38 = vld [vmem:[%s883_s1 + $0xd8] sm:$0xf0]  ;;  %v508_v40 = vld [vmem:[%s883_s1 + $0xa8] sm:$0xf]  ;;  %v578_v42 = vld [vmem:[%s883_s1 + $0x64] sm:$0xf]  ;;  %v485_v45 = vor.u32 %v584_v35, %v484_v32 }
   0xb   :  { %294 = vmatpush.bf16.msrb.mxu1 %v541_v23  ;;  %v529_v39 = vor.u32 %v591_v37, %v526_v38  ;;  %v470_v43 = vld [vmem:[%s883_s1 + $0x70] sm:$0xf0]  ;;  %v589_v44 = vld [vmem:[%s883_s1 + $0xb4] sm:$0xf0]  ;;  %v468_v46 = vld [vmem:[%s883_s1 + $0x60] sm:$0xf] }
   0xc   :  { %270 = vmatpush.bf16.msra.mxu2 %v505_v26  ;;  %v509_v47 = vor.u32 %v589_v44, %v508_v40  ;;  %v587_v48 = vld [vmem:[%s883_s1 + $0xac] sm:$0xf]  ;;  %v510_v49 = vld [vmem:[%s883_s1 + $0xb8] sm:$0xf0]  ;;  %v580_v50 = vld [vmem:[%s883_s1 + $0x6c] sm:$0xf0]  ;;  %v473_v54 = vor.u32 %v578_v42, %v470_v43 }
   0xd   :  { %244 = vmatpush.bf16.msra.mxu0 %v501_v30  ;;  %v492_v51 = vld [vmem:[%s883_s1 + $0x88] sm:$0xf]  ;;  %v585_v52 = vld [vmem:[%s883_s1 + $0x94] sm:$0xf0]  ;;  %v513_v53 = vor.u32 %v587_v48, %v510_v49  ;;  %v583_v55 = vld [vmem:[%s883_s1 + $0x8c] sm:$0xf]  ;;  %v469_v58 = vor.u32 %v580_v50, %v468_v46 }
   0xe   :  { %320 = vmatpush.bf16.msrb.mxu3 %v545_v31  ;;  %v494_v56 = vld [vmem:[%s883_s1 + $0x98] sm:$0xf0]  ;;  %v758_v57 = vld [vmem:[%s884_s0] sm:$0xff]  ;;  %v454_v60 = vld [vmem:[%s883_s1 + $0x50] sm:$0xf0]  ;;  %v493_v62 = vor.u32 %v585_v52, %v492_v51 }
   0xf   :  { %295 = vmatpush.bf16.msrb.mxu1 %v525_v36  ;;  %v574_v59 = vld [vmem:[%s883_s1 + $0x44] sm:$0xf]  ;;  %v452_v61 = vld [vmem:[%s883_s1 + $0x40] sm:$0xf]  ;;  %v54_v63 = vunpack.c.h.b16 %v758_v57  ;;  %v576_v0 = vld [vmem:[%s883_s1 + $0x4c] sm:$0xf0]  ;;  %v497_v3 = vor.u32 %v583_v55, %v494_v56  ;;  %v53_v29 = vunpack.c.l.b16 %v758_v57 }
  0x10   :  { %271 = vmatpush.bf16.msra.mxu2 %v489_v41  ;;  %v476_v1 = vld [vmem:[%s883_s1 + $0x68] sm:$0xf]  ;;  %v581_v2 = vld [vmem:[%s883_s1 + $0x74] sm:$0xf0]  ;;  %v457_v5 = vor.u32 %v574_v59, %v454_v60  ;;  %v579_v6 = vld [vmem:[%s883_s1 + $0x6c] sm:$0xf]  ;;  %v453_v8 = vor.u32 %v576_v0, %v452_v61 }
  0x11   :  { %245 = vmatpush.bf16.msra.mxu0 %v485_v45  ;;  %v779_v4 = vpack.c.b16 %v54_v63, %v54_v63  ;;  %v478_v7 = vld [vmem:[%s883_s1 + $0x78] sm:$0xf0]  ;;  %v570_v9 = vld [vmem:[%s883_s1 + $0x24] sm:$0xf]  ;;  %v438_v10 = vld [vmem:[%s883_s1 + $0x30] sm:$0xf0]  ;;  %v477_v12 = vor.u32 %v581_v2, %v476_v1  ;;  %v55_v41 = vpack.c.b16 %v53_v29, %v53_v29 }
  0x12   :  { %321 = vmatpush.bf16.msrb.mxu3 %v529_v39  ;;  %v436_v11 = vld [vmem:[%s883_s1 + $0x20] sm:$0xf]  ;;  %v572_v13 = vld [vmem:[%s883_s1 + $0x2c] sm:$0xf0]  ;;  %v460_v14 = vld [vmem:[%s883_s1 + $0x48] sm:$0xf]  ;;  %v481_v16 = vor.u32 %v579_v6, %v478_v7  ;;  %v441_v17 = vor.u32 %v570_v9, %v438_v10 }
  0x13   :  { %296 = vmatpush.bf16.msrb.mxu1 %v509_v47  ;;  %564 = vmatmul.msk.bf16.vlgmr.msra.gmra.mxu3 %vm238_vm0, %v779_v4  ;;  %v577_v15 = vld [vmem:[%s883_s1 + $0x54] sm:$0xf0]  ;;  %v566_v18 = vld [vmem:[%s883_s1 + $0x4] sm:$0xf]  ;;  %v575_v19 = vld [vmem:[%s883_s1 + $0x4c] sm:$0xf]  ;;  %v437_v21 = vor.u32 %v572_v13, %v436_v11 }
  0x14   :  { %272 = vmatpush.bf16.msra.mxu2 %v473_v54  ;;  %562 = vmatmul.msk.bf16.vlgmr.msra.gmra.mxu1 %vm238_vm0, %v779_v4  ;;  %v462_v20 = vld [vmem:[%s883_s1 + $0x58] sm:$0xf0]  ;;  %v422_v22 = vld [vmem:[%s883_s1 + $0x10] sm:$0xf0]  ;;  %v420_v23 = vld [vmem:[%s883_s1] sm:$0xf]  ;;  %v461_v25 = vor.u32 %v577_v15, %v460_v14 }
  0x15   :  { %246 = vmatpush.bf16.msra.mxu0 %v469_v58  ;;  %v568_v24 = vld [vmem:[%s883_s1 + $0xc] sm:$0xf0]  ;;  %v598_v26 = vld [vmem:[%s883_s1 + $0x104] sm:$0xf]  ;;  %v550_v27 = vld [vmem:[%s883_s1 + $0x110] sm:$0xf0]  ;;  %v465_v30 = vor.u32 %v575_v19, %v462_v20  ;;  %v425_v34 = vor.u32 %v566_v18, %v422_v22 }
  0x16   :  { %322 = vmatpush.bf16.msrb.mxu3 %v513_v53  ;;  %v444_v28 = vld [vmem:[%s883_s1 + $0x28] sm:$0xf]  ;;  %v573_v31 = vld [vmem:[%s883_s1 + $0x34] sm:$0xf0]  ;;  %v599_v32 = vld [vmem:[%s883_s1 + $0x10c] sm:$0xf]  ;;  %v421_v37 = vor.u32 %v568_v24, %v420_v23  ;;  %v553_v38 = vor.u32 %v598_v26, %v550_v27 }
  0x17   :  { %297 = vmatpush.bf16.msrb.mxu1 %v493_v62  ;;  %v558_v33 = vld [vmem:[%s883_s1 + $0x118] sm:$0xf0]  ;;  %v571_v35 = vld [vmem:[%s883_s1 + $0x2c] sm:$0xf]  ;;  %v445_v39 = vor.u32 %v573_v31, %v444_v28  ;;  %v428_v43 = vld [vmem:[%s883_s1 + $0x8] sm:$0xf] }
  0x18   :  { %273 = vmatpush.bf16.msra.mxu2 %v457_v5  ;;  %v446_v36 = vld [vmem:[%s883_s1 + $0x38] sm:$0xf0]  ;;  %v561_v40 = vor.u32 %v599_v32, %v558_v33  ;;  %v569_v44 = vld [vmem:[%s883_s1 + $0x14] sm:$0xf0]  ;;  %v567_v45 = vld [vmem:[%s883_s1 + $0xc] sm:$0xf] }
  0x19   :  { %247 = vmatpush.bf16.msra.mxu0 %v453_v8  ;;  %v449_v42 = vor.u32 %v571_v35, %v446_v36  ;;  %v430_v46 = vld [vmem:[%s883_s1 + $0x18] sm:$0xf0]  ;;  %v429_v47 = vor.u32 %v569_v44, %v428_v43  ;;  %v612_v8 = vmov 512.0   ;;  %v388_v10 = vld [vmem:[%s885_s2] sm:$0xff]  ;;  %v614_v13 = vmov 1  }
  0x1a   :  { %323 = vmatpush.bf16.msrb.mxu3 %v497_v3  ;;  %v433_v48 = vor.u32 %v567_v45, %v430_v46  ;;  %608 = vrcp.f32 %v612_v8  ;;  %607 = vset.pattern.permute.xlu0 %v614_v13 }
  0x1b   :  { %298 = vmatpush.bf16.msrb.mxu1 %v477_v12  ;;  %v613_v12 = vmov 0  }
  0x1c   :  { %274 = vmatpush.bf16.msra.mxu2 %v441_v17  ;;  %605 = vset.pattern.permute.xlu1 %v613_v12 }
  0x1d   :  { %248 = vmatpush.bf16.msra.mxu0 %v437_v21  ;;  %391 = vperm.xlu1 %605, %v388_v10  }
  0x1e   :  { %324 = vmatpush.bf16.msrb.mxu3 %v481_v16 }
  0x1f   :  { %299 = vmatpush.bf16.msrb.mxu1 %v461_v25 }
  0x20   :  { %275 = vmatpush.bf16.msra.mxu2 %v425_v34  ;;  %v609_v9 = vpop.eup %608 }
  0x21   :  { %249 = vmatpush.bf16.msra.mxu0 %v421_v37  ;;  %v352_v11 = vmul.f32 512.0, %v609_v9  ;;  %vm356_vm1 = vweird.f32 %v609_v9 }
  0x22   :  { %325 = vmatpush.bf16.msrb.mxu3 %v465_v30 }
  0x23   :  { %300 = vmatpush.bf16.msrb.mxu1 %v445_v39  ;;  %276 = vmatmul.bf16.vlgmr.msra.gmra.mxu2 %v55_v41  ;;  %v353_v14 = vsub.f32 1.0, %v352_v11 }
  0x24   :  { %288 = vmatpush.bf16.msrb.mxu2 %v553_v38  ;;  %250 = vmatmul.bf16.vlgmr.msra.gmra.mxu0 %v55_v41 }
  0x25   :  { %340 = vmatpush.bf16.msrb.mxu0 %v561_v40  ;;  %v354_v15 = vmul.f32 %v609_v9, %v353_v14  ;;  %606 = vset.pattern.permute.xlu1 %v614_v13 }
  0x26   :  { %326 = vmatpush.bf16.msrb.mxu3 %v449_v42  ;;  %399 = vperm.xlu1 %606, %v388_v10  }
  0x27   :  { %301 = vmatpush.bf16.msrb.mxu1 %v429_v47  ;;  %v355_v16 = vadd.f32 %v609_v9, %v354_v15 }
  0x29   :  { %v357_v17 = vsel %vm356_vm1, %v609_v9, %v355_v16 }
  0x2a   :  { %327 = vmatpush.bf16.msrb.mxu3 %v433_v48  ;;  %302 = vmatmul.bf16.vlgmr.msrb.gmra.mxu1 %v55_v41 }
  0x2d   :  { %328 = vmatmul.bf16.vlgmr.msrb.gmra.mxu3 %v55_v41 }
  0x33   :  { %563 = vmatmul.msk.bf16.vlgmr.msrb.gmra.mxu2 %vm238_vm0, %v779_v4 }
  0x34   :  { %565 = vmatmul.msk.bf16.vlgmr.msrb.gmra.mxu0 %vm238_vm0, %v779_v4 }
  0x8f   :  { %v392_v37 = vpop.permute.xlu1 %391 }
  0x91   :  { %v264_v49 = vpop.f32.mrf.mxu1 }
  0x96   :  { %v316_v50 = vpop.f32.mrf.mxu3 }
  0x98   :  { %v400_v46 = vpop.permute.xlu1 %399 }
  0x99   :  { %v266_v51 = vpop.f32.mrf.mxu1 }
  0x9e   :  { %v318_v53 = vpop.f32.mrf.mxu3 }
  0xa1   :  { %v251_v52 = vpop.f32.mrf.mxu0 }
  0xa2   :  { %v265_v63 = vadd.f32 %v264_v49, %v251_v52 }
  0xa6   :  { %v277_v54 = vpop.f32.mrf.mxu2 }
  0xa7   :  { %v303_v55 = vpop.f32.mrf.mxu1 }
  0xa8   :  { %v317_v1 = vadd.f32 %v316_v50, %v303_v55 }
  0xa9   :  { %v253_v56 = vpop.f32.mrf.mxu0 }
  0xae   :  { %v279_v58 = vpop.f32.mrf.mxu2 }
  0xaf   :  { %v305_v59 = vpop.f32.mrf.mxu1 }
  0xb0   :  { %v329_v57 = vpop.f32.mrf.mxu3 }
  0xb1   :  { %v342_v60 = vpop.f32.mrf.mxu0 }
  0xb2   :  { %v343_v2 = vadd.f32 %v342_v60, %v329_v57 }
  0xb6   :  { %v290_v62 = vpop.f32.mrf.mxu2 }
  0xb7   :  { %v291_v0 = vadd.f32 %v290_v62, %v277_v54 }
  0xb8   :  { %v331_v61 = vpop.f32.mrf.mxu3 }
  0xb9   :  { %v346_v3 = vadd.f32 %v291_v0, %v265_v63  ;;  %v344_v4 = vpop.f32.mrf.mxu0 }
  0xbb   :  { %v347_v5 = vadd.f32 %v346_v3, %v317_v1 }
  0xbd   :  { %v348_v6 = vadd.f32 %v347_v5, %v343_v2 }
  0xbe   :  { %v292_v7 = vpop.f32.mrf.mxu2 }
  0xbf   :  { %349 = vadd.xlane.f32.xlu0 %v348_v6 }
 0x132   :  { %v350_v18 = vpop.xlane.xlu0 %349 }
 0x133   :  { %v358_v19 = vmul.f32 %v357_v17, %v350_v18 }
 0x135   :  { %v359_v20 = vsub.f32 %v265_v63, %v358_v19  ;;  %v360_v21 = vsub.f32 %v291_v0, %v358_v19  ;;  %v361_v22 = vsub.f32 %v317_v1, %v358_v19  ;;  %v362_v23 = vsub.f32 %v343_v2, %v358_v19 }
 0x137   :  { %v363_v24 = vmul.f32 %v359_v20, %v359_v20  ;;  %v364_v25 = vmul.f32 %v360_v21, %v360_v21  ;;  %v365_v26 = vmul.f32 %v361_v22, %v361_v22  ;;  %v366_v28 = vmul.f32 %v362_v23, %v362_v23 }
 0x139   :  { %v367_v27 = vadd.f32 %v364_v25, %v363_v24 }
 0x13b   :  { %v368_v29 = vadd.f32 %v367_v27, %v365_v26 }
 0x13d   :  { %v369_v30 = vadd.f32 %v368_v29, %v366_v28 }
 0x13f   :  { %370 = vadd.xlane.f32.xlu0 %v369_v30 }
 0x1b2   :  { %v371_v31 = vpop.xlane.xlu0 %370 }
 0x1b3   :  { %v372_v32 = vmul.f32 %v371_v31, %v357_v17 }
 0x1b5   :  { %v373_v33 = vadd.f32 1e-05, %v372_v32 }
 0x1b7   :  { %610 = vrsqrt.f32 %v373_v33  ;;  %vm380_vm3 = vweird.f32 %v373_v33 }
 0x1bd   :  { %v611_v34 = vpop.eup %610 }
 0x1be   :  { %v375_v35 = vmul.f32 %v611_v34, %v373_v33  ;;  %vm381_vm2 = vweird.f32 %v611_v34 }
 0x1bf   :  { %vm382_vm4 = vmor %vm380_vm3, %vm381_vm2 }
 0x1c0   :  { %v376_v36 = vmul.f32 %v611_v34, %v375_v35 }
 0x1c2   :  { %v377_v38 = vmul.f32 0.5, %v376_v36 }
 0x1c4   :  { %v378_v39 = vsub.f32 1.5, %v377_v38 }
 0x1c6   :  { %v379_v40 = vmul.f32 %v611_v34, %v378_v39 }
 0x1c8   :  { %v383_v41 = vsel %vm382_vm4, %v611_v34, %v379_v40 }
 0x1c9   :  { %v384_v42 = vmul.f32 %v383_v41, %v359_v20  ;;  %v385_v43 = vmul.f32 %v383_v41, %v360_v21  ;;  %v386_v44 = vmul.f32 %v383_v41, %v361_v22  ;;  %v387_v45 = vmul.f32 %v383_v41, %v362_v23 }
 0x1cb   :  { %v394_v47 = vmul.f32 %v392_v37, %v384_v42  ;;  %v395_v48 = vmul.f32 %v392_v37, %v385_v43  ;;  %v396_v49 = vmul.f32 %v392_v37, %v386_v44  ;;  %v397_v50 = vmul.f32 %v392_v37, %v387_v45 }
 0x1cd   :  { %v402_v51 = vadd.f32 %v400_v46, %v394_v47  ;;  %v403_v52 = vadd.f32 %v400_v46, %v395_v48  ;;  %v404_v53 = vadd.f32 %v400_v46, %v396_v49  ;;  %v405_v54 = vadd.f32 %v400_v46, %v397_v50 }
 0x1cf   :  { %v406_v55 = vmax.f32 %v402_v51, 0.0  ;;  %v407_v56 = vmax.f32 %v403_v52, 0.0  ;;  %v408_v57 = vmax.f32 %v404_v53, 0.0  ;;  %v409_v58 = vmax.f32 %v405_v54, 0.0 }
 0x1d1   :  { %410 = vst [vmem:[%s886_s3] sm:$0xff] %v406_v55 }
 0x1d2   :  { %411 = vst [vmem:[%s886_s3 + $0x8] sm:$0xff] %v407_v56 }
 0x1d3   :  { %412 = vst [vmem:[%s886_s3 + $0x10] sm:$0xff] %v408_v57 }
 0x1d4   :  { %413 = vst [vmem:[%s886_s3 + $0x18] sm:$0xff] %v409_v58 }

// kernel: transformer_unet_forward.63
= control target key start
LH: loop header
LB: loop body
LE: loop exit
PB: predicated region body
PF: predicated region fallthrough
CT: control target
= control target key end

     0   :  { %v133_v2 = vmov 0   ;;  %vm39_vm0 = vcmask 1043456   ;;  %vm35_vm1 = vcmask 64512   ;;  %v118_v24 = vlaneseq  ;;  %s169_s1 = inlined_call_operand.vmem [shape: bf16[8,512], index: 1, kind: input, shape index: {}]   ;;  %s170_s2 = inlined_call_operand.vmem [shape: f32[1,2], index: 2, kind: input, shape index: {}]   ;;  %s171_s0 = inlined_call_operand.vmem [shape: bf16[1,8], index: 0, kind: input, shape index: {}]   ;;  %s172_s3 = inlined_call_operand.vmem [shape: f32[1,512], index: 3, kind: output, shape index: {}]  }
   0x1   :  { %v16_v0 = vld [vmem:[%s169_s1] sm:$0xff]  ;;  %v17_v1 = vld [vmem:[%s169_s1 + $0x8] sm:$0xff]  ;;  %132 = vset.pattern.permute.xlu0 %v133_v2  ;;  %vm111_vm2 = vcmask 1040384   ;;  %vm113_vm3 = vcmask 1042434   ;;  %vm115_vm4 = vcmask 1041408  }
   0x2   :  { %v27_v3 = vunpack.c.l.b16 %v16_v0  ;;  %v28_v4 = vunpack.c.h.b16 %v16_v0  ;;  %v29_v5 = vunpack.c.l.b16 %v17_v1  ;;  %v30_v6 = vunpack.c.h.b16 %v17_v1  ;;  %v18_v7 = vld [vmem:[%s170_s2] sm:$0x1] }
   0x3   :  { %21 = vperm.xlu0 %132, %v18_v7   ;;  %v15_v16 = vld [vmem:[%s171_s0] sm:$0x1]  ;;  %vm120_vm5 = vcmp.lt.s32.totalorder %v118_v24, 512 }
   0x4   :  { %v31_v8 = vpack.c.b16 %v27_v3, %v27_v3  ;;  %v32_v9 = vpack.c.b16 %v28_v4, %v28_v4  ;;  %v33_v10 = vpack.c.b16 %v29_v5, %v29_v5  ;;  %v34_v11 = vpack.c.b16 %v30_v6, %v30_v6 }
   0x6   :  { %v41_v12 = vsel %vm39_vm0, %v31_v8, 0  ;;  %v44_v13 = vsel %vm39_vm0, %v32_v9, 0  ;;  %v47_v14 = vsel %vm39_vm0, %v33_v10, 0  ;;  %v50_v15 = vsel %vm39_vm0, %v34_v11, 0 }
   0x7   :  { %59 = vmatpush.bf16.msra.mxu0 %v41_v12  ;;  %72 = vmatpush.bf16.msra.mxu1 %v44_v13 }
   0x8   :  { %85 = vmatpush.bf16.msra.mxu2 %v47_v14  ;;  %98 = vmatpush.bf16.msra.mxu3 %v50_v15 }
   0xa   :  { %127 = vmatmul.msk.bf16.vlgmr.msra.gmra.mxu0 %vm35_vm1, %v15_v16  ;;  %128 = vmatmul.msk.bf16.vlgmr.msra.gmra.mxu1 %vm35_vm1, %v15_v16 }
   0xb   :  { %129 = vmatmul.msk.bf16.vlgmr.msra.gmra.mxu2 %vm35_vm1, %v15_v16  ;;  %130 = vmatmul.msk.bf16.vlgmr.msra.gmra.mxu3 %vm35_vm1, %v15_v16 }
  0x75   :  { %v22_v17 = vpop.permute.xlu0 %21 }
  0x76   :  { %v24_v20 = vperm.slane %v22_v17, 0 }
  0x87   :  { %v61_v18 = vpop.f32.mrf.mxu0  ;;  %v74_v19 = vpop.f32.mrf.mxu1 }
  0x88   :  { %v75_v21 = vadd.f32 %v74_v19, %v24_v20  ;;  %v62_v25 = vadd.f32 %v61_v18, %v24_v20 }
  0x8a   :  { %v108_v26 = vrot.slane %v75_v21, 7 }
  0x8c   :  { %v112_v33 = vsel %vm111_vm2, %v62_v25, %v108_v26 }
  0x8e   :  { %v87_v22 = vpop.f32.mrf.mxu2  ;;  %v100_v23 = vpop.f32.mrf.mxu3 }
  0x8f   :  { %v88_v27 = vadd.f32 %v87_v22, %v24_v20  ;;  %v101_v28 = vadd.f32 %v100_v23, %v24_v20  ;;  %v63_v29 = vpop.f32.mrf.mxu0  ;;  %v76_v30 = vpop.f32.mrf.mxu1 }
  0x91   :  { %v109_v31 = vrot.slane %v88_v27, 6  ;;  %v110_v32 = vrot.slane %v101_v28, 5 }
  0x93   :  { %v114_v34 = vsel %vm113_vm3, %v109_v31, %v110_v32 }
  0x94   :  { %v116_v35 = vsel %vm115_vm4, %v112_v33, %v114_v34 }
  0x95   :  { %122 = vst.msk [vmem:[%s172_s3] sm:$0xf] %vm120_vm5, %v116_v35 }
  0x96   :  { %v89_v36 = vpop.f32.mrf.mxu2  ;;  %v102_v37 = vpop.f32.mrf.mxu3 }

</bundles_post_ra>
